<compile_context>
chip_gen: v6e
topology: v6e:2x2x1
jax: 0.10.0
libtpu: 0.0.40
codegen_flags: <defaults>
</compile_context>

<pallas_src>
import functools
import math

import jax
import jax.numpy as jnp
from jax.experimental import pallas as pl
from jax.experimental.pallas import tpu as pltpu

COMMITMENT_COST = 0.5
IMG_CHANNELS = 1
VQVAE_EMBEDDING_DIM = 256
VQVAE_NUM_EMBEDDINGS = 512
GN_EPS = 1e-5
GN_GROUPS = 8

MATMUL_DTYPE = jnp.bfloat16          # MXU-native operands; accumulation stays f32
ACT_DTYPE = jnp.bfloat16             # inter-layer activation dtype


def _detect_vmem_limit():
    """Per-generation scoped-VMEM budget (128 MiB parts get a big budget, v7x stays
    conservative); falls back to 48 MiB if the query is unavailable."""
    try:
        info = pltpu.get_tpu_info()
        cap = int(getattr(info, "vmem_capacity_bytes", 0) or 0)
        if cap > 0:
            return int(min(cap * 3 // 4, 100 * 1024 * 1024))
    except Exception:
        pass
    return 48 * 1024 * 1024


VMEM_LIMIT_BYTES = _detect_vmem_limit()


def _round_up(x, m):
    return (x + m - 1) // m * m


def _pick_tile(total, candidates):
    for c in candidates:
        if c <= total and total % c == 0:
            return c
    return total


def _select_tiles(Mp, Np, Kp, out_bytes):
    """Pick (tm, tn, tk). Prefer a single K block when the double-buffered working
    set fits the VMEM budget; prefer >=2 output blocks when the problem is big
    enough (v7x has 2 TensorCores)."""
    tm = _pick_tile(Mp, (512, 256, 128, 64, 32, 16))
    tn = _pick_tile(Np, (512, 256, 128))

    def fits(tk_, tn_, tm_):
        need = (2 * tm_ * tk_ * 2          # A double-buffered, bf16
                + 2 * tk_ * tn_ * 2        # B double-buffered, bf16
                + 2 * tn_ * 4              # bias
                + 2 * tm_ * tn_ * out_bytes  # output double-buffered
                + tm_ * tn_ * 4)           # f32 accumulator scratch
        return need <= VMEM_LIMIT_BYTES - (2 << 20)

    tk = None
    for cand in (Kp, 1536, 1152, 1024, 768, 512, 384, 256, 128):
        if cand <= Kp and Kp % cand == 0 and fits(cand, tn, tm):
            tk = cand
            break
    if tk is None:
        tk = 128
        while not fits(tk, tn, tm) and tn > 128:
            tn //= 2
        while not fits(tk, tn, tm) and tm > 16:
            tm //= 2

    # v7x megacore: make sure there are >=2 parallel output blocks for big problems.
    if (Mp // tm) * (Np // tn) == 1 and Mp * Np >= 512 * 512:
        if Np % 256 == 0:
            tn = min(tn, Np // 2)
        elif Mp % 32 == 0:
            tm = Mp // 2
    return tm, tn, tk


# ----------------------------------------------------------------------------
# Tiled matmul + bias + activation (backbone of every conv layer)
# ----------------------------------------------------------------------------
def _mm_bias_act_kernel(act, a_ref, b_ref, bias_ref, o_ref, acc_ref):
    """grid = (M/tm, N/tn, K/tk); acc_ref is an f32 VMEM accumulator."""
    @pl.when(pl.program_id(2) == 0)
    def _init():
        acc_ref[...] = jnp.zeros_like(acc_ref)

    acc_ref[...] += jnp.dot(a_ref[...], b_ref[...],
                            preferred_element_type=jnp.float32)

    @pl.when(pl.program_id(2) == pl.num_programs(2) - 1)
    def _finalize():
        y = acc_ref[...] + bias_ref[...]          # epilogue stays f32
        if act == "relu":
            y = jnp.maximum(y, 0.0)
        elif act == "tanh":
            y = jnp.tanh(y)
        o_ref[...] = y.astype(o_ref.dtype)


def _mm_bias_act_single_kernel(act, a_ref, b_ref, bias_ref, o_ref):
    """Single K-block variant: no scratch accumulator, no init/finalize branches."""
    y = jnp.dot(a_ref[...], b_ref[...],
                preferred_element_type=jnp.float32) + bias_ref[...]
    if act == "relu":
        y = jnp.maximum(y, 0.0)
    elif act == "tanh":
        y = jnp.tanh(y)
    o_ref[...] = y.astype(o_ref.dtype)


def matmul_bias_prepped(a, layer, act="none", out_dtype=ACT_DTYPE):
    """act(a @ W + b) with W/b pre-padded + pre-cast (see _prep_conv*).
    a: (M, K) any float dtype; returns (M, N) in out_dtype."""
    M, K = a.shape
    assert K == layer["K"]
    wp, bp = layer["w"], layer["b"]
    Kp, Np = wp.shape
    N = layer["N"]
    Mp = _round_up(M, 16)                       # bf16 vregs pack (16, 128)
    ap = jnp.pad(a, ((0, Mp - M), (0, Kp - K))).astype(MATMUL_DTYPE)

    out_bytes = jnp.dtype(out_dtype).itemsize
    tm, tn, tk = _select_tiles(Mp, Np, Kp, out_bytes)
    grid = (Mp // tm, Np // tn, Kp // tk)

    common = dict(
        out_shape=jax.ShapeDtypeStruct((Mp, Np), out_dtype),
        grid=grid,
        in_specs=[
            pl.BlockSpec((tm, tk), lambda i, j, k: (i, k)),
            pl.BlockSpec((tk, tn), lambda i, j, k: (k, j)),
            pl.BlockSpec((1, tn), lambda i, j, k: (0, j)),
        ],
        out_specs=pl.BlockSpec((tm, tn), lambda i, j, k: (i, j)),
        compiler_params=pltpu.CompilerParams(
            dimension_semantics=("parallel", "parallel", "arbitrary"),
            vmem_limit_bytes=VMEM_LIMIT_BYTES),
        cost_estimate=pl.CostEstimate(
            flops=2 * Mp * Np * Kp,
            transcendentals=Mp * Np if act == "tanh" else 0,
            bytes_accessed=2 * (Mp * Kp + Kp * Np) + 4 * Np + out_bytes * Mp * Np),
    )
    if grid[2] == 1:
        out = pl.pallas_call(
            functools.partial(_mm_bias_act_single_kernel, act), **common)(ap, wp, bp)
    else:
        out = pl.pallas_call(
            functools.partial(_mm_bias_act_kernel, act),
            scratch_shapes=[pltpu.VMEM((tm, tn), jnp.float32)], **common)(ap, wp, bp)
    return out[:M, :N]


# ----------------------------------------------------------------------------
# GroupNorm (+ fused residual add + ReLU) directly on NHWC blocks
# ----------------------------------------------------------------------------
def _gn_kernel(eps, inv_count, relu, has_res, *refs):
    if has_res:
        x_ref, g_ref, b_ref, p_ref, r_ref, o_ref = refs
    else:
        x_ref, g_ref, b_ref, p_ref, o_ref = refs
    x = x_ref[0].astype(jnp.float32)                       # (HW, C)
    pmat = p_ref[...]                                      # (C, C) 0/1 group mask
    # Single-pass stats: sum(x) and sum(x^2), group reduce via projector matmul.
    s1 = jnp.sum(x, axis=0, keepdims=True)                 # (1, C)
    s2 = jnp.sum(x * x, axis=0, keepdims=True)             # (1, C)
    mean = jnp.dot(s1, pmat, preferred_element_type=jnp.float32) * inv_count
    ex2 = jnp.dot(s2, pmat, preferred_element_type=jnp.float32) * inv_count
    var = jnp.maximum(ex2 - mean * mean, 0.0)              # clamp f32 cancellation
    y = (x - mean) * jax.lax.rsqrt(var + eps) * g_ref[...] + b_ref[...]
    if has_res:
        y = y + r_ref[0].astype(jnp.float32)
    if relu:
        y = jnp.maximum(y, 0.0)
    o_ref[0] = y.astype(o_ref.dtype)


def group_norm(x, gamma, beta, pmat, relu=False, residual=None,
               groups=GN_GROUPS, out_dtype=ACT_DTYPE):
    """nn.GroupNorm(groups, C) on an NHWC tensor, optionally fused residual + ReLU.
    bf16 in / bf16 out, all stats in f32 in-kernel."""
    B, H, W, C = x.shape
    Cg = C // groups
    HW = H * W
    inv_count = 1.0 / float(HW * Cg)
    # TODO(synk): for large H*W (esp. v7x 64 MiB VMEM), tile the HW axis with
    # two-pass / running stats instead of one (HW, C) slab per batch element.
    x3 = x.reshape(B, HW, C)

    has_res = residual is not None
    inputs = [x3, gamma, beta, pmat]
    in_specs = [
        pl.BlockSpec((1, HW, C), lambda b: (b, 0, 0)),
        pl.BlockSpec((1, C), lambda b: (0, 0)),
        pl.BlockSpec((1, C), lambda b: (0, 0)),
        pl.BlockSpec((C, C), lambda b: (0, 0)),
    ]
    if has_res:
        inputs.append(residual.reshape(B, HW, C))
        in_specs.append(pl.BlockSpec((1, HW, C), lambda b: (b, 0, 0)))

    y = pl.pallas_call(
        functools.partial(_gn_kernel, GN_EPS, inv_count, relu, has_res),
        out_shape=jax.ShapeDtypeStruct((B, HW, C), out_dtype),
        grid=(B,),
        in_specs=in_specs,
        out_specs=pl.BlockSpec((1, HW, C), lambda b: (b, 0, 0)),
        compiler_params=pltpu.CompilerParams(
            dimension_semantics=("parallel",),
            vmem_limit_bytes=VMEM_LIMIT_BYTES),
    )(*inputs)
    return y.reshape(B, H, W, C)


# ----------------------------------------------------------------------------
# Vector quantizer (distances, argmin, one-hot @ codebook, commitment loss)
# ----------------------------------------------------------------------------
def _vq_kernel(commitment_cost, n_valid, tile_n, d_dim,
               x_ref, esq_ref, et_ref, e_ref, q_ref, idx_ref, loss_ref):
    i = pl.program_id(0)
    x = x_ref[...]                                        # (tile_n, D) f32
    # ||x||^2 is constant per row -> dropped from the argmin distance.
    # Distance matmul in bf16 (f32 accumulate); codebook norm is precomputed.
    d = esq_ref[...] - 2.0 * jnp.dot(x.astype(et_ref.dtype), et_ref[...],
                                     preferred_element_type=jnp.float32)  # (tile_n, K)
    Kn = d.shape[1]
    iota = jax.lax.broadcasted_iota(jnp.int32, d.shape, 1)
    dmin = jnp.min(d, axis=1, keepdims=True)
    # first index of the minimum (matches torch.argmin tie-break)
    idx = jnp.min(jnp.where(d == dmin, iota, Kn), axis=1, keepdims=True)
    one_hot = (iota == idx).astype(jnp.float32)
    q = jnp.dot(one_hot, e_ref[...], preferred_element_type=jnp.float32)  # (tile_n, D)
    q_ref[...] = q
    idx_ref[...] = jnp.broadcast_to(idx, idx_ref.shape)   # lane-dense idx store

    rows = i * tile_n + jax.lax.broadcasted_iota(jnp.int32, (x.shape[0], 1), 0)
    mask = (rows < n_valid).astype(jnp.float32)           # ignore padded rows
    partial = jnp.sum(((q - x) ** 2) * mask)

    @pl.when(i == 0)
    def _init():
        loss_ref[...] = jnp.zeros_like(loss_ref)

    loss_ref[...] += partial

    @pl.when(i == pl.num_programs(0) - 1)
    def _finalize():
        loss_ref[...] *= commitment_cost / float(n_valid * d_dim)


def vector_quantize(flat_latents, emb):
    """emb: dict with e (K, D) f32, et (D, K) bf16, esq (1, K) f32 (pre-prepared)."""
    N, D = flat_latents.shape
    K = emb["e"].shape[0]
    assert D % 128 == 0 and K % 128 == 0
    Np_ = _round_up(N, 16)
    tile_n = _pick_tile(Np_, (256, 128, 64, 32, 16))
    xp = jnp.pad(flat_latents.astype(jnp.float32), ((0, Np_ - N), (0, 0)))

    q, idx, loss = pl.pallas_call(
        functools.partial(_vq_kernel, COMMITMENT_COST, N, tile_n, D),
        out_shape=(
            jax.ShapeDtypeStruct((Np_, D), jnp.float32),
            jax.ShapeDtypeStruct((Np_, 128), jnp.int32),
            jax.ShapeDtypeStruct((1, 1), jnp.float32),
        ),
        grid=(Np_ // tile_n,),
        in_specs=[
            pl.BlockSpec((tile_n, D), lambda i: (i, 0)),
            pl.BlockSpec((1, K), lambda i: (0, 0)),
            pl.BlockSpec((D, K), lambda i: (0, 0)),
            pl.BlockSpec((K, D), lambda i: (0, 0)),
        ],
        out_specs=(
            pl.BlockSpec((tile_n, D), lambda i: (i, 0)),
            pl.BlockSpec((tile_n, 128), lambda i: (i, 0)),
            pl.BlockSpec((1, 1), lambda i: (0, 0)),
        ),
        compiler_params=pltpu.CompilerParams(
            dimension_semantics=("arbitrary",),   # loss accumulates across row tiles
            vmem_limit_bytes=VMEM_LIMIT_BYTES),
    )(xp, emb["esq"], emb["et"], emb["e"])
    return q[:N], idx[:N, 0:1], loss


# ----------------------------------------------------------------------------
# Conv / ConvTranspose wrappers (im2col glue in JAX; all compute in Pallas)
# ----------------------------------------------------------------------------
def _im2col(x, kh, kw, stride, pad):
    """x: NHWC -> (B*Ho*Wo, kh*kw*C) patches (row-major over (i, j, c))."""
    B, H, W, C = x.shape
    xp = jnp.pad(x, ((0, 0), (pad, pad), (pad, pad), (0, 0)))
    Hp, Wp = H + 2 * pad, W + 2 * pad
    Ho = (Hp - kh) // stride + 1
    Wo = (Wp - kw) // stride + 1
    cols = []
    for i in range(kh):
        for j in range(kw):
            cols.append(xp[:, i:i + (Ho - 1) * stride + 1:stride,
                           j:j + (Wo - 1) * stride + 1:stride, :])
    patches = jnp.stack(cols, axis=-2)                 # (B, Ho, Wo, kh*kw, C)
    return patches.reshape(B * Ho * Wo, kh * kw * C), (B, Ho, Wo)


def conv2d(x, layer, stride=1, pad=0, act="none", out_dtype=ACT_DTYPE):
    """x: NHWC; layer: prepped dict (w (Kp,Np) bf16, b (1,Np) f32, meta)."""
    # TODO(synk): fuse im2col into the matmul's input DMA (implicit GEMM over the
    # kh*kw taps via index_map) to avoid materializing patches in HBM at scale.
    B, H, W, _ = x.shape
    kh, kw, cin = layer["kh"], layer["kw"], layer["cin"]
    if kh == 1 and kw == 1 and stride == 1 and pad == 0:
        patches, (Ho, Wo) = x.reshape(B * H * W, cin), (H, W)   # 1x1: no im2col
    else:
        patches, (_, Ho, Wo) = _im2col(x, kh, kw, stride, pad)
    y = matmul_bias_prepped(patches, layer, act=act, out_dtype=out_dtype)
    return y.reshape(B, Ho, Wo, layer["N"])


def conv_transpose2d(x, layer, act="none", out_dtype=ACT_DTYPE):
    """ConvTranspose2d(k=4, s=2, p=1) fused over all four stride-2 phases:
    one k=2/s=1 im2col on the 1-padded input, one matmul against the combined
    (2*2*Cin, 4*Cout) weight, then a single depth-to-space reshape + crop."""
    B, H, W, _ = x.shape
    cout = layer["cout"]
    patches, (_, Ho, Wo) = _im2col(x, 2, 2, 1, 1)              # Ho = H+1, Wo = W+1
    y = matmul_bias_prepped(patches, layer, act=act, out_dtype=out_dtype)  # (M, 4*Cout)
    y = y.reshape(B, Ho, Wo, 2, 2, cout)
    y = jnp.transpose(y, (0, 1, 3, 2, 4, 5)).reshape(B, 2 * Ho, 2 * Wo, cout)
    return y[:, 1:2 * H + 1, 1:2 * W + 1, :]


# ----------------------------------------------------------------------------
# One-time parameter preparation (pad / transpose / cast hoisted out of forward)
# ----------------------------------------------------------------------------
def _prep_conv(w, b):
    """w: PyTorch Conv2d layout (Cout, Cin, kh, kw)."""
    Cout, Cin, kh, kw = w.shape
    K = kh * kw * Cin
    Kp, Np = _round_up(K, 128), _round_up(Cout, 128)
    wmat = jnp.transpose(w, (2, 3, 1, 0)).reshape(K, Cout)
    wp = jnp.pad(wmat, ((0, Kp - K), (0, Np - Cout))).astype(MATMUL_DTYPE)
    bp = jnp.pad(b.astype(jnp.float32).reshape(1, Cout), ((0, 0), (0, Np - Cout)))
    return dict(w=wp, b=bp, K=K, N=Cout, kh=kh, kw=kw, cin=Cin)


# phase (output-row parity within the depth-to-space cell) -> original kernel tap
# for patch offset dy in {0,1}: phase 0 uses taps (2,0), phase 1 uses (3,1).
_CT_KMAP = ((2, 0), (3, 1))


def _prep_conv_transpose(w, b):
    """w: PyTorch ConvTranspose2d layout (Cin, Cout, 4, 4); stride 2, pad 1.
    Builds the combined (2*2*Cin, 4*Cout) matrix for the fused phase matmul."""
    Cin, Cout, kh, kw = w.shape
    assert kh == 4 and kw == 4
    cols = []
    for pr in range(2):
        for pc in range(2):
            wsub = w[:, :, jnp.array(_CT_KMAP[pr]), :][:, :, :, jnp.array(_CT_KMAP[pc])]
            cols.append(jnp.transpose(wsub, (2, 3, 0, 1)).reshape(4 * Cin, Cout))
    wcomb = jnp.concatenate(cols, axis=1)                  # (4*Cin, 4*Cout)
    bcomb = jnp.tile(b.astype(jnp.float32), 4)             # (4*Cout,)
    K, N = 4 * Cin, 4 * Cout
    Kp, Np = _round_up(K, 128), _round_up(N, 128)
    wp = jnp.pad(wcomb, ((0, Kp - K), (0, Np - N))).astype(MATMUL_DTYPE)
    bp = jnp.pad(bcomb.reshape(1, N), ((0, 0), (0, Np - N)))
    return dict(w=wp, b=bp, K=K, N=N, cin=Cin, cout=Cout)


def prepare_params(params):
    prep = {}
    for name in ("enc_conv1", "enc_conv2", "enc_conv3", "enc_proj", "dec_proj"):
        prep[name] = _prep_conv(*params[name])
    for name in ("enc_rb1", "enc_rb2", "dec_rb1", "dec_rb2"):
        p = params[name]
        prep[name] = dict(
            conv1=_prep_conv(p["w1"], p["b1"]),
            conv2=_prep_conv(p["w2"], p["b2"]),
            g1=p["g1"].astype(jnp.float32).reshape(1, -1),
            bt1=p["bt1"].astype(jnp.float32).reshape(1, -1),
            g2=p["g2"].astype(jnp.float32).reshape(1, -1),
            bt2=p["bt2"].astype(jnp.float32).reshape(1, -1))
    for name in ("dec_ct1", "dec_ct2", "dec_ct3"):
        prep[name] = _prep_conv_transpose(*params[name])
    e = params["embedding"].astype(jnp.float32)
    prep["embedding"] = dict(
        e=e, et=e.T.astype(MATMUL_DTYPE),
        esq=jnp.sum(e * e, axis=1).reshape(1, -1))
    C = 256
    gid = jnp.arange(C, dtype=jnp.int32) // (C // GN_GROUPS)
    prep["gn_pmat"] = (gid[:, None] == gid[None, :]).astype(jnp.float32)
    return prep


# ----------------------------------------------------------------------------
# Model definition (matches the PyTorch module structure)
# ----------------------------------------------------------------------------
def residual_block(x, p, pmat):
    h = conv2d(x, p["conv1"], stride=1, pad=1)
    h = group_norm(h, p["g1"], p["bt1"], pmat, relu=True)
    h = conv2d(h, p["conv2"], stride=1, pad=1)
    # norm2 + identity-shortcut add + ReLU fused in one GroupNorm kernel
    return group_norm(h, p["g2"], p["bt2"], pmat, relu=True, residual=x)


def vqvae_forward(prep, x_nchw):
    pmat = prep["gn_pmat"]
    x = jnp.transpose(x_nchw, (0, 2, 3, 1)).astype(ACT_DTYPE)  # NCHW -> NHWC

    # Encoder
    h = conv2d(x, prep["enc_conv1"], stride=2, pad=1, act="relu")
    h = conv2d(h, prep["enc_conv2"], stride=2, pad=1, act="relu")
    h = conv2d(h, prep["enc_conv3"], stride=2, pad=1, act="relu")
    h = residual_block(h, prep["enc_rb1"], pmat)
    h = residual_block(h, prep["enc_rb2"], pmat)
    z = conv2d(h, prep["enc_proj"], stride=1, pad=0, out_dtype=jnp.float32)

    # Vector quantizer
    B, Hp, Wp, D = z.shape
    flat = z.reshape(B * Hp * Wp, D)
    q_flat, idx, loss = vector_quantize(flat, prep["embedding"])
    quantized = q_flat.reshape(B, Hp, Wp, D)
    encoding_indices = idx.reshape(B, Hp, Wp)
    vq_loss = loss[0, 0]
    # Note: straight-through estimator affects gradients only; forward value of
    # `quantized` is identical.  vq_loss = commitment_cost * mse(q, z) exactly as
    # in the reference module.
    # TODO(synk): EMA codebook update (training-only buffer mutation) not modelled.

    # Decoder
    d = conv2d(quantized, prep["dec_proj"], stride=1, pad=0)
    d = residual_block(d, prep["dec_rb1"], pmat)
    d = residual_block(d, prep["dec_rb2"], pmat)
    d = conv_transpose2d(d, prep["dec_ct1"], act="relu")
    d = conv_transpose2d(d, prep["dec_ct2"], act="relu")
    x_recon = conv_transpose2d(d, prep["dec_ct3"], act="tanh", out_dtype=jnp.float32)

    x_recon = jnp.transpose(x_recon, (0, 3, 1, 2))             # NHWC -> NCHW
    quantized_nchw = jnp.transpose(quantized, (0, 3, 1, 2))
    return x_recon, vq_loss, quantized_nchw, encoding_indices


# ----------------------------------------------------------------------------
# Deterministic parameter initialization (PyTorch-style uniform bounds)
# ----------------------------------------------------------------------------
def _uniform(key, shape, bound):
    return jax.random.uniform(key, shape, jnp.float32, -bound, bound)


def _init_conv(key, cout, cin, kh, kw):
    k1, k2 = jax.random.split(key)
    bound = 1.0 / math.sqrt(cin * kh * kw)
    return _uniform(k1, (cout, cin, kh, kw), bound), _uniform(k2, (cout,), bound)


def _init_convT(key, cin, cout, kh, kw):
    k1, k2 = jax.random.split(key)
    bound = 1.0 / math.sqrt(cout * kh * kw)
    return _uniform(k1, (cin, cout, kh, kw), bound), _uniform(k2, (cout,), bound)


def _init_rb(key, c):
    k1, k2 = jax.random.split(key)
    w1, b1 = _init_conv(k1, c, c, 3, 3)
    w2, b2 = _init_conv(k2, c, c, 3, 3)
    return dict(w1=w1, b1=b1, g1=jnp.ones((c,)), bt1=jnp.zeros((c,)),
                w2=w2, b2=b2, g2=jnp.ones((c,)), bt2=jnp.zeros((c,)))


def init_vqvae_params(key, in_channels, embedding_dim, num_embeddings):
    ks = jax.random.split(key, 12)
    params = {
        "enc_conv1": _init_conv(ks[0], 64, in_channels, 4, 4),
        "enc_conv2": _init_conv(ks[1], 128, 64, 4, 4),
        "enc_conv3": _init_conv(ks[2], 256, 128, 4, 4),
        "enc_rb1": _init_rb(ks[3], 256),
        "enc_rb2": _init_rb(ks[4], 256),
        "enc_proj": _init_conv(ks[5], embedding_dim, 256, 1, 1),
        "embedding": jax.random.uniform(
            ks[6], (num_embeddings, embedding_dim), jnp.float32,
            -1.0 / num_embeddings, 1.0 / num_embeddings),
        "dec_proj": _init_conv(ks[7], 256, embedding_dim, 1, 1),
        "dec_rb1": _init_rb(ks[8], 256),
        "dec_rb2": _init_rb(ks[9], 256),
        "dec_ct1": _init_convT(ks[10], 256, 128, 4, 4),
        "dec_ct2": _init_convT(ks[11], 128, 64, 4, 4),
    }
    kct3 = jax.random.fold_in(key, 99)
    params["dec_ct3"] = _init_convT(kct3, 64, in_channels, 4, 4)
    return params


# ----------------------------------------------------------------------------
if __name__ == "__main__":
    root = jax.random.PRNGKey(0)
    pkey, xkey = jax.random.split(root)

    params = init_vqvae_params(pkey, IMG_CHANNELS, VQVAE_EMBEDDING_DIM,
                               VQVAE_NUM_EMBEDDINGS)
    prep = prepare_params(params)          # one-time pad/transpose/cast (outside jit)

    # input image: (B, C, H, W) = (2, 1, 16, 16)  ->  latent grid 2x2
    x = jax.random.normal(xkey, (2, IMG_CHANNELS, 16, 16), jnp.float32)

    fwd = jax.jit(functools.partial(vqvae_forward, prep))
    x_recon, vq_loss, quantized, encoding_indices = fwd(x)
    jax.block_until_ready((x_recon, vq_loss, quantized, encoding_indices))

    assert x_recon.shape == (2, IMG_CHANNELS, 16, 16)
    assert quantized.shape == (2, VQVAE_EMBEDDING_DIM, 2, 2)
    assert encoding_indices.shape == (2, 2, 2)
    assert vq_loss.shape == ()
    assert bool(jnp.isfinite(x_recon).all()) and bool(jnp.isfinite(vq_loss))
    print("KERNEL_OK")
</pallas_src>

<mosaic_0001>
module attributes {stable_mosaic.version = 11 : i64} {
  func.func @_mm_bias_act_single_kernel(%arg0: i32, %arg1: i32, %arg2: i32, %arg3: memref<128x128xbf16, #tpu.memory_space<vmem>>, %arg4: memref<128x128xbf16, #tpu.memory_space<vmem>>, %arg5: memref<1x128xf32, #tpu.memory_space<vmem>>, %arg6: memref<128x128xbf16, #tpu.memory_space<vmem>>) attributes {dimension_semantics = [#tpu.dimension_semantics<parallel>, #tpu.dimension_semantics<parallel>, #tpu.dimension_semantics<arbitrary>], iteration_bounds = array<i64: 1, 1, 1>, scalar_prefetch = 0 : i64, scratch_operands = 0 : i64, tpu.core_type = #tpu.core_type<tc>, window_params = [{transform_indices = @transform_0, window_bounds = array<i64: 128, 128>}, {transform_indices = @transform_1, window_bounds = array<i64: 128, 128>}, {transform_indices = @transform_2, window_bounds = array<i64: 1, 128>}, {transform_indices = @transform_3, window_bounds = array<i64: 128, 128>}]} {
    %c0 = arith.constant 0 : index
    %c0_0 = arith.constant 0 : index
    %0 = vector.load %arg3[%c0, %c0_0] : memref<128x128xbf16, #tpu.memory_space<vmem>>, vector<128x128xbf16>
    %c0_1 = arith.constant 0 : index
    %c0_2 = arith.constant 0 : index
    %1 = vector.load %arg4[%c0_1, %c0_2] : memref<128x128xbf16, #tpu.memory_space<vmem>>, vector<128x128xbf16>
    %cst = arith.constant dense<0.000000e+00> : vector<128x128xf32>
    %2 = tpu.matmul %0, %1, %cst {dimension_numbers = #tpu.dot_dimension_numbers<[1], [0], [0], [1], [0, 0, 1, 1], [], []>} : vector<128x128xbf16>, vector<128x128xbf16>, vector<128x128xf32> -> vector<128x128xf32>
    %c0_3 = arith.constant 0 : index
    %c0_4 = arith.constant 0 : index
    %3 = vector.load %arg5[%c0_3, %c0_4] : memref<1x128xf32, #tpu.memory_space<vmem>>, vector<1x128xf32>
    %4 = vector.broadcast %3 : vector<1x128xf32> to vector<128x128xf32>
    %5 = arith.addf %2, %4 : vector<128x128xf32>
    %cst_5 = arith.constant 0.000000e+00 : f32
    %6 = vector.broadcast %cst_5 : f32 to vector<128x128xf32>
    %7 = arith.maximumf %5, %6 : vector<128x128xf32>
    %8 = arith.truncf %7 : vector<128x128xf32> to vector<128x128xbf16>
    %c0_6 = arith.constant 0 : index
    %c0_7 = arith.constant 0 : index
    %9 = vector.load %arg6[%c0_6, %c0_7] : memref<128x128xbf16, #tpu.memory_space<vmem>>, vector<128x128xbf16>
    tpu.vector_store %arg6[%c0_6, %c0_7], %8 {strides = array<i32>} : memref<128x128xbf16, #tpu.memory_space<vmem>>, vector<128x128xbf16>,
    return
  }
  func.func @transform_0(%arg0: i32, %arg1: i32, %arg2: i32) -> (i32, i32) {
    %c0_i32 = arith.constant 0 : i32
    return %arg0, %arg2 : i32, i32
  }
  func.func @transform_1(%arg0: i32, %arg1: i32, %arg2: i32) -> (i32, i32) {
    %c0_i32 = arith.constant 0 : i32
    return %arg2, %arg1 : i32, i32
  }
  func.func @transform_2(%arg0: i32, %arg1: i32, %arg2: i32) -> (i32, i32) {
    %c0_i32 = arith.constant 0 : i32
    %c0_i32_0 = arith.constant 0 : i32
    return %c0_i32, %arg1 : i32, i32
  }
  func.func @transform_3(%arg0: i32, %arg1: i32, %arg2: i32) -> (i32, i32) {
    %c0_i32 = arith.constant 0 : i32
    return %arg0, %arg1 : i32, i32
  }
}

module attributes {stable_mosaic.version = 11 : i64} {
  func.func @_mm_bias_act_single_kernel(%arg0: i32, %arg1: i32, %arg2: i32, %arg3: memref<32x1024xbf16, #tpu.memory_space<vmem>>, %arg4: memref<1024x128xbf16, #tpu.memory_space<vmem>>, %arg5: memref<1x128xf32, #tpu.memory_space<vmem>>, %arg6: memref<32x128xbf16, #tpu.memory_space<vmem>>) attributes {dimension_semantics = [#tpu.dimension_semantics<parallel>, #tpu.dimension_semantics<parallel>, #tpu.dimension_semantics<arbitrary>], iteration_bounds = array<i64: 1, 1, 1>, scalar_prefetch = 0 : i64, scratch_operands = 0 : i64, tpu.core_type = #tpu.core_type<tc>, window_params = [{transform_indices = @transform_0, window_bounds = array<i64: 32, 1024>}, {transform_indices = @transform_1, window_bounds = array<i64: 1024, 128>}, {transform_indices = @transform_2, window_bounds = array<i64: 1, 128>}, {transform_indices = @transform_3, window_bounds = array<i64: 32, 128>}]} {
    %c0 = arith.constant 0 : index
    %c0_0 = arith.constant 0 : index
    %0 = vector.load %arg3[%c0, %c0_0] : memref<32x1024xbf16, #tpu.memory_space<vmem>>, vector<32x1024xbf16>
    %c0_1 = arith.constant 0 : index
    %c0_2 = arith.constant 0 : index
    %1 = vector.load %arg4[%c0_1, %c0_2] : memref<1024x128xbf16, #tpu.memory_space<vmem>>, vector<1024x128xbf16>
    %cst = arith.constant dense<0.000000e+00> : vector<32x128xf32>
    %2 = tpu.matmul %0, %1, %cst {dimension_numbers = #tpu.dot_dimension_numbers<[1], [0], [0], [1], [0, 0, 1, 1], [], []>} : vector<32x1024xbf16>, vector<1024x128xbf16>, vector<32x128xf32> -> vector<32x128xf32>
    %c0_3 = arith.constant 0 : index
    %c0_4 = arith.constant 0 : index
    %3 = vector.load %arg5[%c0_3, %c0_4] : memref<1x128xf32, #tpu.memory_space<vmem>>, vector<1x128xf32>
    %4 = vector.broadcast %3 : vector<1x128xf32> to vector<32x128xf32>
    %5 = arith.addf %2, %4 : vector<32x128xf32>
    %cst_5 = arith.constant 0.000000e+00 : f32
    %6 = vector.broadcast %cst_5 : f32 to vector<32x128xf32>
    %7 = arith.maximumf %5, %6 : vector<32x128xf32>
    %8 = arith.truncf %7 : vector<32x128xf32> to vector<32x128xbf16>
    %c0_6 = arith.constant 0 : index
    %c0_7 = arith.constant 0 : index
    %9 = vector.load %arg6[%c0_6, %c0_7] : memref<32x128xbf16, #tpu.memory_space<vmem>>, vector<32x128xbf16>
    tpu.vector_store %arg6[%c0_6, %c0_7], %8 {strides = array<i32>} : memref<32x128xbf16, #tpu.memory_space<vmem>>, vector<32x128xbf16>,
    return
  }
  func.func @transform_0(%arg0: i32, %arg1: i32, %arg2: i32) -> (i32, i32) {
    %c0_i32 = arith.constant 0 : i32
    return %arg0, %arg2 : i32, i32
  }
  func.func @transform_1(%arg0: i32, %arg1: i32, %arg2: i32) -> (i32, i32) {
    %c0_i32 = arith.constant 0 : i32
    return %arg2, %arg1 : i32, i32
  }
  func.func @transform_2(%arg0: i32, %arg1: i32, %arg2: i32) -> (i32, i32) {
    %c0_i32 = arith.constant 0 : i32
    %c0_i32_0 = arith.constant 0 : i32
    return %c0_i32, %arg1 : i32, i32
  }
  func.func @transform_3(%arg0: i32, %arg1: i32, %arg2: i32) -> (i32, i32) {
    %c0_i32 = arith.constant 0 : i32
    return %arg0, %arg1 : i32, i32
  }
}

module attributes {stable_mosaic.version = 11 : i64} {
  func.func @_mm_bias_act_single_kernel(%arg0: i32, %arg1: i32, %arg2: i32, %arg3: memref<16x2048xbf16, #tpu.memory_space<vmem>>, %arg4: memref<2048x256xbf16, #tpu.memory_space<vmem>>, %arg5: memref<1x256xf32, #tpu.memory_space<vmem>>, %arg6: memref<16x256xbf16, #tpu.memory_space<vmem>>) attributes {dimension_semantics = [#tpu.dimension_semantics<parallel>, #tpu.dimension_semantics<parallel>, #tpu.dimension_semantics<arbitrary>], iteration_bounds = array<i64: 1, 1, 1>, scalar_prefetch = 0 : i64, scratch_operands = 0 : i64, tpu.core_type = #tpu.core_type<tc>, window_params = [{transform_indices = @transform_0, window_bounds = array<i64: 16, 2048>}, {transform_indices = @transform_1, window_bounds = array<i64: 2048, 256>}, {transform_indices = @transform_2, window_bounds = array<i64: 1, 256>}, {transform_indices = @transform_3, window_bounds = array<i64: 16, 256>}]} {
    %c0 = arith.constant 0 : index
    %c0_0 = arith.constant 0 : index
    %0 = vector.load %arg3[%c0, %c0_0] : memref<16x2048xbf16, #tpu.memory_space<vmem>>, vector<16x2048xbf16>
    %c0_1 = arith.constant 0 : index
    %c0_2 = arith.constant 0 : index
    %1 = vector.load %arg4[%c0_1, %c0_2] : memref<2048x256xbf16, #tpu.memory_space<vmem>>, vector<2048x256xbf16>
    %cst = arith.constant dense<0.000000e+00> : vector<16x256xf32>
    %2 = tpu.matmul %0, %1, %cst {dimension_numbers = #tpu.dot_dimension_numbers<[1], [0], [0], [1], [0, 0, 1, 1], [], []>} : vector<16x2048xbf16>, vector<2048x256xbf16>, vector<16x256xf32> -> vector<16x256xf32>
    %c0_3 = arith.constant 0 : index
    %c0_4 = arith.constant 0 : index
    %3 = vector.load %arg5[%c0_3, %c0_4] : memref<1x256xf32, #tpu.memory_space<vmem>>, vector<1x256xf32>
    %4 = vector.broadcast %3 : vector<1x256xf32> to vector<16x256xf32>
    %5 = arith.addf %2, %4 : vector<16x256xf32>
    %cst_5 = arith.constant 0.000000e+00 : f32
    %6 = vector.broadcast %cst_5 : f32 to vector<16x256xf32>
    %7 = arith.maximumf %5, %6 : vector<16x256xf32>
    %8 = arith.truncf %7 : vector<16x256xf32> to vector<16x256xbf16>
    %c0_6 = arith.constant 0 : index
    %c0_7 = arith.constant 0 : index
    %9 = vector.load %arg6[%c0_6, %c0_7] : memref<16x256xbf16, #tpu.memory_space<vmem>>, vector<16x256xbf16>
    tpu.vector_store %arg6[%c0_6, %c0_7], %8 {strides = array<i32>} : memref<16x256xbf16, #tpu.memory_space<vmem>>, vector<16x256xbf16>,
    return
  }
  func.func @transform_0(%arg0: i32, %arg1: i32, %arg2: i32) -> (i32, i32) {
    %c0_i32 = arith.constant 0 : i32
    return %arg0, %arg2 : i32, i32
  }
  func.func @transform_1(%arg0: i32, %arg1: i32, %arg2: i32) -> (i32, i32) {
    %c0_i32 = arith.constant 0 : i32
    return %arg2, %arg1 : i32, i32
  }
  func.func @transform_2(%arg0: i32, %arg1: i32, %arg2: i32) -> (i32, i32) {
    %c0_i32 = arith.constant 0 : i32
    %c0_i32_0 = arith.constant 0 : i32
    return %c0_i32, %arg1 : i32, i32
  }
  func.func @transform_3(%arg0: i32, %arg1: i32, %arg2: i32) -> (i32, i32) {
    %c0_i32 = arith.constant 0 : i32
    return %arg0, %arg1 : i32, i32
  }
}

module attributes {stable_mosaic.version = 11 : i64} {
  func.func @_mm_bias_act_single_kernel(%arg0: i32, %arg1: i32, %arg2: i32, %arg3: memref<16x2304xbf16, #tpu.memory_space<vmem>>, %arg4: memref<2304x256xbf16, #tpu.memory_space<vmem>>, %arg5: memref<1x256xf32, #tpu.memory_space<vmem>>, %arg6: memref<16x256xbf16, #tpu.memory_space<vmem>>) attributes {dimension_semantics = [#tpu.dimension_semantics<parallel>, #tpu.dimension_semantics<parallel>, #tpu.dimension_semantics<arbitrary>], iteration_bounds = array<i64: 1, 1, 1>, scalar_prefetch = 0 : i64, scratch_operands = 0 : i64, tpu.core_type = #tpu.core_type<tc>, window_params = [{transform_indices = @transform_0, window_bounds = array<i64: 16, 2304>}, {transform_indices = @transform_1, window_bounds = array<i64: 2304, 256>}, {transform_indices = @transform_2, window_bounds = array<i64: 1, 256>}, {transform_indices = @transform_3, window_bounds = array<i64: 16, 256>}]} {
    %c0 = arith.constant 0 : index
    %c0_0 = arith.constant 0 : index
    %0 = vector.load %arg3[%c0, %c0_0] : memref<16x2304xbf16, #tpu.memory_space<vmem>>, vector<16x2304xbf16>
    %c0_1 = arith.constant 0 : index
    %c0_2 = arith.constant 0 : index
    %1 = vector.load %arg4[%c0_1, %c0_2] : memref<2304x256xbf16, #tpu.memory_space<vmem>>, vector<2304x256xbf16>
    %cst = arith.constant dense<0.000000e+00> : vector<16x256xf32>
    %2 = tpu.matmul %0, %1, %cst {dimension_numbers = #tpu.dot_dimension_numbers<[1], [0], [0], [1], [0, 0, 1, 1], [], []>} : vector<16x2304xbf16>, vector<2304x256xbf16>, vector<16x256xf32> -> vector<16x256xf32>
    %c0_3 = arith.constant 0 : index
    %c0_4 = arith.constant 0 : index
    %3 = vector.load %arg5[%c0_3, %c0_4] : memref<1x256xf32, #tpu.memory_space<vmem>>, vector<1x256xf32>
    %4 = vector.broadcast %3 : vector<1x256xf32> to vector<16x256xf32>
    %5 = arith.addf %2, %4 : vector<16x256xf32>
    %6 = arith.truncf %5 : vector<16x256xf32> to vector<16x256xbf16>
    %c0_5 = arith.constant 0 : index
    %c0_6 = arith.constant 0 : index
    %7 = vector.load %arg6[%c0_5, %c0_6] : memref<16x256xbf16, #tpu.memory_space<vmem>>, vector<16x256xbf16>
    tpu.vector_store %arg6[%c0_5, %c0_6], %6 {strides = array<i32>} : memref<16x256xbf16, #tpu.memory_space<vmem>>, vector<16x256xbf16>,
    return
  }
  func.func @transform_0(%arg0: i32, %arg1: i32, %arg2: i32) -> (i32, i32) {
    %c0_i32 = arith.constant 0 : i32
    return %arg0, %arg2 : i32, i32
  }
  func.func @transform_1(%arg0: i32, %arg1: i32, %arg2: i32) -> (i32, i32) {
    %c0_i32 = arith.constant 0 : i32
    return %arg2, %arg1 : i32, i32
  }
  func.func @transform_2(%arg0: i32, %arg1: i32, %arg2: i32) -> (i32, i32) {
    %c0_i32 = arith.constant 0 : i32
    %c0_i32_0 = arith.constant 0 : i32
    return %c0_i32, %arg1 : i32, i32
  }
  func.func @transform_3(%arg0: i32, %arg1: i32, %arg2: i32) -> (i32, i32) {
    %c0_i32 = arith.constant 0 : i32
    return %arg0, %arg1 : i32, i32
  }
}

module attributes {stable_mosaic.version = 11 : i64} {
  func.func @_gn_kernel(%arg0: i32, %arg1: memref<1x4x256xbf16, #tpu.memory_space<vmem>>, %arg2: memref<1x256xf32, #tpu.memory_space<vmem>>, %arg3: memref<1x256xf32, #tpu.memory_space<vmem>>, %arg4: memref<256x256xf32, #tpu.memory_space<vmem>>, %arg5: memref<1x4x256xbf16, #tpu.memory_space<vmem>>) attributes {dimension_semantics = [#tpu.dimension_semantics<parallel>], iteration_bounds = array<i64: 2>, scalar_prefetch = 0 : i64, scratch_operands = 0 : i64, tpu.core_type = #tpu.core_type<tc>, window_params = [{transform_indices = @transform_0, window_bounds = array<i64: 1, 4, 256>}, {pipeline_mode = #tpu.pipeline_mode<synchronous>, transform_indices = @transform_1, window_bounds = array<i64: 1, 256>}, {pipeline_mode = #tpu.pipeline_mode<synchronous>, transform_indices = @transform_2, window_bounds = array<i64: 1, 256>}, {pipeline_mode = #tpu.pipeline_mode<synchronous>, transform_indices = @transform_3, window_bounds = array<i64: 256, 256>}, {transform_indices = @transform_4, window_bounds = array<i64: 1, 4, 256>}]} {
    %c0 = arith.constant 0 : index
    %c0_0 = arith.constant 0 : index
    %c0_1 = arith.constant 0 : index
    %0 = vector.load %arg1[%c0, %c0_0, %c0_1] : memref<1x4x256xbf16, #tpu.memory_space<vmem>>, vector<1x4x256xbf16>
    %1 = vector.shape_cast %0 : vector<1x4x256xbf16> to vector<4x256xbf16>
    %2 = arith.extf %1 : vector<4x256xbf16> to vector<4x256xf32>
    %c0_2 = arith.constant 0 : index
    %c0_3 = arith.constant 0 : index
    %3 = vector.load %arg4[%c0_2, %c0_3] : memref<256x256xf32, #tpu.memory_space<vmem>>, vector<256x256xf32>
    %cst = arith.constant dense<0.000000e+00> : vector<256xf32>
    %4 = vector.multi_reduction <add>, %2, %cst [0] : vector<4x256xf32> to vector<256xf32>
    %5 = vector.shape_cast %4 : vector<256xf32> to vector<1x256xf32>
    %6 = arith.mulf %2, %2 : vector<4x256xf32>
    %cst_4 = arith.constant dense<0.000000e+00> : vector<256xf32>
    %7 = vector.multi_reduction <add>, %6, %cst_4 [0] : vector<4x256xf32> to vector<256xf32>
    %8 = vector.shape_cast %7 : vector<256xf32> to vector<1x256xf32>
    %cst_5 = arith.constant dense<0.000000e+00> : vector<1x256xf32>
    %9 = tpu.matmul %5, %3, %cst_5 {dimension_numbers = #tpu.dot_dimension_numbers<[1], [0], [0], [1], [0, 0, 1, 1], [], []>} : vector<1x256xf32>, vector<256x256xf32>, vector<1x256xf32> -> vector<1x256xf32>
    %cst_6 = arith.constant 7.812500e-03 : f32
    %10 = vector.broadcast %cst_6 : f32 to vector<1x256xf32>
    %11 = arith.mulf %9, %10 : vector<1x256xf32>
    %cst_7 = arith.constant dense<0.000000e+00> : vector<1x256xf32>
    %12 = tpu.matmul %8, %3, %cst_7 {dimension_numbers = #tpu.dot_dimension_numbers<[1], [0], [0], [1], [0, 0, 1, 1], [], []>} : vector<1x256xf32>, vector<256x256xf32>, vector<1x256xf32> -> vector<1x256xf32>
    %cst_8 = arith.constant 7.812500e-03 : f32
    %13 = vector.broadcast %cst_8 : f32 to vector<1x256xf32>
    %14 = arith.mulf %12, %13 : vector<1x256xf32>
    %15 = arith.mulf %11, %11 : vector<1x256xf32>
    %16 = arith.subf %14, %15 : vector<1x256xf32>
    %cst_9 = arith.constant 0.000000e+00 : f32
    %17 = vector.broadcast %cst_9 : f32 to vector<1x256xf32>
    %18 = arith.maximumf %16, %17 : vector<1x256xf32>
    %19 = vector.broadcast %11 : vector<1x256xf32> to vector<4x256xf32>
    %20 = arith.subf %2, %19 : vector<4x256xf32>
    %cst_10 = arith.constant 9.99999974E-6 : f32
    %21 = vector.broadcast %cst_10 : f32 to vector<1x256xf32>
    %22 = arith.addf %18, %21 : vector<1x256xf32>
    %23 = math.rsqrt %22 : vector<1x256xf32>
    %24 = vector.broadcast %23 : vector<1x256xf32> to vector<4x256xf32>
    %25 = arith.mulf %20, %24 : vector<4x256xf32>
    %c0_11 = arith.constant 0 : index
    %c0_12 = arith.constant 0 : index
    %26 = vector.load %arg2[%c0_11, %c0_12] : memref<1x256xf32, #tpu.memory_space<vmem>>, vector<1x256xf32>
    %27 = vector.broadcast %26 : vector<1x256xf32> to vector<4x256xf32>
    %28 = arith.mulf %25, %27 : vector<4x256xf32>
    %c0_13 = arith.constant 0 : index
    %c0_14 = arith.constant 0 : index
    %29 = vector.load %arg3[%c0_13, %c0_14] : memref<1x256xf32, #tpu.memory_space<vmem>>, vector<1x256xf32>
    %30 = vector.broadcast %29 : vector<1x256xf32> to vector<4x256xf32>
    %31 = arith.addf %28, %30 : vector<4x256xf32>
    %cst_15 = arith.constant 0.000000e+00 : f32
    %32 = vector.broadcast %cst_15 : f32 to vector<4x256xf32>
    %33 = arith.maximumf %31, %32 : vector<4x256xf32>
    %34 = arith.truncf %33 : vector<4x256xf32> to vector<4x256xbf16>
    %c0_16 = arith.constant 0 : index
    %c0_17 = arith.constant 0 : index
    %c0_18 = arith.constant 0 : index
    %35 = vector.load %arg5[%c0_16, %c0_17, %c0_18] : memref<1x4x256xbf16, #tpu.memory_space<vmem>>, vector<1x4x256xbf16>
    %36 = vector.shape_cast %35 : vector<1x4x256xbf16> to vector<4x256xbf16>
    %37 = vector.shape_cast %34 : vector<4x256xbf16> to vector<1x4x256xbf16>
    tpu.vector_store %arg5[%c0_16, %c0_17, %c0_18], %37 {strides = array<i32>} : memref<1x4x256xbf16, #tpu.memory_space<vmem>>, vector<1x4x256xbf16>,
    return
  }
  func.func @transform_0(%arg0: i32) -> (i32, i32, i32) {
    %c0_i32 = arith.constant 0 : i32
    %c0_i32_0 = arith.constant 0 : i32
    %c0_i32_1 = arith.constant 0 : i32
    return %arg0, %c0_i32, %c0_i32_0 : i32, i32, i32
  }
  func.func @transform_1(%arg0: i32) -> (i32, i32) {
    %c0_i32 = arith.constant 0 : i32
    %c0_i32_0 = arith.constant 0 : i32
    %c0_i32_1 = arith.constant 0 : i32
    return %c0_i32, %c0_i32_0 : i32, i32
  }
  func.func @transform_2(%arg0: i32) -> (i32, i32) {
    %c0_i32 = arith.constant 0 : i32
    %c0_i32_0 = arith.constant 0 : i32
    %c0_i32_1 = arith.constant 0 : i32
    return %c0_i32, %c0_i32_0 : i32, i32
  }
  func.func @transform_3(%arg0: i32) -> (i32, i32) {
    %c0_i32 = arith.constant 0 : i32
    %c0_i32_0 = arith.constant 0 : i32
    %c0_i32_1 = arith.constant 0 : i32
    return %c0_i32, %c0_i32_0 : i32, i32
  }
  func.func @transform_4(%arg0: i32) -> (i32, i32, i32) {
    %c0_i32 = arith.constant 0 : i32
    %c0_i32_0 = arith.constant 0 : i32
    %c0_i32_1 = arith.constant 0 : i32
    return %arg0, %c0_i32, %c0_i32_0 : i32, i32, i32
  }
}

module attributes {stable_mosaic.version = 11 : i64} {
  func.func @_gn_kernel(%arg0: i32, %arg1: memref<1x4x256xbf16, #tpu.memory_space<vmem>>, %arg2: memref<1x256xf32, #tpu.memory_space<vmem>>, %arg3: memref<1x256xf32, #tpu.memory_space<vmem>>, %arg4: memref<256x256xf32, #tpu.memory_space<vmem>>, %arg5: memref<1x4x256xbf16, #tpu.memory_space<vmem>>, %arg6: memref<1x4x256xbf16, #tpu.memory_space<vmem>>) attributes {dimension_semantics = [#tpu.dimension_semantics<parallel>], iteration_bounds = array<i64: 2>, scalar_prefetch = 0 : i64, scratch_operands = 0 : i64, tpu.core_type = #tpu.core_type<tc>, window_params = [{transform_indices = @transform_0, window_bounds = array<i64: 1, 4, 256>}, {pipeline_mode = #tpu.pipeline_mode<synchronous>, transform_indices = @transform_1, window_bounds = array<i64: 1, 256>}, {pipeline_mode = #tpu.pipeline_mode<synchronous>, transform_indices = @transform_2, window_bounds = array<i64: 1, 256>}, {pipeline_mode = #tpu.pipeline_mode<synchronous>, transform_indices = @transform_3, window_bounds = array<i64: 256, 256>}, {transform_indices = @transform_4, window_bounds = array<i64: 1, 4, 256>}, {transform_indices = @transform_5, window_bounds = array<i64: 1, 4, 256>}]} {
    %c0 = arith.constant 0 : index
    %c0_0 = arith.constant 0 : index
    %c0_1 = arith.constant 0 : index
    %0 = vector.load %arg1[%c0, %c0_0, %c0_1] : memref<1x4x256xbf16, #tpu.memory_space<vmem>>, vector<1x4x256xbf16>
    %1 = vector.shape_cast %0 : vector<1x4x256xbf16> to vector<4x256xbf16>
    %2 = arith.extf %1 : vector<4x256xbf16> to vector<4x256xf32>
    %c0_2 = arith.constant 0 : index
    %c0_3 = arith.constant 0 : index
    %3 = vector.load %arg4[%c0_2, %c0_3] : memref<256x256xf32, #tpu.memory_space<vmem>>, vector<256x256xf32>
    %cst = arith.constant dense<0.000000e+00> : vector<256xf32>
    %4 = vector.multi_reduction <add>, %2, %cst [0] : vector<4x256xf32> to vector<256xf32>
    %5 = vector.shape_cast %4 : vector<256xf32> to vector<1x256xf32>
    %6 = arith.mulf %2, %2 : vector<4x256xf32>
    %cst_4 = arith.constant dense<0.000000e+00> : vector<256xf32>
    %7 = vector.multi_reduction <add>, %6, %cst_4 [0] : vector<4x256xf32> to vector<256xf32>
    %8 = vector.shape_cast %7 : vector<256xf32> to vector<1x256xf32>
    %cst_5 = arith.constant dense<0.000000e+00> : vector<1x256xf32>
    %9 = tpu.matmul %5, %3, %cst_5 {dimension_numbers = #tpu.dot_dimension_numbers<[1], [0], [0], [1], [0, 0, 1, 1], [], []>} : vector<1x256xf32>, vector<256x256xf32>, vector<1x256xf32> -> vector<1x256xf32>
    %cst_6 = arith.constant 7.812500e-03 : f32
    %10 = vector.broadcast %cst_6 : f32 to vector<1x256xf32>
    %11 = arith.mulf %9, %10 : vector<1x256xf32>
    %cst_7 = arith.constant dense<0.000000e+00> : vector<1x256xf32>
    %12 = tpu.matmul %8, %3, %cst_7 {dimension_numbers = #tpu.dot_dimension_numbers<[1], [0], [0], [1], [0, 0, 1, 1], [], []>} : vector<1x256xf32>, vector<256x256xf32>, vector<1x256xf32> -> vector<1x256xf32>
    %cst_8 = arith.constant 7.812500e-03 : f32
    %13 = vector.broadcast %cst_8 : f32 to vector<1x256xf32>
    %14 = arith.mulf %12, %13 : vector<1x256xf32>
    %15 = arith.mulf %11, %11 : vector<1x256xf32>
    %16 = arith.subf %14, %15 : vector<1x256xf32>
    %cst_9 = arith.constant 0.000000e+00 : f32
    %17 = vector.broadcast %cst_9 : f32 to vector<1x256xf32>
    %18 = arith.maximumf %16, %17 : vector<1x256xf32>
    %19 = vector.broadcast %11 : vector<1x256xf32> to vector<4x256xf32>
    %20 = arith.subf %2, %19 : vector<4x256xf32>
    %cst_10 = arith.constant 9.99999974E-6 : f32
    %21 = vector.broadcast %cst_10 : f32 to vector<1x256xf32>
    %22 = arith.addf %18, %21 : vector<1x256xf32>
    %23 = math.rsqrt %22 : vector<1x256xf32>
    %24 = vector.broadcast %23 : vector<1x256xf32> to vector<4x256xf32>
    %25 = arith.mulf %20, %24 : vector<4x256xf32>
    %c0_11 = arith.constant 0 : index
    %c0_12 = arith.constant 0 : index
    %26 = vector.load %arg2[%c0_11, %c0_12] : memref<1x256xf32, #tpu.memory_space<vmem>>, vector<1x256xf32>
    %27 = vector.broadcast %26 : vector<1x256xf32> to vector<4x256xf32>
    %28 = arith.mulf %25, %27 : vector<4x256xf32>
    %c0_13 = arith.constant 0 : index
    %c0_14 = arith.constant 0 : index
    %29 = vector.load %arg3[%c0_13, %c0_14] : memref<1x256xf32, #tpu.memory_space<vmem>>, vector<1x256xf32>
    %30 = vector.broadcast %29 : vector<1x256xf32> to vector<4x256xf32>
    %31 = arith.addf %28, %30 : vector<4x256xf32>
    %c0_15 = arith.constant 0 : index
    %c0_16 = arith.constant 0 : index
    %c0_17 = arith.constant 0 : index
    %32 = vector.load %arg5[%c0_15, %c0_16, %c0_17] : memref<1x4x256xbf16, #tpu.memory_space<vmem>>, vector<1x4x256xbf16>
    %33 = vector.shape_cast %32 : vector<1x4x256xbf16> to vector<4x256xbf16>
    %34 = arith.extf %33 : vector<4x256xbf16> to vector<4x256xf32>
    %35 = arith.addf %31, %34 : vector<4x256xf32>
    %cst_18 = arith.constant 0.000000e+00 : f32
    %36 = vector.broadcast %cst_18 : f32 to vector<4x256xf32>
    %37 = arith.maximumf %35, %36 : vector<4x256xf32>
    %38 = arith.truncf %37 : vector<4x256xf32> to vector<4x256xbf16>
    %c0_19 = arith.constant 0 : index
    %c0_20 = arith.constant 0 : index
    %c0_21 = arith.constant 0 : index
    %39 = vector.load %arg6[%c0_19, %c0_20, %c0_21] : memref<1x4x256xbf16, #tpu.memory_space<vmem>>, vector<1x4x256xbf16>
    %40 = vector.shape_cast %39 : vector<1x4x256xbf16> to vector<4x256xbf16>
    %41 = vector.shape_cast %38 : vector<4x256xbf16> to vector<1x4x256xbf16>
    tpu.vector_store %arg6[%c0_19, %c0_20, %c0_21], %41 {strides = array<i32>} : memref<1x4x256xbf16, #tpu.memory_space<vmem>>, vector<1x4x256xbf16>,
    return
  }
  func.func @transform_0(%arg0: i32) -> (i32, i32, i32) {
    %c0_i32 = arith.constant 0 : i32
    %c0_i32_0 = arith.constant 0 : i32
    %c0_i32_1 = arith.constant 0 : i32
    return %arg0, %c0_i32, %c0_i32_0 : i32, i32, i32
  }
  func.func @transform_1(%arg0: i32) -> (i32, i32) {
    %c0_i32 = arith.constant 0 : i32
    %c0_i32_0 = arith.constant 0 : i32
    %c0_i32_1 = arith.constant 0 : i32
    return %c0_i32, %c0_i32_0 : i32, i32
  }
  func.func @transform_2(%arg0: i32) -> (i32, i32) {
    %c0_i32 = arith.constant 0 : i32
    %c0_i32_0 = arith.constant 0 : i32
    %c0_i32_1 = arith.constant 0 : i32
    return %c0_i32, %c0_i32_0 : i32, i32
  }
  func.func @transform_3(%arg0: i32) -> (i32, i32) {
    %c0_i32 = arith.constant 0 : i32
    %c0_i32_0 = arith.constant 0 : i32
    %c0_i32_1 = arith.constant 0 : i32
    return %c0_i32, %c0_i32_0 : i32, i32
  }
  func.func @transform_4(%arg0: i32) -> (i32, i32, i32) {
    %c0_i32 = arith.constant 0 : i32
    %c0_i32_0 = arith.constant 0 : i32
    %c0_i32_1 = arith.constant 0 : i32
    return %arg0, %c0_i32, %c0_i32_0 : i32, i32, i32
  }
  func.func @transform_5(%arg0: i32) -> (i32, i32, i32) {
    %c0_i32 = arith.constant 0 : i32
    %c0_i32_0 = arith.constant 0 : i32
    %c0_i32_1 = arith.constant 0 : i32
    return %arg0, %c0_i32, %c0_i32_0 : i32, i32, i32
  }
}

module attributes {stable_mosaic.version = 11 : i64} {
  func.func @_mm_bias_act_single_kernel(%arg0: i32, %arg1: i32, %arg2: i32, %arg3: memref<16x256xbf16, #tpu.memory_space<vmem>>, %arg4: memref<256x256xbf16, #tpu.memory_space<vmem>>, %arg5: memref<1x256xf32, #tpu.memory_space<vmem>>, %arg6: memref<16x256xf32, #tpu.memory_space<vmem>>) attributes {dimension_semantics = [#tpu.dimension_semantics<parallel>, #tpu.dimension_semantics<parallel>, #tpu.dimension_semantics<arbitrary>], iteration_bounds = array<i64: 1, 1, 1>, scalar_prefetch = 0 : i64, scratch_operands = 0 : i64, tpu.core_type = #tpu.core_type<tc>, window_params = [{transform_indices = @transform_0, window_bounds = array<i64: 16, 256>}, {transform_indices = @transform_1, window_bounds = array<i64: 256, 256>}, {transform_indices = @transform_2, window_bounds = array<i64: 1, 256>}, {transform_indices = @transform_3, window_bounds = array<i64: 16, 256>}]} {
    %c0 = arith.constant 0 : index
    %c0_0 = arith.constant 0 : index
    %0 = vector.load %arg3[%c0, %c0_0] : memref<16x256xbf16, #tpu.memory_space<vmem>>, vector<16x256xbf16>
    %c0_1 = arith.constant 0 : index
    %c0_2 = arith.constant 0 : index
    %1 = vector.load %arg4[%c0_1, %c0_2] : memref<256x256xbf16, #tpu.memory_space<vmem>>, vector<256x256xbf16>
    %cst = arith.constant dense<0.000000e+00> : vector<16x256xf32>
    %2 = tpu.matmul %0, %1, %cst {dimension_numbers = #tpu.dot_dimension_numbers<[1], [0], [0], [1], [0, 0, 1, 1], [], []>} : vector<16x256xbf16>, vector<256x256xbf16>, vector<16x256xf32> -> vector<16x256xf32>
    %c0_3 = arith.constant 0 : index
    %c0_4 = arith.constant 0 : index
    %3 = vector.load %arg5[%c0_3, %c0_4] : memref<1x256xf32, #tpu.memory_space<vmem>>, vector<1x256xf32>
    %4 = vector.broadcast %3 : vector<1x256xf32> to vector<16x256xf32>
    %5 = arith.addf %2, %4 : vector<16x256xf32>
    %c0_5 = arith.constant 0 : index
    %c0_6 = arith.constant 0 : index
    %6 = vector.load %arg6[%c0_5, %c0_6] : memref<16x256xf32, #tpu.memory_space<vmem>>, vector<16x256xf32>
    tpu.vector_store %arg6[%c0_5, %c0_6], %5 {strides = array<i32>} : memref<16x256xf32, #tpu.memory_space<vmem>>, vector<16x256xf32>,
    return
  }
  func.func @transform_0(%arg0: i32, %arg1: i32, %arg2: i32) -> (i32, i32) {
    %c0_i32 = arith.constant 0 : i32
    return %arg0, %arg2 : i32, i32
  }
  func.func @transform_1(%arg0: i32, %arg1: i32, %arg2: i32) -> (i32, i32) {
    %c0_i32 = arith.constant 0 : i32
    return %arg2, %arg1 : i32, i32
  }
  func.func @transform_2(%arg0: i32, %arg1: i32, %arg2: i32) -> (i32, i32) {
    %c0_i32 = arith.constant 0 : i32
    %c0_i32_0 = arith.constant 0 : i32
    return %c0_i32, %arg1 : i32, i32
  }
  func.func @transform_3(%arg0: i32, %arg1: i32, %arg2: i32) -> (i32, i32) {
    %c0_i32 = arith.constant 0 : i32
    return %arg0, %arg1 : i32, i32
  }
}

module attributes {stable_mosaic.version = 11 : i64} {
  func.func @_vq_kernel(%arg0: i32, %arg1: memref<16x256xf32, #tpu.memory_space<vmem>>, %arg2: memref<1x512xf32, #tpu.memory_space<vmem>>, %arg3: memref<256x512xbf16, #tpu.memory_space<vmem>>, %arg4: memref<512x256xf32, #tpu.memory_space<vmem>>, %arg5: memref<16x256xf32, #tpu.memory_space<vmem>>, %arg6: memref<16x128xi32, #tpu.memory_space<vmem>>, %arg7: memref<1x1xf32, #tpu.memory_space<vmem>>) attributes {dimension_semantics = [#tpu.dimension_semantics<arbitrary>], iteration_bounds = array<i64: 1>, scalar_prefetch = 0 : i64, scratch_operands = 0 : i64, tpu.core_type = #tpu.core_type<tc>, window_params = [{transform_indices = @transform_0, window_bounds = array<i64: 16, 256>}, {pipeline_mode = #tpu.pipeline_mode<synchronous>, transform_indices = @transform_1, window_bounds = array<i64: 1, 512>}, {pipeline_mode = #tpu.pipeline_mode<synchronous>, transform_indices = @transform_2, window_bounds = array<i64: 256, 512>}, {pipeline_mode = #tpu.pipeline_mode<synchronous>, transform_indices = @transform_3, window_bounds = array<i64: 512, 256>}, {transform_indices = @transform_4, window_bounds = array<i64: 16, 256>}, {transform_indices = @transform_5, window_bounds = array<i64: 16, 128>}, {pipeline_mode = #tpu.pipeline_mode<synchronous>, transform_indices = @transform_6, window_bounds = array<i64: 1, 1>}]} {
    %c0 = arith.constant 0 : index
    %c0_0 = arith.constant 0 : index
    %0 = vector.load %arg1[%c0, %c0_0] : memref<16x256xf32, #tpu.memory_space<vmem>>, vector<16x256xf32>
    %c0_1 = arith.constant 0 : index
    %c0_2 = arith.constant 0 : index
    %1 = vector.load %arg2[%c0_1, %c0_2] : memref<1x512xf32, #tpu.memory_space<vmem>>, vector<1x512xf32>
    %2 = arith.truncf %0 : vector<16x256xf32> to vector<16x256xbf16>
    %c0_3 = arith.constant 0 : index
    %c0_4 = arith.constant 0 : index
    %3 = vector.load %arg3[%c0_3, %c0_4] : memref<256x512xbf16, #tpu.memory_space<vmem>>, vector<256x512xbf16>
    %cst = arith.constant dense<0.000000e+00> : vector<16x512xf32>
    %4 = tpu.matmul %2, %3, %cst {dimension_numbers = #tpu.dot_dimension_numbers<[1], [0], [0], [1], [0, 0, 1, 1], [], []>} : vector<16x256xbf16>, vector<256x512xbf16>, vector<16x512xf32> -> vector<16x512xf32>
    %cst_5 = arith.constant 2.000000e+00 : f32
    %5 = vector.broadcast %cst_5 : f32 to vector<16x512xf32>
    %6 = arith.mulf %5, %4 : vector<16x512xf32>
    %7 = vector.broadcast %1 : vector<1x512xf32> to vector<16x512xf32>
    %8 = arith.subf %7, %6 : vector<16x512xf32>
    %9 = tpu.iota {dimensions = array<i32: 1>} : vector<16x512xi32>
    %cst_6 = arith.constant dense<0x7F800000> : vector<16xf32>
    %10 = vector.multi_reduction <minimumf>, %8, %cst_6 [1] : vector<16x512xf32> to vector<16xf32>
    %11 = vector.shape_cast %10 : vector<16xf32> to vector<16x1xf32>
    %12 = vector.broadcast %11 : vector<16x1xf32> to vector<16x512xf32>
    %13 = arith.cmpf oeq, %8, %12 : vector<16x512xf32>
    %c512_i32 = arith.constant 512 : i32
    %14 = vector.broadcast %c512_i32 : i32 to vector<16x512xi32>
    %15 = arith.select %13, %9, %14 : vector<16x512xi1>, vector<16x512xi32>
    %cst_7 = arith.constant dense<2147483647> : vector<16xi32>
    %16 = vector.multi_reduction <minsi>, %15, %cst_7 [1] : vector<16x512xi32> to vector<16xi32>
    %17 = vector.shape_cast %16 : vector<16xi32> to vector<16x1xi32>
    %18 = vector.broadcast %17 : vector<16x1xi32> to vector<16x512xi32>
    %19 = arith.cmpi eq, %9, %18 : vector<16x512xi32>
    %20 = arith.extui %19 : vector<16x512xi1> to vector<16x512xi32>
    %21 = arith.sitofp %20 : vector<16x512xi32> to vector<16x512xf32>
    %c0_8 = arith.constant 0 : index
    %c0_9 = arith.constant 0 : index
    %22 = vector.load %arg4[%c0_8, %c0_9] : memref<512x256xf32, #tpu.memory_space<vmem>>, vector<512x256xf32>
    %cst_10 = arith.constant dense<0.000000e+00> : vector<16x256xf32>
    %23 = tpu.matmul %21, %22, %cst_10 {dimension_numbers = #tpu.dot_dimension_numbers<[1], [0], [0], [1], [0, 0, 1, 1], [], []>} : vector<16x512xf32>, vector<512x256xf32>, vector<16x256xf32> -> vector<16x256xf32>
    %c0_11 = arith.constant 0 : index
    %c0_12 = arith.constant 0 : index
    %24 = vector.load %arg5[%c0_11, %c0_12] : memref<16x256xf32, #tpu.memory_space<vmem>>, vector<16x256xf32>
    tpu.vector_store %arg5[%c0_11, %c0_12], %23 {strides = array<i32>} : memref<16x256xf32, #tpu.memory_space<vmem>>, vector<16x256xf32>,
    %25 = vector.shape_cast %17 : vector<16x1xi32> to vector<16x1xi32>
    %26 = vector.broadcast %25 : vector<16x1xi32> to vector<16x128xi32>
    %c0_13 = arith.constant 0 : index
    %c0_14 = arith.constant 0 : index
    %27 = vector.load %arg6[%c0_13, %c0_14] : memref<16x128xi32, #tpu.memory_space<vmem>>, vector<16x128xi32>
    tpu.vector_store %arg6[%c0_13, %c0_14], %26 {strides = array<i32>} : memref<16x128xi32, #tpu.memory_space<vmem>>, vector<16x128xi32>,
    %c16_i32 = arith.constant 16 : i32
    %28 = arith.muli %arg0, %c16_i32 : i32
    %29 = tpu.iota {dimensions = array<i32: 0>} : vector<16x1xi32>
    %30 = vector.broadcast %28 : i32 to vector<16x1xi32>
    %31 = arith.addi %30, %29 : vector<16x1xi32>
    %c8_i32 = arith.constant 8 : i32
    %32 = vector.broadcast %c8_i32 : i32 to vector<16x1xi32>
    %33 = arith.cmpi slt, %31, %32 : vector<16x1xi32>
    %34 = arith.extui %33 : vector<16x1xi1> to vector<16x1xi32>
    %35 = arith.sitofp %34 : vector<16x1xi32> to vector<16x1xf32>
    %36 = arith.subf %23, %0 : vector<16x256xf32>
    %37 = arith.mulf %36, %36 : vector<16x256xf32>
    %38 = vector.broadcast %35 : vector<16x1xf32> to vector<16x256xf32>
    %39 = arith.mulf %37, %38 : vector<16x256xf32>
    %40 = vector.shape_cast %39 : vector<16x256xf32> to vector<1x16x256xf32>
    %cst_15 = arith.constant dense<0.000000e+00> : vector<1xf32>
    %41 = vector.multi_reduction <add>, %40, %cst_15 [1, 2] : vector<1x16x256xf32> to vector<1xf32>
    %42 = vector.shape_cast %41 : vector<1xf32> to vector<1x1x1xf32>
    %43 = vector.extract %42[0, 0, 0] : f32 from vector<1x1x1xf32>
    %c0_i32 = arith.constant 0 : i32
    %44 = arith.cmpi eq, %arg0, %c0_i32 : i32
    %45 = arith.extui %44 : i1 to i32
    %c0_i32_16 = arith.constant 0 : i32
    %46 = arith.cmpi ne, %45, %c0_i32_16 : i32
    scf.if %46 {
      %cst_23 = arith.constant 0.000000e+00 : f32
      %54 = vector.broadcast %cst_23 : f32 to vector<1x1xf32>
      %c0_24 = arith.constant 0 : index
      %c0_25 = arith.constant 0 : index
      %55 = vector.load %arg7[%c0_24, %c0_25] : memref<1x1xf32, #tpu.memory_space<vmem>>, vector<1x1xf32>
      tpu.vector_store %arg7[%c0_24, %c0_25], %54 {strides = array<i32>} : memref<1x1xf32, #tpu.memory_space<vmem>>, vector<1x1xf32>,
    } else {
    }
    %c0_17 = arith.constant 0 : index
    %c0_18 = arith.constant 0 : index
    %47 = vector.load %arg7[%c0_17, %c0_18] : memref<1x1xf32, #tpu.memory_space<vmem>>, vector<1x1xf32>
    %48 = vector.broadcast %43 : f32 to vector<1x1xf32>
    %49 = arith.addf %47, %48 : vector<1x1xf32>
    %c0_19 = arith.constant 0 : index
    %c0_20 = arith.constant 0 : index
    %50 = vector.load %arg7[%c0_19, %c0_20] : memref<1x1xf32, #tpu.memory_space<vmem>>, vector<1x1xf32>
    tpu.vector_store %arg7[%c0_19, %c0_20], %49 {strides = array<i32>} : memref<1x1xf32, #tpu.memory_space<vmem>>, vector<1x1xf32>,
    %c0_i32_21 = arith.constant 0 : i32
    %51 = arith.cmpi eq, %arg0, %c0_i32_21 : i32
    %52 = arith.extui %51 : i1 to i32
    %c0_i32_22 = arith.constant 0 : i32
    %53 = arith.cmpi ne, %52, %c0_i32_22 : i32
    scf.if %53 {
      %c0_23 = arith.constant 0 : index
      %c0_24 = arith.constant 0 : index
      %54 = vector.load %arg7[%c0_23, %c0_24] : memref<1x1xf32, #tpu.memory_space<vmem>>, vector<1x1xf32>
      %cst_25 = arith.constant 2.44140625E-4 : f32
      %55 = vector.broadcast %cst_25 : f32 to vector<1x1xf32>
      %56 = arith.mulf %54, %55 : vector<1x1xf32>
      %c0_26 = arith.constant 0 : index
      %c0_27 = arith.constant 0 : index
      %57 = vector.load %arg7[%c0_26, %c0_27] : memref<1x1xf32, #tpu.memory_space<vmem>>, vector<1x1xf32>
      tpu.vector_store %arg7[%c0_26, %c0_27], %56 {strides = array<i32>} : memref<1x1xf32, #tpu.memory_space<vmem>>, vector<1x1xf32>,
    } else {
    }
    return
  }
  func.func @transform_0(%arg0: i32) -> (i32, i32) {
    %c0_i32 = arith.constant 0 : i32
    %c0_i32_0 = arith.constant 0 : i32
    return %arg0, %c0_i32 : i32, i32
  }
  func.func @transform_1(%arg0: i32) -> (i32, i32) {
    %c0_i32 = arith.constant 0 : i32
    %c0_i32_0 = arith.constant 0 : i32
    %c0_i32_1 = arith.constant 0 : i32
    return %c0_i32, %c0_i32_0 : i32, i32
  }
  func.func @transform_2(%arg0: i32) -> (i32, i32) {
    %c0_i32 = arith.constant 0 : i32
    %c0_i32_0 = arith.constant 0 : i32
    %c0_i32_1 = arith.constant 0 : i32
    return %c0_i32, %c0_i32_0 : i32, i32
  }
  func.func @transform_3(%arg0: i32) -> (i32, i32) {
    %c0_i32 = arith.constant 0 : i32
    %c0_i32_0 = arith.constant 0 : i32
    %c0_i32_1 = arith.constant 0 : i32
    return %c0_i32, %c0_i32_0 : i32, i32
  }
  func.func @transform_4(%arg0: i32) -> (i32, i32) {
    %c0_i32 = arith.constant 0 : i32
    %c0_i32_0 = arith.constant 0 : i32
    return %arg0, %c0_i32 : i32, i32
  }
  func.func @transform_5(%arg0: i32) -> (i32, i32) {
    %c0_i32 = arith.constant 0 : i32
    %c0_i32_0 = arith.constant 0 : i32
    return %arg0, %c0_i32 : i32, i32
  }
  func.func @transform_6(%arg0: i32) -> (i32, i32) {
    %c0_i32 = arith.constant 0 : i32
    %c0_i32_0 = arith.constant 0 : i32
    %c0_i32_1 = arith.constant 0 : i32
    return %c0_i32, %c0_i32_0 : i32, i32
  }
}

module attributes {stable_mosaic.version = 11 : i64} {
  func.func @_mm_bias_act_single_kernel(%arg0: i32, %arg1: i32, %arg2: i32, %arg3: memref<16x256xbf16, #tpu.memory_space<vmem>>, %arg4: memref<256x256xbf16, #tpu.memory_space<vmem>>, %arg5: memref<1x256xf32, #tpu.memory_space<vmem>>, %arg6: memref<16x256xbf16, #tpu.memory_space<vmem>>) attributes {dimension_semantics = [#tpu.dimension_semantics<parallel>, #tpu.dimension_semantics<parallel>, #tpu.dimension_semantics<arbitrary>], iteration_bounds = array<i64: 1, 1, 1>, scalar_prefetch = 0 : i64, scratch_operands = 0 : i64, tpu.core_type = #tpu.core_type<tc>, window_params = [{transform_indices = @transform_0, window_bounds = array<i64: 16, 256>}, {transform_indices = @transform_1, window_bounds = array<i64: 256, 256>}, {transform_indices = @transform_2, window_bounds = array<i64: 1, 256>}, {transform_indices = @transform_3, window_bounds = array<i64: 16, 256>}]} {
    %c0 = arith.constant 0 : index
    %c0_0 = arith.constant 0 : index
    %0 = vector.load %arg3[%c0, %c0_0] : memref<16x256xbf16, #tpu.memory_space<vmem>>, vector<16x256xbf16>
    %c0_1 = arith.constant 0 : index
    %c0_2 = arith.constant 0 : index
    %1 = vector.load %arg4[%c0_1, %c0_2] : memref<256x256xbf16, #tpu.memory_space<vmem>>, vector<256x256xbf16>
    %cst = arith.constant dense<0.000000e+00> : vector<16x256xf32>
    %2 = tpu.matmul %0, %1, %cst {dimension_numbers = #tpu.dot_dimension_numbers<[1], [0], [0], [1], [0, 0, 1, 1], [], []>} : vector<16x256xbf16>, vector<256x256xbf16>, vector<16x256xf32> -> vector<16x256xf32>
    %c0_3 = arith.constant 0 : index
    %c0_4 = arith.constant 0 : index
    %3 = vector.load %arg5[%c0_3, %c0_4] : memref<1x256xf32, #tpu.memory_space<vmem>>, vector<1x256xf32>
    %4 = vector.broadcast %3 : vector<1x256xf32> to vector<16x256xf32>
    %5 = arith.addf %2, %4 : vector<16x256xf32>
    %6 = arith.truncf %5 : vector<16x256xf32> to vector<16x256xbf16>
    %c0_5 = arith.constant 0 : index
    %c0_6 = arith.constant 0 : index
    %7 = vector.load %arg6[%c0_5, %c0_6] : memref<16x256xbf16, #tpu.memory_space<vmem>>, vector<16x256xbf16>
    tpu.vector_store %arg6[%c0_5, %c0_6], %6 {strides = array<i32>} : memref<16x256xbf16, #tpu.memory_space<vmem>>, vector<16x256xbf16>,
    return
  }
  func.func @transform_0(%arg0: i32, %arg1: i32, %arg2: i32) -> (i32, i32) {
    %c0_i32 = arith.constant 0 : i32
    return %arg0, %arg2 : i32, i32
  }
  func.func @transform_1(%arg0: i32, %arg1: i32, %arg2: i32) -> (i32, i32) {
    %c0_i32 = arith.constant 0 : i32
    return %arg2, %arg1 : i32, i32
  }
  func.func @transform_2(%arg0: i32, %arg1: i32, %arg2: i32) -> (i32, i32) {
    %c0_i32 = arith.constant 0 : i32
    %c0_i32_0 = arith.constant 0 : i32
    return %c0_i32, %arg1 : i32, i32
  }
  func.func @transform_3(%arg0: i32, %arg1: i32, %arg2: i32) -> (i32, i32) {
    %c0_i32 = arith.constant 0 : i32
    return %arg0, %arg1 : i32, i32
  }
}

module attributes {stable_mosaic.version = 11 : i64} {
  func.func @_mm_bias_act_single_kernel(%arg0: i32, %arg1: i32, %arg2: i32, %arg3: memref<32x1024xbf16, #tpu.memory_space<vmem>>, %arg4: memref<1024x512xbf16, #tpu.memory_space<vmem>>, %arg5: memref<1x512xf32, #tpu.memory_space<vmem>>, %arg6: memref<32x512xbf16, #tpu.memory_space<vmem>>) attributes {dimension_semantics = [#tpu.dimension_semantics<parallel>, #tpu.dimension_semantics<parallel>, #tpu.dimension_semantics<arbitrary>], iteration_bounds = array<i64: 1, 1, 1>, scalar_prefetch = 0 : i64, scratch_operands = 0 : i64, tpu.core_type = #tpu.core_type<tc>, window_params = [{transform_indices = @transform_0, window_bounds = array<i64: 32, 1024>}, {transform_indices = @transform_1, window_bounds = array<i64: 1024, 512>}, {transform_indices = @transform_2, window_bounds = array<i64: 1, 512>}, {transform_indices = @transform_3, window_bounds = array<i64: 32, 512>}]} {
    %c0 = arith.constant 0 : index
    %c0_0 = arith.constant 0 : index
    %0 = vector.load %arg3[%c0, %c0_0] : memref<32x1024xbf16, #tpu.memory_space<vmem>>, vector<32x1024xbf16>
    %c0_1 = arith.constant 0 : index
    %c0_2 = arith.constant 0 : index
    %1 = vector.load %arg4[%c0_1, %c0_2] : memref<1024x512xbf16, #tpu.memory_space<vmem>>, vector<1024x512xbf16>
    %cst = arith.constant dense<0.000000e+00> : vector<32x512xf32>
    %2 = tpu.matmul %0, %1, %cst {dimension_numbers = #tpu.dot_dimension_numbers<[1], [0], [0], [1], [0, 0, 1, 1], [], []>} : vector<32x1024xbf16>, vector<1024x512xbf16>, vector<32x512xf32> -> vector<32x512xf32>
    %c0_3 = arith.constant 0 : index
    %c0_4 = arith.constant 0 : index
    %3 = vector.load %arg5[%c0_3, %c0_4] : memref<1x512xf32, #tpu.memory_space<vmem>>, vector<1x512xf32>
    %4 = vector.broadcast %3 : vector<1x512xf32> to vector<32x512xf32>
    %5 = arith.addf %2, %4 : vector<32x512xf32>
    %cst_5 = arith.constant 0.000000e+00 : f32
    %6 = vector.broadcast %cst_5 : f32 to vector<32x512xf32>
    %7 = arith.maximumf %5, %6 : vector<32x512xf32>
    %8 = arith.truncf %7 : vector<32x512xf32> to vector<32x512xbf16>
    %c0_6 = arith.constant 0 : index
    %c0_7 = arith.constant 0 : index
    %9 = vector.load %arg6[%c0_6, %c0_7] : memref<32x512xbf16, #tpu.memory_space<vmem>>, vector<32x512xbf16>
    tpu.vector_store %arg6[%c0_6, %c0_7], %8 {strides = array<i32>} : memref<32x512xbf16, #tpu.memory_space<vmem>>, vector<32x512xbf16>,
    return
  }
  func.func @transform_0(%arg0: i32, %arg1: i32, %arg2: i32) -> (i32, i32) {
    %c0_i32 = arith.constant 0 : i32
    return %arg0, %arg2 : i32, i32
  }
  func.func @transform_1(%arg0: i32, %arg1: i32, %arg2: i32) -> (i32, i32) {
    %c0_i32 = arith.constant 0 : i32
    return %arg2, %arg1 : i32, i32
  }
  func.func @transform_2(%arg0: i32, %arg1: i32, %arg2: i32) -> (i32, i32) {
    %c0_i32 = arith.constant 0 : i32
    %c0_i32_0 = arith.constant 0 : i32
    return %c0_i32, %arg1 : i32, i32
  }
  func.func @transform_3(%arg0: i32, %arg1: i32, %arg2: i32) -> (i32, i32) {
    %c0_i32 = arith.constant 0 : i32
    return %arg0, %arg1 : i32, i32
  }
}

module attributes {stable_mosaic.version = 11 : i64} {
  func.func @_mm_bias_act_single_kernel(%arg0: i32, %arg1: i32, %arg2: i32, %arg3: memref<64x512xbf16, #tpu.memory_space<vmem>>, %arg4: memref<512x256xbf16, #tpu.memory_space<vmem>>, %arg5: memref<1x256xf32, #tpu.memory_space<vmem>>, %arg6: memref<64x256xbf16, #tpu.memory_space<vmem>>) attributes {dimension_semantics = [#tpu.dimension_semantics<parallel>, #tpu.dimension_semantics<parallel>, #tpu.dimension_semantics<arbitrary>], iteration_bounds = array<i64: 1, 1, 1>, scalar_prefetch = 0 : i64, scratch_operands = 0 : i64, tpu.core_type = #tpu.core_type<tc>, window_params = [{transform_indices = @transform_0, window_bounds = array<i64: 64, 512>}, {transform_indices = @transform_1, window_bounds = array<i64: 512, 256>}, {transform_indices = @transform_2, window_bounds = array<i64: 1, 256>}, {transform_indices = @transform_3, window_bounds = array<i64: 64, 256>}]} {
    %c0 = arith.constant 0 : index
    %c0_0 = arith.constant 0 : index
    %0 = vector.load %arg3[%c0, %c0_0] : memref<64x512xbf16, #tpu.memory_space<vmem>>, vector<64x512xbf16>
    %c0_1 = arith.constant 0 : index
    %c0_2 = arith.constant 0 : index
    %1 = vector.load %arg4[%c0_1, %c0_2] : memref<512x256xbf16, #tpu.memory_space<vmem>>, vector<512x256xbf16>
    %cst = arith.constant dense<0.000000e+00> : vector<64x256xf32>
    %2 = tpu.matmul %0, %1, %cst {dimension_numbers = #tpu.dot_dimension_numbers<[1], [0], [0], [1], [0, 0, 1, 1], [], []>} : vector<64x512xbf16>, vector<512x256xbf16>, vector<64x256xf32> -> vector<64x256xf32>
    %c0_3 = arith.constant 0 : index
    %c0_4 = arith.constant 0 : index
    %3 = vector.load %arg5[%c0_3, %c0_4] : memref<1x256xf32, #tpu.memory_space<vmem>>, vector<1x256xf32>
    %4 = vector.broadcast %3 : vector<1x256xf32> to vector<64x256xf32>
    %5 = arith.addf %2, %4 : vector<64x256xf32>
    %cst_5 = arith.constant 0.000000e+00 : f32
    %6 = vector.broadcast %cst_5 : f32 to vector<64x256xf32>
    %7 = arith.maximumf %5, %6 : vector<64x256xf32>
    %8 = arith.truncf %7 : vector<64x256xf32> to vector<64x256xbf16>
    %c0_6 = arith.constant 0 : index
    %c0_7 = arith.constant 0 : index
    %9 = vector.load %arg6[%c0_6, %c0_7] : memref<64x256xbf16, #tpu.memory_space<vmem>>, vector<64x256xbf16>
    tpu.vector_store %arg6[%c0_6, %c0_7], %8 {strides = array<i32>} : memref<64x256xbf16, #tpu.memory_space<vmem>>, vector<64x256xbf16>,
    return
  }
  func.func @transform_0(%arg0: i32, %arg1: i32, %arg2: i32) -> (i32, i32) {
    %c0_i32 = arith.constant 0 : i32
    return %arg0, %arg2 : i32, i32
  }
  func.func @transform_1(%arg0: i32, %arg1: i32, %arg2: i32) -> (i32, i32) {
    %c0_i32 = arith.constant 0 : i32
    return %arg2, %arg1 : i32, i32
  }
  func.func @transform_2(%arg0: i32, %arg1: i32, %arg2: i32) -> (i32, i32) {
    %c0_i32 = arith.constant 0 : i32
    %c0_i32_0 = arith.constant 0 : i32
    return %c0_i32, %arg1 : i32, i32
  }
  func.func @transform_3(%arg0: i32, %arg1: i32, %arg2: i32) -> (i32, i32) {
    %c0_i32 = arith.constant 0 : i32
    return %arg0, %arg1 : i32, i32
  }
}

module attributes {stable_mosaic.version = 11 : i64} {
  func.func @_mm_bias_act_single_kernel(%arg0: i32, %arg1: i32, %arg2: i32, %arg3: memref<16x256xbf16, #tpu.memory_space<vmem>>, %arg4: memref<256x128xbf16, #tpu.memory_space<vmem>>, %arg5: memref<1x128xf32, #tpu.memory_space<vmem>>, %arg6: memref<16x128xf32, #tpu.memory_space<vmem>>) attributes {dimension_semantics = [#tpu.dimension_semantics<parallel>, #tpu.dimension_semantics<parallel>, #tpu.dimension_semantics<arbitrary>], iteration_bounds = array<i64: 11, 1, 1>, scalar_prefetch = 0 : i64, scratch_operands = 0 : i64, tpu.core_type = #tpu.core_type<tc>, window_params = [{transform_indices = @transform_0, window_bounds = array<i64: 16, 256>}, {transform_indices = @transform_1, window_bounds = array<i64: 256, 128>}, {transform_indices = @transform_2, window_bounds = array<i64: 1, 128>}, {transform_indices = @transform_3, window_bounds = array<i64: 16, 128>}]} {
    %c0 = arith.constant 0 : index
    %c0_0 = arith.constant 0 : index
    %0 = vector.load %arg3[%c0, %c0_0] : memref<16x256xbf16, #tpu.memory_space<vmem>>, vector<16x256xbf16>
    %c0_1 = arith.constant 0 : index
    %c0_2 = arith.constant 0 : index
    %1 = vector.load %arg4[%c0_1, %c0_2] : memref<256x128xbf16, #tpu.memory_space<vmem>>, vector<256x128xbf16>
    %cst = arith.constant dense<0.000000e+00> : vector<16x128xf32>
    %2 = tpu.matmul %0, %1, %cst {dimension_numbers = #tpu.dot_dimension_numbers<[1], [0], [0], [1], [0, 0, 1, 1], [], []>} : vector<16x256xbf16>, vector<256x128xbf16>, vector<16x128xf32> -> vector<16x128xf32>
    %c0_3 = arith.constant 0 : index
    %c0_4 = arith.constant 0 : index
    %3 = vector.load %arg5[%c0_3, %c0_4] : memref<1x128xf32, #tpu.memory_space<vmem>>, vector<1x128xf32>
    %4 = vector.broadcast %3 : vector<1x128xf32> to vector<16x128xf32>
    %5 = arith.addf %2, %4 : vector<16x128xf32>
    %6 = math.tanh %5 : vector<16x128xf32>
    %c0_5 = arith.constant 0 : index
    %c0_6 = arith.constant 0 : index
    %7 = vector.load %arg6[%c0_5, %c0_6] : memref<16x128xf32, #tpu.memory_space<vmem>>, vector<16x128xf32>
    tpu.vector_store %arg6[%c0_5, %c0_6], %6 {strides = array<i32>} : memref<16x128xf32, #tpu.memory_space<vmem>>, vector<16x128xf32>,
    return
  }
  func.func @transform_0(%arg0: i32, %arg1: i32, %arg2: i32) -> (i32, i32) {
    %c0_i32 = arith.constant 0 : i32
    return %arg0, %arg2 : i32, i32
  }
  func.func @transform_1(%arg0: i32, %arg1: i32, %arg2: i32) -> (i32, i32) {
    %c0_i32 = arith.constant 0 : i32
    return %arg2, %arg1 : i32, i32
  }
  func.func @transform_2(%arg0: i32, %arg1: i32, %arg2: i32) -> (i32, i32) {
    %c0_i32 = arith.constant 0 : i32
    %c0_i32_0 = arith.constant 0 : i32
    return %c0_i32, %arg1 : i32, i32
  }
  func.func @transform_3(%arg0: i32, %arg1: i32, %arg2: i32) -> (i32, i32) {
    %c0_i32 = arith.constant 0 : i32
    return %arg0, %arg1 : i32, i32
  }
}

</mosaic_0001>

<bundles_post_ra>
// kernel: vqvae_forward.25
= control target key start
LH: loop header
LB: loop body
LE: loop exit
PB: predicated region body
PF: predicated region fallthrough
CT: control target
= control target key end

     0   :  { %8 = vsyncpa [#allocation3], 0  ;;  %s677_s0 = inlined_call_operand.vmem [shape: bf16[128,128], index: 0, kind: input, shape index: {}]   ;;  %s678_s1 = inlined_call_operand.hbm [shape: bf16[128,128], index: 1, kind: input, shape index: {}]   ;;  %s679_s2 = inlined_call_operand.hbm [shape: f32[1,128], index: 2, kind: input, shape index: {}]   ;;  %s680_s3 = inlined_call_operand.vmem [shape: bf16[128,128], index: 3, kind: output, shape index: {}]  }
   0x1   :  { %9 = vsyncpa [#allocation5], 0  ;;  %s599_s12 = smov [#allocation2]  }
   0x2   :  { %s17_s13 = sshll.u32 %s599_s12, 4  ;;  %s18_s13 = int_to_ptr.vmem [resolvable:$true] %s17_s13 }
   0x3   :  { %s563_s14 = scalar_lea.vmem %s18_s13, 1024  ;;  %p568_p1 = scmp.lt.s32.totalorder %s18_s13, %s18_s13 }
   0x4   :  { %p564_p0 = scmp.ne.s32.totalorder %s18_s13, %s563_s14  ;;  %p569_p2 = scmp.lt.s32.totalorder %s563_s14, %s563_s14 }
   0x6   :  { %p570_p3 = por %p569_p2, %p568_p1 }
   0x8   :  { %p571_p4 = pnand %p570_p3, %p564_p0 }
   0xa   :  { %574 = shalt.err (!%p571_p4)
}
   0xb   :  { %s600_s15 = smov 64   ;;  %s601_s16 = smov 4  }
   0xc   :  { %23 = dma.hbm_to_vmem [thread:$0]  %s678_s1, 1024, %s18_s13, [#allocation3], %s600_s15, %s600_s15, %s601_s16  }
   0xd   :  { %s602_s19 = smov [#allocation4]  }
   0xe   :  { %s30_s20 = sshll.u32 %s602_s19, 4  ;;  %s31_s20 = int_to_ptr.vmem [resolvable:$true] %s30_s20 }
   0xf   :  { %s583_s21 = scalar_lea.vmem %s31_s20, 16  ;;  %s587_s22 = scalar_lea.vmem %s31_s20, 32 }
  0x10   :  { %p584_p5 = scmp.ne.s32.totalorder %s31_s20, %s583_s21  ;;  %p588_p6 = scmp.lt.s32.totalorder %s31_s20, %s31_s20 }
  0x11   :  { %p589_p7 = scmp.lt.s32.totalorder %s587_s22, %s583_s21 }
  0x13   :  { %p590_p8 = por %p589_p7, %p588_p6 }
  0x15   :  { %p591_p9 = pnand %p590_p8, %p584_p5 }
  0x17   :  { %594 = shalt.err (!%p591_p9)
}
  0x18   :  { %33 = dma.hbm_to_vmem [thread:$0]  %s679_s2, 16, %s31_s20, [#allocation5]  }
  0x19   :  { %595 = dma.done.wait [#allocation3], 1024  }
  0x1a   :  { %596 = vsyncadd [#allocation3], 4294966272 }
  0x1b   :  { %597 = dma.done.wait [#allocation5], 16  }
  0x1c   :  { %598 = vsyncadd [#allocation5], 4294967280  ;;  %v539_v0 = vld [vmem:[#allocation2 + $0x38] sm:$0xff]   ;;  %v540_v1 = vld [vmem:[#allocation2 + $0x30] sm:$0xff]  }
  0x1d   :  { %487 = vmatprep.subr.bf16.mxu0 %v539_v0  ;;  %519 = vmatprep.subr.bf16.mxu1 %v539_v0  ;;  %v541_v2 = vld [vmem:[#allocation2 + $0x28] sm:$0xff]   ;;  %v542_v3 = vld [vmem:[#allocation2 + $0x20] sm:$0xff]   ;;  %v543_v6 = vld [vmem:[#allocation2 + $0x18] sm:$0xff]  }
  0x1e   :  { %488 = vmatpush3.bf16.msra.mxu0 %v539_v0  ;;  %527 = vmatpush3.bf16.msra.mxu1 %v539_v0  ;;  %v547_v4 = vld [vmem:[%s677_s0] sm:$0xff]   ;;  %v544_v7 = vld [vmem:[#allocation2 + $0x10] sm:$0xff]   ;;  %v545_v8 = vld [vmem:[#allocation2 + $0x8] sm:$0xff]  }
  0x1f   :  { %489 = vmatprep.subr.bf16.mxu0 %v540_v1  ;;  %520 = vmatprep.subr.bf16.mxu1 %v540_v1  ;;  %v548_v5 = vld [vmem:[%s677_s0 + $0x20] sm:$0xff]   ;;  %v549_v10 = vld [vmem:[%s677_s0 + $0x8] sm:$0xff]   ;;  %v551_v12 = vld [vmem:[%s677_s0 + $0x10] sm:$0xff]  }
  0x20   :  { %503 = vmatprep.mubr.bf16.mxu0 %v547_v4  ;;  %511 = vmatprep.mubr.bf16.mxu1 %v548_v5  ;;  %v546_v9 = vld [vmem:[#allocation2] sm:$0xff]   ;;  %v550_v11 = vld [vmem:[%s677_s0 + $0x28] sm:$0xff]   ;;  %v552_v13 = vld [vmem:[%s677_s0 + $0x30] sm:$0xff]  }
  0x21   :  { %v553_v14 = vld [vmem:[%s677_s0 + $0x18] sm:$0xff]   ;;  %v375_v16 = vld [vmem:[#allocation4] ss:$0 sm:$0xff] }
  0x22   :  { %490 = vmatpush3.bf16.msra.mxu0 %v540_v1  ;;  %528 = vmatpush3.bf16.msra.mxu1 %v540_v1  ;;  %v554_v15 = vld [vmem:[%s677_s0 + $0x38] sm:$0xff]  }
  0x23   :  { %491 = vmatprep.subr.bf16.mxu0 %v541_v2  ;;  %521 = vmatprep.subr.bf16.mxu1 %v541_v2 }
  0x26   :  { %492 = vmatpush3.bf16.msra.mxu0 %v541_v2  ;;  %529 = vmatpush3.bf16.msra.mxu1 %v541_v2 }
  0x27   :  { %493 = vmatprep.subr.bf16.mxu0 %v542_v3  ;;  %522 = vmatprep.subr.bf16.mxu1 %v542_v3 }
  0x2a   :  { %494 = vmatpush3.bf16.msra.mxu0 %v542_v3  ;;  %530 = vmatpush3.bf16.msra.mxu1 %v542_v3 }
  0x2b   :  { %495 = vmatprep.subr.bf16.mxu0 %v543_v6  ;;  %523 = vmatprep.subr.bf16.mxu1 %v543_v6 }
  0x2e   :  { %496 = vmatpush3.bf16.msra.mxu0 %v543_v6  ;;  %531 = vmatpush3.bf16.msra.mxu1 %v543_v6 }
  0x2f   :  { %497 = vmatprep.subr.bf16.mxu0 %v544_v7  ;;  %524 = vmatprep.subr.bf16.mxu1 %v544_v7 }
  0x32   :  { %498 = vmatpush3.bf16.msra.mxu0 %v544_v7  ;;  %532 = vmatpush3.bf16.msra.mxu1 %v544_v7 }
  0x33   :  { %499 = vmatprep.subr.bf16.mxu0 %v545_v8  ;;  %525 = vmatprep.subr.bf16.mxu1 %v545_v8 }
  0x36   :  { %500 = vmatpush3.bf16.msra.mxu0 %v545_v8  ;;  %533 = vmatpush3.bf16.msra.mxu1 %v545_v8 }
  0x37   :  { %501 = vmatprep.subr.bf16.mxu0 %v546_v9  ;;  %526 = vmatprep.subr.bf16.mxu1 %v546_v9 }
  0x3a   :  { %502 = vmatpush3.bf16.msra.mxu0 %v546_v9  ;;  %534 = vmatpush3.bf16.msra.mxu1 %v546_v9 }
  0x3d   :  { %504 = vmatmul.mubr.bf16.vlgmr.msra.gmra.mxu0 %v549_v10  ;;  %512 = vmatmul.mubr.bf16.vlgmr.msra.gmra.mxu1 %v550_v11 }
  0x3e   :  { %507 = vmatprep.mubr.bf16.mxu0 %v551_v12  ;;  %515 = vmatprep.mubr.bf16.mxu1 %v552_v13 }
  0x45   :  { %508 = vmatmul.mubr.bf16.gmra.mxu0 %v553_v14  ;;  %516 = vmatmul.mubr.bf16.gmra.mxu1 %v554_v15 }
  0xfd   :  { %v505_v17 = vpop.f32.mrf.mxu0  ;;  %v513_v18 = vpop.f32.mrf.mxu1 }
  0xfe   :  { %v219_v19 = vadd.f32 %v505_v17, %v375_v16  ;;  %v251_v20 = vadd.f32 %v513_v18, %v375_v16 }
  0xff   :  { %v210_v21 = vpop.f32.mrf.mxu0  ;;  %v242_v22 = vpop.f32.mrf.mxu1 }
 0x100   :  { %v211_v23 = vadd.f32 %v375_v16, %v210_v21  ;;  %v243_v24 = vadd.f32 %v375_v16, %v242_v22  ;;  %v275_v29 = vmax.f32 %v219_v19, 0.0  ;;  %v283_v30 = vmax.f32 %v251_v20, 0.0 }
 0x101   :  { %v506_v25 = vpop.f32.mrf.mxu0  ;;  %v514_v26 = vpop.f32.mrf.mxu1 }
 0x102   :  { %v222_v27 = vadd.f32 %v506_v25, %v375_v16  ;;  %v254_v28 = vadd.f32 %v514_v26, %v375_v16  ;;  %v273_v37 = vmax.f32 %v211_v23, 0.0  ;;  %v281_v38 = vmax.f32 %v243_v24, 0.0 }
 0x103   :  { %v213_v31 = vpop.f32.mrf.mxu0  ;;  %v245_v32 = vpop.f32.mrf.mxu1 }
 0x104   :  { %v276_v33 = vmax.f32 %v222_v27, 0.0  ;;  %v284_v34 = vmax.f32 %v254_v28, 0.0  ;;  %v214_v35 = vadd.f32 %v375_v16, %v213_v31  ;;  %v246_v36 = vadd.f32 %v375_v16, %v245_v32 }
 0x105   :  { %v509_v39 = vpop.f32.mrf.mxu0  ;;  %v517_v40 = vpop.f32.mrf.mxu1 }
 0x106   :  { %v432_v41 = vpack.c.bf16 %v276_v33, %v275_v29  ;;  %v452_v42 = vpack.c.bf16 %v284_v34, %v283_v30  ;;  %v274_v43 = vmax.f32 %v214_v35, 0.0  ;;  %v282_v44 = vmax.f32 %v246_v36, 0.0 }
 0x107   :  { %v235_v45 = vadd.f32 %v509_v39, %v375_v16  ;;  %v267_v46 = vadd.f32 %v517_v40, %v375_v16  ;;  %v226_v47 = vpop.f32.mrf.mxu0  ;;  %v258_v48 = vpop.f32.mrf.mxu1 }
 0x108   :  { %464 = vst [vmem:[%s680_s3 + $0x8] sm:$0xff] %v432_v41   ;;  %468 = vst [vmem:[%s680_s3 + $0x28] sm:$0xff] %v452_v42   ;;  %v427_v49 = vpack.c.bf16 %v274_v43, %v273_v37  ;;  %v447_v50 = vpack.c.bf16 %v282_v44, %v281_v38  ;;  %v227_v51 = vadd.f32 %v375_v16, %v226_v47 }
 0x109   :  { %v259_v52 = vadd.f32 %v375_v16, %v258_v48  ;;  %v510_v53 = vpop.f32.mrf.mxu0  ;;  %v518_v54 = vpop.f32.mrf.mxu1  ;;  %v279_v57 = vmax.f32 %v235_v45, 0.0  ;;  %v287_v58 = vmax.f32 %v267_v46, 0.0 }
 0x10a   :  { %428 = vst [vmem:[%s680_s3] sm:$0xff] %v427_v49   ;;  %467 = vst [vmem:[%s680_s3 + $0x20] sm:$0xff] %v447_v50   ;;  %v238_v55 = vadd.f32 %v510_v53, %v375_v16  ;;  %v270_v56 = vadd.f32 %v518_v54, %v375_v16  ;;  %v277_v1 = vmax.f32 %v227_v51, 0.0 }
 0x10b   :  { %v229_v59 = vpop.f32.mrf.mxu0  ;;  %v261_v60 = vpop.f32.mrf.mxu1  ;;  %v285_v2 = vmax.f32 %v259_v52, 0.0 }
 0x10c   :  { %v280_v61 = vmax.f32 %v238_v55, 0.0  ;;  %v288_v62 = vmax.f32 %v270_v56, 0.0  ;;  %v230_v63 = vadd.f32 %v375_v16, %v229_v59  ;;  %v262_v0 = vadd.f32 %v375_v16, %v261_v60 }
 0x10e   :  { %v442_v3 = vpack.c.bf16 %v280_v61, %v279_v57  ;;  %v462_v4 = vpack.c.bf16 %v288_v62, %v287_v58  ;;  %v278_v5 = vmax.f32 %v230_v63, 0.0  ;;  %v286_v6 = vmax.f32 %v262_v0, 0.0 }
 0x110   :  { %466 = vst [vmem:[%s680_s3 + $0x18] sm:$0xff] %v442_v3   ;;  %470 = vst [vmem:[%s680_s3 + $0x38] sm:$0xff] %v462_v4   ;;  %v437_v7 = vpack.c.bf16 %v278_v5, %v277_v1  ;;  %v457_v8 = vpack.c.bf16 %v286_v6, %v285_v2 }
 0x112   :  { %465 = vst [vmem:[%s680_s3 + $0x10] sm:$0xff] %v437_v7   ;;  %469 = vst [vmem:[%s680_s3 + $0x30] sm:$0xff] %v457_v8  }
 0x113   :  { %373 = vsyncpa [#allocation3], 1 }
 0x114   :  { %374 = vsyncpa [#allocation5], 1 }

// kernel: vqvae_forward.26
= control target key start
LH: loop header
LB: loop body
LE: loop exit
PB: predicated region body
PF: predicated region fallthrough
CT: control target
= control target key end

     0   :  { %s1399_s1 = inlined_call_operand.vmem [shape: bf16[1024,128], index: 1, kind: input, shape index: {}]   ;;  %s1400_s0 = inlined_call_operand.vmem [shape: bf16[32,1024], index: 0, kind: input, shape index: {}]   ;;  %s1401_s2 = inlined_call_operand.vmem [shape: f32[1,128], index: 2, kind: input, shape index: {}]   ;;  %s1402_s3 = inlined_call_operand.vmem [shape: bf16[32,128], index: 3, kind: output, shape index: {}]  }
   0x1   :  { %v1066_v0 = vld [vmem:[%s1399_s1 + $0x78] sm:$0xff]   ;;  %v1070_v4 = vld [vmem:[%s1399_s1 + $0x70] sm:$0xff]   ;;  %v1074_v8 = vld [vmem:[%s1399_s1 + $0x68] sm:$0xff]  }
   0x2   :  { %v1067_v1 = vld [vmem:[%s1399_s1 + $0xf8] sm:$0xff]   ;;  %954 = vmatprep.subr.bf16.mxu0 %v1066_v0  ;;  %v1071_v5 = vld [vmem:[%s1399_s1 + $0xf0] sm:$0xff]   ;;  %v1075_v9 = vld [vmem:[%s1399_s1 + $0xe8] sm:$0xff]  }
   0x3   :  { %v1068_v2 = vld [vmem:[%s1399_s1 + $0x38] sm:$0xff]   ;;  %982 = vmatprep.subr.bf16.mxu1 %v1067_v1  ;;  %v1072_v6 = vld [vmem:[%s1399_s1 + $0x30] sm:$0xff]   ;;  %v1076_v10 = vld [vmem:[%s1399_s1 + $0x28] sm:$0xff]  }
   0x4   :  { %v1069_v3 = vld [vmem:[%s1399_s1 + $0xb8] sm:$0xff]   ;;  %955 = vmatpush3.bf16.msra.mxu0 %v1068_v2  ;;  %v1073_v7 = vld [vmem:[%s1399_s1 + $0xb0] sm:$0xff]   ;;  %v1077_v11 = vld [vmem:[%s1399_s1 + $0xa8] sm:$0xff]  }
   0x5   :  { %983 = vmatpush3.bf16.msra.mxu1 %v1069_v3  ;;  %956 = vmatprep.subr.bf16.mxu0 %v1070_v4  ;;  %v1078_v12 = vld [vmem:[%s1399_s1 + $0x60] sm:$0xff]   ;;  %v1082_v16 = vld [vmem:[%s1399_s1 + $0x58] sm:$0xff]   ;;  %v1086_v20 = vld [vmem:[%s1399_s1 + $0x50] sm:$0xff]  }
   0x6   :  { %984 = vmatprep.subr.bf16.mxu1 %v1071_v5  ;;  %v1079_v13 = vld [vmem:[%s1399_s1 + $0xe0] sm:$0xff]   ;;  %v1083_v17 = vld [vmem:[%s1399_s1 + $0xd8] sm:$0xff]   ;;  %v1087_v21 = vld [vmem:[%s1399_s1 + $0xd0] sm:$0xff]  }
   0x7   :  { %v1080_v14 = vld [vmem:[%s1399_s1 + $0x20] sm:$0xff]   ;;  %v1084_v18 = vld [vmem:[%s1399_s1 + $0x18] sm:$0xff]   ;;  %v1088_v22 = vld [vmem:[%s1399_s1 + $0x10] sm:$0xff]  }
   0x8   :  { %957 = vmatpush3.bf16.msra.mxu0 %v1072_v6  ;;  %v1081_v15 = vld [vmem:[%s1399_s1 + $0xa0] sm:$0xff]   ;;  %v1085_v19 = vld [vmem:[%s1399_s1 + $0x98] sm:$0xff]   ;;  %v1089_v23 = vld [vmem:[%s1399_s1 + $0x90] sm:$0xff]  }
   0x9   :  { %985 = vmatpush3.bf16.msra.mxu1 %v1073_v7  ;;  %958 = vmatprep.subr.bf16.mxu0 %v1074_v8  ;;  %v1090_v24 = vld [vmem:[%s1399_s1 + $0x48] sm:$0xff]   ;;  %v1094_v28 = vld [vmem:[%s1399_s1 + $0x40] sm:$0xff]   ;;  %v1098_v40 = vld [vmem:[%s1399_s1 + $0x178] sm:$0xff]  }
   0xa   :  { %986 = vmatprep.subr.bf16.mxu1 %v1075_v9  ;;  %v1091_v25 = vld [vmem:[%s1399_s1 + $0xc8] sm:$0xff]   ;;  %v1095_v29 = vld [vmem:[%s1399_s1 + $0xc0] sm:$0xff]   ;;  %v1099_v41 = vld [vmem:[%s1399_s1 + $0x1f8] sm:$0xff]  }
   0xb   :  { %v1092_v26 = vld [vmem:[%s1399_s1 + $0x8] sm:$0xff]   ;;  %v1096_v30 = vld [vmem:[%s1399_s1] sm:$0xff]   ;;  %v1100_v42 = vld [vmem:[%s1399_s1 + $0x138] sm:$0xff]  }
   0xc   :  { %959 = vmatpush3.bf16.msra.mxu0 %v1076_v10  ;;  %v1093_v27 = vld [vmem:[%s1399_s1 + $0x88] sm:$0xff]   ;;  %v1097_v31 = vld [vmem:[%s1399_s1 + $0x80] sm:$0xff]   ;;  %v1101_v43 = vld [vmem:[%s1399_s1 + $0x1b8] sm:$0xff]  }
   0xd   :  { %987 = vmatpush3.bf16.msra.mxu1 %v1077_v11  ;;  %960 = vmatprep.subr.bf16.mxu0 %v1078_v12  ;;  %v15_v32 = vld [vmem:[%s1400_s0] sm:$0xff]  ;;  %v16_v34 = vld [vmem:[%s1400_s0 + $0x8] sm:$0xff]  ;;  %v1102_v44 = vld [vmem:[%s1399_s1 + $0x170] sm:$0xff]  }
   0xe   :  { %988 = vmatprep.subr.bf16.mxu1 %v1079_v13  ;;  %v19_v33 = vld [vmem:[%s1400_s0 + $0x20] sm:$0xff]  ;;  %v20_v37 = vld [vmem:[%s1400_s0 + $0x28] sm:$0xff]  ;;  %v1103_v45 = vld [vmem:[%s1399_s1 + $0x1f0] sm:$0xff]  }
   0xf   :  { %v855_v35 = vcombine.low %v15_v32, %v19_v33  ;;  %v856_v36 = vcombine.high %v15_v32, %v19_v33  ;;  %v857_v38 = vcombine.low %v16_v34, %v20_v37  ;;  %v858_v39 = vcombine.high %v16_v34, %v20_v37  ;;  %v1104_v46 = vld [vmem:[%s1399_s1 + $0x130] sm:$0xff]   ;;  %v1106_v48 = vld [vmem:[%s1399_s1 + $0x168] sm:$0xff]   ;;  %v1110_v52 = vld [vmem:[%s1399_s1 + $0x160] sm:$0xff]  }
  0x10   :  { %961 = vmatpush3.bf16.msra.mxu0 %v1080_v14  ;;  %v1105_v47 = vld [vmem:[%s1399_s1 + $0x1b0] sm:$0xff]   ;;  %v1107_v49 = vld [vmem:[%s1399_s1 + $0x1e8] sm:$0xff]   ;;  %v1111_v53 = vld [vmem:[%s1399_s1 + $0x1e0] sm:$0xff]  }
  0x11   :  { %989 = vmatpush3.bf16.msra.mxu1 %v1081_v15  ;;  %962 = vmatprep.subr.bf16.mxu0 %v1082_v16  ;;  %v1108_v50 = vld [vmem:[%s1399_s1 + $0x128] sm:$0xff]   ;;  %v1112_v54 = vld [vmem:[%s1399_s1 + $0x120] sm:$0xff]   ;;  %v1114_v56 = vld [vmem:[%s1399_s1 + $0x158] sm:$0xff]  }
  0x12   :  { %990 = vmatprep.subr.bf16.mxu1 %v1083_v17  ;;  %662 = vmatprep.mubr.bf16.mxu0 %v856_v36  ;;  %v1109_v51 = vld [vmem:[%s1399_s1 + $0x1a8] sm:$0xff]   ;;  %v1113_v55 = vld [vmem:[%s1399_s1 + $0x1a0] sm:$0xff]   ;;  %v1115_v57 = vld [vmem:[%s1399_s1 + $0x1d8] sm:$0xff]  }
  0x13   :  { %711 = vmatprep.mubr.bf16.mxu1 %v858_v39  ;;  %v23_v58 = vld [vmem:[%s1400_s0 + $0x40] sm:$0xff]  ;;  %v1116_v61 = vld [vmem:[%s1399_s1 + $0x118] sm:$0xff]   ;;  %v24_v0 = vld [vmem:[%s1400_s0 + $0x48] sm:$0xff] }
  0x14   :  { %963 = vmatpush3.bf16.msra.mxu0 %v1084_v18  ;;  %v27_v59 = vld [vmem:[%s1400_s0 + $0x60] sm:$0xff]  ;;  %v1117_v63 = vld [vmem:[%s1399_s1 + $0x198] sm:$0xff]   ;;  %v28_v1 = vld [vmem:[%s1400_s0 + $0x68] sm:$0xff] }
  0x15   :  { %991 = vmatpush3.bf16.msra.mxu1 %v1085_v19  ;;  %964 = vmatprep.subr.bf16.mxu0 %v1086_v20  ;;  %v864_v60 = vcombine.high %v23_v58, %v27_v59  ;;  %v863_v62 = vcombine.low %v23_v58, %v27_v59  ;;  %v866_v2 = vcombine.high %v24_v0, %v28_v1  ;;  %v1118_v4 = vld [vmem:[%s1399_s1 + $0x150] sm:$0xff]   ;;  %v1122_v8 = vld [vmem:[%s1399_s1 + $0x148] sm:$0xff]   ;;  %v1126_v12 = vld [vmem:[%s1399_s1 + $0x140] sm:$0xff]  }
  0x16   :  { %992 = vmatprep.subr.bf16.mxu1 %v1087_v21  ;;  %v865_v3 = vcombine.low %v24_v0, %v28_v1  ;;  %v1119_v5 = vld [vmem:[%s1399_s1 + $0x1d0] sm:$0xff]   ;;  %v1123_v9 = vld [vmem:[%s1399_s1 + $0x1c8] sm:$0xff]   ;;  %v1127_v13 = vld [vmem:[%s1399_s1 + $0x1c0] sm:$0xff]  }
  0x17   :  { %v1120_v6 = vld [vmem:[%s1399_s1 + $0x110] sm:$0xff]   ;;  %v1124_v10 = vld [vmem:[%s1399_s1 + $0x108] sm:$0xff]   ;;  %v1128_v14 = vld [vmem:[%s1399_s1 + $0x100] sm:$0xff]  }
  0x18   :  { %965 = vmatpush3.bf16.msra.mxu0 %v1088_v22  ;;  %v1121_v7 = vld [vmem:[%s1399_s1 + $0x190] sm:$0xff]   ;;  %v1125_v11 = vld [vmem:[%s1399_s1 + $0x188] sm:$0xff]   ;;  %v1129_v15 = vld [vmem:[%s1399_s1 + $0x180] sm:$0xff]  }
  0x19   :  { %993 = vmatpush3.bf16.msra.mxu1 %v1089_v23  ;;  %966 = vmatprep.subr.bf16.mxu0 %v1090_v24  ;;  %v17_v16 = vld [vmem:[%s1400_s0 + $0x10] sm:$0xff]  ;;  %v18_v18 = vld [vmem:[%s1400_s0 + $0x18] sm:$0xff] }
  0x1a   :  { %994 = vmatprep.subr.bf16.mxu1 %v1091_v25  ;;  %v21_v17 = vld [vmem:[%s1400_s0 + $0x30] sm:$0xff]  ;;  %v22_v19 = vld [vmem:[%s1400_s0 + $0x38] sm:$0xff] }
  0x1b   :  { %v859_v20 = vcombine.low %v17_v16, %v21_v17  ;;  %v860_v21 = vcombine.high %v17_v16, %v21_v17  ;;  %v861_v22 = vcombine.low %v18_v18, %v22_v19  ;;  %v862_v23 = vcombine.high %v18_v18, %v22_v19  ;;  %v25_v24 = vld [vmem:[%s1400_s0 + $0x50] sm:$0xff] }
  0x1c   :  { %967 = vmatpush3.bf16.msra.mxu0 %v1092_v26  ;;  %v29_v25 = vld [vmem:[%s1400_s0 + $0x70] sm:$0xff]  ;;  %v26_v26 = vld [vmem:[%s1400_s0 + $0x58] sm:$0xff] }
  0x1d   :  { %995 = vmatpush3.bf16.msra.mxu1 %v1093_v27  ;;  %968 = vmatprep.subr.bf16.mxu0 %v1094_v28  ;;  %v868_v27 = vcombine.high %v25_v24, %v29_v25  ;;  %v30_v28 = vld [vmem:[%s1400_s0 + $0x78] sm:$0xff] }
  0x1e   :  { %996 = vmatprep.subr.bf16.mxu1 %v1095_v29  ;;  %v870_v29 = vcombine.high %v26_v26, %v30_v28 }
  0x20   :  { %969 = vmatpush3.bf16.msra.mxu0 %v1096_v30  ;;  %v867_v30 = vcombine.low %v25_v24, %v29_v25 }
  0x21   :  { %997 = vmatpush3.bf16.msra.mxu1 %v1097_v31  ;;  %1010 = vmatprep.subr.bf16.mxu0 %v1098_v40  ;;  %v869_v31 = vcombine.low %v26_v26, %v30_v28 }
  0x22   :  { %1038 = vmatprep.subr.bf16.mxu1 %v1099_v41 }
  0x23   :  { %663 = vmatmul.mubr.bf16.vlgmr.msra.gmra.mxu0 %v855_v35 }
  0x24   :  { %712 = vmatmul.mubr.bf16.vlgmr.msra.gmra.mxu1 %v857_v38  ;;  %1011 = vmatpush3.bf16.msra.mxu0 %v1100_v42 }
  0x25   :  { %1039 = vmatpush3.bf16.msra.mxu1 %v1101_v43  ;;  %1012 = vmatprep.subr.bf16.mxu0 %v1102_v44 }
  0x26   :  { %1040 = vmatprep.subr.bf16.mxu1 %v1103_v45  ;;  %670 = vmatprep.mubr.bf16.mxu0 %v864_v60 }
  0x27   :  { %719 = vmatprep.mubr.bf16.mxu1 %v866_v2 }
  0x28   :  { %1013 = vmatpush3.bf16.msra.mxu0 %v1104_v46 }
  0x29   :  { %1041 = vmatpush3.bf16.msra.mxu1 %v1105_v47  ;;  %1014 = vmatprep.subr.bf16.mxu0 %v1106_v48  ;;  %v854_v47 = vld [vmem:[%s1401_s2] ss:$0 sm:$0xff] }
  0x2a   :  { %1042 = vmatprep.subr.bf16.mxu1 %v1107_v49 }
  0x2b   :  { %671 = vmatmul.mubr.bf16.gmra.mxu0 %v863_v62 }
  0x2c   :  { %1015 = vmatpush3.bf16.msra.mxu0 %v1108_v50  ;;  %720 = vmatmul.mubr.bf16.gmra.mxu1 %v865_v3 }
  0x2d   :  { %1043 = vmatpush3.bf16.msra.mxu1 %v1109_v51  ;;  %1016 = vmatprep.subr.bf16.mxu0 %v1110_v52 }
  0x2e   :  { %1044 = vmatprep.subr.bf16.mxu1 %v1111_v53  ;;  %760 = vmatprep.mubr.bf16.mxu0 %v860_v21 }
  0x2f   :  { %809 = vmatprep.mubr.bf16.mxu1 %v862_v23 }
  0x30   :  { %1017 = vmatpush3.bf16.msra.mxu0 %v1112_v54 }
  0x31   :  { %1045 = vmatpush3.bf16.msra.mxu1 %v1113_v55  ;;  %1018 = vmatprep.subr.bf16.mxu0 %v1114_v56 }
  0x32   :  { %1046 = vmatprep.subr.bf16.mxu1 %v1115_v57 }
  0x34   :  { %1019 = vmatpush3.bf16.msra.mxu0 %v1116_v61 }
  0x35   :  { %1047 = vmatpush3.bf16.msra.mxu1 %v1117_v63  ;;  %1020 = vmatprep.subr.bf16.mxu0 %v1118_v4 }
  0x36   :  { %1048 = vmatprep.subr.bf16.mxu1 %v1119_v5 }
  0x38   :  { %1021 = vmatpush3.bf16.msra.mxu0 %v1120_v6 }
  0x39   :  { %1049 = vmatpush3.bf16.msra.mxu1 %v1121_v7  ;;  %1022 = vmatprep.subr.bf16.mxu0 %v1122_v8 }
  0x3a   :  { %1050 = vmatprep.subr.bf16.mxu1 %v1123_v9 }
  0x3c   :  { %1023 = vmatpush3.bf16.msra.mxu0 %v1124_v10 }
  0x3d   :  { %1051 = vmatpush3.bf16.msra.mxu1 %v1125_v11  ;;  %1024 = vmatprep.subr.bf16.mxu0 %v1126_v12 }
  0x3e   :  { %1052 = vmatprep.subr.bf16.mxu1 %v1127_v13 }
  0x40   :  { %1025 = vmatpush3.bf16.msra.mxu0 %v1128_v14 }
  0x41   :  { %1053 = vmatpush3.bf16.msra.mxu1 %v1129_v15 }
  0x43   :  { %761 = vmatmul.mubr.bf16.vlgmr.msra.gmra.mxu0 %v859_v20 }
  0x44   :  { %810 = vmatmul.mubr.bf16.vlgmr.msra.gmra.mxu1 %v861_v22  ;;  %768 = vmatprep.mubr.bf16.mxu0 %v868_v27 }
  0x45   :  { %817 = vmatprep.mubr.bf16.mxu1 %v870_v29 }
  0x4b   :  { %769 = vmatmul.mubr.bf16.gmra.mxu0 %v867_v30 }
  0x4c   :  { %818 = vmatmul.mubr.bf16.gmra.mxu1 %v869_v31 }
  0xe3   :  { %v970_v32 = vpop.f32.mrf.mxu0 }
  0xe4   :  { %v998_v33 = vpop.f32.mrf.mxu1 }
  0xe5   :  { %v971_v34 = vpop.f32.mrf.mxu0 }
  0xe6   :  { %v999_v35 = vpop.f32.mrf.mxu1  ;;  %v972_v46 = vadd.f32 %v971_v34, %v970_v32 }
  0xe7   :  { %v973_v36 = vpop.f32.mrf.mxu0  ;;  %v1000_v51 = vadd.f32 %v999_v35, %v998_v33 }
  0xe8   :  { %v1001_v37 = vpop.f32.mrf.mxu1  ;;  %v665_v50 = vadd.f32 %v972_v46, %v854_v47 }
  0xe9   :  { %v974_v38 = vpop.f32.mrf.mxu0 }
  0xea   :  { %v1002_v39 = vpop.f32.mrf.mxu1  ;;  %v975_v52 = vadd.f32 %v974_v38, %v973_v36  ;;  %v714_v58 = vadd.f32 %v1000_v51, %v665_v50 }
  0xeb   :  { %v976_v40 = vpop.f32.mrf.mxu0  ;;  %v1003_v63 = vadd.f32 %v1002_v39, %v1001_v37 }
  0xec   :  { %v1004_v41 = vpop.f32.mrf.mxu1  ;;  %v668_v59 = vadd.f32 %v975_v52, %v854_v47 }
  0xed   :  { %v977_v42 = vpop.f32.mrf.mxu0 }
  0xee   :  { %v1005_v43 = vpop.f32.mrf.mxu1  ;;  %v978_v55 = vadd.f32 %v977_v42, %v976_v40  ;;  %v717_v5 = vadd.f32 %v1003_v63, %v668_v59 }
  0xef   :  { %v979_v44 = vpop.f32.mrf.mxu0  ;;  %v1006_v2 = vadd.f32 %v1005_v43, %v1004_v41 }
  0xf0   :  { %v1007_v45 = vpop.f32.mrf.mxu1  ;;  %v673_v1 = vadd.f32 %v978_v55, %v854_v47 }
  0xf1   :  { %v980_v48 = vpop.f32.mrf.mxu0 }
  0xf2   :  { %v1008_v49 = vpop.f32.mrf.mxu1  ;;  %v981_v6 = vadd.f32 %v980_v48, %v979_v44  ;;  %v722_v14 = vadd.f32 %v1006_v2, %v673_v1 }
  0xf3   :  { %v1009_v18 = vadd.f32 %v1008_v49, %v1007_v45 }
  0xf4   :  { %v676_v17 = vadd.f32 %v981_v6, %v854_v47 }
  0xf6   :  { %v725_v28 = vadd.f32 %v1009_v18, %v676_v17 }
 0x103   :  { %v1026_v53 = vpop.f32.mrf.mxu0 }
 0x104   :  { %v1054_v54 = vpop.f32.mrf.mxu1 }
 0x105   :  { %v1027_v56 = vpop.f32.mrf.mxu0 }
 0x106   :  { %v1055_v57 = vpop.f32.mrf.mxu1  ;;  %v1028_v60 = vadd.f32 %v1027_v56, %v1026_v53 }
 0x107   :  { %v1029_v61 = vpop.f32.mrf.mxu0  ;;  %v1056_v7 = vadd.f32 %v1055_v57, %v1054_v54 }
 0x108   :  { %v1057_v62 = vpop.f32.mrf.mxu1  ;;  %v763_v0 = vadd.f32 %v1028_v60, %v714_v58 }
 0x109   :  { %v1030_v3 = vpop.f32.mrf.mxu0 }
 0x10a   :  { %v1058_v4 = vpop.f32.mrf.mxu1  ;;  %v1031_v8 = vadd.f32 %v1030_v3, %v1029_v61  ;;  %v812_v11 = vadd.f32 %v1056_v7, %v763_v0 }
 0x10b   :  { %v1032_v9 = vpop.f32.mrf.mxu0  ;;  %v1059_v13 = vadd.f32 %v1058_v4, %v1057_v62 }
 0x10c   :  { %v1060_v10 = vpop.f32.mrf.mxu1  ;;  %v766_v12 = vadd.f32 %v1031_v8, %v717_v5  ;;  %v826_v23 = vmax.f32 %v812_v11, 0.0 }
 0x10d   :  { %v1033_v15 = vpop.f32.mrf.mxu0 }
 0x10e   :  { %v1061_v16 = vpop.f32.mrf.mxu1  ;;  %v815_v19 = vadd.f32 %v1059_v13, %v766_v12  ;;  %v1034_v20 = vadd.f32 %v1033_v15, %v1032_v9 }
 0x10f   :  { %v1035_v21 = vpop.f32.mrf.mxu0  ;;  %v1062_v30 = vadd.f32 %v1061_v16, %v1060_v10 }
 0x110   :  { %v1063_v22 = vpop.f32.mrf.mxu1  ;;  %v827_v24 = vmax.f32 %v815_v19, 0.0  ;;  %v771_v25 = vadd.f32 %v1034_v20, %v722_v14 }
 0x111   :  { %v1036_v26 = vpop.f32.mrf.mxu0 }
 0x112   :  { %v1064_v27 = vpop.f32.mrf.mxu1  ;;  %v946_v29 = vpack.c.bf16 %v827_v24, %v826_v23  ;;  %v1037_v31 = vadd.f32 %v1036_v26, %v1035_v21  ;;  %v820_v32 = vadd.f32 %v1062_v30, %v771_v25 }
 0x113   :  { %v1065_v34 = vadd.f32 %v1064_v27, %v1063_v22 }
 0x114   :  { %947 = vst [vmem:[%s1402_s3] sm:$0xff] %v946_v29   ;;  %v774_v33 = vadd.f32 %v1037_v31, %v725_v28  ;;  %v828_v36 = vmax.f32 %v820_v32, 0.0 }
 0x116   :  { %v823_v35 = vadd.f32 %v1065_v34, %v774_v33 }
 0x118   :  { %v829_v37 = vmax.f32 %v823_v35, 0.0 }
 0x11a   :  { %v951_v38 = vpack.c.bf16 %v829_v37, %v828_v36 }
 0x11c   :  { %953 = vst [vmem:[%s1402_s3 + $0x8] sm:$0xff] %v951_v38  }

// kernel: vqvae_forward.29
= control target key start
LH: loop header
LB: loop body
LE: loop exit
PB: predicated region body
PF: predicated region fallthrough
CT: control target
= control target key end

     0   :  { %s641_s15 = smov 0   ;;  %s879_s0 = inlined_call_operand.vmem [shape: bf16[2,4,256], index: 0, kind: input, shape index: {}]   ;;  %s880_s1 = inlined_call_operand.vmem [shape: f32[1,256], index: 1, kind: input, shape index: {}]   ;;  %s881_s2 = inlined_call_operand.vmem [shape: f32[1,256], index: 2, kind: input, shape index: {}]   ;;  %s882_s3 = inlined_call_operand.vmem [shape: f32[256,256], index: 3, kind: input, shape index: {}]   ;;  %s883_s4 = inlined_call_operand.vmem [shape: bf16[2,4,256], index: 4, kind: output, shape index: {}]  }
   0x1 LB: > { %s581_s16 = sadd.s32 4294967295, %s614_s15   ;;  %p585_p0 = scmp.ge.s32.totalorder %s614_s15, 1  ;;  %s614_s15 = sphi %s641_s15, %s14_s15  }
   0x2   : > { %p162_p1 = scmp.lt.s32.totalorder %s614_s15, 3 }
   0x4   : > { %p163_p2 = pnand %p585_p0, %p162_p1 }
   0x5   : > { %p188_p3 = scmp.lt.s32.totalorder (!%p163_p2), %s581_s16, 1 }
   0x6   : > { %166 = sbr.rel (%p163_p2) target bundleno = 313 (0x139), region = 36 }
   0xb   : > { %v231_v0 = vld [vmem:[%s882_s3 + $0xf8] sm:$0xff]  ;;  %v230_v1 = vld [vmem:[%s882_s3 + $0xf0] sm:$0xff]  ;;  %v229_v2 = vld [vmem:[%s882_s3 + $0xe8] sm:$0xff]  ;;  %s885_s16 = smov (!%p188_p3, %s581_s16), 1  ;;  %vm267_vm0 = vcmask 1043456  }
   0xc   : > { %300 = vmatprep.subr.mxu0 %v231_v0  ;;  %373 = vmatprep.subr.mxu1 %v231_v0  ;;  %v228_v3 = vld [vmem:[%s882_s3 + $0xe0] sm:$0xff]  ;;  %v227_v4 = vld [vmem:[%s882_s3 + $0xd8] sm:$0xff]  ;;  %v226_v5 = vld [vmem:[%s882_s3 + $0xd0] sm:$0xff]  ;;  %s594_s7 = sshll.u32 %s885_s16, 2 }
   0xd   : > { %301 = vmatpush1.msra.mxu0 %v230_v1  ;;  %374 = vmatpush1.msra.mxu1 %v230_v1  ;;  %v225_v6 = vld [vmem:[%s882_s3 + $0xc8] sm:$0xff]  ;;  %v224_v7 = vld [vmem:[%s882_s3 + $0xc0] sm:$0xff]  ;;  %v223_v8 = vld [vmem:[%s882_s3 + $0xb8] sm:$0xff]  ;;  %s192_s18 = scalar_lea.vmem %s879_s0, %s594_s7  ;;  %s197_s13 = scalar_lea.vmem %s883_s4, %s594_s7 }
   0xe   : > { %302 = vmatprep.subr.mxu0 %v229_v2  ;;  %375 = vmatprep.subr.mxu1 %v229_v2  ;;  %v222_v9 = vld [vmem:[%s882_s3 + $0xb0] sm:$0xff]  ;;  %v221_v10 = vld [vmem:[%s882_s3 + $0xa8] sm:$0xff]  ;;  %v220_v11 = vld [vmem:[%s882_s3 + $0xa0] sm:$0xff] }
   0xf   : > { %303 = vmatpush1.msra.mxu0 %v228_v3  ;;  %376 = vmatpush1.msra.mxu1 %v228_v3  ;;  %v219_v12 = vld [vmem:[%s882_s3 + $0x98] sm:$0xff]  ;;  %v218_v13 = vld [vmem:[%s882_s3 + $0x90] sm:$0xff]  ;;  %v217_v14 = vld [vmem:[%s882_s3 + $0x88] sm:$0xff] }
  0x10   : > { %304 = vmatprep.subr.mxu0 %v227_v4  ;;  %377 = vmatprep.subr.mxu1 %v227_v4  ;;  %v216_v15 = vld [vmem:[%s882_s3 + $0x80] sm:$0xff]  ;;  %v215_v16 = vld [vmem:[%s882_s3 + $0x78] sm:$0xff]  ;;  %v214_v17 = vld [vmem:[%s882_s3 + $0x70] sm:$0xff] }
  0x11   : > { %305 = vmatpush1.msra.mxu0 %v226_v5  ;;  %378 = vmatpush1.msra.mxu1 %v226_v5  ;;  %v213_v18 = vld [vmem:[%s882_s3 + $0x68] sm:$0xff]  ;;  %v212_v19 = vld [vmem:[%s882_s3 + $0x60] sm:$0xff]  ;;  %v211_v20 = vld [vmem:[%s882_s3 + $0x58] sm:$0xff] }
  0x12   : > { %306 = vmatprep.subr.mxu0 %v225_v6  ;;  %379 = vmatprep.subr.mxu1 %v225_v6  ;;  %v210_v21 = vld [vmem:[%s882_s3 + $0x50] sm:$0xff]  ;;  %v209_v22 = vld [vmem:[%s882_s3 + $0x48] sm:$0xff]  ;;  %v208_v23 = vld [vmem:[%s882_s3 + $0x40] sm:$0xff] }
  0x13   : > { %307 = vmatpush1.msra.mxu0 %v224_v7  ;;  %380 = vmatpush1.msra.mxu1 %v224_v7  ;;  %v207_v24 = vld [vmem:[%s882_s3 + $0x38] sm:$0xff]  ;;  %v206_v25 = vld [vmem:[%s882_s3 + $0x30] sm:$0xff]  ;;  %v198_v26 = vld [vmem:[%s192_s18] sm:$0xf] }
  0x14   : > { %308 = vmatprep.subr.mxu0 %v223_v8  ;;  %381 = vmatprep.subr.mxu1 %v223_v8  ;;  %v205_v27 = vld [vmem:[%s882_s3 + $0x28] sm:$0xff]  ;;  %v204_v28 = vld [vmem:[%s882_s3 + $0x20] sm:$0xff]  ;;  %v203_v29 = vld [vmem:[%s882_s3 + $0x18] sm:$0xff]  ;;  %v748_v30 = vunpack.c.l.bf16 %v198_v26 }
  0x15   : > { %309 = vmatpush1.msra.mxu0 %v222_v9  ;;  %382 = vmatpush1.msra.mxu1 %v222_v9  ;;  %v202_v31 = vld [vmem:[%s882_s3 + $0x10] sm:$0xff]  ;;  %v201_v32 = vld [vmem:[%s882_s3 + $0x8] sm:$0xff]  ;;  %v200_v33 = vld [vmem:[%s882_s3] sm:$0xff] }
  0x16   : > { %310 = vmatprep.subr.mxu0 %v221_v10  ;;  %383 = vmatprep.subr.mxu1 %v221_v10  ;;  %v263_v34 = vld [vmem:[%s882_s3 + $0x1f8] sm:$0xff]  ;;  %v282_v35 = vmul.f32 %v748_v30, %v748_v30  ;;  %v262_v36 = vld [vmem:[%s882_s3 + $0x1f0] sm:$0xff]  ;;  %v261_v37 = vld [vmem:[%s882_s3 + $0x1e8] sm:$0xff]  ;;  %v265_v39 = vcombine.high %v748_v30, %v748_v30  ;;  %v268_v49 = vsel %vm267_vm0, %v748_v30, 0.0 }
  0x17   : > { %311 = vmatpush1.msra.mxu0 %v220_v11  ;;  %384 = vmatpush1.msra.mxu1 %v220_v11  ;;  %v260_v38 = vld [vmem:[%s882_s3 + $0x1e0] sm:$0xff]  ;;  %v259_v40 = vld [vmem:[%s882_s3 + $0x1d8] sm:$0xff]  ;;  %v258_v42 = vld [vmem:[%s882_s3 + $0x1d0] sm:$0xff]  ;;  %v269_v56 = vrot.slane %v268_v49, 4 }
  0x18   : > { %312 = vmatprep.subr.mxu0 %v219_v12  ;;  %385 = vmatprep.subr.mxu1 %v219_v12  ;;  %v284_v41 = vcombine.high %v282_v35, %v282_v35  ;;  %v257_v43 = vld [vmem:[%s882_s3 + $0x1c8] sm:$0xff]  ;;  %v256_v44 = vld [vmem:[%s882_s3 + $0x1c0] sm:$0xff]  ;;  %v275_v45 = vsel %vm267_vm0, %v265_v39, 0.0  ;;  %v255_v46 = vld [vmem:[%s882_s3 + $0x1b8] sm:$0xff]  ;;  %v286_v50 = vsel %vm267_vm0, %v282_v35, 0.0 }
  0x19   : > { %313 = vmatpush1.msra.mxu0 %v218_v13  ;;  %386 = vmatpush1.msra.mxu1 %v218_v13  ;;  %v254_v48 = vld [vmem:[%s882_s3 + $0x1b0] sm:$0xff]  ;;  %v253_v51 = vld [vmem:[%s882_s3 + $0x1a8] sm:$0xff]  ;;  %v276_v52 = vrot.slane %v275_v45, 4  ;;  %v252_v53 = vld [vmem:[%s882_s3 + $0x1a0] sm:$0xff]  ;;  %v287_v57 = vrot.slane %v286_v50, 4  ;;  %v270_v0 = vadd.f32 %v269_v56, %v268_v49  ;;  %v452_v49 = vlaneseq }
  0x1a   : > { %314 = vmatprep.subr.mxu0 %v217_v14  ;;  %387 = vmatprep.subr.mxu1 %v217_v14  ;;  %v293_v47 = vsel %vm267_vm0, %v284_v41, 0.0  ;;  %v251_v55 = vld [vmem:[%s882_s3 + $0x198] sm:$0xff]  ;;  %v250_v58 = vld [vmem:[%s882_s3 + $0x190] sm:$0xff]  ;;  %v249_v59 = vld [vmem:[%s882_s3 + $0x188] sm:$0xff] }
  0x1b   : > { %315 = vmatpush1.msra.mxu0 %v216_v15  ;;  %388 = vmatpush1.msra.mxu1 %v216_v15  ;;  %v294_v54 = vrot.slane %v293_v47, 4  ;;  %v277_v60 = vadd.f32 %v276_v52, %v275_v45  ;;  %v248_v61 = vld [vmem:[%s882_s3 + $0x180] sm:$0xff]  ;;  %v247_v63 = vld [vmem:[%s882_s3 + $0x178] sm:$0xff]  ;;  %v288_v1 = vadd.f32 %v287_v57, %v286_v50  ;;  %v246_v2 = vld [vmem:[%s882_s3 + $0x170] sm:$0xff]  ;;  %v271_v8 = vrot.slane %v270_v0, 2 }
  0x1c   : > { %316 = vmatprep.subr.mxu0 %v215_v16  ;;  %389 = vmatprep.subr.mxu1 %v215_v16  ;;  %v245_v3 = vld [vmem:[%s882_s3 + $0x168] sm:$0xff]  ;;  %v244_v5 = vld [vmem:[%s882_s3 + $0x160] sm:$0xff]  ;;  %v243_v7 = vld [vmem:[%s882_s3 + $0x158] sm:$0xff] }
  0x1d   : > { %317 = vmatpush1.msra.mxu0 %v214_v17  ;;  %390 = vmatpush1.msra.mxu1 %v214_v17  ;;  %v295_v62 = vadd.f32 %v294_v54, %v293_v47  ;;  %v278_v4 = vrot.slane %v277_v60, 2  ;;  %v289_v9 = vrot.slane %v288_v1, 2  ;;  %v242_v10 = vld [vmem:[%s882_s3 + $0x150] sm:$0xff]  ;;  %v241_v11 = vld [vmem:[%s882_s3 + $0x148] sm:$0xff]  ;;  %v240_v13 = vld [vmem:[%s882_s3 + $0x140] sm:$0xff]  ;;  %v272_v16 = vadd.f32 %v271_v8, %v270_v0 }
  0x1e   : > { %318 = vmatprep.subr.mxu0 %v213_v18  ;;  %391 = vmatprep.subr.mxu1 %v213_v18  ;;  %v239_v15 = vld [vmem:[%s882_s3 + $0x138] sm:$0xff]  ;;  %v238_v18 = vld [vmem:[%s882_s3 + $0x130] sm:$0xff] }
  0x1f   : > { %319 = vmatpush1.msra.mxu0 %v212_v19  ;;  %392 = vmatpush1.msra.mxu1 %v212_v19  ;;  %v296_v6 = vrot.slane %v295_v62, 2  ;;  %v279_v12 = vadd.f32 %v278_v4, %v277_v60  ;;  %v290_v17 = vadd.f32 %v289_v9, %v288_v1  ;;  %v237_v19 = vld [vmem:[%s882_s3 + $0x128] sm:$0xff]  ;;  %v234_v26 = vld [vmem:[%s882_s3 + $0x110] sm:$0xff] }
  0x20   : > { %320 = vmatprep.subr.mxu0 %v211_v20  ;;  %393 = vmatprep.subr.mxu1 %v211_v20 }
  0x21   : > { %321 = vmatpush1.msra.mxu0 %v210_v21  ;;  %394 = vmatpush1.msra.mxu1 %v210_v21  ;;  %v297_v14 = vadd.f32 %v296_v6, %v295_v62  ;;  %v280_v20 = vrot.slane %v279_v12, 1  ;;  %v236_v21 = vld [vmem:[%s882_s3 + $0x120] sm:$0xff] }
  0x22   : > { %322 = vmatprep.subr.mxu0 %v209_v22  ;;  %395 = vmatprep.subr.mxu1 %v209_v22 }
  0x23   : > { %323 = vmatpush1.msra.mxu0 %v208_v23  ;;  %396 = vmatpush1.msra.mxu1 %v208_v23  ;;  %v298_v22 = vrot.slane %v297_v14, 1  ;;  %v235_v23 = vld [vmem:[%s882_s3 + $0x118] sm:$0xff] }
  0x24   : > { %324 = vmatprep.subr.mxu0 %v207_v24  ;;  %397 = vmatprep.subr.mxu1 %v207_v24  ;;  %v273_v24 = vrot.slane %v272_v16, 1 }
  0x25   : > { %325 = vmatpush1.msra.mxu0 %v206_v25  ;;  %398 = vmatpush1.msra.mxu1 %v206_v25  ;;  %v291_v25 = vrot.slane %v290_v17, 1 }
  0x26   : > { %326 = vmatprep.subr.mxu0 %v205_v27  ;;  %399 = vmatprep.subr.mxu1 %v205_v27  ;;  %v233_v27 = vld [vmem:[%s882_s3 + $0x108] sm:$0xff] }
  0x27   : > { %327 = vmatpush1.msra.mxu0 %v204_v28  ;;  %400 = vmatpush1.msra.mxu1 %v204_v28  ;;  %v281_v28 = vadd.f32 %v280_v20, %v279_v12 }
  0x28   : > { %328 = vmatprep.subr.mxu0 %v203_v29  ;;  %401 = vmatprep.subr.mxu1 %v203_v29  ;;  %v232_v29 = vld [vmem:[%s882_s3 + $0x100] sm:$0xff] }
  0x29   : > { %329 = vmatpush1.msra.mxu0 %v202_v31  ;;  %402 = vmatpush1.msra.mxu1 %v202_v31  ;;  %v299_v31 = vadd.f32 %v298_v22, %v297_v14 }
  0x2a   : > { %330 = vmatprep.subr.mxu0 %v201_v32  ;;  %403 = vmatprep.subr.mxu1 %v201_v32  ;;  %v274_v32 = vadd.f32 %v273_v24, %v272_v16 }
  0x2b   : > { %331 = vmatpush1.msra.mxu0 %v200_v33  ;;  %404 = vmatpush1.msra.mxu1 %v200_v33  ;;  %v292_v33 = vadd.f32 %v291_v25, %v290_v17 }
  0x2c   : > { %332 = vmatprep.subr.mxu0 %v263_v34  ;;  %405 = vmatprep.subr.mxu1 %v263_v34 }
  0x2d   : > { %333 = vmatpush2.msra.mxu0 %v262_v36  ;;  %406 = vmatpush2.msra.mxu1 %v262_v36 }
  0x2e   : > { %334 = vmatprep.subr.mxu0 %v261_v37  ;;  %407 = vmatprep.subr.mxu1 %v261_v37 }
  0x2f   : > { %335 = vmatpush2.msra.mxu0 %v260_v38  ;;  %408 = vmatpush2.msra.mxu1 %v260_v38 }
  0x30   : > { %336 = vmatprep.subr.mxu0 %v259_v40  ;;  %409 = vmatprep.subr.mxu1 %v259_v40 }
  0x31   : > { %337 = vmatpush2.msra.mxu0 %v258_v42  ;;  %410 = vmatpush2.msra.mxu1 %v258_v42 }
  0x32   : > { %338 = vmatprep.subr.mxu0 %v257_v43  ;;  %411 = vmatprep.subr.mxu1 %v257_v43 }
  0x33   : > { %339 = vmatpush2.msra.mxu0 %v256_v44  ;;  %412 = vmatpush2.msra.mxu1 %v256_v44 }
  0x34   : > { %340 = vmatprep.subr.mxu0 %v255_v46  ;;  %413 = vmatprep.subr.mxu1 %v255_v46 }
  0x35   : > { %341 = vmatpush2.msra.mxu0 %v254_v48  ;;  %414 = vmatpush2.msra.mxu1 %v254_v48 }
  0x36   : > { %342 = vmatprep.subr.mxu0 %v253_v51  ;;  %415 = vmatprep.subr.mxu1 %v253_v51  ;;  %v453_v51 = vshrl.u32 %v452_v49, 7 }
  0x37   : > { %343 = vmatpush2.msra.mxu0 %v252_v53  ;;  %416 = vmatpush2.msra.mxu1 %v252_v53 }
  0x38   : > { %344 = vmatprep.subr.mxu0 %v251_v55  ;;  %417 = vmatprep.subr.mxu1 %v251_v55  ;;  %v454_v52 = vsub.s32 0, %v453_v51  ;;  %v490_v53 = vsub.s32 1, %v453_v51  ;;  %v482_v55 = vld [vmem:[%s880_s1] sm:$0x3] }
  0x39   : > { %345 = vmatpush2.msra.mxu0 %v250_v58  ;;  %418 = vmatpush2.msra.mxu1 %v250_v58  ;;  %v495_v58 = vld [vmem:[%s881_s2] sm:$0x3] }
  0x3a   : > { %346 = vmatprep.subr.mxu0 %v249_v59  ;;  %419 = vmatprep.subr.mxu1 %v249_v59  ;;  %v491_v59 = vrot.slane %v482_v55, %v490_v53  ;;  %v504_v0 = vrot.slane %v495_v58, %v490_v53 }
  0x3b   : > { %347 = vmatpush2.msra.mxu0 %v248_v61  ;;  %420 = vmatpush2.msra.mxu1 %v248_v61  ;;  %v487_v61 = vrot.slane %v482_v55, %v454_v52 }
  0x3c   : > { %348 = vmatprep.subr.mxu0 %v247_v63  ;;  %421 = vmatprep.subr.mxu1 %v247_v63  ;;  %v500_v63 = vrot.slane %v495_v58, %v454_v52 }
  0x3d   : > { %349 = vmatpush2.msra.mxu0 %v246_v2  ;;  %422 = vmatpush2.msra.mxu1 %v246_v2 }
  0x3e   : > { %350 = vmatprep.subr.mxu0 %v245_v3  ;;  %423 = vmatprep.subr.mxu1 %v245_v3 }
  0x3f   : > { %351 = vmatpush2.msra.mxu0 %v244_v5  ;;  %424 = vmatpush2.msra.mxu1 %v244_v5  ;;  %v492_v5 = vcombine.low %v487_v61, %v491_v59 }
  0x40   : > { %352 = vmatprep.subr.mxu0 %v243_v7  ;;  %425 = vmatprep.subr.mxu1 %v243_v7  ;;  %v505_v7 = vcombine.low %v500_v63, %v504_v0 }
  0x41   : > { %353 = vmatpush2.msra.mxu0 %v242_v10  ;;  %426 = vmatpush2.msra.mxu1 %v242_v10 }
  0x42   : > { %354 = vmatprep.subr.mxu0 %v241_v11  ;;  %427 = vmatprep.subr.mxu1 %v241_v11 }
  0x43   : > { %355 = vmatpush2.msra.mxu0 %v240_v13  ;;  %428 = vmatpush2.msra.mxu1 %v240_v13 }
  0x44   : > { %356 = vmatprep.subr.mxu0 %v239_v15  ;;  %429 = vmatprep.subr.mxu1 %v239_v15 }
  0x45   : > { %357 = vmatpush2.msra.mxu0 %v238_v18  ;;  %430 = vmatpush2.msra.mxu1 %v238_v18 }
  0x46   : > { %358 = vmatprep.subr.mxu0 %v237_v19  ;;  %431 = vmatprep.subr.mxu1 %v237_v19 }
  0x47   : > { %359 = vmatpush2.msra.mxu0 %v236_v21  ;;  %432 = vmatpush2.msra.mxu1 %v236_v21 }
  0x48   : > { %360 = vmatprep.subr.mxu0 %v235_v23  ;;  %433 = vmatprep.subr.mxu1 %v235_v23 }
  0x49   : > { %361 = vmatpush2.msra.mxu0 %v234_v26  ;;  %434 = vmatpush2.msra.mxu1 %v234_v26 }
  0x4a   : > { %362 = vmatprep.subr.mxu0 %v233_v27  ;;  %435 = vmatprep.subr.mxu1 %v233_v27 }
  0x4b   : > { %363 = vmatpush2.msra.mxu0 %v232_v29  ;;  %364 = vmatprep.mubr.f32.mxu0 %v281_v28 }
  0x4c   : > { %436 = vmatpush2.msra.mxu1 %v232_v29  ;;  %437 = vmatprep.mubr.f32.mxu1 %v299_v31 }
  0x4d   : > { %365 = vmatmul.mubr.f32.vlgmr.msra.gmra.mxu0 %v274_v32  ;;  %438 = vmatmul.mubr.f32.vlgmr.msra.gmra.mxu1 %v292_v33 }
 0x10d   : > { %v366_v34 = vpop.f32.mrf.mxu0  ;;  %v439_v35 = vpop.f32.mrf.mxu1 }
 0x10e   : > { %v371_v36 = vmul.f32 0.0078125, %v366_v34  ;;  %v444_v37 = vmul.f32 0.0078125, %v439_v35 }
 0x10f   : > { %v368_v38 = vpop.f32.mrf.mxu0  ;;  %v441_v39 = vpop.f32.mrf.mxu1 }
 0x110   : > { %v446_v40 = vmul.f32 %v371_v36, %v371_v36  ;;  %v372_v41 = vmul.f32 0.0078125, %v368_v38  ;;  %v445_v44 = vmul.f32 0.0078125, %v441_v39  ;;  %v455_v56 = vrot.slane %v371_v36, %v454_v52 }
 0x112   : > { %v448_v42 = vsub.f32 %v444_v37, %v446_v40  ;;  %v447_v43 = vmul.f32 %v372_v41, %v372_v41  ;;  %v459_v54 = vrot.slane %v372_v41, %v454_v52 }
 0x114   : > { %v450_v45 = vmax.f32 %v448_v42, 0.0  ;;  %v449_v46 = vsub.f32 %v445_v44, %v447_v43  ;;  %v462_v60 = vcombine.low %v455_v56, %v459_v54 }
 0x116   : > { %v465_v47 = vadd.f32 1e-05, %v450_v45  ;;  %v451_v48 = vmax.f32 %v449_v46, 0.0  ;;  %v464_v3 = vsub.f32 %v748_v30, %v462_v60 }
 0x118   : > { %604 = vrsqrt.f32 %v465_v47  ;;  %v466_v50 = vadd.f32 1e-05, %v451_v48 }
 0x11a   : > { %606 = vrsqrt.f32 %v466_v50 }
 0x125   : > { %v605_v57 = vpop.eup %604 }
 0x126   : > { %v472_v1 = vrot.slane %v605_v57, %v454_v52 }
 0x127   : > { %v607_v62 = vpop.eup %606 }
 0x128   : > { %v476_v2 = vrot.slane %v607_v62, %v454_v52 }
 0x12a   : > { %v479_v4 = vcombine.low %v472_v1, %v476_v2 }
 0x12c   : > { %v481_v6 = vmul.f32 %v479_v4, %v464_v3 }
 0x12e   : > { %v494_v8 = vmul.f32 %v492_v5, %v481_v6 }
 0x130   : > { %v507_v9 = vadd.f32 %v505_v7, %v494_v8 }
 0x132   : > { %v508_v10 = vmax.f32 %v507_v9, 0.0 }
 0x134   : > { %v510_v11 = vcombine.high %v508_v10, %v508_v10 }
 0x136   : > { %v590_v12 = vpack.c.bf16 %v510_v11, %v508_v10 }
 0x138   : > { %591 = vst.sshfl [vmem:[%s197_s13] sm:$0x33 pattern:$0x76325410] %v590_v12 }
 0x139 PF: > { %s14_s15 = sadd.s32 1, %s614_s15  }
 0x13a   : > { %p11_p4 = scmp.ge.s32.totalorder %s14_s15, 4  }
 0x13c   :  { %13 = sbr.rel (!%p11_p4) target bundleno = 1 (0x1), region = 66 }

// kernel: vqvae_forward.31
= control target key start
LH: loop header
LB: loop body
LE: loop exit
PB: predicated region body
PF: predicated region fallthrough
CT: control target
= control target key end

     0   :  { %s711_s18 = smov 0   ;;  %s950_s0 = inlined_call_operand.vmem [shape: bf16[2,4,256], index: 0, kind: input, shape index: {}]   ;;  %s951_s1 = inlined_call_operand.vmem [shape: f32[1,256], index: 1, kind: input, shape index: {}]   ;;  %s952_s2 = inlined_call_operand.vmem [shape: f32[1,256], index: 2, kind: input, shape index: {}]   ;;  %s953_s3 = inlined_call_operand.vmem [shape: f32[256,256], index: 3, kind: input, shape index: {}]   ;;  %s954_s4 = inlined_call_operand.vmem [shape: bf16[2,4,256], index: 4, kind: input, shape index: {}]   ;;  %s955_s5 = inlined_call_operand.vmem [shape: bf16[2,4,256], index: 5, kind: output, shape index: {}]  }
   0x1 LB: > { %s643_s19 = sadd.s32 4294967295, %s679_s18   ;;  %p647_p0 = scmp.ge.s32.totalorder %s679_s18, 1  ;;  %s679_s18 = sphi %s711_s18, %s15_s18  }
   0x2   : > { %p197_p1 = scmp.lt.s32.totalorder %s679_s18, 3 }
   0x4   : > { %p198_p2 = pnand %p647_p0, %p197_p1 }
   0x5   : > { %p230_p3 = scmp.lt.s32.totalorder (!%p198_p2), %s643_s19, 1 }
   0x6   : > { %201 = sbr.rel (%p198_p2) target bundleno = 315 (0x13b), region = 40 }
   0xb   : > { %v278_v0 = vld [vmem:[%s953_s3 + $0xf8] sm:$0xff]  ;;  %v277_v1 = vld [vmem:[%s953_s3 + $0xf0] sm:$0xff]  ;;  %v276_v2 = vld [vmem:[%s953_s3 + $0xe8] sm:$0xff]  ;;  %s957_s19 = smov (!%p230_p3, %s643_s19), 1  ;;  %vm314_vm0 = vcmask 1043456  }
   0xc   : > { %347 = vmatprep.subr.mxu0 %v278_v0  ;;  %420 = vmatprep.subr.mxu1 %v278_v0  ;;  %v275_v3 = vld [vmem:[%s953_s3 + $0xe0] sm:$0xff]  ;;  %v274_v4 = vld [vmem:[%s953_s3 + $0xd8] sm:$0xff]  ;;  %v273_v5 = vld [vmem:[%s953_s3 + $0xd0] sm:$0xff]  ;;  %s783_s12 = sshll.u32 %s957_s19, 2 }
   0xd   : > { %348 = vmatpush1.msra.mxu0 %v277_v1  ;;  %421 = vmatpush1.msra.mxu1 %v277_v1  ;;  %v272_v6 = vld [vmem:[%s953_s3 + $0xc8] sm:$0xff]  ;;  %v271_v7 = vld [vmem:[%s953_s3 + $0xc0] sm:$0xff]  ;;  %v270_v8 = vld [vmem:[%s953_s3 + $0xb8] sm:$0xff]  ;;  %s234_s22 = scalar_lea.vmem %s950_s0, %s783_s12  ;;  %s239_s20 = scalar_lea.vmem %s954_s4, %s783_s12 }
   0xe   : > { %349 = vmatprep.subr.mxu0 %v276_v2  ;;  %422 = vmatprep.subr.mxu1 %v276_v2  ;;  %v269_v9 = vld [vmem:[%s953_s3 + $0xb0] sm:$0xff]  ;;  %v268_v10 = vld [vmem:[%s953_s3 + $0xa8] sm:$0xff]  ;;  %v267_v11 = vld [vmem:[%s953_s3 + $0xa0] sm:$0xff] }
   0xf   : > { %350 = vmatpush1.msra.mxu0 %v275_v3  ;;  %423 = vmatpush1.msra.mxu1 %v275_v3  ;;  %v266_v12 = vld [vmem:[%s953_s3 + $0x98] sm:$0xff]  ;;  %v265_v13 = vld [vmem:[%s953_s3 + $0x90] sm:$0xff]  ;;  %v264_v14 = vld [vmem:[%s953_s3 + $0x88] sm:$0xff] }
  0x10   : > { %351 = vmatprep.subr.mxu0 %v274_v4  ;;  %424 = vmatprep.subr.mxu1 %v274_v4  ;;  %v263_v15 = vld [vmem:[%s953_s3 + $0x80] sm:$0xff]  ;;  %v262_v16 = vld [vmem:[%s953_s3 + $0x78] sm:$0xff]  ;;  %v261_v17 = vld [vmem:[%s953_s3 + $0x70] sm:$0xff] }
  0x11   : > { %352 = vmatpush1.msra.mxu0 %v273_v5  ;;  %425 = vmatpush1.msra.mxu1 %v273_v5  ;;  %v260_v18 = vld [vmem:[%s953_s3 + $0x68] sm:$0xff]  ;;  %v259_v19 = vld [vmem:[%s953_s3 + $0x60] sm:$0xff]  ;;  %v258_v20 = vld [vmem:[%s953_s3 + $0x58] sm:$0xff] }
  0x12   : > { %353 = vmatprep.subr.mxu0 %v272_v6  ;;  %426 = vmatprep.subr.mxu1 %v272_v6  ;;  %v257_v21 = vld [vmem:[%s953_s3 + $0x50] sm:$0xff]  ;;  %v256_v22 = vld [vmem:[%s953_s3 + $0x48] sm:$0xff]  ;;  %v255_v23 = vld [vmem:[%s953_s3 + $0x40] sm:$0xff] }
  0x13   : > { %354 = vmatpush1.msra.mxu0 %v271_v7  ;;  %427 = vmatpush1.msra.mxu1 %v271_v7  ;;  %v254_v24 = vld [vmem:[%s953_s3 + $0x38] sm:$0xff]  ;;  %v253_v25 = vld [vmem:[%s953_s3 + $0x30] sm:$0xff]  ;;  %v245_v26 = vld [vmem:[%s234_s22] sm:$0xf]  ;;  %s244_s22 = scalar_lea.vmem %s955_s5, %s783_s12 }
  0x14   : > { %355 = vmatprep.subr.mxu0 %v270_v8  ;;  %428 = vmatprep.subr.mxu1 %v270_v8  ;;  %v252_v27 = vld [vmem:[%s953_s3 + $0x28] sm:$0xff]  ;;  %v251_v28 = vld [vmem:[%s953_s3 + $0x20] sm:$0xff]  ;;  %v250_v29 = vld [vmem:[%s953_s3 + $0x18] sm:$0xff]  ;;  %v816_v30 = vunpack.c.l.bf16 %v245_v26 }
  0x15   : > { %356 = vmatpush1.msra.mxu0 %v269_v9  ;;  %429 = vmatpush1.msra.mxu1 %v269_v9  ;;  %v249_v31 = vld [vmem:[%s953_s3 + $0x10] sm:$0xff]  ;;  %v248_v32 = vld [vmem:[%s953_s3 + $0x8] sm:$0xff]  ;;  %v247_v33 = vld [vmem:[%s953_s3] sm:$0xff] }
  0x16   : > { %357 = vmatprep.subr.mxu0 %v268_v10  ;;  %430 = vmatprep.subr.mxu1 %v268_v10  ;;  %v310_v34 = vld [vmem:[%s953_s3 + $0x1f8] sm:$0xff]  ;;  %v329_v35 = vmul.f32 %v816_v30, %v816_v30  ;;  %v309_v36 = vld [vmem:[%s953_s3 + $0x1f0] sm:$0xff]  ;;  %v308_v37 = vld [vmem:[%s953_s3 + $0x1e8] sm:$0xff]  ;;  %v312_v39 = vcombine.high %v816_v30, %v816_v30  ;;  %v315_v49 = vsel %vm314_vm0, %v816_v30, 0.0 }
  0x17   : > { %358 = vmatpush1.msra.mxu0 %v267_v11  ;;  %431 = vmatpush1.msra.mxu1 %v267_v11  ;;  %v307_v38 = vld [vmem:[%s953_s3 + $0x1e0] sm:$0xff]  ;;  %v306_v40 = vld [vmem:[%s953_s3 + $0x1d8] sm:$0xff]  ;;  %v305_v42 = vld [vmem:[%s953_s3 + $0x1d0] sm:$0xff]  ;;  %v316_v56 = vrot.slane %v315_v49, 4 }
  0x18   : > { %359 = vmatprep.subr.mxu0 %v266_v12  ;;  %432 = vmatprep.subr.mxu1 %v266_v12  ;;  %v331_v41 = vcombine.high %v329_v35, %v329_v35  ;;  %v304_v43 = vld [vmem:[%s953_s3 + $0x1c8] sm:$0xff]  ;;  %v303_v44 = vld [vmem:[%s953_s3 + $0x1c0] sm:$0xff]  ;;  %v322_v45 = vsel %vm314_vm0, %v312_v39, 0.0  ;;  %v302_v46 = vld [vmem:[%s953_s3 + $0x1b8] sm:$0xff]  ;;  %v333_v50 = vsel %vm314_vm0, %v329_v35, 0.0 }
  0x19   : > { %360 = vmatpush1.msra.mxu0 %v265_v13  ;;  %433 = vmatpush1.msra.mxu1 %v265_v13  ;;  %v301_v48 = vld [vmem:[%s953_s3 + $0x1b0] sm:$0xff]  ;;  %v300_v51 = vld [vmem:[%s953_s3 + $0x1a8] sm:$0xff]  ;;  %v323_v52 = vrot.slane %v322_v45, 4  ;;  %v299_v53 = vld [vmem:[%s953_s3 + $0x1a0] sm:$0xff]  ;;  %v334_v57 = vrot.slane %v333_v50, 4  ;;  %v317_v0 = vadd.f32 %v316_v56, %v315_v49  ;;  %v499_v49 = vlaneseq }
  0x1a   : > { %361 = vmatprep.subr.mxu0 %v264_v14  ;;  %434 = vmatprep.subr.mxu1 %v264_v14  ;;  %v340_v47 = vsel %vm314_vm0, %v331_v41, 0.0  ;;  %v298_v55 = vld [vmem:[%s953_s3 + $0x198] sm:$0xff]  ;;  %v297_v58 = vld [vmem:[%s953_s3 + $0x190] sm:$0xff]  ;;  %v296_v59 = vld [vmem:[%s953_s3 + $0x188] sm:$0xff] }
  0x1b   : > { %362 = vmatpush1.msra.mxu0 %v263_v15  ;;  %435 = vmatpush1.msra.mxu1 %v263_v15  ;;  %v341_v54 = vrot.slane %v340_v47, 4  ;;  %v324_v60 = vadd.f32 %v323_v52, %v322_v45  ;;  %v295_v61 = vld [vmem:[%s953_s3 + $0x180] sm:$0xff]  ;;  %v294_v63 = vld [vmem:[%s953_s3 + $0x178] sm:$0xff]  ;;  %v335_v1 = vadd.f32 %v334_v57, %v333_v50  ;;  %v293_v2 = vld [vmem:[%s953_s3 + $0x170] sm:$0xff]  ;;  %v318_v8 = vrot.slane %v317_v0, 2 }
  0x1c   : > { %363 = vmatprep.subr.mxu0 %v262_v16  ;;  %436 = vmatprep.subr.mxu1 %v262_v16  ;;  %v292_v3 = vld [vmem:[%s953_s3 + $0x168] sm:$0xff]  ;;  %v291_v5 = vld [vmem:[%s953_s3 + $0x160] sm:$0xff]  ;;  %v290_v7 = vld [vmem:[%s953_s3 + $0x158] sm:$0xff] }
  0x1d   : > { %364 = vmatpush1.msra.mxu0 %v261_v17  ;;  %437 = vmatpush1.msra.mxu1 %v261_v17  ;;  %v342_v62 = vadd.f32 %v341_v54, %v340_v47  ;;  %v325_v4 = vrot.slane %v324_v60, 2  ;;  %v336_v9 = vrot.slane %v335_v1, 2  ;;  %v289_v10 = vld [vmem:[%s953_s3 + $0x150] sm:$0xff]  ;;  %v288_v11 = vld [vmem:[%s953_s3 + $0x148] sm:$0xff]  ;;  %v287_v13 = vld [vmem:[%s953_s3 + $0x140] sm:$0xff]  ;;  %v319_v16 = vadd.f32 %v318_v8, %v317_v0 }
  0x1e   : > { %365 = vmatprep.subr.mxu0 %v260_v18  ;;  %438 = vmatprep.subr.mxu1 %v260_v18  ;;  %v286_v15 = vld [vmem:[%s953_s3 + $0x138] sm:$0xff]  ;;  %v285_v18 = vld [vmem:[%s953_s3 + $0x130] sm:$0xff] }
  0x1f   : > { %366 = vmatpush1.msra.mxu0 %v259_v19  ;;  %439 = vmatpush1.msra.mxu1 %v259_v19  ;;  %v343_v6 = vrot.slane %v342_v62, 2  ;;  %v326_v12 = vadd.f32 %v325_v4, %v324_v60  ;;  %v337_v17 = vadd.f32 %v336_v9, %v335_v1  ;;  %v284_v19 = vld [vmem:[%s953_s3 + $0x128] sm:$0xff]  ;;  %v281_v26 = vld [vmem:[%s953_s3 + $0x110] sm:$0xff] }
  0x20   : > { %367 = vmatprep.subr.mxu0 %v258_v20  ;;  %440 = vmatprep.subr.mxu1 %v258_v20 }
  0x21   : > { %368 = vmatpush1.msra.mxu0 %v257_v21  ;;  %441 = vmatpush1.msra.mxu1 %v257_v21  ;;  %v344_v14 = vadd.f32 %v343_v6, %v342_v62  ;;  %v327_v20 = vrot.slane %v326_v12, 1  ;;  %v283_v21 = vld [vmem:[%s953_s3 + $0x120] sm:$0xff] }
  0x22   : > { %369 = vmatprep.subr.mxu0 %v256_v22  ;;  %442 = vmatprep.subr.mxu1 %v256_v22  ;;  %v555_v6 = vld [vmem:[%s239_s20] sm:$0xf] }
  0x23   : > { %370 = vmatpush1.msra.mxu0 %v255_v23  ;;  %443 = vmatpush1.msra.mxu1 %v255_v23  ;;  %v345_v22 = vrot.slane %v344_v14, 1  ;;  %v282_v23 = vld [vmem:[%s953_s3 + $0x118] sm:$0xff]  ;;  %v556_v9 = vunpack.c.l.bf16 %v555_v6 }
  0x24   : > { %371 = vmatprep.subr.mxu0 %v254_v24  ;;  %444 = vmatprep.subr.mxu1 %v254_v24  ;;  %v320_v24 = vrot.slane %v319_v16, 1 }
  0x25   : > { %372 = vmatpush1.msra.mxu0 %v253_v25  ;;  %445 = vmatpush1.msra.mxu1 %v253_v25  ;;  %v338_v25 = vrot.slane %v337_v17, 1 }
  0x26   : > { %373 = vmatprep.subr.mxu0 %v252_v27  ;;  %446 = vmatprep.subr.mxu1 %v252_v27  ;;  %v280_v27 = vld [vmem:[%s953_s3 + $0x108] sm:$0xff] }
  0x27   : > { %374 = vmatpush1.msra.mxu0 %v251_v28  ;;  %447 = vmatpush1.msra.mxu1 %v251_v28  ;;  %v328_v28 = vadd.f32 %v327_v20, %v326_v12 }
  0x28   : > { %375 = vmatprep.subr.mxu0 %v250_v29  ;;  %448 = vmatprep.subr.mxu1 %v250_v29  ;;  %v279_v29 = vld [vmem:[%s953_s3 + $0x100] sm:$0xff] }
  0x29   : > { %376 = vmatpush1.msra.mxu0 %v249_v31  ;;  %449 = vmatpush1.msra.mxu1 %v249_v31  ;;  %v346_v31 = vadd.f32 %v345_v22, %v344_v14 }
  0x2a   : > { %377 = vmatprep.subr.mxu0 %v248_v32  ;;  %450 = vmatprep.subr.mxu1 %v248_v32  ;;  %v321_v32 = vadd.f32 %v320_v24, %v319_v16 }
  0x2b   : > { %378 = vmatpush1.msra.mxu0 %v247_v33  ;;  %451 = vmatpush1.msra.mxu1 %v247_v33  ;;  %v339_v33 = vadd.f32 %v338_v25, %v337_v17 }
  0x2c   : > { %379 = vmatprep.subr.mxu0 %v310_v34  ;;  %452 = vmatprep.subr.mxu1 %v310_v34 }
  0x2d   : > { %380 = vmatpush2.msra.mxu0 %v309_v36  ;;  %453 = vmatpush2.msra.mxu1 %v309_v36 }
  0x2e   : > { %381 = vmatprep.subr.mxu0 %v308_v37  ;;  %454 = vmatprep.subr.mxu1 %v308_v37 }
  0x2f   : > { %382 = vmatpush2.msra.mxu0 %v307_v38  ;;  %455 = vmatpush2.msra.mxu1 %v307_v38 }
  0x30   : > { %383 = vmatprep.subr.mxu0 %v306_v40  ;;  %456 = vmatprep.subr.mxu1 %v306_v40 }
  0x31   : > { %384 = vmatpush2.msra.mxu0 %v305_v42  ;;  %457 = vmatpush2.msra.mxu1 %v305_v42 }
  0x32   : > { %385 = vmatprep.subr.mxu0 %v304_v43  ;;  %458 = vmatprep.subr.mxu1 %v304_v43 }
  0x33   : > { %386 = vmatpush2.msra.mxu0 %v303_v44  ;;  %459 = vmatpush2.msra.mxu1 %v303_v44 }
  0x34   : > { %387 = vmatprep.subr.mxu0 %v302_v46  ;;  %460 = vmatprep.subr.mxu1 %v302_v46 }
  0x35   : > { %388 = vmatpush2.msra.mxu0 %v301_v48  ;;  %461 = vmatpush2.msra.mxu1 %v301_v48 }
  0x36   : > { %389 = vmatprep.subr.mxu0 %v300_v51  ;;  %462 = vmatprep.subr.mxu1 %v300_v51  ;;  %v500_v51 = vshrl.u32 %v499_v49, 7 }
  0x37   : > { %390 = vmatpush2.msra.mxu0 %v299_v53  ;;  %463 = vmatpush2.msra.mxu1 %v299_v53 }
  0x38   : > { %391 = vmatprep.subr.mxu0 %v298_v55  ;;  %464 = vmatprep.subr.mxu1 %v298_v55  ;;  %v501_v52 = vsub.s32 0, %v500_v51  ;;  %v537_v53 = vsub.s32 1, %v500_v51  ;;  %v529_v55 = vld [vmem:[%s951_s1] sm:$0x3] }
  0x39   : > { %392 = vmatpush2.msra.mxu0 %v297_v58  ;;  %465 = vmatpush2.msra.mxu1 %v297_v58  ;;  %v542_v58 = vld [vmem:[%s952_s2] sm:$0x3] }
  0x3a   : > { %393 = vmatprep.subr.mxu0 %v296_v59  ;;  %466 = vmatprep.subr.mxu1 %v296_v59  ;;  %v538_v59 = vrot.slane %v529_v55, %v537_v53  ;;  %v551_v0 = vrot.slane %v542_v58, %v537_v53 }
  0x3b   : > { %394 = vmatpush2.msra.mxu0 %v295_v61  ;;  %467 = vmatpush2.msra.mxu1 %v295_v61  ;;  %v534_v61 = vrot.slane %v529_v55, %v501_v52 }
  0x3c   : > { %395 = vmatprep.subr.mxu0 %v294_v63  ;;  %468 = vmatprep.subr.mxu1 %v294_v63  ;;  %v547_v63 = vrot.slane %v542_v58, %v501_v52 }
  0x3d   : > { %396 = vmatpush2.msra.mxu0 %v293_v2  ;;  %469 = vmatpush2.msra.mxu1 %v293_v2 }
  0x3e   : > { %397 = vmatprep.subr.mxu0 %v292_v3  ;;  %470 = vmatprep.subr.mxu1 %v292_v3  ;;  %v552_v8 = vcombine.low %v547_v63, %v551_v0 }
  0x3f   : > { %398 = vmatpush2.msra.mxu0 %v291_v5  ;;  %471 = vmatpush2.msra.mxu1 %v291_v5  ;;  %v539_v5 = vcombine.low %v534_v61, %v538_v59 }
  0x40   : > { %399 = vmatprep.subr.mxu0 %v290_v7  ;;  %472 = vmatprep.subr.mxu1 %v290_v7 }
  0x41   : > { %400 = vmatpush2.msra.mxu0 %v289_v10  ;;  %473 = vmatpush2.msra.mxu1 %v289_v10 }
  0x42   : > { %401 = vmatprep.subr.mxu0 %v288_v11  ;;  %474 = vmatprep.subr.mxu1 %v288_v11 }
  0x43   : > { %402 = vmatpush2.msra.mxu0 %v287_v13  ;;  %475 = vmatpush2.msra.mxu1 %v287_v13 }
  0x44   : > { %403 = vmatprep.subr.mxu0 %v286_v15  ;;  %476 = vmatprep.subr.mxu1 %v286_v15 }
  0x45   : > { %404 = vmatpush2.msra.mxu0 %v285_v18  ;;  %477 = vmatpush2.msra.mxu1 %v285_v18 }
  0x46   : > { %405 = vmatprep.subr.mxu0 %v284_v19  ;;  %478 = vmatprep.subr.mxu1 %v284_v19 }
  0x47   : > { %406 = vmatpush2.msra.mxu0 %v283_v21  ;;  %479 = vmatpush2.msra.mxu1 %v283_v21 }
  0x48   : > { %407 = vmatprep.subr.mxu0 %v282_v23  ;;  %480 = vmatprep.subr.mxu1 %v282_v23 }
  0x49   : > { %408 = vmatpush2.msra.mxu0 %v281_v26  ;;  %481 = vmatpush2.msra.mxu1 %v281_v26 }
  0x4a   : > { %409 = vmatprep.subr.mxu0 %v280_v27  ;;  %482 = vmatprep.subr.mxu1 %v280_v27 }
  0x4b   : > { %410 = vmatpush2.msra.mxu0 %v279_v29  ;;  %411 = vmatprep.mubr.f32.mxu0 %v328_v28 }
  0x4c   : > { %483 = vmatpush2.msra.mxu1 %v279_v29  ;;  %484 = vmatprep.mubr.f32.mxu1 %v346_v31 }
  0x4d   : > { %412 = vmatmul.mubr.f32.vlgmr.msra.gmra.mxu0 %v321_v32  ;;  %485 = vmatmul.mubr.f32.vlgmr.msra.gmra.mxu1 %v339_v33 }
 0x10d   : > { %v413_v34 = vpop.f32.mrf.mxu0  ;;  %v486_v35 = vpop.f32.mrf.mxu1 }
 0x10e   : > { %v418_v36 = vmul.f32 0.0078125, %v413_v34  ;;  %v491_v37 = vmul.f32 0.0078125, %v486_v35 }
 0x10f   : > { %v415_v38 = vpop.f32.mrf.mxu0  ;;  %v488_v39 = vpop.f32.mrf.mxu1 }
 0x110   : > { %v493_v40 = vmul.f32 %v418_v36, %v418_v36  ;;  %v419_v41 = vmul.f32 0.0078125, %v415_v38  ;;  %v492_v44 = vmul.f32 0.0078125, %v488_v39  ;;  %v502_v56 = vrot.slane %v418_v36, %v501_v52 }
 0x112   : > { %v495_v42 = vsub.f32 %v491_v37, %v493_v40  ;;  %v494_v43 = vmul.f32 %v419_v41, %v419_v41  ;;  %v506_v54 = vrot.slane %v419_v41, %v501_v52 }
 0x114   : > { %v497_v45 = vmax.f32 %v495_v42, 0.0  ;;  %v496_v46 = vsub.f32 %v492_v44, %v494_v43  ;;  %v509_v60 = vcombine.low %v502_v56, %v506_v54 }
 0x116   : > { %v512_v47 = vadd.f32 1e-05, %v497_v45  ;;  %v498_v48 = vmax.f32 %v496_v46, 0.0  ;;  %v511_v3 = vsub.f32 %v816_v30, %v509_v60 }
 0x118   : > { %669 = vrsqrt.f32 %v512_v47  ;;  %v513_v50 = vadd.f32 1e-05, %v498_v48 }
 0x11a   : > { %671 = vrsqrt.f32 %v513_v50 }
 0x125   : > { %v670_v57 = vpop.eup %669 }
 0x126   : > { %v519_v1 = vrot.slane %v670_v57, %v501_v52 }
 0x127   : > { %v672_v62 = vpop.eup %671 }
 0x128   : > { %v523_v2 = vrot.slane %v672_v62, %v501_v52 }
 0x12a   : > { %v526_v4 = vcombine.low %v519_v1, %v523_v2 }
 0x12c   : > { %v528_v7 = vmul.f32 %v526_v4, %v511_v3 }
 0x12e   : > { %v541_v10 = vmul.f32 %v539_v5, %v528_v7 }
 0x130   : > { %v554_v11 = vadd.f32 %v552_v8, %v541_v10 }
 0x132   : > { %v557_v12 = vadd.f32 %v556_v9, %v554_v11 }
 0x134   : > { %v558_v13 = vmax.f32 %v557_v12, 0.0 }
 0x136   : > { %v560_v14 = vcombine.high %v558_v13, %v558_v13 }
 0x138   : > { %v654_v15 = vpack.c.bf16 %v560_v14, %v558_v13 }
 0x13a   : > { %655 = vst.sshfl [vmem:[%s244_s22] sm:$0x33 pattern:$0x76325410] %v654_v15 }
 0x13b PF: > { %s15_s18 = sadd.s32 1, %s679_s18  }
 0x13c   : > { %p12_p4 = scmp.ge.s32.totalorder %s15_s18, 4  }
 0x13e   :  { %14 = sbr.rel (!%p12_p4) target bundleno = 1 (0x1), region = 73 }

// kernel: vqvae_forward.27
= control target key start
LH: loop header
LB: loop body
LE: loop exit
PB: predicated region body
PF: predicated region fallthrough
CT: control target
= control target key end

     0   :  { %s3577_s1 = inlined_call_operand.vmem [shape: bf16[2048,256], index: 1, kind: input, shape index: {}]   ;;  %s3578_s0 = inlined_call_operand.vmem [shape: bf16[16,2048], index: 0, kind: input, shape index: {}]   ;;  %s3579_s2 = inlined_call_operand.vmem [shape: f32[1,256], index: 2, kind: input, shape index: {}]   ;;  %s3580_s3 = inlined_call_operand.vmem [shape: bf16[16,256], index: 3, kind: output, shape index: {}]  }
   0x1   :  { %v2300_v0 = vld [vmem:[%s3577_s1 + $0x74] ss:$8 sps:$4 sm:$0xff]   ;;  %v2304_v2 = vld [vmem:[%s3577_s1 + $0x70] ss:$8 sps:$4 sm:$0xff]   ;;  %v2306_v4 = vld [vmem:[%s3577_s1 + $0x64] ss:$8 sps:$4 sm:$0xff]  }
   0x2   :  { %v2302_v1 = vld [vmem:[%s3577_s1 + $0x174] ss:$8 sps:$4 sm:$0xff]   ;;  %1658 = vmatprep.subr.bf16.mxu0 %v2300_v0  ;;  %v2305_v3 = vld [vmem:[%s3577_s1 + $0x170] ss:$8 sps:$4 sm:$0xff]   ;;  %v2308_v5 = vld [vmem:[%s3577_s1 + $0x164] ss:$8 sps:$4 sm:$0xff]  }
   0x3   :  { %1701 = vmatprep.subr.bf16.mxu1 %v2302_v1  ;;  %1659 = vmatpush1.bf16.msra.mxu0 %v2304_v2  ;;  %v2310_v6 = vld [vmem:[%s3577_s1 + $0x60] ss:$8 sps:$4 sm:$0xff]   ;;  %v2312_v8 = vld [vmem:[%s3577_s1 + $0x54] ss:$8 sps:$4 sm:$0xff]   ;;  %v2316_v10 = vld [vmem:[%s3577_s1 + $0x50] ss:$8 sps:$4 sm:$0xff]  }
   0x4   :  { %1702 = vmatpush1.bf16.msra.mxu1 %v2305_v3  ;;  %1660 = vmatprep.subr.bf16.mxu0 %v2306_v4  ;;  %v2311_v7 = vld [vmem:[%s3577_s1 + $0x160] ss:$8 sps:$4 sm:$0xff]   ;;  %v2314_v9 = vld [vmem:[%s3577_s1 + $0x154] ss:$8 sps:$4 sm:$0xff]   ;;  %v2317_v11 = vld [vmem:[%s3577_s1 + $0x150] ss:$8 sps:$4 sm:$0xff]  }
   0x5   :  { %1703 = vmatprep.subr.bf16.mxu1 %v2308_v5  ;;  %v2318_v12 = vld [vmem:[%s3577_s1 + $0x44] ss:$8 sps:$4 sm:$0xff]   ;;  %v2322_v14 = vld [vmem:[%s3577_s1 + $0x40] ss:$8 sps:$4 sm:$0xff]   ;;  %v2324_v16 = vld [vmem:[%s3577_s1 + $0x34] ss:$8 sps:$4 sm:$0xff]  }
   0x6   :  { %v2320_v13 = vld [vmem:[%s3577_s1 + $0x144] ss:$8 sps:$4 sm:$0xff]   ;;  %v2323_v15 = vld [vmem:[%s3577_s1 + $0x140] ss:$8 sps:$4 sm:$0xff]   ;;  %v2326_v17 = vld [vmem:[%s3577_s1 + $0x134] ss:$8 sps:$4 sm:$0xff]  }
   0x7   :  { %1661 = vmatpush1.bf16.msra.mxu0 %v2310_v6  ;;  %v2328_v18 = vld [vmem:[%s3577_s1 + $0x30] ss:$8 sps:$4 sm:$0xff]   ;;  %v2330_v20 = vld [vmem:[%s3577_s1 + $0x24] ss:$8 sps:$4 sm:$0xff]   ;;  %v2334_v22 = vld [vmem:[%s3577_s1 + $0x20] ss:$8 sps:$4 sm:$0xff]  }
   0x8   :  { %1704 = vmatpush1.bf16.msra.mxu1 %v2311_v7  ;;  %1662 = vmatprep.subr.bf16.mxu0 %v2312_v8  ;;  %v2329_v19 = vld [vmem:[%s3577_s1 + $0x130] ss:$8 sps:$4 sm:$0xff]   ;;  %v2332_v21 = vld [vmem:[%s3577_s1 + $0x124] ss:$8 sps:$4 sm:$0xff]   ;;  %v2335_v23 = vld [vmem:[%s3577_s1 + $0x120] ss:$8 sps:$4 sm:$0xff]  }
   0x9   :  { %1705 = vmatprep.subr.bf16.mxu1 %v2314_v9  ;;  %v2336_v24 = vld [vmem:[%s3577_s1 + $0x14] ss:$8 sps:$4 sm:$0xff]   ;;  %v2340_v26 = vld [vmem:[%s3577_s1 + $0x10] ss:$8 sps:$4 sm:$0xff]   ;;  %v2342_v28 = vld [vmem:[%s3577_s1 + $0x4] ss:$8 sps:$4 sm:$0xff]  }
   0xa   :  { %v2338_v25 = vld [vmem:[%s3577_s1 + $0x114] ss:$8 sps:$4 sm:$0xff]   ;;  %v2341_v27 = vld [vmem:[%s3577_s1 + $0x110] ss:$8 sps:$4 sm:$0xff]   ;;  %v2344_v29 = vld [vmem:[%s3577_s1 + $0x104] ss:$8 sps:$4 sm:$0xff]  }
   0xb   :  { %1663 = vmatpush1.bf16.msra.mxu0 %v2316_v10  ;;  %v2346_v30 = vld [vmem:[%s3577_s1] ss:$8 sps:$4 sm:$0xff]   ;;  %v2348_v32 = vld [vmem:[%s3577_s1 + $0xf4] ss:$8 sps:$4 sm:$0xff]   ;;  %v2352_v34 = vld [vmem:[%s3577_s1 + $0xf0] ss:$8 sps:$4 sm:$0xff]  }
   0xc   :  { %1706 = vmatpush1.bf16.msra.mxu1 %v2317_v11  ;;  %1664 = vmatprep.subr.bf16.mxu0 %v2318_v12  ;;  %v2347_v31 = vld [vmem:[%s3577_s1 + $0x100] ss:$8 sps:$4 sm:$0xff]   ;;  %v2350_v33 = vld [vmem:[%s3577_s1 + $0x1f4] ss:$8 sps:$4 sm:$0xff]   ;;  %v2353_v35 = vld [vmem:[%s3577_s1 + $0x1f0] ss:$8 sps:$4 sm:$0xff]  }
   0xd   :  { %1707 = vmatprep.subr.bf16.mxu1 %v2320_v13  ;;  %v2354_v36 = vld [vmem:[%s3577_s1 + $0xe4] ss:$8 sps:$4 sm:$0xff]   ;;  %v2358_v38 = vld [vmem:[%s3577_s1 + $0xe0] ss:$8 sps:$4 sm:$0xff]   ;;  %v2360_v40 = vld [vmem:[%s3577_s1 + $0xd4] ss:$8 sps:$4 sm:$0xff]  }
   0xe   :  { %v2356_v37 = vld [vmem:[%s3577_s1 + $0x1e4] ss:$8 sps:$4 sm:$0xff]   ;;  %v2359_v39 = vld [vmem:[%s3577_s1 + $0x1e0] ss:$8 sps:$4 sm:$0xff]   ;;  %v2362_v41 = vld [vmem:[%s3577_s1 + $0x1d4] ss:$8 sps:$4 sm:$0xff]  }
   0xf   :  { %1665 = vmatpush1.bf16.msra.mxu0 %v2322_v14  ;;  %v2364_v42 = vld [vmem:[%s3577_s1 + $0xd0] ss:$8 sps:$4 sm:$0xff]   ;;  %v2366_v44 = vld [vmem:[%s3577_s1 + $0xc4] ss:$8 sps:$4 sm:$0xff]   ;;  %v2370_v46 = vld [vmem:[%s3577_s1 + $0xc0] ss:$8 sps:$4 sm:$0xff]  }
  0x10   :  { %1708 = vmatpush1.bf16.msra.mxu1 %v2323_v15  ;;  %1666 = vmatprep.subr.bf16.mxu0 %v2324_v16  ;;  %v2365_v43 = vld [vmem:[%s3577_s1 + $0x1d0] ss:$8 sps:$4 sm:$0xff]   ;;  %v2368_v45 = vld [vmem:[%s3577_s1 + $0x1c4] ss:$8 sps:$4 sm:$0xff]   ;;  %v2371_v47 = vld [vmem:[%s3577_s1 + $0x1c0] ss:$8 sps:$4 sm:$0xff]  }
  0x11   :  { %1709 = vmatprep.subr.bf16.mxu1 %v2326_v17  ;;  %v14_v48 = vld [vmem:[%s3578_s0] sm:$0xff]  ;;  %v15_v50 = vld [vmem:[%s3578_s0 + $0x8] sm:$0xff]  ;;  %v2372_v52 = vld [vmem:[%s3577_s1 + $0xb4] ss:$8 sps:$4 sm:$0xff]  }
  0x12   :  { %v22_v49 = vld [vmem:[%s3578_s0 + $0x40] sm:$0xff]  ;;  %v23_v51 = vld [vmem:[%s3578_s0 + $0x48] sm:$0xff]  ;;  %v2374_v54 = vld [vmem:[%s3577_s1 + $0x1b4] ss:$8 sps:$4 sm:$0xff]  }
  0x13   :  { %1667 = vmatpush1.bf16.msra.mxu0 %v2328_v18  ;;  %v2025_v53 = vcombine.high %v14_v48, %v22_v49  ;;  %v2027_v55 = vcombine.high %v15_v50, %v23_v51  ;;  %v2376_v56 = vld [vmem:[%s3577_s1 + $0xb0] ss:$8 sps:$4 sm:$0xff]   ;;  %v2378_v58 = vld [vmem:[%s3577_s1 + $0xa4] ss:$8 sps:$4 sm:$0xff]   ;;  %v2382_v60 = vld [vmem:[%s3577_s1 + $0xa0] ss:$8 sps:$4 sm:$0xff]   ;;  %v2024_v8 = vcombine.low %v14_v48, %v22_v49  ;;  %v2026_v9 = vcombine.low %v15_v50, %v23_v51 }
  0x14   :  { %1710 = vmatpush1.bf16.msra.mxu1 %v2329_v19  ;;  %1668 = vmatprep.subr.bf16.mxu0 %v2330_v20  ;;  %v2377_v57 = vld [vmem:[%s3577_s1 + $0x1b0] ss:$8 sps:$4 sm:$0xff]   ;;  %v2380_v59 = vld [vmem:[%s3577_s1 + $0x1a4] ss:$8 sps:$4 sm:$0xff]   ;;  %v2383_v61 = vld [vmem:[%s3577_s1 + $0x1a0] ss:$8 sps:$4 sm:$0xff]  }
  0x15   :  { %1711 = vmatprep.subr.bf16.mxu1 %v2332_v21  ;;  %1690 = vmatprep.mubr.bf16.mxu0 %v2025_v53  ;;  %v2384_v62 = vld [vmem:[%s3577_s1 + $0x94] ss:$8 sps:$4 sm:$0xff]   ;;  %v2388_v0 = vld [vmem:[%s3577_s1 + $0x90] ss:$8 sps:$4 sm:$0xff]   ;;  %v2390_v2 = vld [vmem:[%s3577_s1 + $0x84] ss:$8 sps:$4 sm:$0xff]  }
  0x16   :  { %1733 = vmatprep.mubr.bf16.mxu1 %v2027_v55  ;;  %v2386_v63 = vld [vmem:[%s3577_s1 + $0x194] ss:$8 sps:$4 sm:$0xff]   ;;  %v2389_v1 = vld [vmem:[%s3577_s1 + $0x190] ss:$8 sps:$4 sm:$0xff]   ;;  %v2392_v3 = vld [vmem:[%s3577_s1 + $0x184] ss:$8 sps:$4 sm:$0xff]  }
  0x17   :  { %1669 = vmatpush1.bf16.msra.mxu0 %v2334_v22  ;;  %v2394_v4 = vld [vmem:[%s3577_s1 + $0x80] ss:$8 sps:$4 sm:$0xff]   ;;  %v2398_v6 = vld [vmem:[%s3577_s1 + $0x274] ss:$8 sps:$4 sm:$0xff]   ;;  %v2396_v10 = vld [vmem:[%s3577_s1 + $0x270] ss:$8 sps:$4 sm:$0xff]  }
  0x18   :  { %1712 = vmatpush1.bf16.msra.mxu1 %v2335_v23  ;;  %1670 = vmatprep.subr.bf16.mxu0 %v2336_v24  ;;  %v2395_v5 = vld [vmem:[%s3577_s1 + $0x180] ss:$8 sps:$4 sm:$0xff]   ;;  %v2401_v7 = vld [vmem:[%s3577_s1 + $0x374] ss:$8 sps:$4 sm:$0xff]   ;;  %v2399_v11 = vld [vmem:[%s3577_s1 + $0x370] ss:$8 sps:$4 sm:$0xff]  }
  0x19   :  { %1713 = vmatprep.subr.bf16.mxu1 %v2338_v25  ;;  %v2404_v12 = vld [vmem:[%s3577_s1 + $0x264] ss:$8 sps:$4 sm:$0xff]   ;;  %v2402_v14 = vld [vmem:[%s3577_s1 + $0x260] ss:$8 sps:$4 sm:$0xff]   ;;  %v2410_v16 = vld [vmem:[%s3577_s1 + $0x254] ss:$8 sps:$4 sm:$0xff]  }
  0x1a   :  { %v2407_v13 = vld [vmem:[%s3577_s1 + $0x364] ss:$8 sps:$4 sm:$0xff]   ;;  %v2405_v15 = vld [vmem:[%s3577_s1 + $0x360] ss:$8 sps:$4 sm:$0xff]   ;;  %v2413_v17 = vld [vmem:[%s3577_s1 + $0x354] ss:$8 sps:$4 sm:$0xff]  }
  0x1b   :  { %1671 = vmatpush1.bf16.msra.mxu0 %v2340_v26  ;;  %v2408_v18 = vld [vmem:[%s3577_s1 + $0x250] ss:$8 sps:$4 sm:$0xff]   ;;  %v2416_v20 = vld [vmem:[%s3577_s1 + $0x244] ss:$8 sps:$4 sm:$0xff]   ;;  %v2414_v22 = vld [vmem:[%s3577_s1 + $0x240] ss:$8 sps:$4 sm:$0xff]  }
  0x1c   :  { %1714 = vmatpush1.bf16.msra.mxu1 %v2341_v27  ;;  %1672 = vmatprep.subr.bf16.mxu0 %v2342_v28  ;;  %v2411_v19 = vld [vmem:[%s3577_s1 + $0x350] ss:$8 sps:$4 sm:$0xff]   ;;  %v2419_v21 = vld [vmem:[%s3577_s1 + $0x344] ss:$8 sps:$4 sm:$0xff]   ;;  %v2417_v23 = vld [vmem:[%s3577_s1 + $0x340] ss:$8 sps:$4 sm:$0xff]  }
  0x1d   :  { %1715 = vmatprep.subr.bf16.mxu1 %v2344_v29  ;;  %v2422_v24 = vld [vmem:[%s3577_s1 + $0x234] ss:$8 sps:$4 sm:$0xff]   ;;  %v2420_v26 = vld [vmem:[%s3577_s1 + $0x230] ss:$8 sps:$4 sm:$0xff]   ;;  %v2428_v28 = vld [vmem:[%s3577_s1 + $0x224] ss:$8 sps:$4 sm:$0xff]  }
  0x1e   :  { %v2425_v25 = vld [vmem:[%s3577_s1 + $0x334] ss:$8 sps:$4 sm:$0xff]   ;;  %v2423_v27 = vld [vmem:[%s3577_s1 + $0x330] ss:$8 sps:$4 sm:$0xff]   ;;  %v2431_v29 = vld [vmem:[%s3577_s1 + $0x324] ss:$8 sps:$4 sm:$0xff]  }
  0x1f   :  { %1673 = vmatpush1.bf16.msra.mxu0 %v2346_v30  ;;  %v2426_v30 = vld [vmem:[%s3577_s1 + $0x220] ss:$8 sps:$4 sm:$0xff]   ;;  %v2444_v48 = vld [vmem:[%s3577_s1 + $0x2f0] ss:$8 sps:$4 sm:$0xff]   ;;  %v2452_v50 = vld [vmem:[%s3577_s1 + $0x2e4] ss:$8 sps:$4 sm:$0xff]  }
  0x20   :  { %1716 = vmatpush1.bf16.msra.mxu1 %v2347_v31  ;;  %1674 = vmatprep.subr.bf16.mxu0 %v2348_v32  ;;  %v2429_v31 = vld [vmem:[%s3577_s1 + $0x320] ss:$8 sps:$4 sm:$0xff]   ;;  %v2434_v32 = vld [vmem:[%s3577_s1 + $0x214] ss:$8 sps:$4 sm:$0xff]   ;;  %v2447_v49 = vld [vmem:[%s3577_s1 + $0x3f0] ss:$8 sps:$4 sm:$0xff]  }
  0x21   :  { %1717 = vmatprep.subr.bf16.mxu1 %v2350_v33  ;;  %v2437_v33 = vld [vmem:[%s3577_s1 + $0x314] ss:$8 sps:$4 sm:$0xff]   ;;  %v2455_v51 = vld [vmem:[%s3577_s1 + $0x3e4] ss:$8 sps:$4 sm:$0xff]   ;;  %v2453_v53 = vld [vmem:[%s3577_s1 + $0x3e0] ss:$8 sps:$4 sm:$0xff]  }
  0x22   :  { %v2461_v55 = vld [vmem:[%s3577_s1 + $0x3d4] ss:$8 sps:$4 sm:$0xff]  }
  0x23   :  { %1675 = vmatpush2.bf16.msra.mxu0 %v2352_v34  ;;  %v2432_v34 = vld [vmem:[%s3577_s1 + $0x210] ss:$8 sps:$4 sm:$0xff]  }
  0x24   :  { %1718 = vmatpush2.bf16.msra.mxu1 %v2353_v35  ;;  %1676 = vmatprep.subr.bf16.mxu0 %v2354_v36  ;;  %v2435_v35 = vld [vmem:[%s3577_s1 + $0x310] ss:$8 sps:$4 sm:$0xff]  }
  0x25   :  { %1719 = vmatprep.subr.bf16.mxu1 %v2356_v37  ;;  %v2995_v36 = vld [vmem:[%s3578_s0 + $0x10] sm:$0xff] }
  0x26   :  { %v3000_v37 = vld [vmem:[%s3578_s0 + $0x50] sm:$0xff] }
  0x27   :  { %1677 = vmatpush2.bf16.msra.mxu0 %v2358_v38  ;;  %v3005_v38 = vld [vmem:[%s3578_s0 + $0x18] sm:$0xff] }
  0x28   :  { %1720 = vmatpush2.bf16.msra.mxu1 %v2359_v39  ;;  %1678 = vmatprep.subr.bf16.mxu0 %v2360_v40  ;;  %v3010_v39 = vld [vmem:[%s3578_s0 + $0x58] sm:$0xff]  ;;  %v2440_v40 = vld [vmem:[%s3577_s1 + $0x204] ss:$8 sps:$4 sm:$0xff]  }
  0x29   :  { %1721 = vmatprep.subr.bf16.mxu1 %v2362_v41  ;;  %v2029_v41 = vcombine.high %v2995_v36, %v3000_v37 }
  0x2b   :  { %1679 = vmatpush2.bf16.msra.mxu0 %v2364_v42  ;;  %v2443_v42 = vld [vmem:[%s3577_s1 + $0x304] ss:$8 sps:$4 sm:$0xff]  }
  0x2c   :  { %1722 = vmatpush2.bf16.msra.mxu1 %v2365_v43  ;;  %1680 = vmatprep.subr.bf16.mxu0 %v2366_v44  ;;  %v2031_v43 = vcombine.high %v3005_v38, %v3010_v39  ;;  %v2438_v44 = vld [vmem:[%s3577_s1 + $0x200] ss:$8 sps:$4 sm:$0xff]  }
  0x2d   :  { %1723 = vmatprep.subr.bf16.mxu1 %v2368_v45  ;;  %v2441_v45 = vld [vmem:[%s3577_s1 + $0x300] ss:$8 sps:$4 sm:$0xff]  }
  0x2f   :  { %1681 = vmatpush2.bf16.msra.mxu0 %v2370_v46  ;;  %v2446_v46 = vld [vmem:[%s3577_s1 + $0x2f4] ss:$8 sps:$4 sm:$0xff]  }
  0x30   :  { %1724 = vmatpush2.bf16.msra.mxu1 %v2371_v47  ;;  %1682 = vmatprep.subr.bf16.mxu0 %v2372_v52  ;;  %v2449_v47 = vld [vmem:[%s3577_s1 + $0x3f4] ss:$8 sps:$4 sm:$0xff]   ;;  %v2450_v52 = vld [vmem:[%s3577_s1 + $0x2e0] ss:$8 sps:$4 sm:$0xff]  }
  0x31   :  { %1725 = vmatprep.subr.bf16.mxu1 %v2374_v54  ;;  %v2458_v54 = vld [vmem:[%s3577_s1 + $0x2d4] ss:$8 sps:$4 sm:$0xff]  }
  0x33   :  { %1683 = vmatpush2.bf16.msra.mxu0 %v2376_v56  ;;  %v2456_v56 = vld [vmem:[%s3577_s1 + $0x2d0] ss:$8 sps:$4 sm:$0xff]  }
  0x34   :  { %1726 = vmatpush2.bf16.msra.mxu1 %v2377_v57  ;;  %1684 = vmatprep.subr.bf16.mxu0 %v2378_v58  ;;  %v2459_v57 = vld [vmem:[%s3577_s1 + $0x3d0] ss:$8 sps:$4 sm:$0xff]   ;;  %v2464_v58 = vld [vmem:[%s3577_s1 + $0x2c4] ss:$8 sps:$4 sm:$0xff]  }
  0x35   :  { %1727 = vmatprep.subr.bf16.mxu1 %v2380_v59  ;;  %v2467_v59 = vld [vmem:[%s3577_s1 + $0x3c4] ss:$8 sps:$4 sm:$0xff]  }
  0x37   :  { %1685 = vmatpush2.bf16.msra.mxu0 %v2382_v60  ;;  %v2462_v60 = vld [vmem:[%s3577_s1 + $0x2c0] ss:$8 sps:$4 sm:$0xff]  }
  0x38   :  { %1728 = vmatpush2.bf16.msra.mxu1 %v2383_v61  ;;  %1686 = vmatprep.subr.bf16.mxu0 %v2384_v62  ;;  %v2465_v61 = vld [vmem:[%s3577_s1 + $0x3c0] ss:$8 sps:$4 sm:$0xff]   ;;  %v2470_v62 = vld [vmem:[%s3577_s1 + $0x2b4] ss:$8 sps:$4 sm:$0xff]  }
  0x39   :  { %1729 = vmatprep.subr.bf16.mxu1 %v2386_v63  ;;  %v2473_v63 = vld [vmem:[%s3577_s1 + $0x3b4] ss:$8 sps:$4 sm:$0xff]  }
  0x3b   :  { %1687 = vmatpush2.bf16.msra.mxu0 %v2388_v0  ;;  %v2468_v0 = vld [vmem:[%s3577_s1 + $0x2b0] ss:$8 sps:$4 sm:$0xff]  }
  0x3c   :  { %1730 = vmatpush2.bf16.msra.mxu1 %v2389_v1  ;;  %1688 = vmatprep.subr.bf16.mxu0 %v2390_v2  ;;  %v2471_v1 = vld [vmem:[%s3577_s1 + $0x3b0] ss:$8 sps:$4 sm:$0xff]   ;;  %v2476_v2 = vld [vmem:[%s3577_s1 + $0x2a4] ss:$8 sps:$4 sm:$0xff]  }
  0x3d   :  { %1731 = vmatprep.subr.bf16.mxu1 %v2392_v3  ;;  %v2479_v3 = vld [vmem:[%s3577_s1 + $0x3a4] ss:$8 sps:$4 sm:$0xff]  }
  0x3f   :  { %1689 = vmatpush2.bf16.msra.mxu0 %v2394_v4  ;;  %v2474_v4 = vld [vmem:[%s3577_s1 + $0x2a0] ss:$8 sps:$4 sm:$0xff]  }
  0x40   :  { %1732 = vmatpush2.bf16.msra.mxu1 %v2395_v5  ;;  %1744 = vmatprep.subr.bf16.mxu0 %v2398_v6  ;;  %v2477_v5 = vld [vmem:[%s3577_s1 + $0x3a0] ss:$8 sps:$4 sm:$0xff]   ;;  %v2482_v6 = vld [vmem:[%s3577_s1 + $0x294] ss:$8 sps:$4 sm:$0xff]  }
  0x41   :  { %1787 = vmatprep.subr.bf16.mxu1 %v2401_v7  ;;  %v2485_v7 = vld [vmem:[%s3577_s1 + $0x394] ss:$8 sps:$4 sm:$0xff]  }
  0x42   :  { %1691 = vmatmul.mubr.bf16.vlgmr.msra.gmra.mxu0 %v2024_v8  ;;  %v2480_v8 = vld [vmem:[%s3577_s1 + $0x290] ss:$8 sps:$4 sm:$0xff]  }
  0x43   :  { %1734 = vmatmul.mubr.bf16.vlgmr.msra.gmra.mxu1 %v2026_v9  ;;  %1745 = vmatpush1.bf16.msra.mxu0 %v2396_v10  ;;  %v2483_v9 = vld [vmem:[%s3577_s1 + $0x390] ss:$8 sps:$4 sm:$0xff]   ;;  %v2488_v10 = vld [vmem:[%s3577_s1 + $0x284] ss:$8 sps:$4 sm:$0xff]  }
  0x44   :  { %1788 = vmatpush1.bf16.msra.mxu1 %v2399_v11  ;;  %1746 = vmatprep.subr.bf16.mxu0 %v2404_v12  ;;  %v2491_v11 = vld [vmem:[%s3577_s1 + $0x384] ss:$8 sps:$4 sm:$0xff]   ;;  %v2486_v12 = vld [vmem:[%s3577_s1 + $0x280] ss:$8 sps:$4 sm:$0xff]  }
  0x45   :  { %1789 = vmatprep.subr.bf16.mxu1 %v2407_v13  ;;  %1776 = vmatprep.mubr.bf16.mxu0 %v2029_v41  ;;  %v2489_v13 = vld [vmem:[%s3577_s1 + $0x380] ss:$8 sps:$4 sm:$0xff]   ;;  %v2519_v41 = vld [vmem:[%s3577_s1 + $0x530] ss:$8 sps:$4 sm:$0xff]  }
  0x46   :  { %1819 = vmatprep.mubr.bf16.mxu1 %v2031_v43  ;;  %v2527_v43 = vld [vmem:[%s3577_s1 + $0x524] ss:$8 sps:$4 sm:$0xff]  }
  0x47   :  { %1747 = vmatpush1.bf16.msra.mxu0 %v2402_v14  ;;  %v2494_v14 = vld [vmem:[%s3577_s1 + $0x474] ss:$8 sps:$4 sm:$0xff]  }
  0x48   :  { %1790 = vmatpush1.bf16.msra.mxu1 %v2405_v15  ;;  %1748 = vmatprep.subr.bf16.mxu0 %v2410_v16  ;;  %v2497_v15 = vld [vmem:[%s3577_s1 + $0x574] ss:$8 sps:$4 sm:$0xff]   ;;  %v2028_v16 = vcombine.low %v2995_v36, %v3000_v37  ;;  %v2510_v36 = vld [vmem:[%s3577_s1 + $0x440] ss:$8 sps:$4 sm:$0xff]  }
  0x49   :  { %1791 = vmatprep.subr.bf16.mxu1 %v2413_v17  ;;  %v2030_v17 = vcombine.low %v3005_v38, %v3010_v39  ;;  %v2513_v37 = vld [vmem:[%s3577_s1 + $0x540] ss:$8 sps:$4 sm:$0xff]   ;;  %v2518_v38 = vld [vmem:[%s3577_s1 + $0x434] ss:$8 sps:$4 sm:$0xff]  }
  0x4a   :  { %v2521_v39 = vld [vmem:[%s3577_s1 + $0x534] ss:$8 sps:$4 sm:$0xff]  }
  0x4b   :  { %1749 = vmatpush1.bf16.msra.mxu0 %v2408_v18  ;;  %v2492_v18 = vld [vmem:[%s3577_s1 + $0x470] ss:$8 sps:$4 sm:$0xff]  }
  0x4c   :  { %1792 = vmatpush1.bf16.msra.mxu1 %v2411_v19  ;;  %1750 = vmatprep.subr.bf16.mxu0 %v2416_v20  ;;  %v2495_v19 = vld [vmem:[%s3577_s1 + $0x570] ss:$8 sps:$4 sm:$0xff]   ;;  %v2500_v20 = vld [vmem:[%s3577_s1 + $0x464] ss:$8 sps:$4 sm:$0xff]  }
  0x4d   :  { %1793 = vmatprep.subr.bf16.mxu1 %v2419_v21  ;;  %v2503_v21 = vld [vmem:[%s3577_s1 + $0x564] ss:$8 sps:$4 sm:$0xff]  }
  0x4f   :  { %1751 = vmatpush1.bf16.msra.mxu0 %v2414_v22  ;;  %v2498_v22 = vld [vmem:[%s3577_s1 + $0x460] ss:$8 sps:$4 sm:$0xff]  }
  0x50   :  { %1794 = vmatpush1.bf16.msra.mxu1 %v2417_v23  ;;  %1752 = vmatprep.subr.bf16.mxu0 %v2422_v24  ;;  %v2501_v23 = vld [vmem:[%s3577_s1 + $0x560] ss:$8 sps:$4 sm:$0xff]  }
  0x51   :  { %1795 = vmatprep.subr.bf16.mxu1 %v2425_v25  ;;  %v3155_v24 = vld [vmem:[%s3578_s0 + $0x20] sm:$0xff] }
  0x52   :  { %v3160_v25 = vld [vmem:[%s3578_s0 + $0x60] sm:$0xff] }
  0x53   :  { %1753 = vmatpush1.bf16.msra.mxu0 %v2420_v26  ;;  %v3165_v26 = vld [vmem:[%s3578_s0 + $0x28] sm:$0xff] }
  0x54   :  { %1796 = vmatpush1.bf16.msra.mxu1 %v2423_v27  ;;  %1754 = vmatprep.subr.bf16.mxu0 %v2428_v28  ;;  %v3170_v27 = vld [vmem:[%s3578_s0 + $0x68] sm:$0xff]  ;;  %v2506_v28 = vld [vmem:[%s3577_s1 + $0x454] ss:$8 sps:$4 sm:$0xff]  }
  0x55   :  { %1797 = vmatprep.subr.bf16.mxu1 %v2431_v29  ;;  %v2033_v29 = vcombine.high %v3155_v24, %v3160_v25 }
  0x57   :  { %1755 = vmatpush1.bf16.msra.mxu0 %v2426_v30  ;;  %v2509_v30 = vld [vmem:[%s3577_s1 + $0x554] ss:$8 sps:$4 sm:$0xff]  }
  0x58   :  { %1798 = vmatpush1.bf16.msra.mxu1 %v2429_v31  ;;  %1756 = vmatprep.subr.bf16.mxu0 %v2434_v32  ;;  %v2035_v31 = vcombine.high %v3165_v26, %v3170_v27  ;;  %v2504_v32 = vld [vmem:[%s3577_s1 + $0x450] ss:$8 sps:$4 sm:$0xff]  }
  0x59   :  { %1799 = vmatprep.subr.bf16.mxu1 %v2437_v33  ;;  %v2507_v33 = vld [vmem:[%s3577_s1 + $0x550] ss:$8 sps:$4 sm:$0xff]  }
  0x5b   :  { %1757 = vmatpush1.bf16.msra.mxu0 %v2432_v34  ;;  %v2512_v34 = vld [vmem:[%s3577_s1 + $0x444] ss:$8 sps:$4 sm:$0xff]  }
  0x5c   :  { %1800 = vmatpush1.bf16.msra.mxu1 %v2435_v35  ;;  %1758 = vmatprep.subr.bf16.mxu0 %v2440_v40  ;;  %v2515_v35 = vld [vmem:[%s3577_s1 + $0x544] ss:$8 sps:$4 sm:$0xff]   ;;  %v2516_v40 = vld [vmem:[%s3577_s1 + $0x430] ss:$8 sps:$4 sm:$0xff]  }
  0x5d   :  { %1801 = vmatprep.subr.bf16.mxu1 %v2443_v42  ;;  %v2524_v42 = vld [vmem:[%s3577_s1 + $0x424] ss:$8 sps:$4 sm:$0xff]  }
  0x5f   :  { %1759 = vmatpush1.bf16.msra.mxu0 %v2438_v44  ;;  %v2522_v44 = vld [vmem:[%s3577_s1 + $0x420] ss:$8 sps:$4 sm:$0xff]  }
  0x60   :  { %1802 = vmatpush1.bf16.msra.mxu1 %v2441_v45  ;;  %1760 = vmatprep.subr.bf16.mxu0 %v2446_v46  ;;  %v2525_v45 = vld [vmem:[%s3577_s1 + $0x520] ss:$8 sps:$4 sm:$0xff]   ;;  %v2530_v46 = vld [vmem:[%s3577_s1 + $0x414] ss:$8 sps:$4 sm:$0xff]  }
  0x61   :  { %1803 = vmatprep.subr.bf16.mxu1 %v2449_v47  ;;  %v2533_v47 = vld [vmem:[%s3577_s1 + $0x514] ss:$8 sps:$4 sm:$0xff]  }
  0x63   :  { %1761 = vmatpush2.bf16.msra.mxu0 %v2444_v48  ;;  %v2528_v48 = vld [vmem:[%s3577_s1 + $0x410] ss:$8 sps:$4 sm:$0xff]  }
  0x64   :  { %1804 = vmatpush2.bf16.msra.mxu1 %v2447_v49  ;;  %1762 = vmatprep.subr.bf16.mxu0 %v2452_v50  ;;  %v2531_v49 = vld [vmem:[%s3577_s1 + $0x510] ss:$8 sps:$4 sm:$0xff]   ;;  %v2536_v50 = vld [vmem:[%s3577_s1 + $0x404] ss:$8 sps:$4 sm:$0xff]  }
  0x65   :  { %1805 = vmatprep.subr.bf16.mxu1 %v2455_v51  ;;  %v2539_v51 = vld [vmem:[%s3577_s1 + $0x504] ss:$8 sps:$4 sm:$0xff]  }
  0x67   :  { %1763 = vmatpush2.bf16.msra.mxu0 %v2450_v52  ;;  %v2534_v52 = vld [vmem:[%s3577_s1 + $0x400] ss:$8 sps:$4 sm:$0xff]  }
  0x68   :  { %1806 = vmatpush2.bf16.msra.mxu1 %v2453_v53  ;;  %1764 = vmatprep.subr.bf16.mxu0 %v2458_v54  ;;  %v2537_v53 = vld [vmem:[%s3577_s1 + $0x500] ss:$8 sps:$4 sm:$0xff]   ;;  %v2542_v54 = vld [vmem:[%s3577_s1 + $0x4f4] ss:$8 sps:$4 sm:$0xff]  }
  0x69   :  { %1807 = vmatprep.subr.bf16.mxu1 %v2461_v55  ;;  %v2545_v55 = vld [vmem:[%s3577_s1 + $0x5f4] ss:$8 sps:$4 sm:$0xff]  }
  0x6b   :  { %1765 = vmatpush2.bf16.msra.mxu0 %v2456_v56  ;;  %v2540_v56 = vld [vmem:[%s3577_s1 + $0x4f0] ss:$8 sps:$4 sm:$0xff]  }
  0x6c   :  { %1808 = vmatpush2.bf16.msra.mxu1 %v2459_v57  ;;  %1766 = vmatprep.subr.bf16.mxu0 %v2464_v58  ;;  %v2543_v57 = vld [vmem:[%s3577_s1 + $0x5f0] ss:$8 sps:$4 sm:$0xff]   ;;  %v2548_v58 = vld [vmem:[%s3577_s1 + $0x4e4] ss:$8 sps:$4 sm:$0xff]  }
  0x6d   :  { %1809 = vmatprep.subr.bf16.mxu1 %v2467_v59  ;;  %v2551_v59 = vld [vmem:[%s3577_s1 + $0x5e4] ss:$8 sps:$4 sm:$0xff]  }
  0x6f   :  { %1767 = vmatpush2.bf16.msra.mxu0 %v2462_v60  ;;  %v2546_v60 = vld [vmem:[%s3577_s1 + $0x4e0] ss:$8 sps:$4 sm:$0xff]  }
  0x70   :  { %1810 = vmatpush2.bf16.msra.mxu1 %v2465_v61  ;;  %1768 = vmatprep.subr.bf16.mxu0 %v2470_v62  ;;  %v2549_v61 = vld [vmem:[%s3577_s1 + $0x5e0] ss:$8 sps:$4 sm:$0xff]   ;;  %v2554_v62 = vld [vmem:[%s3577_s1 + $0x4d4] ss:$8 sps:$4 sm:$0xff]  }
  0x71   :  { %1811 = vmatprep.subr.bf16.mxu1 %v2473_v63  ;;  %v2557_v63 = vld [vmem:[%s3577_s1 + $0x5d4] ss:$8 sps:$4 sm:$0xff]  }
  0x73   :  { %1769 = vmatpush2.bf16.msra.mxu0 %v2468_v0  ;;  %v2552_v0 = vld [vmem:[%s3577_s1 + $0x4d0] ss:$8 sps:$4 sm:$0xff]  }
  0x74   :  { %1812 = vmatpush2.bf16.msra.mxu1 %v2471_v1  ;;  %1770 = vmatprep.subr.bf16.mxu0 %v2476_v2  ;;  %v2555_v1 = vld [vmem:[%s3577_s1 + $0x5d0] ss:$8 sps:$4 sm:$0xff]   ;;  %v2560_v2 = vld [vmem:[%s3577_s1 + $0x4c4] ss:$8 sps:$4 sm:$0xff]  }
  0x75   :  { %1813 = vmatprep.subr.bf16.mxu1 %v2479_v3  ;;  %v2563_v3 = vld [vmem:[%s3577_s1 + $0x5c4] ss:$8 sps:$4 sm:$0xff]  }
  0x77   :  { %1771 = vmatpush2.bf16.msra.mxu0 %v2474_v4  ;;  %v2558_v4 = vld [vmem:[%s3577_s1 + $0x4c0] ss:$8 sps:$4 sm:$0xff]  }
  0x78   :  { %1814 = vmatpush2.bf16.msra.mxu1 %v2477_v5  ;;  %1772 = vmatprep.subr.bf16.mxu0 %v2482_v6  ;;  %v2561_v5 = vld [vmem:[%s3577_s1 + $0x5c0] ss:$8 sps:$4 sm:$0xff]   ;;  %v2566_v6 = vld [vmem:[%s3577_s1 + $0x4b4] ss:$8 sps:$4 sm:$0xff]  }
  0x79   :  { %1815 = vmatprep.subr.bf16.mxu1 %v2485_v7  ;;  %v2569_v7 = vld [vmem:[%s3577_s1 + $0x5b4] ss:$8 sps:$4 sm:$0xff]  }
  0x7b   :  { %1773 = vmatpush2.bf16.msra.mxu0 %v2480_v8  ;;  %v2564_v8 = vld [vmem:[%s3577_s1 + $0x4b0] ss:$8 sps:$4 sm:$0xff]  }
  0x7c   :  { %1816 = vmatpush2.bf16.msra.mxu1 %v2483_v9  ;;  %1774 = vmatprep.subr.bf16.mxu0 %v2488_v10  ;;  %v2567_v9 = vld [vmem:[%s3577_s1 + $0x5b0] ss:$8 sps:$4 sm:$0xff]   ;;  %v2572_v10 = vld [vmem:[%s3577_s1 + $0x4a4] ss:$8 sps:$4 sm:$0xff]  }
  0x7d   :  { %1817 = vmatprep.subr.bf16.mxu1 %v2491_v11  ;;  %v2575_v11 = vld [vmem:[%s3577_s1 + $0x5a4] ss:$8 sps:$4 sm:$0xff]  }
  0x7f   :  { %1775 = vmatpush2.bf16.msra.mxu0 %v2486_v12  ;;  %v2570_v12 = vld [vmem:[%s3577_s1 + $0x4a0] ss:$8 sps:$4 sm:$0xff]  }
  0x80   :  { %1818 = vmatpush2.bf16.msra.mxu1 %v2489_v13  ;;  %1830 = vmatprep.subr.bf16.mxu0 %v2494_v14  ;;  %v2573_v13 = vld [vmem:[%s3577_s1 + $0x5a0] ss:$8 sps:$4 sm:$0xff]   ;;  %v2578_v14 = vld [vmem:[%s3577_s1 + $0x494] ss:$8 sps:$4 sm:$0xff]  }
  0x81   :  { %1873 = vmatprep.subr.bf16.mxu1 %v2497_v15  ;;  %v2581_v15 = vld [vmem:[%s3577_s1 + $0x594] ss:$8 sps:$4 sm:$0xff]  }
  0x82   :  { %1777 = vmatmul.mubr.bf16.vlgmr.msra.gmra.mxu0 %v2028_v16  ;;  %v2576_v16 = vld [vmem:[%s3577_s1 + $0x490] ss:$8 sps:$4 sm:$0xff]  }
  0x83   :  { %1820 = vmatmul.mubr.bf16.vlgmr.msra.gmra.mxu1 %v2030_v17  ;;  %1831 = vmatpush1.bf16.msra.mxu0 %v2492_v18  ;;  %v2579_v17 = vld [vmem:[%s3577_s1 + $0x590] ss:$8 sps:$4 sm:$0xff]   ;;  %v2584_v18 = vld [vmem:[%s3577_s1 + $0x484] ss:$8 sps:$4 sm:$0xff]  }
  0x84   :  { %1874 = vmatpush1.bf16.msra.mxu1 %v2495_v19  ;;  %1832 = vmatprep.subr.bf16.mxu0 %v2500_v20  ;;  %v2587_v19 = vld [vmem:[%s3577_s1 + $0x584] ss:$8 sps:$4 sm:$0xff]   ;;  %v2582_v20 = vld [vmem:[%s3577_s1 + $0x480] ss:$8 sps:$4 sm:$0xff]  }
  0x85   :  { %1875 = vmatprep.subr.bf16.mxu1 %v2503_v21  ;;  %1862 = vmatprep.mubr.bf16.mxu0 %v2033_v29  ;;  %v2585_v21 = vld [vmem:[%s3577_s1 + $0x580] ss:$8 sps:$4 sm:$0xff]   ;;  %v2032_v29 = vcombine.low %v3155_v24, %v3160_v25  ;;  %v2588_v24 = vld [vmem:[%s3577_s1 + $0x670] ss:$8 sps:$4 sm:$0xff]  }
  0x86   :  { %1905 = vmatprep.mubr.bf16.mxu1 %v2035_v31  ;;  %v3362_v31 = vld [vmem:[%s3578_s0 + $0x70] sm:$0xff] }
  0x87   :  { %1833 = vmatpush1.bf16.msra.mxu0 %v2498_v22  ;;  %v2590_v22 = vld [vmem:[%s3577_s1 + $0x674] ss:$8 sps:$4 sm:$0xff]   ;;  %v2591_v25 = vld [vmem:[%s3577_s1 + $0x770] ss:$8 sps:$4 sm:$0xff]  }
  0x88   :  { %1876 = vmatpush1.bf16.msra.mxu1 %v2501_v23  ;;  %1834 = vmatprep.subr.bf16.mxu0 %v2506_v28  ;;  %v2593_v23 = vld [vmem:[%s3577_s1 + $0x774] ss:$8 sps:$4 sm:$0xff]  }
  0x89   :  { %1877 = vmatprep.subr.bf16.mxu1 %v2509_v30  ;;  %v3353_v28 = vld [vmem:[%s3578_s0 + $0x30] sm:$0xff]  ;;  %v2034_v30 = vcombine.low %v3165_v26, %v3170_v27  ;;  %v2596_v26 = vld [vmem:[%s3577_s1 + $0x664] ss:$8 sps:$4 sm:$0xff]  }
  0x8a   :  { %v2599_v27 = vld [vmem:[%s3577_s1 + $0x764] ss:$8 sps:$4 sm:$0xff]  }
  0x8b   :  { %1835 = vmatpush1.bf16.msra.mxu0 %v2504_v32  ;;  %v3367_v32 = vld [vmem:[%s3578_s0 + $0x38] sm:$0xff] }
  0x8c   :  { %1878 = vmatpush1.bf16.msra.mxu1 %v2507_v33  ;;  %1836 = vmatprep.subr.bf16.mxu0 %v2512_v34  ;;  %v3372_v33 = vld [vmem:[%s3578_s0 + $0x78] sm:$0xff]  ;;  %v2037_v34 = vcombine.high %v3353_v28, %v3362_v31 }
  0x8d   :  { %1879 = vmatprep.subr.bf16.mxu1 %v2515_v35  ;;  %v2039_v35 = vcombine.high %v3367_v32, %v3372_v33 }
  0x8f   :  { %1837 = vmatpush1.bf16.msra.mxu0 %v2510_v36  ;;  %v2594_v36 = vld [vmem:[%s3577_s1 + $0x660] ss:$8 sps:$4 sm:$0xff]  }
  0x90   :  { %1880 = vmatpush1.bf16.msra.mxu1 %v2513_v37  ;;  %1838 = vmatprep.subr.bf16.mxu0 %v2518_v38  ;;  %v2597_v37 = vld [vmem:[%s3577_s1 + $0x760] ss:$8 sps:$4 sm:$0xff]   ;;  %v2602_v38 = vld [vmem:[%s3577_s1 + $0x654] ss:$8 sps:$4 sm:$0xff]  }
  0x91   :  { %1881 = vmatprep.subr.bf16.mxu1 %v2521_v39  ;;  %v2605_v39 = vld [vmem:[%s3577_s1 + $0x754] ss:$8 sps:$4 sm:$0xff]  }
  0x93   :  { %1839 = vmatpush1.bf16.msra.mxu0 %v2516_v40  ;;  %v2600_v40 = vld [vmem:[%s3577_s1 + $0x650] ss:$8 sps:$4 sm:$0xff]  }
  0x94   :  { %1882 = vmatpush1.bf16.msra.mxu1 %v2519_v41  ;;  %1840 = vmatprep.subr.bf16.mxu0 %v2524_v42  ;;  %v2603_v41 = vld [vmem:[%s3577_s1 + $0x750] ss:$8 sps:$4 sm:$0xff]   ;;  %v2608_v42 = vld [vmem:[%s3577_s1 + $0x644] ss:$8 sps:$4 sm:$0xff]  }
  0x95   :  { %1883 = vmatprep.subr.bf16.mxu1 %v2527_v43  ;;  %v2611_v43 = vld [vmem:[%s3577_s1 + $0x744] ss:$8 sps:$4 sm:$0xff]  }
  0x97   :  { %1841 = vmatpush1.bf16.msra.mxu0 %v2522_v44  ;;  %v2606_v44 = vld [vmem:[%s3577_s1 + $0x640] ss:$8 sps:$4 sm:$0xff]  }
  0x98   :  { %1884 = vmatpush1.bf16.msra.mxu1 %v2525_v45  ;;  %1842 = vmatprep.subr.bf16.mxu0 %v2530_v46  ;;  %v2609_v45 = vld [vmem:[%s3577_s1 + $0x740] ss:$8 sps:$4 sm:$0xff]   ;;  %v2614_v46 = vld [vmem:[%s3577_s1 + $0x634] ss:$8 sps:$4 sm:$0xff]  }
  0x99   :  { %1885 = vmatprep.subr.bf16.mxu1 %v2533_v47  ;;  %v2617_v47 = vld [vmem:[%s3577_s1 + $0x734] ss:$8 sps:$4 sm:$0xff]  }
  0x9b   :  { %1843 = vmatpush1.bf16.msra.mxu0 %v2528_v48  ;;  %v2612_v48 = vld [vmem:[%s3577_s1 + $0x630] ss:$8 sps:$4 sm:$0xff]  }
  0x9c   :  { %1886 = vmatpush1.bf16.msra.mxu1 %v2531_v49  ;;  %1844 = vmatprep.subr.bf16.mxu0 %v2536_v50  ;;  %v2615_v49 = vld [vmem:[%s3577_s1 + $0x730] ss:$8 sps:$4 sm:$0xff]   ;;  %v2620_v50 = vld [vmem:[%s3577_s1 + $0x624] ss:$8 sps:$4 sm:$0xff]  }
  0x9d   :  { %1887 = vmatprep.subr.bf16.mxu1 %v2539_v51  ;;  %v2623_v51 = vld [vmem:[%s3577_s1 + $0x724] ss:$8 sps:$4 sm:$0xff]  }
  0x9f   :  { %1845 = vmatpush1.bf16.msra.mxu0 %v2534_v52  ;;  %v2618_v52 = vld [vmem:[%s3577_s1 + $0x620] ss:$8 sps:$4 sm:$0xff]  }
  0xa0   :  { %1888 = vmatpush1.bf16.msra.mxu1 %v2537_v53  ;;  %1846 = vmatprep.subr.bf16.mxu0 %v2542_v54  ;;  %v2621_v53 = vld [vmem:[%s3577_s1 + $0x720] ss:$8 sps:$4 sm:$0xff]   ;;  %v2626_v54 = vld [vmem:[%s3577_s1 + $0x614] ss:$8 sps:$4 sm:$0xff]  }
  0xa1   :  { %1889 = vmatprep.subr.bf16.mxu1 %v2545_v55  ;;  %v2629_v55 = vld [vmem:[%s3577_s1 + $0x714] ss:$8 sps:$4 sm:$0xff]  }
  0xa3   :  { %1847 = vmatpush2.bf16.msra.mxu0 %v2540_v56  ;;  %v2624_v56 = vld [vmem:[%s3577_s1 + $0x610] ss:$8 sps:$4 sm:$0xff]  }
  0xa4   :  { %1890 = vmatpush2.bf16.msra.mxu1 %v2543_v57  ;;  %1848 = vmatprep.subr.bf16.mxu0 %v2548_v58  ;;  %v2627_v57 = vld [vmem:[%s3577_s1 + $0x710] ss:$8 sps:$4 sm:$0xff]   ;;  %v2632_v58 = vld [vmem:[%s3577_s1 + $0x604] ss:$8 sps:$4 sm:$0xff]  }
  0xa5   :  { %1891 = vmatprep.subr.bf16.mxu1 %v2551_v59  ;;  %v2635_v59 = vld [vmem:[%s3577_s1 + $0x704] ss:$8 sps:$4 sm:$0xff]  }
  0xa7   :  { %1849 = vmatpush2.bf16.msra.mxu0 %v2546_v60  ;;  %v2630_v60 = vld [vmem:[%s3577_s1 + $0x600] ss:$8 sps:$4 sm:$0xff]  }
  0xa8   :  { %1892 = vmatpush2.bf16.msra.mxu1 %v2549_v61  ;;  %1850 = vmatprep.subr.bf16.mxu0 %v2554_v62  ;;  %v2633_v61 = vld [vmem:[%s3577_s1 + $0x700] ss:$8 sps:$4 sm:$0xff]   ;;  %v2638_v62 = vld [vmem:[%s3577_s1 + $0x6f4] ss:$8 sps:$4 sm:$0xff]  }
  0xa9   :  { %1893 = vmatprep.subr.bf16.mxu1 %v2557_v63  ;;  %v2641_v63 = vld [vmem:[%s3577_s1 + $0x7f4] ss:$8 sps:$4 sm:$0xff]  }
  0xab   :  { %1851 = vmatpush2.bf16.msra.mxu0 %v2552_v0  ;;  %v2636_v0 = vld [vmem:[%s3577_s1 + $0x6f0] ss:$8 sps:$4 sm:$0xff]  }
  0xac   :  { %1894 = vmatpush2.bf16.msra.mxu1 %v2555_v1  ;;  %1852 = vmatprep.subr.bf16.mxu0 %v2560_v2  ;;  %v2639_v1 = vld [vmem:[%s3577_s1 + $0x7f0] ss:$8 sps:$4 sm:$0xff]   ;;  %v2644_v2 = vld [vmem:[%s3577_s1 + $0x6e4] ss:$8 sps:$4 sm:$0xff]  }
  0xad   :  { %1895 = vmatprep.subr.bf16.mxu1 %v2563_v3  ;;  %v2647_v3 = vld [vmem:[%s3577_s1 + $0x7e4] ss:$8 sps:$4 sm:$0xff]  }
  0xaf   :  { %1853 = vmatpush2.bf16.msra.mxu0 %v2558_v4  ;;  %v2642_v4 = vld [vmem:[%s3577_s1 + $0x6e0] ss:$8 sps:$4 sm:$0xff]  }
  0xb0   :  { %1896 = vmatpush2.bf16.msra.mxu1 %v2561_v5  ;;  %1854 = vmatprep.subr.bf16.mxu0 %v2566_v6  ;;  %v2645_v5 = vld [vmem:[%s3577_s1 + $0x7e0] ss:$8 sps:$4 sm:$0xff]   ;;  %v2650_v6 = vld [vmem:[%s3577_s1 + $0x6d4] ss:$8 sps:$4 sm:$0xff]  }
  0xb1   :  { %1897 = vmatprep.subr.bf16.mxu1 %v2569_v7  ;;  %v2653_v7 = vld [vmem:[%s3577_s1 + $0x7d4] ss:$8 sps:$4 sm:$0xff]  }
  0xb3   :  { %1855 = vmatpush2.bf16.msra.mxu0 %v2564_v8  ;;  %v2648_v8 = vld [vmem:[%s3577_s1 + $0x6d0] ss:$8 sps:$4 sm:$0xff]  }
  0xb4   :  { %1898 = vmatpush2.bf16.msra.mxu1 %v2567_v9  ;;  %1856 = vmatprep.subr.bf16.mxu0 %v2572_v10  ;;  %v2651_v9 = vld [vmem:[%s3577_s1 + $0x7d0] ss:$8 sps:$4 sm:$0xff]   ;;  %v2656_v10 = vld [vmem:[%s3577_s1 + $0x6c4] ss:$8 sps:$4 sm:$0xff]  }
  0xb5   :  { %1899 = vmatprep.subr.bf16.mxu1 %v2575_v11  ;;  %v2659_v11 = vld [vmem:[%s3577_s1 + $0x7c4] ss:$8 sps:$4 sm:$0xff]  }
  0xb7   :  { %1857 = vmatpush2.bf16.msra.mxu0 %v2570_v12  ;;  %v2654_v12 = vld [vmem:[%s3577_s1 + $0x6c0] ss:$8 sps:$4 sm:$0xff]  }
  0xb8   :  { %1900 = vmatpush2.bf16.msra.mxu1 %v2573_v13  ;;  %1858 = vmatprep.subr.bf16.mxu0 %v2578_v14  ;;  %v2657_v13 = vld [vmem:[%s3577_s1 + $0x7c0] ss:$8 sps:$4 sm:$0xff]   ;;  %v2662_v14 = vld [vmem:[%s3577_s1 + $0x6b4] ss:$8 sps:$4 sm:$0xff]  }
  0xb9   :  { %1901 = vmatprep.subr.bf16.mxu1 %v2581_v15  ;;  %v2665_v15 = vld [vmem:[%s3577_s1 + $0x7b4] ss:$8 sps:$4 sm:$0xff]  }
  0xbb   :  { %1859 = vmatpush2.bf16.msra.mxu0 %v2576_v16  ;;  %v2660_v16 = vld [vmem:[%s3577_s1 + $0x6b0] ss:$8 sps:$4 sm:$0xff]  }
  0xbc   :  { %1902 = vmatpush2.bf16.msra.mxu1 %v2579_v17  ;;  %1860 = vmatprep.subr.bf16.mxu0 %v2584_v18  ;;  %v2663_v17 = vld [vmem:[%s3577_s1 + $0x7b0] ss:$8 sps:$4 sm:$0xff]   ;;  %v2668_v18 = vld [vmem:[%s3577_s1 + $0x6a4] ss:$8 sps:$4 sm:$0xff]  }
  0xbd   :  { %1903 = vmatprep.subr.bf16.mxu1 %v2587_v19  ;;  %v2671_v19 = vld [vmem:[%s3577_s1 + $0x7a4] ss:$8 sps:$4 sm:$0xff]  }
  0xbf   :  { %1861 = vmatpush2.bf16.msra.mxu0 %v2582_v20  ;;  %v2666_v20 = vld [vmem:[%s3577_s1 + $0x6a0] ss:$8 sps:$4 sm:$0xff]  }
  0xc0   :  { %1904 = vmatpush2.bf16.msra.mxu1 %v2585_v21  ;;  %1916 = vmatprep.subr.bf16.mxu0 %v2590_v22  ;;  %v2669_v21 = vld [vmem:[%s3577_s1 + $0x7a0] ss:$8 sps:$4 sm:$0xff]   ;;  %v2674_v22 = vld [vmem:[%s3577_s1 + $0x694] ss:$8 sps:$4 sm:$0xff]  }
  0xc1   :  { %1959 = vmatprep.subr.bf16.mxu1 %v2593_v23  ;;  %v2677_v23 = vld [vmem:[%s3577_s1 + $0x794] ss:$8 sps:$4 sm:$0xff]  }
  0xc2   :  { %1863 = vmatmul.mubr.bf16.vlgmr.msra.gmra.mxu0 %v2032_v29  ;;  %v2672_v29 = vld [vmem:[%s3577_s1 + $0x690] ss:$8 sps:$4 sm:$0xff]  }
  0xc3   :  { %1906 = vmatmul.mubr.bf16.vlgmr.msra.gmra.mxu1 %v2034_v30  ;;  %1917 = vmatpush1.bf16.msra.mxu0 %v2588_v24  ;;  %v2675_v30 = vld [vmem:[%s3577_s1 + $0x790] ss:$8 sps:$4 sm:$0xff]   ;;  %v2680_v24 = vld [vmem:[%s3577_s1 + $0x684] ss:$8 sps:$4 sm:$0xff]  }
  0xc4   :  { %1960 = vmatpush1.bf16.msra.mxu1 %v2591_v25  ;;  %1918 = vmatprep.subr.bf16.mxu0 %v2596_v26  ;;  %v2683_v25 = vld [vmem:[%s3577_s1 + $0x784] ss:$8 sps:$4 sm:$0xff]   ;;  %v2678_v26 = vld [vmem:[%s3577_s1 + $0x680] ss:$8 sps:$4 sm:$0xff]  }
  0xc5   :  { %1961 = vmatprep.subr.bf16.mxu1 %v2599_v27  ;;  %1948 = vmatprep.mubr.bf16.mxu0 %v2037_v34  ;;  %v2681_v27 = vld [vmem:[%s3577_s1 + $0x780] ss:$8 sps:$4 sm:$0xff]   ;;  %v2036_v34 = vcombine.low %v3353_v28, %v3362_v31 }
  0xc6   :  { %1991 = vmatprep.mubr.bf16.mxu1 %v2039_v35  ;;  %v2038_v35 = vcombine.low %v3367_v32, %v3372_v33  ;;  %v286_v31 = vld [vmem:[%s3579_s2] sm:$0x3] }
  0xc7   :  { %1919 = vmatpush1.bf16.msra.mxu0 %v2594_v36 }
  0xc8   :  { %1962 = vmatpush1.bf16.msra.mxu1 %v2597_v37  ;;  %1920 = vmatprep.subr.bf16.mxu0 %v2602_v38 }
  0xc9   :  { %1963 = vmatprep.subr.bf16.mxu1 %v2605_v39 }
  0xcb   :  { %1921 = vmatpush1.bf16.msra.mxu0 %v2600_v40 }
  0xcc   :  { %1964 = vmatpush1.bf16.msra.mxu1 %v2603_v41  ;;  %1922 = vmatprep.subr.bf16.mxu0 %v2608_v42  ;;  %v288_v42 = vlaneseq }
  0xcd   :  { %1965 = vmatprep.subr.bf16.mxu1 %v2611_v43 }
  0xcf   :  { %1923 = vmatpush1.bf16.msra.mxu0 %v2606_v44 }
  0xd0   :  { %1966 = vmatpush1.bf16.msra.mxu1 %v2609_v45  ;;  %1924 = vmatprep.subr.bf16.mxu0 %v2614_v46  ;;  %v289_v45 = vshrl.u32 %v288_v42, 7 }
  0xd1   :  { %1967 = vmatprep.subr.bf16.mxu1 %v2617_v47 }
  0xd2   :  { %v290_v28 = vsub.s32 0, %v289_v45 }
  0xd3   :  { %1925 = vmatpush1.bf16.msra.mxu0 %v2612_v48  ;;  %v294_v48 = vsub.s32 1, %v289_v45 }
  0xd4   :  { %1968 = vmatpush1.bf16.msra.mxu1 %v2615_v49  ;;  %1926 = vmatprep.subr.bf16.mxu0 %v2620_v50  ;;  %v291_v49 = vrot.slane %v286_v31, %v290_v28 }
  0xd5   :  { %1969 = vmatprep.subr.bf16.mxu1 %v2623_v51 }
  0xd7   :  { %1927 = vmatpush1.bf16.msra.mxu0 %v2618_v52  ;;  %v295_v52 = vrot.slane %v286_v31, %v294_v48 }
  0xd8   :  { %1970 = vmatpush1.bf16.msra.mxu1 %v2621_v53  ;;  %1928 = vmatprep.subr.bf16.mxu0 %v2626_v54 }
  0xd9   :  { %1971 = vmatprep.subr.bf16.mxu1 %v2629_v55 }
  0xdb   :  { %1929 = vmatpush1.bf16.msra.mxu0 %v2624_v56 }
  0xdc   :  { %1972 = vmatpush1.bf16.msra.mxu1 %v2627_v57  ;;  %1930 = vmatprep.subr.bf16.mxu0 %v2632_v58 }
  0xdd   :  { %1973 = vmatprep.subr.bf16.mxu1 %v2635_v59 }
  0xdf   :  { %1931 = vmatpush1.bf16.msra.mxu0 %v2630_v60 }
  0xe0   :  { %1974 = vmatpush1.bf16.msra.mxu1 %v2633_v61  ;;  %1932 = vmatprep.subr.bf16.mxu0 %v2638_v62 }
  0xe1   :  { %1975 = vmatprep.subr.bf16.mxu1 %v2641_v63 }
  0xe3   :  { %1933 = vmatpush2.bf16.msra.mxu0 %v2636_v0 }
  0xe4   :  { %1976 = vmatpush2.bf16.msra.mxu1 %v2639_v1  ;;  %1934 = vmatprep.subr.bf16.mxu0 %v2644_v2 }
  0xe5   :  { %1977 = vmatprep.subr.bf16.mxu1 %v2647_v3 }
  0xe7   :  { %1935 = vmatpush2.bf16.msra.mxu0 %v2642_v4 }
  0xe8   :  { %1978 = vmatpush2.bf16.msra.mxu1 %v2645_v5  ;;  %1936 = vmatprep.subr.bf16.mxu0 %v2650_v6 }
  0xe9   :  { %1979 = vmatprep.subr.bf16.mxu1 %v2653_v7 }
  0xeb   :  { %1937 = vmatpush2.bf16.msra.mxu0 %v2648_v8 }
  0xec   :  { %1980 = vmatpush2.bf16.msra.mxu1 %v2651_v9  ;;  %1938 = vmatprep.subr.bf16.mxu0 %v2656_v10 }
  0xed   :  { %1981 = vmatprep.subr.bf16.mxu1 %v2659_v11 }
  0xef   :  { %1939 = vmatpush2.bf16.msra.mxu0 %v2654_v12 }
  0xf0   :  { %1982 = vmatpush2.bf16.msra.mxu1 %v2657_v13  ;;  %1940 = vmatprep.subr.bf16.mxu0 %v2662_v14 }
  0xf1   :  { %1983 = vmatprep.subr.bf16.mxu1 %v2665_v15 }
  0xf3   :  { %1941 = vmatpush2.bf16.msra.mxu0 %v2660_v16 }
  0xf4   :  { %1984 = vmatpush2.bf16.msra.mxu1 %v2663_v17  ;;  %1942 = vmatprep.subr.bf16.mxu0 %v2668_v18 }
  0xf5   :  { %1985 = vmatprep.subr.bf16.mxu1 %v2671_v19 }
  0xf7   :  { %1943 = vmatpush2.bf16.msra.mxu0 %v2666_v20 }
  0xf8   :  { %1986 = vmatpush2.bf16.msra.mxu1 %v2669_v21  ;;  %1944 = vmatprep.subr.bf16.mxu0 %v2674_v22 }
  0xf9   :  { %1987 = vmatprep.subr.bf16.mxu1 %v2677_v23 }
  0xfb   :  { %1945 = vmatpush2.bf16.msra.mxu0 %v2672_v29 }
  0xfc   :  { %1988 = vmatpush2.bf16.msra.mxu1 %v2675_v30  ;;  %1946 = vmatprep.subr.bf16.mxu0 %v2680_v24 }
  0xfd   :  { %1989 = vmatprep.subr.bf16.mxu1 %v2683_v25 }
  0xff   :  { %1947 = vmatpush2.bf16.msra.mxu0 %v2678_v26 }
 0x100   :  { %1990 = vmatpush2.bf16.msra.mxu1 %v2681_v27 }
 0x102   :  { %1949 = vmatmul.mubr.bf16.vlgmr.msra.gmra.mxu0 %v2036_v34  ;;  %v1692_v36 = vpop.f32.mrf.mxu0 }
 0x103   :  { %1992 = vmatmul.mubr.bf16.vlgmr.msra.gmra.mxu1 %v2038_v35  ;;  %v1735_v37 = vpop.f32.mrf.mxu1  ;;  %v1693_v53 = vadd.f32 %v1692_v36, %v291_v49 }
 0x104   :  { %v1694_v38 = vpop.f32.mrf.mxu0 }
 0x105   :  { %v1737_v39 = vpop.f32.mrf.mxu1  ;;  %v1695_v56 = vadd.f32 %v1694_v38, %v295_v52  ;;  %v1736_v59 = vadd.f32 %v1735_v37, %v1693_v53 }
 0x106   :  { %v1696_v40 = vpop.f32.mrf.mxu0 }
 0x107   :  { %v1739_v41 = vpop.f32.mrf.mxu1  ;;  %v1697_v60 = vadd.f32 %v1696_v40, %v291_v49  ;;  %v1738_v61 = vadd.f32 %v1737_v39, %v1695_v56 }
 0x108   :  { %v1698_v43 = vpop.f32.mrf.mxu0 }
 0x109   :  { %v1741_v44 = vpop.f32.mrf.mxu1  ;;  %v1699_v62 = vadd.f32 %v1698_v43, %v295_v52  ;;  %v1740_v2 = vadd.f32 %v1739_v41, %v1697_v60 }
 0x10b   :  { %v1742_v4 = vadd.f32 %v1741_v44, %v1699_v62 }
 0x142   :  { %v1778_v46 = vpop.f32.mrf.mxu0 }
 0x143   :  { %v1821_v47 = vpop.f32.mrf.mxu1  ;;  %v1779_v63 = vadd.f32 %v1778_v46, %v1736_v59 }
 0x144   :  { %v1780_v32 = vpop.f32.mrf.mxu0 }
 0x145   :  { %v1823_v33 = vpop.f32.mrf.mxu1  ;;  %v1781_v3 = vadd.f32 %v1780_v32, %v1738_v61  ;;  %v1822_v5 = vadd.f32 %v1821_v47, %v1779_v63 }
 0x146   :  { %v1782_v50 = vpop.f32.mrf.mxu0 }
 0x147   :  { %v1825_v51 = vpop.f32.mrf.mxu1  ;;  %v1783_v6 = vadd.f32 %v1782_v50, %v1740_v2  ;;  %v1824_v9 = vadd.f32 %v1823_v33, %v1781_v3 }
 0x148   :  { %v1784_v54 = vpop.f32.mrf.mxu0 }
 0x149   :  { %v1827_v55 = vpop.f32.mrf.mxu1  ;;  %v1785_v10 = vadd.f32 %v1784_v54, %v1742_v4  ;;  %v1826_v12 = vadd.f32 %v1825_v51, %v1783_v6 }
 0x14b   :  { %v1828_v16 = vadd.f32 %v1827_v55, %v1785_v10 }
 0x182   :  { %v1864_v57 = vpop.f32.mrf.mxu0 }
 0x183   :  { %v1907_v58 = vpop.f32.mrf.mxu1  ;;  %v1865_v11 = vadd.f32 %v1864_v57, %v1822_v5 }
 0x184   :  { %v1866_v0 = vpop.f32.mrf.mxu0 }
 0x185   :  { %v1909_v1 = vpop.f32.mrf.mxu1  ;;  %v1867_v13 = vadd.f32 %v1866_v0, %v1824_v9  ;;  %v1908_v17 = vadd.f32 %v1907_v58, %v1865_v11 }
 0x186   :  { %v1868_v7 = vpop.f32.mrf.mxu0 }
 0x187   :  { %v1911_v8 = vpop.f32.mrf.mxu1  ;;  %v1869_v18 = vadd.f32 %v1868_v7, %v1826_v12  ;;  %v1910_v21 = vadd.f32 %v1909_v1, %v1867_v13 }
 0x188   :  { %v1870_v14 = vpop.f32.mrf.mxu0 }
 0x189   :  { %v1913_v15 = vpop.f32.mrf.mxu1  ;;  %v1871_v22 = vadd.f32 %v1870_v14, %v1828_v16  ;;  %v1912_v24 = vadd.f32 %v1911_v8, %v1869_v18 }
 0x18b   :  { %v1914_v35 = vadd.f32 %v1913_v15, %v1871_v22 }
 0x1c2   :  { %v1950_v19 = vpop.f32.mrf.mxu0 }
 0x1c3   :  { %v1993_v20 = vpop.f32.mrf.mxu1  ;;  %v1951_v23 = vadd.f32 %v1950_v19, %v1908_v17 }
 0x1c4   :  { %v1952_v29 = vpop.f32.mrf.mxu0 }
 0x1c5   :  { %v1995_v30 = vpop.f32.mrf.mxu1  ;;  %v1994_v25 = vadd.f32 %v1993_v20, %v1951_v23  ;;  %v1953_v26 = vadd.f32 %v1952_v29, %v1910_v21 }
 0x1c6   :  { %v1954_v27 = vpop.f32.mrf.mxu0 }
 0x1c7   :  { %v1997_v34 = vpop.f32.mrf.mxu1  ;;  %v1996_v36 = vadd.f32 %v1995_v30, %v1953_v26  ;;  %v1955_v37 = vadd.f32 %v1954_v27, %v1912_v24  ;;  %v2002_v39 = vmax.f32 %v1994_v25, 0.0 }
 0x1c8   :  { %v1956_v38 = vpop.f32.mrf.mxu0 }
 0x1c9   :  { %v2003_v40 = vmax.f32 %v1996_v36, 0.0  ;;  %v1998_v41 = vadd.f32 %v1997_v34, %v1955_v37  ;;  %v1957_v42 = vadd.f32 %v1956_v38, %v1914_v35  ;;  %v1999_v43 = vpop.f32.mrf.mxu1 }
 0x1cb   :  { %v2298_v44 = vpack.c.bf16 %v2003_v40, %v2002_v39  ;;  %v2000_v45 = vadd.f32 %v1999_v43, %v1957_v42  ;;  %v2004_v46 = vmax.f32 %v1998_v41, 0.0 }
 0x1cd   :  { %2018 = vst [vmem:[%s3580_s3] sm:$0xff] %v2298_v44  ;;  %v2005_v47 = vmax.f32 %v2000_v45, 0.0 }
 0x1cf   :  { %v2299_v28 = vpack.c.bf16 %v2005_v47, %v2004_v46 }
 0x1d1   :  { %2019 = vst [vmem:[%s3580_s3 + $0x8] sm:$0xff] %v2299_v28 }

// kernel: vqvae_forward.28
= control target key start
LH: loop header
LB: loop body
LE: loop exit
PB: predicated region body
PF: predicated region fallthrough
CT: control target
= control target key end

     0   :  { %s3983_s1 = inlined_call_operand.vmem [shape: bf16[2304,256], index: 1, kind: input, shape index: {}]   ;;  %s3984_s0 = inlined_call_operand.vmem [shape: bf16[16,2304], index: 0, kind: input, shape index: {}]   ;;  %s3985_s2 = inlined_call_operand.vmem [shape: f32[1,256], index: 2, kind: input, shape index: {}]   ;;  %s3986_s3 = inlined_call_operand.vmem [shape: bf16[16,256], index: 3, kind: output, shape index: {}]  }
   0x1   :  { %v2577_v0 = vld [vmem:[%s3983_s1 + $0x74] ss:$8 sps:$4 sm:$0xff]   ;;  %v2579_v1 = vld [vmem:[%s3983_s1 + $0x70] ss:$8 sps:$4 sm:$0xff]   ;;  %v2583_v4 = vld [vmem:[%s3983_s1 + $0x64] ss:$8 sps:$4 sm:$0xff]  }
   0x2   :  { %1862 = vmatprep.subr.bf16.mxu0 %v2577_v0  ;;  %v2580_v2 = vld [vmem:[%s3983_s1 + $0x174] ss:$8 sps:$4 sm:$0xff]   ;;  %v2582_v3 = vld [vmem:[%s3983_s1 + $0x170] ss:$8 sps:$4 sm:$0xff]   ;;  %v2585_v5 = vld [vmem:[%s3983_s1 + $0x60] ss:$8 sps:$4 sm:$0xff]  }
   0x3   :  { %1863 = vmatpush1.bf16.msra.mxu0 %v2579_v1  ;;  %1905 = vmatprep.subr.bf16.mxu1 %v2580_v2  ;;  %v2586_v6 = vld [vmem:[%s3983_s1 + $0x164] ss:$8 sps:$4 sm:$0xff]   ;;  %v2588_v7 = vld [vmem:[%s3983_s1 + $0x160] ss:$8 sps:$4 sm:$0xff]   ;;  %v2589_v8 = vld [vmem:[%s3983_s1 + $0x54] ss:$8 sps:$4 sm:$0xff]  }
   0x4   :  { %1906 = vmatpush1.bf16.msra.mxu1 %v2582_v3  ;;  %1864 = vmatprep.subr.bf16.mxu0 %v2583_v4  ;;  %v2591_v9 = vld [vmem:[%s3983_s1 + $0x50] ss:$8 sps:$4 sm:$0xff]   ;;  %v2592_v10 = vld [vmem:[%s3983_s1 + $0x154] ss:$8 sps:$4 sm:$0xff]   ;;  %v2595_v11 = vld [vmem:[%s3983_s1 + $0x44] ss:$8 sps:$4 sm:$0xff]  }
   0x5   :  { %1907 = vmatprep.subr.bf16.mxu1 %v2586_v6  ;;  %v2594_v12 = vld [vmem:[%s3983_s1 + $0x150] ss:$8 sps:$4 sm:$0xff]   ;;  %v2598_v13 = vld [vmem:[%s3983_s1 + $0x144] ss:$8 sps:$4 sm:$0xff]   ;;  %v2597_v14 = vld [vmem:[%s3983_s1 + $0x40] ss:$8 sps:$4 sm:$0xff]  }
   0x6   :  { %v2601_v15 = vld [vmem:[%s3983_s1 + $0x34] ss:$8 sps:$4 sm:$0xff]   ;;  %v2600_v16 = vld [vmem:[%s3983_s1 + $0x140] ss:$8 sps:$4 sm:$0xff]   ;;  %v2603_v18 = vld [vmem:[%s3983_s1 + $0x30] ss:$8 sps:$4 sm:$0xff]  }
   0x7   :  { %1865 = vmatpush1.bf16.msra.mxu0 %v2585_v5  ;;  %v2604_v17 = vld [vmem:[%s3983_s1 + $0x134] ss:$8 sps:$4 sm:$0xff]   ;;  %v2607_v19 = vld [vmem:[%s3983_s1 + $0x24] ss:$8 sps:$4 sm:$0xff]   ;;  %v2606_v20 = vld [vmem:[%s3983_s1 + $0x130] ss:$8 sps:$4 sm:$0xff]  }
   0x8   :  { %1866 = vmatprep.subr.bf16.mxu0 %v2589_v8  ;;  %1908 = vmatpush1.bf16.msra.mxu1 %v2588_v7  ;;  %v2610_v21 = vld [vmem:[%s3983_s1 + $0x124] ss:$8 sps:$4 sm:$0xff]   ;;  %v2609_v22 = vld [vmem:[%s3983_s1 + $0x20] ss:$8 sps:$4 sm:$0xff]   ;;  %v2613_v23 = vld [vmem:[%s3983_s1 + $0x14] ss:$8 sps:$4 sm:$0xff]  }
   0x9   :  { %1909 = vmatprep.subr.bf16.mxu1 %v2592_v10  ;;  %v2612_v24 = vld [vmem:[%s3983_s1 + $0x120] ss:$8 sps:$4 sm:$0xff]   ;;  %v2616_v25 = vld [vmem:[%s3983_s1 + $0x114] ss:$8 sps:$4 sm:$0xff]   ;;  %v2615_v26 = vld [vmem:[%s3983_s1 + $0x10] ss:$8 sps:$4 sm:$0xff]  }
   0xa   :  { %v2619_v27 = vld [vmem:[%s3983_s1 + $0x4] ss:$8 sps:$4 sm:$0xff]   ;;  %v2618_v28 = vld [vmem:[%s3983_s1 + $0x110] ss:$8 sps:$4 sm:$0xff]   ;;  %v2621_v30 = vld [vmem:[%s3983_s1] ss:$8 sps:$4 sm:$0xff]  }
   0xb   :  { %1867 = vmatpush1.bf16.msra.mxu0 %v2591_v9  ;;  %v2622_v29 = vld [vmem:[%s3983_s1 + $0x104] ss:$8 sps:$4 sm:$0xff]   ;;  %v2625_v31 = vld [vmem:[%s3983_s1 + $0xf4] ss:$8 sps:$4 sm:$0xff]   ;;  %v2624_v32 = vld [vmem:[%s3983_s1 + $0x100] ss:$8 sps:$4 sm:$0xff]  }
   0xc   :  { %1868 = vmatprep.subr.bf16.mxu0 %v2595_v11  ;;  %1910 = vmatpush1.bf16.msra.mxu1 %v2594_v12  ;;  %v2628_v33 = vld [vmem:[%s3983_s1 + $0x1f4] ss:$8 sps:$4 sm:$0xff]   ;;  %v2627_v34 = vld [vmem:[%s3983_s1 + $0xf0] ss:$8 sps:$4 sm:$0xff]   ;;  %v2631_v35 = vld [vmem:[%s3983_s1 + $0xe4] ss:$8 sps:$4 sm:$0xff]  }
   0xd   :  { %1911 = vmatprep.subr.bf16.mxu1 %v2598_v13  ;;  %v2630_v36 = vld [vmem:[%s3983_s1 + $0x1f0] ss:$8 sps:$4 sm:$0xff]   ;;  %v2634_v37 = vld [vmem:[%s3983_s1 + $0x1e4] ss:$8 sps:$4 sm:$0xff]   ;;  %v2633_v38 = vld [vmem:[%s3983_s1 + $0xe0] ss:$8 sps:$4 sm:$0xff]  }
   0xe   :  { %v2637_v39 = vld [vmem:[%s3983_s1 + $0xd4] ss:$8 sps:$4 sm:$0xff]   ;;  %v2636_v40 = vld [vmem:[%s3983_s1 + $0x1e0] ss:$8 sps:$4 sm:$0xff]   ;;  %v2639_v42 = vld [vmem:[%s3983_s1 + $0xd0] ss:$8 sps:$4 sm:$0xff]  }
   0xf   :  { %1869 = vmatpush1.bf16.msra.mxu0 %v2597_v14  ;;  %v2640_v41 = vld [vmem:[%s3983_s1 + $0x1d4] ss:$8 sps:$4 sm:$0xff]   ;;  %v2643_v43 = vld [vmem:[%s3983_s1 + $0xc4] ss:$8 sps:$4 sm:$0xff]   ;;  %v2642_v44 = vld [vmem:[%s3983_s1 + $0x1d0] ss:$8 sps:$4 sm:$0xff]  }
  0x10   :  { %1870 = vmatprep.subr.bf16.mxu0 %v2601_v15  ;;  %1912 = vmatpush1.bf16.msra.mxu1 %v2600_v16  ;;  %v2646_v45 = vld [vmem:[%s3983_s1 + $0x1c4] ss:$8 sps:$4 sm:$0xff]   ;;  %v2645_v46 = vld [vmem:[%s3983_s1 + $0xc0] ss:$8 sps:$4 sm:$0xff]   ;;  %v2649_v48 = vld [vmem:[%s3983_s1 + $0xb4] ss:$8 sps:$4 sm:$0xff]  }
  0x11   :  { %1913 = vmatprep.subr.bf16.mxu1 %v2604_v17  ;;  %v2674_v47 = vld [vmem:[%s3984_s0 + $0x4] ss:$72 sps:$4 sm:$0xff]   ;;  %v2648_v49 = vld [vmem:[%s3983_s1 + $0x1c0] ss:$8 sps:$4 sm:$0xff]   ;;  %v2652_v50 = vld [vmem:[%s3983_s1 + $0x1b4] ss:$8 sps:$4 sm:$0xff]  }
  0x12   :  { %1894 = vmatprep.mubr.bf16.mxu0 %v2674_v47  ;;  %v2681_v51 = vld [vmem:[%s3984_s0 + $0xc] ss:$72 sps:$4 sm:$0xff]   ;;  %v2651_v52 = vld [vmem:[%s3983_s1 + $0xb0] ss:$8 sps:$4 sm:$0xff]   ;;  %v2657_v56 = vld [vmem:[%s3983_s1 + $0xa0] ss:$8 sps:$4 sm:$0xff]  }
  0x13   :  { %1871 = vmatpush1.bf16.msra.mxu0 %v2603_v18  ;;  %v2655_v53 = vld [vmem:[%s3983_s1 + $0xa4] ss:$8 sps:$4 sm:$0xff]   ;;  %1937 = vmatprep.mubr.bf16.mxu1 %v2681_v51  ;;  %v2654_v54 = vld [vmem:[%s3983_s1 + $0x1b0] ss:$8 sps:$4 sm:$0xff]   ;;  %v2661_v57 = vld [vmem:[%s3983_s1 + $0x94] ss:$8 sps:$4 sm:$0xff]  }
  0x14   :  { %1872 = vmatprep.subr.bf16.mxu0 %v2607_v19  ;;  %1914 = vmatpush1.bf16.msra.mxu1 %v2606_v20  ;;  %v2658_v55 = vld [vmem:[%s3983_s1 + $0x1a4] ss:$8 sps:$4 sm:$0xff]   ;;  %v2660_v58 = vld [vmem:[%s3983_s1 + $0x1a0] ss:$8 sps:$4 sm:$0xff]   ;;  %v2664_v59 = vld [vmem:[%s3983_s1 + $0x194] ss:$8 sps:$4 sm:$0xff]  }
  0x15   :  { %1915 = vmatprep.subr.bf16.mxu1 %v2610_v21  ;;  %v2663_v60 = vld [vmem:[%s3983_s1 + $0x90] ss:$8 sps:$4 sm:$0xff]   ;;  %v2667_v61 = vld [vmem:[%s3983_s1 + $0x84] ss:$8 sps:$4 sm:$0xff]   ;;  %v2669_v0 = vld [vmem:[%s3983_s1 + $0x80] ss:$8 sps:$4 sm:$0xff]  }
  0x16   :  { %v2666_v62 = vld [vmem:[%s3983_s1 + $0x190] ss:$8 sps:$4 sm:$0xff]   ;;  %v2670_v63 = vld [vmem:[%s3983_s1 + $0x184] ss:$8 sps:$4 sm:$0xff]   ;;  %v2678_v1 = vld [vmem:[%s3983_s1 + $0x274] ss:$8 sps:$4 sm:$0xff]  }
  0x17   :  { %1873 = vmatpush1.bf16.msra.mxu0 %v2609_v22  ;;  %v2675_v2 = vld [vmem:[%s3983_s1 + $0x180] ss:$8 sps:$4 sm:$0xff]   ;;  %v2684_v4 = vld [vmem:[%s3983_s1 + $0x374] ss:$8 sps:$4 sm:$0xff]   ;;  %v2676_v5 = vld [vmem:[%s3983_s1 + $0x270] ss:$8 sps:$4 sm:$0xff]  }
  0x18   :  { %1874 = vmatprep.subr.bf16.mxu0 %v2613_v23  ;;  %1916 = vmatpush1.bf16.msra.mxu1 %v2612_v24  ;;  %v2672_v3 = vld [vmem:[%s3984_s0] ss:$72 sps:$4 sm:$0xff]   ;;  %v2687_v7 = vld [vmem:[%s3983_s1 + $0x264] ss:$8 sps:$4 sm:$0xff]   ;;  %v2682_v8 = vld [vmem:[%s3983_s1 + $0x370] ss:$8 sps:$4 sm:$0xff]  }
  0x19   :  { %1917 = vmatprep.subr.bf16.mxu1 %v2616_v25  ;;  %v2679_v6 = vld [vmem:[%s3984_s0 + $0x8] ss:$72 sps:$4 sm:$0xff]   ;;  %v2690_v9 = vld [vmem:[%s3983_s1 + $0x364] ss:$8 sps:$4 sm:$0xff]   ;;  %v2693_v11 = vld [vmem:[%s3983_s1 + $0x254] ss:$8 sps:$4 sm:$0xff]  }
  0x1a   :  { %v2685_v10 = vld [vmem:[%s3983_s1 + $0x260] ss:$8 sps:$4 sm:$0xff]   ;;  %v2696_v13 = vld [vmem:[%s3983_s1 + $0x354] ss:$8 sps:$4 sm:$0xff]   ;;  %v2691_v14 = vld [vmem:[%s3983_s1 + $0x250] ss:$8 sps:$4 sm:$0xff]  }
  0x1b   :  { %1875 = vmatpush1.bf16.msra.mxu0 %v2615_v26  ;;  %v2688_v12 = vld [vmem:[%s3983_s1 + $0x360] ss:$8 sps:$4 sm:$0xff]   ;;  %v2699_v15 = vld [vmem:[%s3983_s1 + $0x244] ss:$8 sps:$4 sm:$0xff]   ;;  %v2694_v16 = vld [vmem:[%s3983_s1 + $0x350] ss:$8 sps:$4 sm:$0xff]  }
  0x1c   :  { %1876 = vmatprep.subr.bf16.mxu0 %v2619_v27  ;;  %1918 = vmatpush1.bf16.msra.mxu1 %v2618_v28  ;;  %v2702_v17 = vld [vmem:[%s3983_s1 + $0x344] ss:$8 sps:$4 sm:$0xff]   ;;  %v2697_v18 = vld [vmem:[%s3983_s1 + $0x240] ss:$8 sps:$4 sm:$0xff]   ;;  %v2705_v19 = vld [vmem:[%s3983_s1 + $0x234] ss:$8 sps:$4 sm:$0xff]  }
  0x1d   :  { %1919 = vmatprep.subr.bf16.mxu1 %v2622_v29  ;;  %v2700_v20 = vld [vmem:[%s3983_s1 + $0x340] ss:$8 sps:$4 sm:$0xff]   ;;  %v2708_v21 = vld [vmem:[%s3983_s1 + $0x334] ss:$8 sps:$4 sm:$0xff]   ;;  %v2703_v22 = vld [vmem:[%s3983_s1 + $0x230] ss:$8 sps:$4 sm:$0xff]  }
  0x1e   :  { %v2711_v23 = vld [vmem:[%s3983_s1 + $0x224] ss:$8 sps:$4 sm:$0xff]   ;;  %v2706_v24 = vld [vmem:[%s3983_s1 + $0x330] ss:$8 sps:$4 sm:$0xff]   ;;  %v2709_v26 = vld [vmem:[%s3983_s1 + $0x220] ss:$8 sps:$4 sm:$0xff]  }
  0x1f   :  { %1877 = vmatpush1.bf16.msra.mxu0 %v2621_v30  ;;  %v2714_v25 = vld [vmem:[%s3983_s1 + $0x324] ss:$8 sps:$4 sm:$0xff]   ;;  %v2717_v27 = vld [vmem:[%s3983_s1 + $0x214] ss:$8 sps:$4 sm:$0xff]   ;;  %v2712_v28 = vld [vmem:[%s3983_s1 + $0x320] ss:$8 sps:$4 sm:$0xff]  }
  0x20   :  { %1878 = vmatprep.subr.bf16.mxu0 %v2625_v31  ;;  %1920 = vmatpush1.bf16.msra.mxu1 %v2624_v32  ;;  %v2720_v29 = vld [vmem:[%s3983_s1 + $0x314] ss:$8 sps:$4 sm:$0xff]   ;;  %v2715_v30 = vld [vmem:[%s3983_s1 + $0x210] ss:$8 sps:$4 sm:$0xff]   ;;  %v2723_v32 = vld [vmem:[%s3983_s1 + $0x204] ss:$8 sps:$4 sm:$0xff]  }
  0x21   :  { %1921 = vmatprep.subr.bf16.mxu1 %v2628_v33  ;;  %v2718_v31 = vld [vmem:[%s3983_s1 + $0x310] ss:$8 sps:$4 sm:$0xff]   ;;  %v2777_v33 = vld [vmem:[%s3984_s0 + $0x14] ss:$72 sps:$4 sm:$0xff]   ;;  %v2750_v51 = vld [vmem:[%s3983_s1 + $0x3c4] ss:$8 sps:$4 sm:$0xff]  }
  0x22   :  { %v2744_v47 = vld [vmem:[%s3983_s1 + $0x3d4] ss:$8 sps:$4 sm:$0xff]  }
  0x23   :  { %1879 = vmatpush2.bf16.msra.mxu0 %v2627_v34  ;;  %v2726_v34 = vld [vmem:[%s3983_s1 + $0x304] ss:$8 sps:$4 sm:$0xff]  }
  0x24   :  { %1880 = vmatprep.subr.bf16.mxu0 %v2631_v35  ;;  %1922 = vmatpush2.bf16.msra.mxu1 %v2630_v36  ;;  %v2721_v35 = vld [vmem:[%s3983_s1 + $0x200] ss:$8 sps:$4 sm:$0xff]   ;;  %v2783_v36 = vld [vmem:[%s3984_s0 + $0x1c] ss:$72 sps:$4 sm:$0xff]  }
  0x25   :  { %1923 = vmatprep.subr.bf16.mxu1 %v2634_v37  ;;  %v2729_v37 = vld [vmem:[%s3983_s1 + $0x2f4] ss:$8 sps:$4 sm:$0xff]  }
  0x27   :  { %1881 = vmatpush2.bf16.msra.mxu0 %v2633_v38  ;;  %v2724_v38 = vld [vmem:[%s3983_s1 + $0x300] ss:$8 sps:$4 sm:$0xff]  }
  0x28   :  { %1882 = vmatprep.subr.bf16.mxu0 %v2637_v39  ;;  %1924 = vmatpush2.bf16.msra.mxu1 %v2636_v40  ;;  %v2732_v39 = vld [vmem:[%s3983_s1 + $0x3f4] ss:$8 sps:$4 sm:$0xff]   ;;  %v2727_v40 = vld [vmem:[%s3983_s1 + $0x2f0] ss:$8 sps:$4 sm:$0xff]  }
  0x29   :  { %1925 = vmatprep.subr.bf16.mxu1 %v2640_v41  ;;  %v2735_v41 = vld [vmem:[%s3983_s1 + $0x2e4] ss:$8 sps:$4 sm:$0xff]  }
  0x2b   :  { %1883 = vmatpush2.bf16.msra.mxu0 %v2639_v42  ;;  %v2730_v42 = vld [vmem:[%s3983_s1 + $0x3f0] ss:$8 sps:$4 sm:$0xff]  }
  0x2c   :  { %1884 = vmatprep.subr.bf16.mxu0 %v2643_v43  ;;  %1926 = vmatpush2.bf16.msra.mxu1 %v2642_v44  ;;  %v2738_v43 = vld [vmem:[%s3983_s1 + $0x3e4] ss:$8 sps:$4 sm:$0xff]   ;;  %v2733_v44 = vld [vmem:[%s3983_s1 + $0x2e0] ss:$8 sps:$4 sm:$0xff]  }
  0x2d   :  { %1927 = vmatprep.subr.bf16.mxu1 %v2646_v45  ;;  %v2741_v45 = vld [vmem:[%s3983_s1 + $0x2d4] ss:$8 sps:$4 sm:$0xff]  }
  0x2f   :  { %1885 = vmatpush2.bf16.msra.mxu0 %v2645_v46  ;;  %v2736_v46 = vld [vmem:[%s3983_s1 + $0x3e0] ss:$8 sps:$4 sm:$0xff]  }
  0x30   :  { %1886 = vmatprep.subr.bf16.mxu0 %v2649_v48  ;;  %1928 = vmatpush2.bf16.msra.mxu1 %v2648_v49  ;;  %v2739_v48 = vld [vmem:[%s3983_s1 + $0x2d0] ss:$8 sps:$4 sm:$0xff]   ;;  %v2747_v49 = vld [vmem:[%s3983_s1 + $0x2c4] ss:$8 sps:$4 sm:$0xff]  }
  0x31   :  { %1929 = vmatprep.subr.bf16.mxu1 %v2652_v50  ;;  %v2742_v50 = vld [vmem:[%s3983_s1 + $0x3d0] ss:$8 sps:$4 sm:$0xff]  }
  0x33   :  { %1887 = vmatpush2.bf16.msra.mxu0 %v2651_v52  ;;  %v2745_v52 = vld [vmem:[%s3983_s1 + $0x2c0] ss:$8 sps:$4 sm:$0xff]  }
  0x34   :  { %1888 = vmatprep.subr.bf16.mxu0 %v2655_v53  ;;  %1930 = vmatpush2.bf16.msra.mxu1 %v2654_v54  ;;  %v2753_v53 = vld [vmem:[%s3983_s1 + $0x2b4] ss:$8 sps:$4 sm:$0xff]   ;;  %v2748_v54 = vld [vmem:[%s3983_s1 + $0x3c0] ss:$8 sps:$4 sm:$0xff]  }
  0x35   :  { %1931 = vmatprep.subr.bf16.mxu1 %v2658_v55  ;;  %v2756_v55 = vld [vmem:[%s3983_s1 + $0x3b4] ss:$8 sps:$4 sm:$0xff]  }
  0x37   :  { %1889 = vmatpush2.bf16.msra.mxu0 %v2657_v56  ;;  %v2751_v56 = vld [vmem:[%s3983_s1 + $0x2b0] ss:$8 sps:$4 sm:$0xff]  }
  0x38   :  { %1890 = vmatprep.subr.bf16.mxu0 %v2661_v57  ;;  %1932 = vmatpush2.bf16.msra.mxu1 %v2660_v58  ;;  %v2759_v57 = vld [vmem:[%s3983_s1 + $0x2a4] ss:$8 sps:$4 sm:$0xff]   ;;  %v2754_v58 = vld [vmem:[%s3983_s1 + $0x3b0] ss:$8 sps:$4 sm:$0xff]  }
  0x39   :  { %1933 = vmatprep.subr.bf16.mxu1 %v2664_v59  ;;  %v2762_v59 = vld [vmem:[%s3983_s1 + $0x3a4] ss:$8 sps:$4 sm:$0xff]  }
  0x3b   :  { %1891 = vmatpush2.bf16.msra.mxu0 %v2663_v60  ;;  %v2757_v60 = vld [vmem:[%s3983_s1 + $0x2a0] ss:$8 sps:$4 sm:$0xff]  }
  0x3c   :  { %1892 = vmatprep.subr.bf16.mxu0 %v2667_v61  ;;  %1934 = vmatpush2.bf16.msra.mxu1 %v2666_v62  ;;  %v2765_v61 = vld [vmem:[%s3983_s1 + $0x294] ss:$8 sps:$4 sm:$0xff]   ;;  %v2760_v62 = vld [vmem:[%s3983_s1 + $0x3a0] ss:$8 sps:$4 sm:$0xff]  }
  0x3d   :  { %1935 = vmatprep.subr.bf16.mxu1 %v2670_v63  ;;  %v2768_v63 = vld [vmem:[%s3983_s1 + $0x394] ss:$8 sps:$4 sm:$0xff]  }
  0x3f   :  { %1893 = vmatpush2.bf16.msra.mxu0 %v2669_v0  ;;  %v2763_v0 = vld [vmem:[%s3983_s1 + $0x290] ss:$8 sps:$4 sm:$0xff]  }
  0x40   :  { %1948 = vmatprep.subr.bf16.mxu0 %v2678_v1  ;;  %1936 = vmatpush2.bf16.msra.mxu1 %v2675_v2  ;;  %v2771_v1 = vld [vmem:[%s3983_s1 + $0x284] ss:$8 sps:$4 sm:$0xff]   ;;  %v2766_v2 = vld [vmem:[%s3983_s1 + $0x390] ss:$8 sps:$4 sm:$0xff]  }
  0x41   :  { %1991 = vmatprep.subr.bf16.mxu1 %v2684_v4  ;;  %v2769_v4 = vld [vmem:[%s3983_s1 + $0x280] ss:$8 sps:$4 sm:$0xff]  }
  0x42   :  { %1895 = vmatmul.mubr.bf16.vlgmr.msra.gmra.mxu0 %v2672_v3  ;;  %v2774_v3 = vld [vmem:[%s3983_s1 + $0x384] ss:$8 sps:$4 sm:$0xff]  }
  0x43   :  { %1949 = vmatpush1.bf16.msra.mxu0 %v2676_v5  ;;  %1938 = vmatmul.mubr.bf16.vlgmr.msra.gmra.mxu1 %v2679_v6  ;;  %v2780_v5 = vld [vmem:[%s3983_s1 + $0x474] ss:$8 sps:$4 sm:$0xff]   ;;  %v2772_v6 = vld [vmem:[%s3983_s1 + $0x380] ss:$8 sps:$4 sm:$0xff]  }
  0x44   :  { %1950 = vmatprep.subr.bf16.mxu0 %v2687_v7  ;;  %1992 = vmatpush1.bf16.msra.mxu1 %v2682_v8  ;;  %v2775_v7 = vld [vmem:[%s3984_s0 + $0x10] ss:$72 sps:$4 sm:$0xff]   ;;  %v2786_v8 = vld [vmem:[%s3983_s1 + $0x574] ss:$8 sps:$4 sm:$0xff]  }
  0x45   :  { %1993 = vmatprep.subr.bf16.mxu1 %v2690_v9  ;;  %1980 = vmatprep.mubr.bf16.mxu0 %v2777_v33  ;;  %v2778_v9 = vld [vmem:[%s3983_s1 + $0x470] ss:$8 sps:$4 sm:$0xff]   ;;  %v2819_v33 = vld [vmem:[%s3983_s1 + $0x414] ss:$8 sps:$4 sm:$0xff]  }
  0x46   :  { %2023 = vmatprep.mubr.bf16.mxu1 %v2783_v36  ;;  %v2817_v36 = vld [vmem:[%s3983_s1 + $0x410] ss:$8 sps:$4 sm:$0xff]  }
  0x47   :  { %1951 = vmatpush1.bf16.msra.mxu0 %v2685_v10  ;;  %v2781_v10 = vld [vmem:[%s3984_s0 + $0x18] ss:$72 sps:$4 sm:$0xff]  }
  0x48   :  { %1952 = vmatprep.subr.bf16.mxu0 %v2693_v11  ;;  %1994 = vmatpush1.bf16.msra.mxu1 %v2688_v12  ;;  %v2789_v11 = vld [vmem:[%s3983_s1 + $0x464] ss:$8 sps:$4 sm:$0xff]   ;;  %v2784_v12 = vld [vmem:[%s3983_s1 + $0x570] ss:$8 sps:$4 sm:$0xff]  }
  0x49   :  { %1995 = vmatprep.subr.bf16.mxu1 %v2696_v13  ;;  %v2792_v13 = vld [vmem:[%s3983_s1 + $0x564] ss:$8 sps:$4 sm:$0xff]  }
  0x4b   :  { %1953 = vmatpush1.bf16.msra.mxu0 %v2691_v14  ;;  %v2787_v14 = vld [vmem:[%s3983_s1 + $0x460] ss:$8 sps:$4 sm:$0xff]  }
  0x4c   :  { %1954 = vmatprep.subr.bf16.mxu0 %v2699_v15  ;;  %1996 = vmatpush1.bf16.msra.mxu1 %v2694_v16  ;;  %v2795_v15 = vld [vmem:[%s3983_s1 + $0x454] ss:$8 sps:$4 sm:$0xff]   ;;  %v2790_v16 = vld [vmem:[%s3983_s1 + $0x560] ss:$8 sps:$4 sm:$0xff]  }
  0x4d   :  { %1997 = vmatprep.subr.bf16.mxu1 %v2702_v17  ;;  %v2798_v17 = vld [vmem:[%s3983_s1 + $0x554] ss:$8 sps:$4 sm:$0xff]  }
  0x4f   :  { %1955 = vmatpush1.bf16.msra.mxu0 %v2697_v18  ;;  %v2879_v18 = vld [vmem:[%s3984_s0 + $0x24] ss:$72 sps:$4 sm:$0xff]  }
  0x50   :  { %1956 = vmatprep.subr.bf16.mxu0 %v2705_v19  ;;  %1998 = vmatpush1.bf16.msra.mxu1 %v2700_v20  ;;  %v2793_v19 = vld [vmem:[%s3983_s1 + $0x450] ss:$8 sps:$4 sm:$0xff]  }
  0x51   :  { %1999 = vmatprep.subr.bf16.mxu1 %v2708_v21  ;;  %v2796_v20 = vld [vmem:[%s3983_s1 + $0x550] ss:$8 sps:$4 sm:$0xff]   ;;  %v2801_v21 = vld [vmem:[%s3983_s1 + $0x444] ss:$8 sps:$4 sm:$0xff]  }
  0x53   :  { %1957 = vmatpush1.bf16.msra.mxu0 %v2703_v22  ;;  %v2885_v22 = vld [vmem:[%s3984_s0 + $0x2c] ss:$72 sps:$4 sm:$0xff]  }
  0x54   :  { %1958 = vmatprep.subr.bf16.mxu0 %v2711_v23  ;;  %2000 = vmatpush1.bf16.msra.mxu1 %v2706_v24  ;;  %v2804_v23 = vld [vmem:[%s3983_s1 + $0x544] ss:$8 sps:$4 sm:$0xff]   ;;  %v2799_v24 = vld [vmem:[%s3983_s1 + $0x440] ss:$8 sps:$4 sm:$0xff]  }
  0x55   :  { %2001 = vmatprep.subr.bf16.mxu1 %v2714_v25  ;;  %v2807_v25 = vld [vmem:[%s3983_s1 + $0x434] ss:$8 sps:$4 sm:$0xff]  }
  0x57   :  { %1959 = vmatpush1.bf16.msra.mxu0 %v2709_v26  ;;  %v2802_v26 = vld [vmem:[%s3983_s1 + $0x540] ss:$8 sps:$4 sm:$0xff]  }
  0x58   :  { %1960 = vmatprep.subr.bf16.mxu0 %v2717_v27  ;;  %2002 = vmatpush1.bf16.msra.mxu1 %v2712_v28  ;;  %v2810_v27 = vld [vmem:[%s3983_s1 + $0x534] ss:$8 sps:$4 sm:$0xff]   ;;  %v2805_v28 = vld [vmem:[%s3983_s1 + $0x430] ss:$8 sps:$4 sm:$0xff]  }
  0x59   :  { %2003 = vmatprep.subr.bf16.mxu1 %v2720_v29  ;;  %v2813_v29 = vld [vmem:[%s3983_s1 + $0x424] ss:$8 sps:$4 sm:$0xff]  }
  0x5b   :  { %1961 = vmatpush1.bf16.msra.mxu0 %v2715_v30  ;;  %v2808_v30 = vld [vmem:[%s3983_s1 + $0x530] ss:$8 sps:$4 sm:$0xff]  }
  0x5c   :  { %1962 = vmatprep.subr.bf16.mxu0 %v2723_v32  ;;  %2004 = vmatpush1.bf16.msra.mxu1 %v2718_v31  ;;  %v2816_v31 = vld [vmem:[%s3983_s1 + $0x524] ss:$8 sps:$4 sm:$0xff]   ;;  %v2811_v32 = vld [vmem:[%s3983_s1 + $0x420] ss:$8 sps:$4 sm:$0xff]  }
  0x5d   :  { %2005 = vmatprep.subr.bf16.mxu1 %v2726_v34  ;;  %v2814_v34 = vld [vmem:[%s3983_s1 + $0x520] ss:$8 sps:$4 sm:$0xff]  }
  0x5f   :  { %1963 = vmatpush1.bf16.msra.mxu0 %v2721_v35  ;;  %v2822_v35 = vld [vmem:[%s3983_s1 + $0x514] ss:$8 sps:$4 sm:$0xff]  }
  0x60   :  { %1964 = vmatprep.subr.bf16.mxu0 %v2729_v37  ;;  %2006 = vmatpush1.bf16.msra.mxu1 %v2724_v38  ;;  %v2825_v37 = vld [vmem:[%s3983_s1 + $0x404] ss:$8 sps:$4 sm:$0xff]   ;;  %v2820_v38 = vld [vmem:[%s3983_s1 + $0x510] ss:$8 sps:$4 sm:$0xff]  }
  0x61   :  { %2007 = vmatprep.subr.bf16.mxu1 %v2732_v39  ;;  %v2828_v39 = vld [vmem:[%s3983_s1 + $0x504] ss:$8 sps:$4 sm:$0xff]  }
  0x63   :  { %1965 = vmatpush2.bf16.msra.mxu0 %v2727_v40  ;;  %v2823_v40 = vld [vmem:[%s3983_s1 + $0x400] ss:$8 sps:$4 sm:$0xff]  }
  0x64   :  { %1966 = vmatprep.subr.bf16.mxu0 %v2735_v41  ;;  %2008 = vmatpush2.bf16.msra.mxu1 %v2730_v42  ;;  %v2831_v41 = vld [vmem:[%s3983_s1 + $0x4f4] ss:$8 sps:$4 sm:$0xff]   ;;  %v2826_v42 = vld [vmem:[%s3983_s1 + $0x500] ss:$8 sps:$4 sm:$0xff]  }
  0x65   :  { %2009 = vmatprep.subr.bf16.mxu1 %v2738_v43  ;;  %v2834_v43 = vld [vmem:[%s3983_s1 + $0x5f4] ss:$8 sps:$4 sm:$0xff]  }
  0x67   :  { %1967 = vmatpush2.bf16.msra.mxu0 %v2733_v44  ;;  %v2829_v44 = vld [vmem:[%s3983_s1 + $0x4f0] ss:$8 sps:$4 sm:$0xff]  }
  0x68   :  { %1968 = vmatprep.subr.bf16.mxu0 %v2741_v45  ;;  %2010 = vmatpush2.bf16.msra.mxu1 %v2736_v46  ;;  %v2837_v45 = vld [vmem:[%s3983_s1 + $0x4e4] ss:$8 sps:$4 sm:$0xff]   ;;  %v2832_v46 = vld [vmem:[%s3983_s1 + $0x5f0] ss:$8 sps:$4 sm:$0xff]  }
  0x69   :  { %2011 = vmatprep.subr.bf16.mxu1 %v2744_v47  ;;  %v2840_v47 = vld [vmem:[%s3983_s1 + $0x5e4] ss:$8 sps:$4 sm:$0xff]  }
  0x6b   :  { %1969 = vmatpush2.bf16.msra.mxu0 %v2739_v48  ;;  %v2835_v48 = vld [vmem:[%s3983_s1 + $0x4e0] ss:$8 sps:$4 sm:$0xff]  }
  0x6c   :  { %1970 = vmatprep.subr.bf16.mxu0 %v2747_v49  ;;  %2012 = vmatpush2.bf16.msra.mxu1 %v2742_v50  ;;  %v2843_v49 = vld [vmem:[%s3983_s1 + $0x4d4] ss:$8 sps:$4 sm:$0xff]   ;;  %v2838_v50 = vld [vmem:[%s3983_s1 + $0x5e0] ss:$8 sps:$4 sm:$0xff]  }
  0x6d   :  { %2013 = vmatprep.subr.bf16.mxu1 %v2750_v51  ;;  %v2846_v51 = vld [vmem:[%s3983_s1 + $0x5d4] ss:$8 sps:$4 sm:$0xff]  }
  0x6f   :  { %1971 = vmatpush2.bf16.msra.mxu0 %v2745_v52  ;;  %v2841_v52 = vld [vmem:[%s3983_s1 + $0x4d0] ss:$8 sps:$4 sm:$0xff]  }
  0x70   :  { %1972 = vmatprep.subr.bf16.mxu0 %v2753_v53  ;;  %2014 = vmatpush2.bf16.msra.mxu1 %v2748_v54  ;;  %v2849_v53 = vld [vmem:[%s3983_s1 + $0x4c4] ss:$8 sps:$4 sm:$0xff]   ;;  %v2844_v54 = vld [vmem:[%s3983_s1 + $0x5d0] ss:$8 sps:$4 sm:$0xff]  }
  0x71   :  { %2015 = vmatprep.subr.bf16.mxu1 %v2756_v55  ;;  %v2852_v55 = vld [vmem:[%s3983_s1 + $0x5c4] ss:$8 sps:$4 sm:$0xff]  }
  0x73   :  { %1973 = vmatpush2.bf16.msra.mxu0 %v2751_v56  ;;  %v2847_v56 = vld [vmem:[%s3983_s1 + $0x4c0] ss:$8 sps:$4 sm:$0xff]  }
  0x74   :  { %1974 = vmatprep.subr.bf16.mxu0 %v2759_v57  ;;  %2016 = vmatpush2.bf16.msra.mxu1 %v2754_v58  ;;  %v2855_v57 = vld [vmem:[%s3983_s1 + $0x4b4] ss:$8 sps:$4 sm:$0xff]   ;;  %v2850_v58 = vld [vmem:[%s3983_s1 + $0x5c0] ss:$8 sps:$4 sm:$0xff]  }
  0x75   :  { %2017 = vmatprep.subr.bf16.mxu1 %v2762_v59  ;;  %v2858_v59 = vld [vmem:[%s3983_s1 + $0x5b4] ss:$8 sps:$4 sm:$0xff]  }
  0x77   :  { %1975 = vmatpush2.bf16.msra.mxu0 %v2757_v60  ;;  %v2853_v60 = vld [vmem:[%s3983_s1 + $0x4b0] ss:$8 sps:$4 sm:$0xff]  }
  0x78   :  { %1976 = vmatprep.subr.bf16.mxu0 %v2765_v61  ;;  %2018 = vmatpush2.bf16.msra.mxu1 %v2760_v62  ;;  %v2861_v61 = vld [vmem:[%s3983_s1 + $0x4a4] ss:$8 sps:$4 sm:$0xff]   ;;  %v2856_v62 = vld [vmem:[%s3983_s1 + $0x5b0] ss:$8 sps:$4 sm:$0xff]  }
  0x79   :  { %2019 = vmatprep.subr.bf16.mxu1 %v2768_v63  ;;  %v2864_v63 = vld [vmem:[%s3983_s1 + $0x5a4] ss:$8 sps:$4 sm:$0xff]  }
  0x7b   :  { %1977 = vmatpush2.bf16.msra.mxu0 %v2763_v0  ;;  %v2859_v0 = vld [vmem:[%s3983_s1 + $0x4a0] ss:$8 sps:$4 sm:$0xff]  }
  0x7c   :  { %1978 = vmatprep.subr.bf16.mxu0 %v2771_v1  ;;  %2020 = vmatpush2.bf16.msra.mxu1 %v2766_v2  ;;  %v2867_v1 = vld [vmem:[%s3983_s1 + $0x494] ss:$8 sps:$4 sm:$0xff]   ;;  %v2862_v2 = vld [vmem:[%s3983_s1 + $0x5a0] ss:$8 sps:$4 sm:$0xff]  }
  0x7d   :  { %2021 = vmatprep.subr.bf16.mxu1 %v2774_v3  ;;  %v2870_v3 = vld [vmem:[%s3983_s1 + $0x594] ss:$8 sps:$4 sm:$0xff]  }
  0x7f   :  { %1979 = vmatpush2.bf16.msra.mxu0 %v2769_v4  ;;  %v2865_v4 = vld [vmem:[%s3983_s1 + $0x490] ss:$8 sps:$4 sm:$0xff]  }
  0x80   :  { %2034 = vmatprep.subr.bf16.mxu0 %v2780_v5  ;;  %2022 = vmatpush2.bf16.msra.mxu1 %v2772_v6  ;;  %v2873_v5 = vld [vmem:[%s3983_s1 + $0x484] ss:$8 sps:$4 sm:$0xff]   ;;  %v2868_v6 = vld [vmem:[%s3983_s1 + $0x590] ss:$8 sps:$4 sm:$0xff]  }
  0x81   :  { %2077 = vmatprep.subr.bf16.mxu1 %v2786_v8  ;;  %v2876_v8 = vld [vmem:[%s3983_s1 + $0x584] ss:$8 sps:$4 sm:$0xff]  }
  0x82   :  { %1981 = vmatmul.mubr.bf16.vlgmr.msra.gmra.mxu0 %v2775_v7  ;;  %v2871_v7 = vld [vmem:[%s3983_s1 + $0x480] ss:$8 sps:$4 sm:$0xff]  }
  0x83   :  { %2035 = vmatpush1.bf16.msra.mxu0 %v2778_v9  ;;  %2024 = vmatmul.mubr.bf16.vlgmr.msra.gmra.mxu1 %v2781_v10  ;;  %v2874_v9 = vld [vmem:[%s3983_s1 + $0x580] ss:$8 sps:$4 sm:$0xff]   ;;  %v2882_v10 = vld [vmem:[%s3983_s1 + $0x674] ss:$8 sps:$4 sm:$0xff]  }
  0x84   :  { %2036 = vmatprep.subr.bf16.mxu0 %v2789_v11  ;;  %2078 = vmatpush1.bf16.msra.mxu1 %v2784_v12  ;;  %v2877_v11 = vld [vmem:[%s3984_s0 + $0x20] ss:$72 sps:$4 sm:$0xff]   ;;  %v2880_v12 = vld [vmem:[%s3983_s1 + $0x670] ss:$8 sps:$4 sm:$0xff]  }
  0x85   :  { %2079 = vmatprep.subr.bf16.mxu1 %v2792_v13  ;;  %2066 = vmatprep.mubr.bf16.mxu0 %v2879_v18  ;;  %v2883_v13 = vld [vmem:[%s3984_s0 + $0x28] ss:$72 sps:$4 sm:$0xff]   ;;  %v2987_v18 = vld [vmem:[%s3984_s0 + $0x3c] ss:$72 sps:$4 sm:$0xff]  }
  0x86   :  { %2109 = vmatprep.mubr.bf16.mxu1 %v2885_v22  ;;  %v2892_v22 = vld [vmem:[%s3983_s1 + $0x760] ss:$8 sps:$4 sm:$0xff]  }
  0x87   :  { %2037 = vmatpush1.bf16.msra.mxu0 %v2787_v14  ;;  %v2888_v14 = vld [vmem:[%s3983_s1 + $0x774] ss:$8 sps:$4 sm:$0xff]  }
  0x88   :  { %2038 = vmatprep.subr.bf16.mxu0 %v2795_v15  ;;  %2080 = vmatpush1.bf16.msra.mxu1 %v2790_v16  ;;  %v2981_v15 = vld [vmem:[%s3984_s0 + $0x34] ss:$72 sps:$4 sm:$0xff]   ;;  %v2891_v16 = vld [vmem:[%s3983_s1 + $0x664] ss:$8 sps:$4 sm:$0xff]  }
  0x89   :  { %2081 = vmatprep.subr.bf16.mxu1 %v2798_v17  ;;  %v2886_v17 = vld [vmem:[%s3983_s1 + $0x770] ss:$8 sps:$4 sm:$0xff]  }
  0x8b   :  { %2039 = vmatpush1.bf16.msra.mxu0 %v2793_v19  ;;  %v2894_v19 = vld [vmem:[%s3983_s1 + $0x764] ss:$8 sps:$4 sm:$0xff]  }
  0x8c   :  { %2040 = vmatprep.subr.bf16.mxu0 %v2801_v21  ;;  %2082 = vmatpush1.bf16.msra.mxu1 %v2796_v20  ;;  %v2889_v20 = vld [vmem:[%s3983_s1 + $0x660] ss:$8 sps:$4 sm:$0xff]   ;;  %v2897_v21 = vld [vmem:[%s3983_s1 + $0x654] ss:$8 sps:$4 sm:$0xff]  }
  0x8d   :  { %2083 = vmatprep.subr.bf16.mxu1 %v2804_v23  ;;  %v2900_v23 = vld [vmem:[%s3983_s1 + $0x754] ss:$8 sps:$4 sm:$0xff]  }
  0x8f   :  { %2041 = vmatpush1.bf16.msra.mxu0 %v2799_v24  ;;  %v2895_v24 = vld [vmem:[%s3983_s1 + $0x650] ss:$8 sps:$4 sm:$0xff]  }
  0x90   :  { %2042 = vmatprep.subr.bf16.mxu0 %v2807_v25  ;;  %2084 = vmatpush1.bf16.msra.mxu1 %v2802_v26  ;;  %v2903_v25 = vld [vmem:[%s3983_s1 + $0x644] ss:$8 sps:$4 sm:$0xff]   ;;  %v2898_v26 = vld [vmem:[%s3983_s1 + $0x750] ss:$8 sps:$4 sm:$0xff]  }
  0x91   :  { %2085 = vmatprep.subr.bf16.mxu1 %v2810_v27  ;;  %v2906_v27 = vld [vmem:[%s3983_s1 + $0x744] ss:$8 sps:$4 sm:$0xff]  }
  0x93   :  { %2043 = vmatpush1.bf16.msra.mxu0 %v2805_v28  ;;  %v2901_v28 = vld [vmem:[%s3983_s1 + $0x640] ss:$8 sps:$4 sm:$0xff]  }
  0x94   :  { %2044 = vmatprep.subr.bf16.mxu0 %v2813_v29  ;;  %2086 = vmatpush1.bf16.msra.mxu1 %v2808_v30  ;;  %v2909_v29 = vld [vmem:[%s3983_s1 + $0x634] ss:$8 sps:$4 sm:$0xff]   ;;  %v2904_v30 = vld [vmem:[%s3983_s1 + $0x740] ss:$8 sps:$4 sm:$0xff]  }
  0x95   :  { %2087 = vmatprep.subr.bf16.mxu1 %v2816_v31  ;;  %v2912_v31 = vld [vmem:[%s3983_s1 + $0x734] ss:$8 sps:$4 sm:$0xff]  }
  0x97   :  { %2045 = vmatpush1.bf16.msra.mxu0 %v2811_v32  ;;  %v2907_v32 = vld [vmem:[%s3983_s1 + $0x630] ss:$8 sps:$4 sm:$0xff]  }
  0x98   :  { %2046 = vmatprep.subr.bf16.mxu0 %v2819_v33  ;;  %2088 = vmatpush1.bf16.msra.mxu1 %v2814_v34  ;;  %v2915_v33 = vld [vmem:[%s3983_s1 + $0x624] ss:$8 sps:$4 sm:$0xff]   ;;  %v2910_v34 = vld [vmem:[%s3983_s1 + $0x730] ss:$8 sps:$4 sm:$0xff]  }
  0x99   :  { %2089 = vmatprep.subr.bf16.mxu1 %v2822_v35  ;;  %v2918_v35 = vld [vmem:[%s3983_s1 + $0x724] ss:$8 sps:$4 sm:$0xff]  }
  0x9b   :  { %2047 = vmatpush1.bf16.msra.mxu0 %v2817_v36  ;;  %v2913_v36 = vld [vmem:[%s3983_s1 + $0x620] ss:$8 sps:$4 sm:$0xff]  }
  0x9c   :  { %2048 = vmatprep.subr.bf16.mxu0 %v2825_v37  ;;  %2090 = vmatpush1.bf16.msra.mxu1 %v2820_v38  ;;  %v2921_v37 = vld [vmem:[%s3983_s1 + $0x614] ss:$8 sps:$4 sm:$0xff]   ;;  %v2916_v38 = vld [vmem:[%s3983_s1 + $0x720] ss:$8 sps:$4 sm:$0xff]  }
  0x9d   :  { %2091 = vmatprep.subr.bf16.mxu1 %v2828_v39  ;;  %v2924_v39 = vld [vmem:[%s3983_s1 + $0x714] ss:$8 sps:$4 sm:$0xff]  }
  0x9f   :  { %2049 = vmatpush1.bf16.msra.mxu0 %v2823_v40  ;;  %v2919_v40 = vld [vmem:[%s3983_s1 + $0x610] ss:$8 sps:$4 sm:$0xff]  }
  0xa0   :  { %2050 = vmatprep.subr.bf16.mxu0 %v2831_v41  ;;  %2092 = vmatpush1.bf16.msra.mxu1 %v2826_v42  ;;  %v2927_v41 = vld [vmem:[%s3983_s1 + $0x604] ss:$8 sps:$4 sm:$0xff]   ;;  %v2922_v42 = vld [vmem:[%s3983_s1 + $0x710] ss:$8 sps:$4 sm:$0xff]  }
  0xa1   :  { %2093 = vmatprep.subr.bf16.mxu1 %v2834_v43  ;;  %v2930_v43 = vld [vmem:[%s3983_s1 + $0x704] ss:$8 sps:$4 sm:$0xff]  }
  0xa3   :  { %2051 = vmatpush2.bf16.msra.mxu0 %v2829_v44  ;;  %v2925_v44 = vld [vmem:[%s3983_s1 + $0x600] ss:$8 sps:$4 sm:$0xff]  }
  0xa4   :  { %2052 = vmatprep.subr.bf16.mxu0 %v2837_v45  ;;  %2094 = vmatpush2.bf16.msra.mxu1 %v2832_v46  ;;  %v2933_v45 = vld [vmem:[%s3983_s1 + $0x6f4] ss:$8 sps:$4 sm:$0xff]   ;;  %v2928_v46 = vld [vmem:[%s3983_s1 + $0x700] ss:$8 sps:$4 sm:$0xff]  }
  0xa5   :  { %2095 = vmatprep.subr.bf16.mxu1 %v2840_v47  ;;  %v2936_v47 = vld [vmem:[%s3983_s1 + $0x7f4] ss:$8 sps:$4 sm:$0xff]  }
  0xa7   :  { %2053 = vmatpush2.bf16.msra.mxu0 %v2835_v48  ;;  %v2931_v48 = vld [vmem:[%s3983_s1 + $0x6f0] ss:$8 sps:$4 sm:$0xff]  }
  0xa8   :  { %2054 = vmatprep.subr.bf16.mxu0 %v2843_v49  ;;  %2096 = vmatpush2.bf16.msra.mxu1 %v2838_v50  ;;  %v2939_v49 = vld [vmem:[%s3983_s1 + $0x6e4] ss:$8 sps:$4 sm:$0xff]   ;;  %v2934_v50 = vld [vmem:[%s3983_s1 + $0x7f0] ss:$8 sps:$4 sm:$0xff]  }
  0xa9   :  { %2097 = vmatprep.subr.bf16.mxu1 %v2846_v51  ;;  %v2942_v51 = vld [vmem:[%s3983_s1 + $0x7e4] ss:$8 sps:$4 sm:$0xff]  }
  0xab   :  { %2055 = vmatpush2.bf16.msra.mxu0 %v2841_v52  ;;  %v2937_v52 = vld [vmem:[%s3983_s1 + $0x6e0] ss:$8 sps:$4 sm:$0xff]  }
  0xac   :  { %2056 = vmatprep.subr.bf16.mxu0 %v2849_v53  ;;  %2098 = vmatpush2.bf16.msra.mxu1 %v2844_v54  ;;  %v2945_v53 = vld [vmem:[%s3983_s1 + $0x6d4] ss:$8 sps:$4 sm:$0xff]   ;;  %v2940_v54 = vld [vmem:[%s3983_s1 + $0x7e0] ss:$8 sps:$4 sm:$0xff]  }
  0xad   :  { %2099 = vmatprep.subr.bf16.mxu1 %v2852_v55  ;;  %v2948_v55 = vld [vmem:[%s3983_s1 + $0x7d4] ss:$8 sps:$4 sm:$0xff]  }
  0xaf   :  { %2057 = vmatpush2.bf16.msra.mxu0 %v2847_v56  ;;  %v2943_v56 = vld [vmem:[%s3983_s1 + $0x6d0] ss:$8 sps:$4 sm:$0xff]  }
  0xb0   :  { %2058 = vmatprep.subr.bf16.mxu0 %v2855_v57  ;;  %2100 = vmatpush2.bf16.msra.mxu1 %v2850_v58  ;;  %v2951_v57 = vld [vmem:[%s3983_s1 + $0x6c4] ss:$8 sps:$4 sm:$0xff]   ;;  %v2946_v58 = vld [vmem:[%s3983_s1 + $0x7d0] ss:$8 sps:$4 sm:$0xff]  }
  0xb1   :  { %2101 = vmatprep.subr.bf16.mxu1 %v2858_v59  ;;  %v2954_v59 = vld [vmem:[%s3983_s1 + $0x7c4] ss:$8 sps:$4 sm:$0xff]  }
  0xb3   :  { %2059 = vmatpush2.bf16.msra.mxu0 %v2853_v60  ;;  %v2949_v60 = vld [vmem:[%s3983_s1 + $0x6c0] ss:$8 sps:$4 sm:$0xff]  }
  0xb4   :  { %2060 = vmatprep.subr.bf16.mxu0 %v2861_v61  ;;  %2102 = vmatpush2.bf16.msra.mxu1 %v2856_v62  ;;  %v2957_v61 = vld [vmem:[%s3983_s1 + $0x6b4] ss:$8 sps:$4 sm:$0xff]   ;;  %v2952_v62 = vld [vmem:[%s3983_s1 + $0x7c0] ss:$8 sps:$4 sm:$0xff]  }
  0xb5   :  { %2103 = vmatprep.subr.bf16.mxu1 %v2864_v63  ;;  %v2960_v63 = vld [vmem:[%s3983_s1 + $0x7b4] ss:$8 sps:$4 sm:$0xff]  }
  0xb7   :  { %2061 = vmatpush2.bf16.msra.mxu0 %v2859_v0  ;;  %v2955_v0 = vld [vmem:[%s3983_s1 + $0x6b0] ss:$8 sps:$4 sm:$0xff]  }
  0xb8   :  { %2062 = vmatprep.subr.bf16.mxu0 %v2867_v1  ;;  %2104 = vmatpush2.bf16.msra.mxu1 %v2862_v2  ;;  %v2963_v1 = vld [vmem:[%s3983_s1 + $0x6a4] ss:$8 sps:$4 sm:$0xff]   ;;  %v2958_v2 = vld [vmem:[%s3983_s1 + $0x7b0] ss:$8 sps:$4 sm:$0xff]  }
  0xb9   :  { %2105 = vmatprep.subr.bf16.mxu1 %v2870_v3  ;;  %v2966_v3 = vld [vmem:[%s3983_s1 + $0x7a4] ss:$8 sps:$4 sm:$0xff]  }
  0xbb   :  { %2063 = vmatpush2.bf16.msra.mxu0 %v2865_v4  ;;  %v2961_v4 = vld [vmem:[%s3983_s1 + $0x6a0] ss:$8 sps:$4 sm:$0xff]  }
  0xbc   :  { %2064 = vmatprep.subr.bf16.mxu0 %v2873_v5  ;;  %2106 = vmatpush2.bf16.msra.mxu1 %v2868_v6  ;;  %v2969_v5 = vld [vmem:[%s3983_s1 + $0x694] ss:$8 sps:$4 sm:$0xff]   ;;  %v2964_v6 = vld [vmem:[%s3983_s1 + $0x7a0] ss:$8 sps:$4 sm:$0xff]  }
  0xbd   :  { %2107 = vmatprep.subr.bf16.mxu1 %v2876_v8  ;;  %v2967_v8 = vld [vmem:[%s3983_s1 + $0x690] ss:$8 sps:$4 sm:$0xff]  }
  0xbf   :  { %2065 = vmatpush2.bf16.msra.mxu0 %v2871_v7  ;;  %v2972_v7 = vld [vmem:[%s3983_s1 + $0x794] ss:$8 sps:$4 sm:$0xff]  }
  0xc0   :  { %2120 = vmatprep.subr.bf16.mxu0 %v2882_v10  ;;  %2108 = vmatpush2.bf16.msra.mxu1 %v2874_v9  ;;  %v2975_v9 = vld [vmem:[%s3983_s1 + $0x684] ss:$8 sps:$4 sm:$0xff]   ;;  %v2970_v10 = vld [vmem:[%s3983_s1 + $0x790] ss:$8 sps:$4 sm:$0xff]  }
  0xc1   :  { %2163 = vmatprep.subr.bf16.mxu1 %v2888_v14  ;;  %v2976_v14 = vld [vmem:[%s3983_s1 + $0x780] ss:$8 sps:$4 sm:$0xff]  }
  0xc2   :  { %2067 = vmatmul.mubr.bf16.vlgmr.msra.gmra.mxu0 %v2877_v11  ;;  %v2978_v11 = vld [vmem:[%s3983_s1 + $0x784] ss:$8 sps:$4 sm:$0xff]  }
  0xc3   :  { %2121 = vmatpush1.bf16.msra.mxu0 %v2880_v12  ;;  %2152 = vmatprep.mubr.bf16.mxu0 %v2981_v15  ;;  %v2973_v12 = vld [vmem:[%s3983_s1 + $0x680] ss:$8 sps:$4 sm:$0xff]   ;;  %v2979_v15 = vld [vmem:[%s3984_s0 + $0x30] ss:$72 sps:$4 sm:$0xff]  }
  0xc4   :  { %2110 = vmatmul.mubr.bf16.vlgmr.msra.gmra.mxu1 %v2883_v13  ;;  %2122 = vmatprep.subr.bf16.mxu0 %v2891_v16  ;;  %v2984_v13 = vld [vmem:[%s3983_s1 + $0x874] ss:$8 sps:$4 sm:$0xff]   ;;  %v2982_v16 = vld [vmem:[%s3983_s1 + $0x870] ss:$8 sps:$4 sm:$0xff]  }
  0xc5   :  { %2164 = vmatpush1.bf16.msra.mxu1 %v2886_v17  ;;  %2195 = vmatprep.mubr.bf16.mxu1 %v2987_v18  ;;  %v3035_v17 = vld [vmem:[%s3984_s0 + $0x44] ss:$72 sps:$4 sm:$0xff]   ;;  %v2985_v18 = vld [vmem:[%s3984_s0 + $0x38] ss:$72 sps:$4 sm:$0xff]  }
  0xc6   :  { %2165 = vmatprep.subr.bf16.mxu1 %v2894_v19  ;;  %v2990_v19 = vld [vmem:[%s3983_s1 + $0x864] ss:$8 sps:$4 sm:$0xff]  }
  0xc7   :  { %2123 = vmatpush1.bf16.msra.mxu0 %v2889_v20  ;;  %v2988_v20 = vld [vmem:[%s3983_s1 + $0x860] ss:$8 sps:$4 sm:$0xff]  }
  0xc8   :  { %2124 = vmatprep.subr.bf16.mxu0 %v2897_v21  ;;  %v2993_v21 = vld [vmem:[%s3983_s1 + $0x854] ss:$8 sps:$4 sm:$0xff]  }
  0xc9   :  { %2166 = vmatpush1.bf16.msra.mxu1 %v2892_v22  ;;  %v2991_v22 = vld [vmem:[%s3983_s1 + $0x850] ss:$8 sps:$4 sm:$0xff]  }
  0xca   :  { %2167 = vmatprep.subr.bf16.mxu1 %v2900_v23  ;;  %v2996_v23 = vld [vmem:[%s3983_s1 + $0x844] ss:$8 sps:$4 sm:$0xff]  }
  0xcb   :  { %2125 = vmatpush1.bf16.msra.mxu0 %v2895_v24  ;;  %v2994_v24 = vld [vmem:[%s3983_s1 + $0x840] ss:$8 sps:$4 sm:$0xff]  }
  0xcc   :  { %2126 = vmatprep.subr.bf16.mxu0 %v2903_v25  ;;  %v2999_v25 = vld [vmem:[%s3983_s1 + $0x834] ss:$8 sps:$4 sm:$0xff]  }
  0xcd   :  { %2168 = vmatpush1.bf16.msra.mxu1 %v2898_v26  ;;  %v2997_v26 = vld [vmem:[%s3983_s1 + $0x830] ss:$8 sps:$4 sm:$0xff]  }
  0xce   :  { %2169 = vmatprep.subr.bf16.mxu1 %v2906_v27  ;;  %v3002_v27 = vld [vmem:[%s3983_s1 + $0x824] ss:$8 sps:$4 sm:$0xff]  }
  0xcf   :  { %2127 = vmatpush1.bf16.msra.mxu0 %v2901_v28  ;;  %v3000_v28 = vld [vmem:[%s3983_s1 + $0x820] ss:$8 sps:$4 sm:$0xff]  }
  0xd0   :  { %2128 = vmatprep.subr.bf16.mxu0 %v2909_v29  ;;  %v3005_v29 = vld [vmem:[%s3983_s1 + $0x814] ss:$8 sps:$4 sm:$0xff]  }
  0xd1   :  { %2170 = vmatpush1.bf16.msra.mxu1 %v2904_v30  ;;  %v3003_v30 = vld [vmem:[%s3983_s1 + $0x810] ss:$8 sps:$4 sm:$0xff]  }
  0xd2   :  { %2171 = vmatprep.subr.bf16.mxu1 %v2912_v31  ;;  %v3008_v31 = vld [vmem:[%s3983_s1 + $0x804] ss:$8 sps:$4 sm:$0xff]  }
  0xd3   :  { %2129 = vmatpush1.bf16.msra.mxu0 %v2907_v32  ;;  %v3006_v32 = vld [vmem:[%s3983_s1 + $0x800] ss:$8 sps:$4 sm:$0xff]  }
  0xd4   :  { %2130 = vmatprep.subr.bf16.mxu0 %v2915_v33  ;;  %v3011_v33 = vld [vmem:[%s3983_s1 + $0x8f4] ss:$8 sps:$4 sm:$0xff]  }
  0xd5   :  { %2172 = vmatpush1.bf16.msra.mxu1 %v2910_v34  ;;  %v3009_v34 = vld [vmem:[%s3983_s1 + $0x8f0] ss:$8 sps:$4 sm:$0xff]  }
  0xd6   :  { %2173 = vmatprep.subr.bf16.mxu1 %v2918_v35  ;;  %v3014_v35 = vld [vmem:[%s3983_s1 + $0x8e4] ss:$8 sps:$4 sm:$0xff]  }
  0xd7   :  { %2131 = vmatpush1.bf16.msra.mxu0 %v2913_v36  ;;  %v3012_v36 = vld [vmem:[%s3983_s1 + $0x8e0] ss:$8 sps:$4 sm:$0xff]  }
  0xd8   :  { %2132 = vmatprep.subr.bf16.mxu0 %v2921_v37  ;;  %v3017_v37 = vld [vmem:[%s3983_s1 + $0x8d4] ss:$8 sps:$4 sm:$0xff]  }
  0xd9   :  { %2174 = vmatpush1.bf16.msra.mxu1 %v2916_v38  ;;  %v3015_v38 = vld [vmem:[%s3983_s1 + $0x8d0] ss:$8 sps:$4 sm:$0xff]  }
  0xda   :  { %2175 = vmatprep.subr.bf16.mxu1 %v2924_v39  ;;  %v3020_v39 = vld [vmem:[%s3983_s1 + $0x8c4] ss:$8 sps:$4 sm:$0xff]  }
  0xdb   :  { %2133 = vmatpush1.bf16.msra.mxu0 %v2919_v40  ;;  %v3018_v40 = vld [vmem:[%s3983_s1 + $0x8c0] ss:$8 sps:$4 sm:$0xff]  }
  0xdc   :  { %2134 = vmatprep.subr.bf16.mxu0 %v2927_v41  ;;  %v3023_v41 = vld [vmem:[%s3983_s1 + $0x8b4] ss:$8 sps:$4 sm:$0xff]  }
  0xdd   :  { %2176 = vmatpush1.bf16.msra.mxu1 %v2922_v42  ;;  %v3021_v42 = vld [vmem:[%s3983_s1 + $0x8b0] ss:$8 sps:$4 sm:$0xff]  }
  0xde   :  { %2177 = vmatprep.subr.bf16.mxu1 %v2930_v43  ;;  %v3026_v43 = vld [vmem:[%s3983_s1 + $0x8a4] ss:$8 sps:$4 sm:$0xff]  }
  0xdf   :  { %2135 = vmatpush1.bf16.msra.mxu0 %v2925_v44  ;;  %v3024_v44 = vld [vmem:[%s3983_s1 + $0x8a0] ss:$8 sps:$4 sm:$0xff]  }
  0xe0   :  { %2136 = vmatprep.subr.bf16.mxu0 %v2933_v45  ;;  %v3029_v45 = vld [vmem:[%s3983_s1 + $0x894] ss:$8 sps:$4 sm:$0xff]  }
  0xe1   :  { %2178 = vmatpush1.bf16.msra.mxu1 %v2928_v46  ;;  %v3027_v46 = vld [vmem:[%s3983_s1 + $0x890] ss:$8 sps:$4 sm:$0xff]  }
  0xe2   :  { %2179 = vmatprep.subr.bf16.mxu1 %v2936_v47  ;;  %v3032_v47 = vld [vmem:[%s3983_s1 + $0x884] ss:$8 sps:$4 sm:$0xff]  }
  0xe3   :  { %2137 = vmatpush2.bf16.msra.mxu0 %v2931_v48  ;;  %v3030_v48 = vld [vmem:[%s3983_s1 + $0x880] ss:$8 sps:$4 sm:$0xff]  }
  0xe4   :  { %2138 = vmatprep.subr.bf16.mxu0 %v2939_v49  ;;  %v3033_v49 = vld [vmem:[%s3984_s0 + $0x40] ss:$72 sps:$4 sm:$0xff]  }
  0xe5   :  { %2180 = vmatpush2.bf16.msra.mxu1 %v2934_v50 }
  0xe6   :  { %2181 = vmatprep.subr.bf16.mxu1 %v2942_v51 }
  0xe7   :  { %2139 = vmatpush2.bf16.msra.mxu0 %v2937_v52 }
  0xe8   :  { %2140 = vmatprep.subr.bf16.mxu0 %v2945_v53 }
  0xe9   :  { %2182 = vmatpush2.bf16.msra.mxu1 %v2940_v54 }
  0xea   :  { %2183 = vmatprep.subr.bf16.mxu1 %v2948_v55 }
  0xeb   :  { %2141 = vmatpush2.bf16.msra.mxu0 %v2943_v56 }
  0xec   :  { %2142 = vmatprep.subr.bf16.mxu0 %v2951_v57 }
  0xed   :  { %2184 = vmatpush2.bf16.msra.mxu1 %v2946_v58 }
  0xee   :  { %2185 = vmatprep.subr.bf16.mxu1 %v2954_v59 }
  0xef   :  { %2143 = vmatpush2.bf16.msra.mxu0 %v2949_v60 }
  0xf0   :  { %2144 = vmatprep.subr.bf16.mxu0 %v2957_v61  ;;  %v322_v61 = vlaneseq }
  0xf1   :  { %2186 = vmatpush2.bf16.msra.mxu1 %v2952_v62 }
  0xf2   :  { %2187 = vmatprep.subr.bf16.mxu1 %v2960_v63 }
  0xf3   :  { %2145 = vmatpush2.bf16.msra.mxu0 %v2955_v0  ;;  %v323_v0 = vshrl.u32 %v322_v61, 7 }
  0xf4   :  { %2146 = vmatprep.subr.bf16.mxu0 %v2963_v1 }
  0xf5   :  { %2188 = vmatpush2.bf16.msra.mxu1 %v2958_v2 }
  0xf6   :  { %2189 = vmatprep.subr.bf16.mxu1 %v2966_v3  ;;  %v324_v3 = vsub.s32 0, %v323_v0 }
  0xf7   :  { %2147 = vmatpush2.bf16.msra.mxu0 %v2961_v4  ;;  %v328_v4 = vsub.s32 1, %v323_v0 }
  0xf8   :  { %2148 = vmatprep.subr.bf16.mxu0 %v2969_v5  ;;  %v320_v5 = vld [vmem:[%s3985_s2] sm:$0x3] }
  0xf9   :  { %2190 = vmatpush2.bf16.msra.mxu1 %v2964_v6 }
  0xfa   :  { %2191 = vmatprep.subr.bf16.mxu1 %v2972_v7 }
  0xfb   :  { %2149 = vmatpush2.bf16.msra.mxu0 %v2967_v8  ;;  %v325_v8 = vrot.slane %v320_v5, %v324_v3 }
  0xfc   :  { %2150 = vmatprep.subr.bf16.mxu0 %v2975_v9  ;;  %v329_v9 = vrot.slane %v320_v5, %v328_v4 }
  0xfd   :  { %2192 = vmatpush2.bf16.msra.mxu1 %v2970_v10 }
  0xfe   :  { %2193 = vmatprep.subr.bf16.mxu1 %v2978_v11 }
  0xff   :  { %2151 = vmatpush2.bf16.msra.mxu0 %v2973_v12 }
 0x100   :  { %2206 = vmatprep.subr.bf16.mxu0 %v2984_v13 }
 0x101   :  { %2194 = vmatpush2.bf16.msra.mxu1 %v2976_v14 }
 0x102   :  { %2153 = vmatmul.mubr.bf16.vlgmr.msra.gmra.mxu0 %v2979_v15  ;;  %v1896_v50 = vpop.f32.mrf.mxu0 }
 0x103   :  { %2207 = vmatpush1.bf16.msra.mxu0 %v2982_v16  ;;  %2238 = vmatprep.mubr.bf16.mxu0 %v3035_v17  ;;  %v1939_v52 = vpop.f32.mrf.mxu1  ;;  %v1897_v12 = vadd.f32 %v1896_v50, %v325_v8 }
 0x104   :  { %2196 = vmatmul.mubr.bf16.vlgmr.msra.gmra.mxu1 %v2985_v18  ;;  %2208 = vmatprep.subr.bf16.mxu0 %v2990_v19  ;;  %v1898_v51 = vpop.f32.mrf.mxu0 }
 0x105   :  { %v1941_v54 = vpop.f32.mrf.mxu1  ;;  %v1899_v13 = vadd.f32 %v1898_v51, %v329_v9  ;;  %v1940_v16 = vadd.f32 %v1939_v52, %v1897_v12 }
 0x106   :  { %v1900_v53 = vpop.f32.mrf.mxu0 }
 0x107   :  { %2209 = vmatpush1.bf16.msra.mxu0 %v2988_v20  ;;  %v1943_v56 = vpop.f32.mrf.mxu1  ;;  %v1901_v17 = vadd.f32 %v1900_v53, %v325_v8  ;;  %v1942_v18 = vadd.f32 %v1941_v54, %v1899_v13 }
 0x108   :  { %2210 = vmatprep.subr.bf16.mxu0 %v2993_v21  ;;  %v1902_v55 = vpop.f32.mrf.mxu0 }
 0x109   :  { %v1945_v58 = vpop.f32.mrf.mxu1  ;;  %v1903_v19 = vadd.f32 %v1902_v55, %v329_v9 }
 0x10b   :  { %2211 = vmatpush1.bf16.msra.mxu0 %v2991_v22 }
 0x10c   :  { %2212 = vmatprep.subr.bf16.mxu0 %v2996_v23 }
 0x10f   :  { %2213 = vmatpush1.bf16.msra.mxu0 %v2994_v24 }
 0x110   :  { %2214 = vmatprep.subr.bf16.mxu0 %v2999_v25  ;;  %v1944_v25 = vadd.f32 %v1943_v56, %v1901_v17 }
 0x113   :  { %2215 = vmatpush1.bf16.msra.mxu0 %v2997_v26  ;;  %v1946_v26 = vadd.f32 %v1945_v58, %v1903_v19 }
 0x114   :  { %2216 = vmatprep.subr.bf16.mxu0 %v3002_v27 }
 0x117   :  { %2217 = vmatpush1.bf16.msra.mxu0 %v3000_v28 }
 0x118   :  { %2218 = vmatprep.subr.bf16.mxu0 %v3005_v29 }
 0x11b   :  { %2219 = vmatpush1.bf16.msra.mxu0 %v3003_v30 }
 0x11c   :  { %2220 = vmatprep.subr.bf16.mxu0 %v3008_v31 }
 0x11f   :  { %2221 = vmatpush1.bf16.msra.mxu0 %v3006_v32 }
 0x120   :  { %2222 = vmatprep.subr.bf16.mxu0 %v3011_v33 }
 0x123   :  { %2223 = vmatpush2.bf16.msra.mxu0 %v3009_v34 }
 0x124   :  { %2224 = vmatprep.subr.bf16.mxu0 %v3014_v35 }
 0x127   :  { %2225 = vmatpush2.bf16.msra.mxu0 %v3012_v36 }
 0x128   :  { %2226 = vmatprep.subr.bf16.mxu0 %v3017_v37 }
 0x12b   :  { %2227 = vmatpush2.bf16.msra.mxu0 %v3015_v38 }
 0x12c   :  { %2228 = vmatprep.subr.bf16.mxu0 %v3020_v39 }
 0x12f   :  { %2229 = vmatpush2.bf16.msra.mxu0 %v3018_v40 }
 0x130   :  { %2230 = vmatprep.subr.bf16.mxu0 %v3023_v41 }
 0x133   :  { %2231 = vmatpush2.bf16.msra.mxu0 %v3021_v42 }
 0x134   :  { %2232 = vmatprep.subr.bf16.mxu0 %v3026_v43 }
 0x137   :  { %2233 = vmatpush2.bf16.msra.mxu0 %v3024_v44 }
 0x138   :  { %2234 = vmatprep.subr.bf16.mxu0 %v3029_v45 }
 0x13b   :  { %2235 = vmatpush2.bf16.msra.mxu0 %v3027_v46 }
 0x13c   :  { %2236 = vmatprep.subr.bf16.mxu0 %v3032_v47 }
 0x13f   :  { %2237 = vmatpush2.bf16.msra.mxu0 %v3030_v48 }
 0x142   :  { %2239 = vmatmul.mubr.bf16.vlgmr.msra.gmra.mxu0 %v3033_v49  ;;  %v1982_v57 = vpop.f32.mrf.mxu0 }
 0x143   :  { %v2025_v60 = vpop.f32.mrf.mxu1  ;;  %v1983_v22 = vadd.f32 %v1982_v57, %v1940_v16 }
 0x144   :  { %v1984_v59 = vpop.f32.mrf.mxu0 }
 0x145   :  { %v2027_v63 = vpop.f32.mrf.mxu1  ;;  %v1985_v23 = vadd.f32 %v1984_v59, %v1942_v18  ;;  %v2026_v28 = vadd.f32 %v2025_v60, %v1983_v22 }
 0x146   :  { %v1986_v62 = vpop.f32.mrf.mxu0 }
 0x147   :  { %v2029_v2 = vpop.f32.mrf.mxu1  ;;  %v1987_v29 = vadd.f32 %v1986_v62, %v1944_v25  ;;  %v2028_v30 = vadd.f32 %v2027_v63, %v1985_v23 }
 0x148   :  { %v1988_v1 = vpop.f32.mrf.mxu0 }
 0x149   :  { %v2031_v7 = vpop.f32.mrf.mxu1  ;;  %v1989_v31 = vadd.f32 %v1988_v1, %v1946_v26  ;;  %v2030_v36 = vadd.f32 %v2029_v2, %v1987_v29 }
 0x14b   :  { %v2032_v37 = vadd.f32 %v2031_v7, %v1989_v31 }
 0x182   :  { %v2068_v6 = vpop.f32.mrf.mxu0 }
 0x183   :  { %v2069_v34 = vadd.f32 %v2068_v6, %v2026_v28 }
 0x184   :  { %v2070_v10 = vpop.f32.mrf.mxu0  ;;  %v2111_v11 = vpop.f32.mrf.mxu1 }
 0x185   :  { %v2071_v35 = vadd.f32 %v2070_v10, %v2028_v30  ;;  %v2112_v40 = vadd.f32 %v2111_v11, %v2069_v34 }
 0x186   :  { %v2072_v14 = vpop.f32.mrf.mxu0  ;;  %v2113_v15 = vpop.f32.mrf.mxu1 }
 0x187   :  { %v2073_v41 = vadd.f32 %v2072_v14, %v2030_v36  ;;  %v2114_v42 = vadd.f32 %v2113_v15, %v2071_v35 }
 0x188   :  { %v2074_v20 = vpop.f32.mrf.mxu0  ;;  %v2115_v21 = vpop.f32.mrf.mxu1 }
 0x189   :  { %v2075_v43 = vadd.f32 %v2074_v20, %v2032_v37  ;;  %v2116_v48 = vadd.f32 %v2115_v21, %v2073_v41 }
 0x18a   :  { %v2117_v27 = vpop.f32.mrf.mxu1 }
 0x18b   :  { %v2118_v49 = vadd.f32 %v2117_v27, %v2075_v43 }
 0x1c2   :  { %v2154_v24 = vpop.f32.mrf.mxu0 }
 0x1c3   :  { %v2155_v44 = vadd.f32 %v2154_v24, %v2112_v40 }
 0x1c4   :  { %v2156_v32 = vpop.f32.mrf.mxu0  ;;  %v2197_v33 = vpop.f32.mrf.mxu1 }
 0x1c5   :  { %v2157_v45 = vadd.f32 %v2156_v32, %v2114_v42  ;;  %v2198_v51 = vadd.f32 %v2197_v33, %v2155_v44 }
 0x1c6   :  { %v2158_v38 = vpop.f32.mrf.mxu0  ;;  %v2199_v39 = vpop.f32.mrf.mxu1 }
 0x1c7   :  { %v2159_v52 = vadd.f32 %v2158_v38, %v2116_v48  ;;  %v2200_v53 = vadd.f32 %v2199_v39, %v2157_v45 }
 0x1c8   :  { %v2160_v46 = vpop.f32.mrf.mxu0  ;;  %v2201_v47 = vpop.f32.mrf.mxu1 }
 0x1c9   :  { %v2161_v54 = vadd.f32 %v2160_v46, %v2118_v49  ;;  %v2202_v60 = vadd.f32 %v2201_v47, %v2159_v52 }
 0x1ca   :  { %v2203_v55 = vpop.f32.mrf.mxu1 }
 0x1cb   :  { %v2204_v61 = vadd.f32 %v2203_v55, %v2161_v54 }
 0x202   :  { %v2240_v50 = vpop.f32.mrf.mxu0 }
 0x203   :  { %v2241_v57 = vadd.f32 %v2240_v50, %v2198_v51 }
 0x204   :  { %v2242_v56 = vpop.f32.mrf.mxu0 }
 0x205   :  { %v2243_v58 = vadd.f32 %v2242_v56, %v2200_v53 }
 0x206   :  { %v2244_v59 = vpop.f32.mrf.mxu0 }
 0x207   :  { %v2575_v62 = vpack.c.bf16 %v2243_v58, %v2241_v57  ;;  %v2245_v0 = vadd.f32 %v2244_v59, %v2202_v60 }
 0x208   :  { %v2246_v63 = vpop.f32.mrf.mxu0 }
 0x209   :  { %2261 = vst [vmem:[%s3986_s3] sm:$0xff] %v2575_v62  ;;  %v2247_v1 = vadd.f32 %v2246_v63, %v2204_v61 }
 0x20b   :  { %v2576_v2 = vpack.c.bf16 %v2247_v1, %v2245_v0 }
 0x20d   :  { %2262 = vst [vmem:[%s3986_s3 + $0x8] sm:$0xff] %v2576_v2 }

// kernel: vqvae_forward.36
= control target key start
LH: loop header
LB: loop body
LE: loop exit
PB: predicated region body
PF: predicated region fallthrough
CT: control target
= control target key end

     0   :  { %v50_v34 = vlaneseq  ;;  %s503_s1 = inlined_call_operand.vmem [shape: bf16[256,256], index: 1, kind: input, shape index: {}]   ;;  %s504_s0 = inlined_call_operand.vmem [shape: bf16[16,256], index: 0, kind: input, shape index: {}]   ;;  %s505_s2 = inlined_call_operand.vmem [shape: f32[1,256], index: 2, kind: input, shape index: {}]   ;;  %s506_s3 = inlined_call_operand.vmem [shape: f32[16,256], index: 3, kind: output, shape index: {}]  }
   0x1   :  { %v315_v0 = vld [vmem:[%s503_s1 + $0x74] ss:$8 sps:$4 sm:$0xff]   ;;  %v317_v1 = vld [vmem:[%s503_s1 + $0x70] ss:$8 sps:$4 sm:$0xff]   ;;  %v318_v2 = vld [vmem:[%s503_s1 + $0x64] ss:$8 sps:$4 sm:$0xff]  }
   0x2   :  { %230 = vmatprep.subr.bf16.mxu0 %v315_v0  ;;  %v320_v3 = vld [vmem:[%s503_s1 + $0x60] ss:$8 sps:$4 sm:$0xff]   ;;  %v321_v4 = vld [vmem:[%s503_s1 + $0x54] ss:$8 sps:$4 sm:$0xff]   ;;  %v323_v5 = vld [vmem:[%s503_s1 + $0x50] ss:$8 sps:$4 sm:$0xff]  }
   0x3   :  { %231 = vmatpush1.bf16.msra.mxu0 %v317_v1  ;;  %v324_v6 = vld [vmem:[%s503_s1 + $0x44] ss:$8 sps:$4 sm:$0xff]   ;;  %v326_v7 = vld [vmem:[%s503_s1 + $0x40] ss:$8 sps:$4 sm:$0xff]   ;;  %v327_v8 = vld [vmem:[%s503_s1 + $0x34] ss:$8 sps:$4 sm:$0xff]  }
   0x4   :  { %232 = vmatprep.subr.bf16.mxu0 %v318_v2  ;;  %v329_v9 = vld [vmem:[%s503_s1 + $0x30] ss:$8 sps:$4 sm:$0xff]   ;;  %v330_v10 = vld [vmem:[%s503_s1 + $0x24] ss:$8 sps:$4 sm:$0xff]   ;;  %v332_v11 = vld [vmem:[%s503_s1 + $0x20] ss:$8 sps:$4 sm:$0xff]  }
   0x5   :  { %v333_v12 = vld [vmem:[%s503_s1 + $0x14] ss:$8 sps:$4 sm:$0xff]   ;;  %v365_v13 = vld [vmem:[%s504_s0 + $0x4] ss:$8 sps:$4 sm:$0xff]   ;;  %v335_v14 = vld [vmem:[%s503_s1 + $0x10] ss:$8 sps:$4 sm:$0xff]  }
   0x6   :  { %v336_v15 = vld [vmem:[%s503_s1 + $0x4] ss:$8 sps:$4 sm:$0xff]   ;;  %262 = vmatprep.mubr.bf16.mxu0 %v365_v13  ;;  %v338_v16 = vld [vmem:[%s503_s1] ss:$8 sps:$4 sm:$0xff]   ;;  %v339_v17 = vld [vmem:[%s503_s1 + $0xf4] ss:$8 sps:$4 sm:$0xff]  }
   0x7   :  { %233 = vmatpush1.bf16.msra.mxu0 %v320_v3  ;;  %v341_v18 = vld [vmem:[%s503_s1 + $0xf0] ss:$8 sps:$4 sm:$0xff]   ;;  %v342_v19 = vld [vmem:[%s503_s1 + $0xe4] ss:$8 sps:$4 sm:$0xff]   ;;  %v344_v20 = vld [vmem:[%s503_s1 + $0xe0] ss:$8 sps:$4 sm:$0xff]  }
   0x8   :  { %234 = vmatprep.subr.bf16.mxu0 %v321_v4  ;;  %v345_v21 = vld [vmem:[%s503_s1 + $0xd4] ss:$8 sps:$4 sm:$0xff]   ;;  %v347_v22 = vld [vmem:[%s503_s1 + $0xd0] ss:$8 sps:$4 sm:$0xff]   ;;  %v348_v23 = vld [vmem:[%s503_s1 + $0xc4] ss:$8 sps:$4 sm:$0xff]  }
   0x9   :  { %v350_v24 = vld [vmem:[%s503_s1 + $0xc0] ss:$8 sps:$4 sm:$0xff]   ;;  %v351_v25 = vld [vmem:[%s503_s1 + $0xb4] ss:$8 sps:$4 sm:$0xff]   ;;  %v353_v26 = vld [vmem:[%s503_s1 + $0xb0] ss:$8 sps:$4 sm:$0xff]  }
   0xa   :  { %v354_v27 = vld [vmem:[%s503_s1 + $0xa4] ss:$8 sps:$4 sm:$0xff]   ;;  %v356_v28 = vld [vmem:[%s503_s1 + $0xa0] ss:$8 sps:$4 sm:$0xff]   ;;  %v357_v29 = vld [vmem:[%s503_s1 + $0x94] ss:$8 sps:$4 sm:$0xff]  }
   0xb   :  { %235 = vmatpush1.bf16.msra.mxu0 %v323_v5  ;;  %v359_v30 = vld [vmem:[%s503_s1 + $0x90] ss:$8 sps:$4 sm:$0xff]   ;;  %v360_v31 = vld [vmem:[%s503_s1 + $0x84] ss:$8 sps:$4 sm:$0xff]   ;;  %v362_v32 = vld [vmem:[%s503_s1 + $0x80] ss:$8 sps:$4 sm:$0xff]  }
   0xc   :  { %236 = vmatprep.subr.bf16.mxu0 %v324_v6  ;;  %v363_v33 = vld [vmem:[%s504_s0] ss:$8 sps:$4 sm:$0xff]   ;;  %v51_v35 = vshrl.u32 %v50_v34, 7 }
   0xd   :  { %v48_v37 = vld [vmem:[%s505_s2] sm:$0x3] }
   0xe   :  { %v52_v36 = vsub.s32 0, %v51_v35  ;;  %v56_v38 = vsub.s32 1, %v51_v35 }
   0xf   :  { %237 = vmatpush1.bf16.msra.mxu0 %v326_v7 }
  0x10   :  { %238 = vmatprep.subr.bf16.mxu0 %v327_v8  ;;  %v53_v39 = vrot.slane %v48_v37, %v52_v36  ;;  %v57_v40 = vrot.slane %v48_v37, %v56_v38 }
  0x13   :  { %239 = vmatpush1.bf16.msra.mxu0 %v329_v9 }
  0x14   :  { %240 = vmatprep.subr.bf16.mxu0 %v330_v10 }
  0x17   :  { %241 = vmatpush1.bf16.msra.mxu0 %v332_v11 }
  0x18   :  { %242 = vmatprep.subr.bf16.mxu0 %v333_v12 }
  0x1b   :  { %243 = vmatpush1.bf16.msra.mxu0 %v335_v14 }
  0x1c   :  { %244 = vmatprep.subr.bf16.mxu0 %v336_v15 }
  0x1f   :  { %245 = vmatpush1.bf16.msra.mxu0 %v338_v16 }
  0x20   :  { %246 = vmatprep.subr.bf16.mxu0 %v339_v17 }
  0x23   :  { %247 = vmatpush2.bf16.msra.mxu0 %v341_v18 }
  0x24   :  { %248 = vmatprep.subr.bf16.mxu0 %v342_v19 }
  0x27   :  { %249 = vmatpush2.bf16.msra.mxu0 %v344_v20 }
  0x28   :  { %250 = vmatprep.subr.bf16.mxu0 %v345_v21 }
  0x2b   :  { %251 = vmatpush2.bf16.msra.mxu0 %v347_v22 }
  0x2c   :  { %252 = vmatprep.subr.bf16.mxu0 %v348_v23 }
  0x2f   :  { %253 = vmatpush2.bf16.msra.mxu0 %v350_v24 }
  0x30   :  { %254 = vmatprep.subr.bf16.mxu0 %v351_v25 }
  0x33   :  { %255 = vmatpush2.bf16.msra.mxu0 %v353_v26 }
  0x34   :  { %256 = vmatprep.subr.bf16.mxu0 %v354_v27 }
  0x37   :  { %257 = vmatpush2.bf16.msra.mxu0 %v356_v28 }
  0x38   :  { %258 = vmatprep.subr.bf16.mxu0 %v357_v29 }
  0x3b   :  { %259 = vmatpush2.bf16.msra.mxu0 %v359_v30 }
  0x3c   :  { %260 = vmatprep.subr.bf16.mxu0 %v360_v31 }
  0x3f   :  { %261 = vmatpush2.bf16.msra.mxu0 %v362_v32 }
  0x42   :  { %263 = vmatmul.mubr.bf16.vlgmr.msra.gmra.mxu0 %v363_v33 }
 0x102   :  { %v264_v41 = vpop.f32.mrf.mxu0 }
 0x103   :  { %v265_v42 = vadd.f32 %v264_v41, %v53_v39 }
 0x104   :  { %v266_v43 = vpop.f32.mrf.mxu0 }
 0x105   :  { %273 = vst [vmem:[%s506_s3] sm:$0xff] %v265_v42  ;;  %v267_v44 = vadd.f32 %v266_v43, %v57_v40 }
 0x106   :  { %v268_v45 = vpop.f32.mrf.mxu0 }
 0x107   :  { %274 = vst [vmem:[%s506_s3 + $0x8] sm:$0xff] %v267_v44  ;;  %v269_v46 = vadd.f32 %v268_v45, %v53_v39 }
 0x108   :  { %v270_v47 = vpop.f32.mrf.mxu0 }
 0x109   :  { %275 = vst [vmem:[%s506_s3 + $0x10] sm:$0xff] %v269_v46  ;;  %v271_v48 = vadd.f32 %v270_v47, %v57_v40 }
 0x10b   :  { %276 = vst [vmem:[%s506_s3 + $0x18] sm:$0xff] %v271_v48 }

// kernel: vqvae_forward.38
= control target key start
LH: loop header
LB: loop body
LE: loop exit
PB: predicated region body
PF: predicated region fallthrough
CT: control target
= control target key end

     0   :  { %v50_v34 = vlaneseq  ;;  %s511_s1 = inlined_call_operand.vmem [shape: bf16[256,256], index: 1, kind: input, shape index: {}]   ;;  %s512_s0 = inlined_call_operand.vmem [shape: bf16[16,256], index: 0, kind: input, shape index: {}]   ;;  %s513_s2 = inlined_call_operand.vmem [shape: f32[1,256], index: 2, kind: input, shape index: {}]   ;;  %s514_s3 = inlined_call_operand.vmem [shape: bf16[16,256], index: 3, kind: output, shape index: {}]  }
   0x1   :  { %v329_v0 = vld [vmem:[%s511_s1 + $0x74] ss:$8 sps:$4 sm:$0xff]   ;;  %v331_v1 = vld [vmem:[%s511_s1 + $0x70] ss:$8 sps:$4 sm:$0xff]   ;;  %v332_v2 = vld [vmem:[%s511_s1 + $0x64] ss:$8 sps:$4 sm:$0xff]  }
   0x2   :  { %230 = vmatprep.subr.bf16.mxu0 %v329_v0  ;;  %v334_v3 = vld [vmem:[%s511_s1 + $0x60] ss:$8 sps:$4 sm:$0xff]   ;;  %v335_v4 = vld [vmem:[%s511_s1 + $0x54] ss:$8 sps:$4 sm:$0xff]   ;;  %v337_v5 = vld [vmem:[%s511_s1 + $0x50] ss:$8 sps:$4 sm:$0xff]  }
   0x3   :  { %231 = vmatpush1.bf16.msra.mxu0 %v331_v1  ;;  %v338_v6 = vld [vmem:[%s511_s1 + $0x44] ss:$8 sps:$4 sm:$0xff]   ;;  %v340_v7 = vld [vmem:[%s511_s1 + $0x40] ss:$8 sps:$4 sm:$0xff]   ;;  %v341_v8 = vld [vmem:[%s511_s1 + $0x34] ss:$8 sps:$4 sm:$0xff]  }
   0x4   :  { %232 = vmatprep.subr.bf16.mxu0 %v332_v2  ;;  %v343_v9 = vld [vmem:[%s511_s1 + $0x30] ss:$8 sps:$4 sm:$0xff]   ;;  %v344_v10 = vld [vmem:[%s511_s1 + $0x24] ss:$8 sps:$4 sm:$0xff]   ;;  %v346_v11 = vld [vmem:[%s511_s1 + $0x20] ss:$8 sps:$4 sm:$0xff]  }
   0x5   :  { %v347_v12 = vld [vmem:[%s511_s1 + $0x14] ss:$8 sps:$4 sm:$0xff]   ;;  %v379_v13 = vld [vmem:[%s512_s0 + $0x4] ss:$8 sps:$4 sm:$0xff]   ;;  %v349_v14 = vld [vmem:[%s511_s1 + $0x10] ss:$8 sps:$4 sm:$0xff]  }
   0x6   :  { %v350_v15 = vld [vmem:[%s511_s1 + $0x4] ss:$8 sps:$4 sm:$0xff]   ;;  %262 = vmatprep.mubr.bf16.mxu0 %v379_v13  ;;  %v352_v16 = vld [vmem:[%s511_s1] ss:$8 sps:$4 sm:$0xff]   ;;  %v353_v17 = vld [vmem:[%s511_s1 + $0xf4] ss:$8 sps:$4 sm:$0xff]  }
   0x7   :  { %233 = vmatpush1.bf16.msra.mxu0 %v334_v3  ;;  %v355_v18 = vld [vmem:[%s511_s1 + $0xf0] ss:$8 sps:$4 sm:$0xff]   ;;  %v356_v19 = vld [vmem:[%s511_s1 + $0xe4] ss:$8 sps:$4 sm:$0xff]   ;;  %v358_v20 = vld [vmem:[%s511_s1 + $0xe0] ss:$8 sps:$4 sm:$0xff]  }
   0x8   :  { %234 = vmatprep.subr.bf16.mxu0 %v335_v4  ;;  %v359_v21 = vld [vmem:[%s511_s1 + $0xd4] ss:$8 sps:$4 sm:$0xff]   ;;  %v361_v22 = vld [vmem:[%s511_s1 + $0xd0] ss:$8 sps:$4 sm:$0xff]   ;;  %v362_v23 = vld [vmem:[%s511_s1 + $0xc4] ss:$8 sps:$4 sm:$0xff]  }
   0x9   :  { %v364_v24 = vld [vmem:[%s511_s1 + $0xc0] ss:$8 sps:$4 sm:$0xff]   ;;  %v365_v25 = vld [vmem:[%s511_s1 + $0xb4] ss:$8 sps:$4 sm:$0xff]   ;;  %v367_v26 = vld [vmem:[%s511_s1 + $0xb0] ss:$8 sps:$4 sm:$0xff]  }
   0xa   :  { %v368_v27 = vld [vmem:[%s511_s1 + $0xa4] ss:$8 sps:$4 sm:$0xff]   ;;  %v370_v28 = vld [vmem:[%s511_s1 + $0xa0] ss:$8 sps:$4 sm:$0xff]   ;;  %v371_v29 = vld [vmem:[%s511_s1 + $0x94] ss:$8 sps:$4 sm:$0xff]  }
   0xb   :  { %235 = vmatpush1.bf16.msra.mxu0 %v337_v5  ;;  %v373_v30 = vld [vmem:[%s511_s1 + $0x90] ss:$8 sps:$4 sm:$0xff]   ;;  %v374_v31 = vld [vmem:[%s511_s1 + $0x84] ss:$8 sps:$4 sm:$0xff]   ;;  %v376_v32 = vld [vmem:[%s511_s1 + $0x80] ss:$8 sps:$4 sm:$0xff]  }
   0xc   :  { %236 = vmatprep.subr.bf16.mxu0 %v338_v6  ;;  %v377_v33 = vld [vmem:[%s512_s0] ss:$8 sps:$4 sm:$0xff]   ;;  %v51_v35 = vshrl.u32 %v50_v34, 7 }
   0xd   :  { %v48_v38 = vld [vmem:[%s513_s2] sm:$0x3] }
   0xe   :  { %v52_v36 = vsub.s32 0, %v51_v35  ;;  %v56_v37 = vsub.s32 1, %v51_v35 }
   0xf   :  { %237 = vmatpush1.bf16.msra.mxu0 %v340_v7 }
  0x10   :  { %238 = vmatprep.subr.bf16.mxu0 %v341_v8  ;;  %v53_v39 = vrot.slane %v48_v38, %v52_v36  ;;  %v57_v40 = vrot.slane %v48_v38, %v56_v37 }
  0x13   :  { %239 = vmatpush1.bf16.msra.mxu0 %v343_v9 }
  0x14   :  { %240 = vmatprep.subr.bf16.mxu0 %v344_v10 }
  0x17   :  { %241 = vmatpush1.bf16.msra.mxu0 %v346_v11 }
  0x18   :  { %242 = vmatprep.subr.bf16.mxu0 %v347_v12 }
  0x1b   :  { %243 = vmatpush1.bf16.msra.mxu0 %v349_v14 }
  0x1c   :  { %244 = vmatprep.subr.bf16.mxu0 %v350_v15 }
  0x1f   :  { %245 = vmatpush1.bf16.msra.mxu0 %v352_v16 }
  0x20   :  { %246 = vmatprep.subr.bf16.mxu0 %v353_v17 }
  0x23   :  { %247 = vmatpush2.bf16.msra.mxu0 %v355_v18 }
  0x24   :  { %248 = vmatprep.subr.bf16.mxu0 %v356_v19 }
  0x27   :  { %249 = vmatpush2.bf16.msra.mxu0 %v358_v20 }
  0x28   :  { %250 = vmatprep.subr.bf16.mxu0 %v359_v21 }
  0x2b   :  { %251 = vmatpush2.bf16.msra.mxu0 %v361_v22 }
  0x2c   :  { %252 = vmatprep.subr.bf16.mxu0 %v362_v23 }
  0x2f   :  { %253 = vmatpush2.bf16.msra.mxu0 %v364_v24 }
  0x30   :  { %254 = vmatprep.subr.bf16.mxu0 %v365_v25 }
  0x33   :  { %255 = vmatpush2.bf16.msra.mxu0 %v367_v26 }
  0x34   :  { %256 = vmatprep.subr.bf16.mxu0 %v368_v27 }
  0x37   :  { %257 = vmatpush2.bf16.msra.mxu0 %v370_v28 }
  0x38   :  { %258 = vmatprep.subr.bf16.mxu0 %v371_v29 }
  0x3b   :  { %259 = vmatpush2.bf16.msra.mxu0 %v373_v30 }
  0x3c   :  { %260 = vmatprep.subr.bf16.mxu0 %v374_v31 }
  0x3f   :  { %261 = vmatpush2.bf16.msra.mxu0 %v376_v32 }
  0x42   :  { %263 = vmatmul.mubr.bf16.vlgmr.msra.gmra.mxu0 %v377_v33 }
 0x102   :  { %v264_v41 = vpop.f32.mrf.mxu0 }
 0x103   :  { %v265_v43 = vadd.f32 %v264_v41, %v53_v39 }
 0x104   :  { %v266_v42 = vpop.f32.mrf.mxu0 }
 0x105   :  { %v267_v44 = vadd.f32 %v266_v42, %v57_v40 }
 0x106   :  { %v268_v45 = vpop.f32.mrf.mxu0 }
 0x107   :  { %v327_v46 = vpack.c.bf16 %v267_v44, %v265_v43  ;;  %v269_v48 = vadd.f32 %v268_v45, %v53_v39 }
 0x108   :  { %v270_v47 = vpop.f32.mrf.mxu0 }
 0x109   :  { %285 = vst [vmem:[%s514_s3] sm:$0xff] %v327_v46  ;;  %v271_v49 = vadd.f32 %v270_v47, %v57_v40 }
 0x10b   :  { %v328_v50 = vpack.c.bf16 %v271_v49, %v269_v48 }
 0x10d   :  { %286 = vst [vmem:[%s514_s3 + $0x8] sm:$0xff] %v328_v50 }

// kernel: vqvae_forward.37
= control target key start
LH: loop header
LB: loop body
LE: loop exit
PB: predicated region body
PF: predicated region fallthrough
CT: control target
= control target key end

     0   :  { %s1909_s0 = inlined_call_operand.vmem [shape: f32[16,256], index: 0, kind: input, shape index: {}]   ;;  %s1910_s1 = inlined_call_operand.vmem [shape: f32[1,512], index: 1, kind: input, shape index: {}]   ;;  %s1911_s2 = inlined_call_operand.vmem [shape: bf16[256,512], index: 2, kind: input, shape index: {}]   ;;  %s1912_s3 = inlined_call_operand.vmem [shape: f32[512,256], index: 3, kind: input, shape index: {}]   ;;  %s1913_s4 = inlined_call_operand.vmem [shape: f32[16,256], index: 4, kind: output, shape index: {0}]   ;;  %s1914_s5 = inlined_call_operand.vmem [shape: s32[16,128], index: 5, kind: output, shape index: {1}]   ;;  %s1915_s6 = inlined_call_operand.hbm [shape: f32[1,1], index: 6, kind: output, shape index: {2}]  }
   0x1   :  { %v1079_v0 = vld [vmem:[%s1911_s2 + $0xe4] ss:$16 sps:$4 sm:$0xff]   ;;  %v1081_v1 = vld [vmem:[%s1911_s2 + $0xec] ss:$16 sps:$4 sm:$0xff]   ;;  %v1083_v2 = vld [vmem:[%s1911_s2 + $0xe0] ss:$16 sps:$4 sm:$0xff]  }
   0x2   :  { %412 = vmatprep.subr.bf16.mxu0 %v1079_v0  ;;  %v1084_v3 = vld [vmem:[%s1911_s2 + $0xe8] ss:$16 sps:$4 sm:$0xff]   ;;  %455 = vmatprep.subr.bf16.mxu1 %v1081_v1  ;;  %v1085_v4 = vld [vmem:[%s1911_s2 + $0xc4] ss:$16 sps:$4 sm:$0xff]   ;;  %v1087_v5 = vld [vmem:[%s1911_s2 + $0xcc] ss:$16 sps:$4 sm:$0xff]  }
   0x3   :  { %413 = vmatpush1.bf16.msra.mxu0 %v1083_v2  ;;  %456 = vmatpush1.bf16.msra.mxu1 %v1084_v3  ;;  %v1089_v6 = vld [vmem:[%s1911_s2 + $0xc0] ss:$16 sps:$4 sm:$0xff]   ;;  %v1090_v7 = vld [vmem:[%s1911_s2 + $0xc8] ss:$16 sps:$4 sm:$0xff]   ;;  %v1091_v8 = vld [vmem:[%s1911_s2 + $0xa4] ss:$16 sps:$4 sm:$0xff]  }
   0x4   :  { %414 = vmatprep.subr.bf16.mxu0 %v1085_v4  ;;  %457 = vmatprep.subr.bf16.mxu1 %v1087_v5  ;;  %v1093_v9 = vld [vmem:[%s1911_s2 + $0xac] ss:$16 sps:$4 sm:$0xff]   ;;  %v1095_v10 = vld [vmem:[%s1911_s2 + $0xa0] ss:$16 sps:$4 sm:$0xff]   ;;  %v1096_v11 = vld [vmem:[%s1911_s2 + $0xa8] ss:$16 sps:$4 sm:$0xff]  }
   0x5   :  { %v1097_v12 = vld [vmem:[%s1911_s2 + $0x84] ss:$16 sps:$4 sm:$0xff]   ;;  %v1099_v13 = vld [vmem:[%s1911_s2 + $0x8c] ss:$16 sps:$4 sm:$0xff]   ;;  %v1101_v14 = vld [vmem:[%s1911_s2 + $0x80] ss:$16 sps:$4 sm:$0xff]  }
   0x6   :  { %v1102_v15 = vld [vmem:[%s1911_s2 + $0x88] ss:$16 sps:$4 sm:$0xff]   ;;  %v1103_v16 = vld [vmem:[%s1911_s2 + $0x64] ss:$16 sps:$4 sm:$0xff]   ;;  %v1105_v17 = vld [vmem:[%s1911_s2 + $0x6c] ss:$16 sps:$4 sm:$0xff]  }
   0x7   :  { %415 = vmatpush1.bf16.msra.mxu0 %v1089_v6  ;;  %458 = vmatpush1.bf16.msra.mxu1 %v1090_v7  ;;  %v1107_v18 = vld [vmem:[%s1911_s2 + $0x60] ss:$16 sps:$4 sm:$0xff]   ;;  %v1108_v19 = vld [vmem:[%s1911_s2 + $0x68] ss:$16 sps:$4 sm:$0xff]   ;;  %v1109_v20 = vld [vmem:[%s1911_s2 + $0x44] ss:$16 sps:$4 sm:$0xff]  }
   0x8   :  { %416 = vmatprep.subr.bf16.mxu0 %v1091_v8  ;;  %459 = vmatprep.subr.bf16.mxu1 %v1093_v9  ;;  %v1111_v21 = vld [vmem:[%s1911_s2 + $0x4c] ss:$16 sps:$4 sm:$0xff]   ;;  %v1113_v22 = vld [vmem:[%s1911_s2 + $0x40] ss:$16 sps:$4 sm:$0xff]   ;;  %v1114_v23 = vld [vmem:[%s1911_s2 + $0x48] ss:$16 sps:$4 sm:$0xff]  }
   0x9   :  { %v1115_v24 = vld [vmem:[%s1911_s2 + $0x24] ss:$16 sps:$4 sm:$0xff]   ;;  %v1117_v25 = vld [vmem:[%s1911_s2 + $0x2c] ss:$16 sps:$4 sm:$0xff]   ;;  %v1119_v26 = vld [vmem:[%s1911_s2 + $0x20] ss:$16 sps:$4 sm:$0xff]  }
   0xa   :  { %v1120_v27 = vld [vmem:[%s1911_s2 + $0x28] ss:$16 sps:$4 sm:$0xff]   ;;  %v1121_v28 = vld [vmem:[%s1911_s2 + $0x4] ss:$16 sps:$4 sm:$0xff]   ;;  %v1123_v29 = vld [vmem:[%s1911_s2 + $0xc] ss:$16 sps:$4 sm:$0xff]  }
   0xb   :  { %417 = vmatpush1.bf16.msra.mxu0 %v1095_v10  ;;  %460 = vmatpush1.bf16.msra.mxu1 %v1096_v11  ;;  %v1125_v30 = vld [vmem:[%s1911_s2] ss:$16 sps:$4 sm:$0xff]   ;;  %v1126_v31 = vld [vmem:[%s1911_s2 + $0x8] ss:$16 sps:$4 sm:$0xff]   ;;  %v1127_v32 = vld [vmem:[%s1911_s2 + $0x1e4] ss:$16 sps:$4 sm:$0xff]  }
   0xc   :  { %418 = vmatprep.subr.bf16.mxu0 %v1097_v12  ;;  %461 = vmatprep.subr.bf16.mxu1 %v1099_v13  ;;  %v1129_v33 = vld [vmem:[%s1911_s2 + $0x1ec] ss:$16 sps:$4 sm:$0xff]   ;;  %v1131_v34 = vld [vmem:[%s1911_s2 + $0x1e0] ss:$16 sps:$4 sm:$0xff]   ;;  %v1132_v35 = vld [vmem:[%s1911_s2 + $0x1e8] ss:$16 sps:$4 sm:$0xff]  }
   0xd   :  { %v1133_v36 = vld [vmem:[%s1911_s2 + $0x1c4] ss:$16 sps:$4 sm:$0xff]   ;;  %v1135_v37 = vld [vmem:[%s1911_s2 + $0x1cc] ss:$16 sps:$4 sm:$0xff]   ;;  %v1137_v38 = vld [vmem:[%s1911_s2 + $0x1c0] ss:$16 sps:$4 sm:$0xff]  }
   0xe   :  { %v1138_v39 = vld [vmem:[%s1911_s2 + $0x1c8] ss:$16 sps:$4 sm:$0xff]   ;;  %v1139_v40 = vld [vmem:[%s1911_s2 + $0x1a4] ss:$16 sps:$4 sm:$0xff]   ;;  %v1141_v41 = vld [vmem:[%s1911_s2 + $0x1ac] ss:$16 sps:$4 sm:$0xff]  }
   0xf   :  { %419 = vmatpush1.bf16.msra.mxu0 %v1101_v14  ;;  %462 = vmatpush1.bf16.msra.mxu1 %v1102_v15  ;;  %v1143_v42 = vld [vmem:[%s1911_s2 + $0x1a0] ss:$16 sps:$4 sm:$0xff]   ;;  %v1144_v43 = vld [vmem:[%s1911_s2 + $0x1a8] ss:$16 sps:$4 sm:$0xff]   ;;  %v1145_v44 = vld [vmem:[%s1911_s2 + $0x184] ss:$16 sps:$4 sm:$0xff]  }
  0x10   :  { %420 = vmatprep.subr.bf16.mxu0 %v1103_v16  ;;  %463 = vmatprep.subr.bf16.mxu1 %v1105_v17  ;;  %v1147_v45 = vld [vmem:[%s1911_s2 + $0x18c] ss:$16 sps:$4 sm:$0xff]   ;;  %v1149_v48 = vld [vmem:[%s1911_s2 + $0x180] ss:$16 sps:$4 sm:$0xff]   ;;  %v1150_v49 = vld [vmem:[%s1911_s2 + $0x188] ss:$16 sps:$4 sm:$0xff]  }
  0x11   :  { %v1376_v46 = vld [vmem:[%s1909_s0 + $0x8] sm:$0xff]  ;;  %v1381_v47 = vld [vmem:[%s1909_s0 + $0x18] sm:$0xff] }
  0x12   :  { %v27_v50 = vpack.c.bf16 %v1381_v47, %v1376_v46 }
  0x13   :  { %421 = vmatpush1.bf16.msra.mxu0 %v1107_v18  ;;  %464 = vmatpush1.bf16.msra.mxu1 %v1108_v19 }
  0x14   :  { %422 = vmatprep.subr.bf16.mxu0 %v1109_v20  ;;  %465 = vmatprep.subr.bf16.mxu1 %v1111_v21 }
  0x17   :  { %423 = vmatpush1.bf16.msra.mxu0 %v1113_v22  ;;  %466 = vmatpush1.bf16.msra.mxu1 %v1114_v23 }
  0x18   :  { %424 = vmatprep.subr.bf16.mxu0 %v1115_v24  ;;  %467 = vmatprep.subr.bf16.mxu1 %v1117_v25 }
  0x1b   :  { %425 = vmatpush1.bf16.msra.mxu0 %v1119_v26  ;;  %468 = vmatpush1.bf16.msra.mxu1 %v1120_v27 }
  0x1c   :  { %426 = vmatprep.subr.bf16.mxu0 %v1121_v28  ;;  %469 = vmatprep.subr.bf16.mxu1 %v1123_v29 }
  0x1f   :  { %427 = vmatpush1.bf16.msra.mxu0 %v1125_v30  ;;  %470 = vmatpush1.bf16.msra.mxu1 %v1126_v31 }
  0x20   :  { %428 = vmatprep.subr.bf16.mxu0 %v1127_v32  ;;  %471 = vmatprep.subr.bf16.mxu1 %v1129_v33 }
  0x23   :  { %429 = vmatpush2.bf16.msra.mxu0 %v1131_v34  ;;  %472 = vmatpush2.bf16.msra.mxu1 %v1132_v35 }
  0x24   :  { %430 = vmatprep.subr.bf16.mxu0 %v1133_v36  ;;  %473 = vmatprep.subr.bf16.mxu1 %v1135_v37 }
  0x27   :  { %431 = vmatpush2.bf16.msra.mxu0 %v1137_v38  ;;  %474 = vmatpush2.bf16.msra.mxu1 %v1138_v39 }
  0x28   :  { %432 = vmatprep.subr.bf16.mxu0 %v1139_v40  ;;  %475 = vmatprep.subr.bf16.mxu1 %v1141_v41 }
  0x2b   :  { %433 = vmatpush2.bf16.msra.mxu0 %v1143_v42  ;;  %476 = vmatpush2.bf16.msra.mxu1 %v1144_v43 }
  0x2c   :  { %12 = vsyncpa [#allocation3], 0  ;;  %434 = vmatprep.subr.bf16.mxu0 %v1145_v44  ;;  %477 = vmatprep.subr.bf16.mxu1 %v1147_v45  ;;  %v1151_v51 = vld [vmem:[%s1911_s2 + $0x164] ss:$16 sps:$4 sm:$0xff]   ;;  %v1153_v52 = vld [vmem:[%s1911_s2 + $0x16c] ss:$16 sps:$4 sm:$0xff]   ;;  %v507_v6 = vlaneseq }
  0x2d   :  { %444 = vmatprep.mubr.bf16.mxu0 %v27_v50  ;;  %487 = vmatprep.mubr.bf16.mxu1 %v27_v50  ;;  %v1155_v53 = vld [vmem:[%s1911_s2 + $0x160] ss:$16 sps:$4 sm:$0xff]   ;;  %v1156_v54 = vld [vmem:[%s1911_s2 + $0x168] ss:$16 sps:$4 sm:$0xff]   ;;  %v1157_v55 = vld [vmem:[%s1911_s2 + $0x144] ss:$16 sps:$4 sm:$0xff]  }
  0x2e   :  { %v1159_v56 = vld [vmem:[%s1911_s2 + $0x14c] ss:$16 sps:$4 sm:$0xff]   ;;  %v1161_v57 = vld [vmem:[%s1911_s2 + $0x140] ss:$16 sps:$4 sm:$0xff]   ;;  %v1162_v58 = vld [vmem:[%s1911_s2 + $0x148] ss:$16 sps:$4 sm:$0xff]  }
  0x2f   :  { %435 = vmatpush2.bf16.msra.mxu0 %v1149_v48  ;;  %478 = vmatpush2.bf16.msra.mxu1 %v1150_v49  ;;  %v1163_v59 = vld [vmem:[%s1911_s2 + $0x124] ss:$16 sps:$4 sm:$0xff]   ;;  %v1165_v60 = vld [vmem:[%s1911_s2 + $0x12c] ss:$16 sps:$4 sm:$0xff]   ;;  %v1167_v61 = vld [vmem:[%s1911_s2 + $0x120] ss:$16 sps:$4 sm:$0xff]  }
  0x30   :  { %436 = vmatprep.subr.bf16.mxu0 %v1151_v51  ;;  %479 = vmatprep.subr.bf16.mxu1 %v1153_v52  ;;  %v1168_v62 = vld [vmem:[%s1911_s2 + $0x128] ss:$16 sps:$4 sm:$0xff]   ;;  %v1169_v63 = vld [vmem:[%s1911_s2 + $0x104] ss:$16 sps:$4 sm:$0xff]   ;;  %v1171_v0 = vld [vmem:[%s1911_s2 + $0x10c] ss:$16 sps:$4 sm:$0xff]  }
  0x31   :  { %v1173_v1 = vld [vmem:[%s1911_s2 + $0x100] ss:$16 sps:$4 sm:$0xff]   ;;  %v1174_v2 = vld [vmem:[%s1911_s2 + $0x108] ss:$16 sps:$4 sm:$0xff]   ;;  %v508_v7 = vshrl.u32 %v507_v6, 7  ;;  %v1454_v49 = vand.u32 127, %v507_v6 }
  0x32   :  { %v1442_v3 = vld [vmem:[%s1909_s0] sm:$0xff]  ;;  %v1447_v4 = vld [vmem:[%s1909_s0 + $0x10] sm:$0xff]  ;;  %s1199_s11 = smov [#allocation2]  }
  0x33   :  { %437 = vmatpush2.bf16.msra.mxu0 %v1155_v53  ;;  %480 = vmatpush2.bf16.msra.mxu1 %v1156_v54  ;;  %v26_v5 = vpack.c.bf16 %v1447_v4, %v1442_v3  ;;  %v509_v8 = vsub.s32 0, %v508_v7  ;;  %v517_v9 = vsub.s32 2, %v508_v7  ;;  %v25_v10 = vld [vmem:[%s1910_s1] sm:$0xf]  ;;  %v513_v11 = vsub.s32 1, %v508_v7  ;;  %s982_s12 = sshll.u32 %s1199_s11, 4  ;;  %s983_s12 = int_to_ptr.vmem [resolvable:$true] %s982_s12 }
  0x34   :  { %438 = vmatprep.subr.bf16.mxu0 %v1157_v55  ;;  %481 = vmatprep.subr.bf16.mxu1 %v1159_v56  ;;  %v521_v12 = vsub.s32 3, %v508_v7  ;;  %v1457_v50 = vadd.s32 128, %v1454_v49  ;;  %v1460_v51 = vadd.s32 256, %v1454_v49  ;;  %v1463_v52 = vadd.s32 384, %v1454_v49  ;;  %s1175_s2 = scalar_lea.vmem %s983_s12, 16  ;;  %s1179_s13 = scalar_lea.vmem %s983_s12, 32 }
  0x35   :  { %v510_v14 = vrot.slane %v25_v10, %v509_v8  ;;  %v518_v16 = vrot.slane %v25_v10, %v517_v9  ;;  %v514_v19 = vrot.slane %v25_v10, %v513_v11  ;;  %v661_v11 = vld [vmem:[%s1912_s3 + $0xf8] sm:$0xff]  ;;  %p1176_p0 = scmp.ne.s32.totalorder %s983_s12, %s1175_s2  ;;  %p1180_p1 = scmp.lt.s32.totalorder %s983_s12, %s983_s12 }
  0x36   :  { %v522_v20 = vrot.slane %v25_v10, %v521_v12  ;;  %v725_v12 = vld [vmem:[%s1912_s3 + $0x2f8] sm:$0xff]  ;;  %p1181_p2 = scmp.lt.s32.totalorder %s1179_s13, %s1175_s2 }
  0x37   :  { %439 = vmatpush2.bf16.msra.mxu0 %v1161_v57  ;;  %482 = vmatpush2.bf16.msra.mxu1 %v1162_v58 }
  0x38   :  { %440 = vmatprep.subr.bf16.mxu0 %v1163_v59  ;;  %483 = vmatprep.subr.bf16.mxu1 %v1165_v60  ;;  %p1182_p3 = por %p1181_p2, %p1180_p1 }
  0x3a   :  { %p1183_p4 = pnand %p1182_p3, %p1176_p0 }
  0x3b   :  { %441 = vmatpush2.bf16.msra.mxu0 %v1167_v61  ;;  %484 = vmatpush2.bf16.msra.mxu1 %v1168_v62 }
  0x3c   :  { %442 = vmatprep.subr.bf16.mxu0 %v1169_v63  ;;  %485 = vmatprep.subr.bf16.mxu1 %v1171_v0 }
  0x3f   :  { %443 = vmatpush2.bf16.msra.mxu0 %v1173_v1  ;;  %486 = vmatpush2.bf16.msra.mxu1 %v1174_v2 }
  0x40   :  { %758 = vmatprep.subr.mxu0 %v661_v11  ;;  %835 = vmatprep.subr.mxu1 %v725_v12  ;;  %v635_v11 = vld [vmem:[%s1912_s3 + $0x28] sm:$0xff] }
  0x41   :  { %v699_v12 = vld [vmem:[%s1912_s3 + $0x228] sm:$0xff] }
  0x42   :  { %445 = vmatmul.mubr.bf16.vlgmr.msra.gmra.mxu0 %v26_v5  ;;  %488 = vmatmul.mubr.bf16.vlgmr.msra.gmra.mxu1 %v26_v5 }
 0x102   :  { %v446_v13 = vpop.f32.mrf.mxu0  ;;  %v489_v15 = vpop.f32.mrf.mxu1 }
 0x103   :  { %v498_v17 = vmul.f32 2.0, %v446_v13  ;;  %v500_v18 = vmul.f32 2.0, %v489_v15  ;;  %v660_v13 = vld [vmem:[%s1912_s3 + $0xf0] sm:$0xff]  ;;  %v659_v15 = vld [vmem:[%s1912_s3 + $0xe8] sm:$0xff] }
 0x104   :  { %v448_v21 = vpop.f32.mrf.mxu0  ;;  %v491_v22 = vpop.f32.mrf.mxu1  ;;  %759 = vmatpush1.msra.mxu0 %v660_v13  ;;  %v634_v13 = vld [vmem:[%s1912_s3 + $0x20] sm:$0xff] }
 0x105   :  { %v499_v23 = vmul.f32 2.0, %v448_v21  ;;  %v501_v24 = vmul.f32 2.0, %v491_v22  ;;  %v527_v25 = vsub.f32 %v510_v14, %v498_v17  ;;  %v529_v26 = vsub.f32 %v518_v16, %v500_v18  ;;  %v658_v17 = vld [vmem:[%s1912_s3 + $0xe0] sm:$0xff]  ;;  %760 = vmatprep.subr.mxu0 %v659_v15  ;;  %v656_v21 = vld [vmem:[%s1912_s3 + $0xd0] sm:$0xff]  ;;  %v633_v15 = vld [vmem:[%s1912_s3 + $0x18] sm:$0xff] }
 0x106   :  { %v450_v27 = vpop.f32.mrf.mxu0  ;;  %v493_v28 = vpop.f32.mrf.mxu1  ;;  %v722_v18 = vld [vmem:[%s1912_s3 + $0x2e0] sm:$0xff]  ;;  %v720_v22 = vld [vmem:[%s1912_s3 + $0x2d0] sm:$0xff]  ;;  %761 = vmatpush1.msra.mxu0 %v658_v17 }
 0x107   :  { %v528_v29 = vsub.f32 %v514_v19, %v499_v23  ;;  %v530_v30 = vsub.f32 %v522_v20, %v501_v24  ;;  %v502_v31 = vmul.f32 2.0, %v450_v27  ;;  %v504_v32 = vmul.f32 2.0, %v493_v28  ;;  %v655_v23 = vld [vmem:[%s1912_s3 + $0xc8] sm:$0xff]  ;;  %v653_v27 = vld [vmem:[%s1912_s3 + $0xb8] sm:$0xff]  ;;  %v632_v17 = vld [vmem:[%s1912_s3 + $0x10] sm:$0xff] }
 0x108   :  { %v452_v33 = vpop.f32.mrf.mxu0  ;;  %v495_v34 = vpop.f32.mrf.mxu1  ;;  %v540_v39 = vmin.f32 %v527_v25, %v529_v26  ;;  %v719_v24 = vld [vmem:[%s1912_s3 + $0x2c8] sm:$0xff]  ;;  %v717_v28 = vld [vmem:[%s1912_s3 + $0x2b8] sm:$0xff] }
 0x109   :  { %v531_v35 = vsub.f32 %v510_v14, %v502_v31  ;;  %v533_v36 = vsub.f32 %v518_v16, %v504_v32  ;;  %v503_v37 = vmul.f32 2.0, %v452_v33  ;;  %v505_v38 = vmul.f32 2.0, %v495_v34  ;;  %v724_v14 = vld [vmem:[%s1912_s3 + $0x2f0] sm:$0xff]  ;;  %v723_v16 = vld [vmem:[%s1912_s3 + $0x2e8] sm:$0xff]  ;;  %v650_v33 = vld [vmem:[%s1912_s3 + $0xa0] sm:$0xff] }
 0x10a   :  { %v541_v40 = vmin.f32 %v528_v29, %v530_v30  ;;  %836 = vmatpush1.msra.mxu1 %v724_v14  ;;  %v651_v31 = vld [vmem:[%s1912_s3 + $0xa8] sm:$0xff]  ;;  %v714_v34 = vld [vmem:[%s1912_s3 + $0x2a0] sm:$0xff] }
 0x10b   :  { %v532_v41 = vsub.f32 %v514_v19, %v503_v37  ;;  %v534_v42 = vsub.f32 %v522_v20, %v505_v38  ;;  %v545_v44 = vmin.f32 %v531_v35, %v533_v36  ;;  %v657_v19 = vld [vmem:[%s1912_s3 + $0xd8] sm:$0xff]  ;;  %837 = vmatprep.subr.mxu1 %v723_v16  ;;  %v715_v32 = vld [vmem:[%s1912_s3 + $0x2a8] sm:$0xff]  ;;  %v648_v37 = vld [vmem:[%s1912_s3 + $0x90] sm:$0xff] }
 0x10c   :  { %v542_v43 = vmin.f32 %v540_v39, %v541_v40  ;;  %v721_v20 = vld [vmem:[%s1912_s3 + $0x2d8] sm:$0xff]  ;;  %838 = vmatpush1.msra.mxu1 %v722_v18  ;;  %762 = vmatprep.subr.mxu0 %v657_v19  ;;  %v712_v38 = vld [vmem:[%s1912_s3 + $0x290] sm:$0xff]  ;;  %v647_v39 = vld [vmem:[%s1912_s3 + $0x88] sm:$0xff] }
 0x10d   :  { %v546_v45 = vmin.f32 %v532_v41, %v534_v42  ;;  %839 = vmatprep.subr.mxu1 %v721_v20  ;;  %763 = vmatpush1.msra.mxu0 %v656_v21  ;;  %v711_v40 = vld [vmem:[%s1912_s3 + $0x288] sm:$0xff]  ;;  %v698_v14 = vld [vmem:[%s1912_s3 + $0x220] sm:$0xff]  ;;  %v697_v16 = vld [vmem:[%s1912_s3 + $0x218] sm:$0xff] }
 0x10e   :  { %543 = vmin.xlane.f32.xlu0 %v542_v43  ;;  %840 = vmatpush1.msra.mxu1 %v720_v22  ;;  %v645_v43 = vld [vmem:[%s1912_s3 + $0x78] sm:$0xff]  ;;  %v696_v18 = vld [vmem:[%s1912_s3 + $0x210] sm:$0xff]  ;;  %v631_v19 = vld [vmem:[%s1912_s3 + $0x8] sm:$0xff] }
 0x10f   :  { %v547_v48 = vmin.f32 %v545_v44, %v546_v45  ;;  %764 = vmatprep.subr.mxu0 %v655_v23  ;;  %841 = vmatprep.subr.mxu1 %v719_v24  ;;  %v709_v44 = vld [vmem:[%s1912_s3 + $0x278] sm:$0xff]  ;;  %v644_v45 = vld [vmem:[%s1912_s3 + $0x70] sm:$0xff]  ;;  %v695_v20 = vld [vmem:[%s1912_s3 + $0x208] sm:$0xff] }
 0x110   :  { %v630_v21 = vld [vmem:[%s1912_s3] sm:$0xff]  ;;  %v693_v23 = vld [vmem:[%s1912_s3 + $0x1f8] sm:$0xff] }
 0x111   :  { %v694_v22 = vld [vmem:[%s1912_s3 + $0x200] sm:$0xff]  ;;  %v757_v24 = vld [vmem:[%s1912_s3 + $0x3f8] sm:$0xff] }
 0x112   :  { %548 = vmin.xlane.f32.xlu0 %v547_v48  ;;  %v708_v48 = vld [vmem:[%s1912_s3 + $0x270] sm:$0xff] }
 0x197   :  { %v544_v53 = vpop.xlane.xlu0 %543 }
 0x198   :  { %vm550_vm0 = vcmp.eq.f32.partialorder %v527_v25, %v544_v53  ;;  %vm551_vm1 = vcmp.eq.f32.partialorder %v528_v29, %v544_v53  ;;  %vm552_vm2 = vcmp.eq.f32.partialorder %v529_v26, %v544_v53  ;;  %vm553_vm3 = vcmp.eq.f32.partialorder %v530_v30, %v544_v53  ;;  %v654_v25 = vld [vmem:[%s1912_s3 + $0xc0] sm:$0xff]  ;;  %v652_v29 = vld [vmem:[%s1912_s3 + $0xb0] sm:$0xff]  ;;  %v643_v53 = vld [vmem:[%s1912_s3 + $0x68] sm:$0xff] }
 0x199   :  { %v558_v54 = vsel %vm550_vm0, %v1454_v49, 512  ;;  %v559_v55 = vsel %vm551_vm1, %v1457_v50, 512  ;;  %v560_v56 = vsel %vm552_vm2, %v1460_v51, 512  ;;  %v561_v57 = vsel %vm553_vm3, %v1463_v52, 512  ;;  %v718_v26 = vld [vmem:[%s1912_s3 + $0x2c0] sm:$0xff]  ;;  %v716_v30 = vld [vmem:[%s1912_s3 + $0x2b0] sm:$0xff]  ;;  %765 = vmatpush1.msra.mxu0 %v654_v25 }
 0x19a   :  { %vm566_vm4 = vcmp.lt.s32.totalorder %v558_v54, %v560_v56  ;;  %vm568_vm5 = vcmp.lt.s32.totalorder %v559_v55, %v561_v57  ;;  %842 = vmatpush1.msra.mxu1 %v718_v26  ;;  %766 = vmatprep.subr.mxu0 %v653_v27  ;;  %v692_v25 = vld [vmem:[%s1912_s3 + $0x1f0] sm:$0xff]  ;;  %v691_v27 = vld [vmem:[%s1912_s3 + $0x1e8] sm:$0xff] }
 0x19b   :  { %v549_v58 = vpop.xlane.xlu0 %548  ;;  %v567_v59 = vsel %vm566_vm4, %v558_v54, %v560_v56  ;;  %v569_v60 = vsel %vm568_vm5, %v559_v55, %v561_v57  ;;  %843 = vmatprep.subr.mxu1 %v717_v28  ;;  %767 = vmatpush1.msra.mxu0 %v652_v29  ;;  %v707_v54 = vld [vmem:[%s1912_s3 + $0x268] sm:$0xff]  ;;  %v642_v55 = vld [vmem:[%s1912_s3 + $0x60] sm:$0xff]  ;;  %v641_v57 = vld [vmem:[%s1912_s3 + $0x58] sm:$0xff] }
 0x19c   :  { %vm554_vm6 = vcmp.eq.f32.partialorder %v531_v35, %v549_v58  ;;  %vm555_vm7 = vcmp.eq.f32.partialorder %v532_v41, %v549_v58  ;;  %vm556_vm8 = vcmp.eq.f32.partialorder %v533_v36, %v549_v58  ;;  %vm557_vm9 = vcmp.eq.f32.partialorder %v534_v42, %v549_v58  ;;  %844 = vmatpush1.msra.mxu1 %v716_v30  ;;  %v649_v35 = vld [vmem:[%s1912_s3 + $0x98] sm:$0xff]  ;;  %v646_v41 = vld [vmem:[%s1912_s3 + $0x80] sm:$0xff]  ;;  %v756_v26 = vld [vmem:[%s1912_s3 + $0x3f0] sm:$0xff] }
 0x19d   :  { %v562_v61 = vsel %vm554_vm6, %v1454_v49, 512  ;;  %v563_v62 = vsel %vm555_vm7, %v1457_v50, 512  ;;  %v564_v63 = vsel %vm556_vm8, %v1460_v51, 512  ;;  %v565_v0 = vsel %vm557_vm9, %v1463_v52, 512  ;;  %v713_v36 = vld [vmem:[%s1912_s3 + $0x298] sm:$0xff]  ;;  %768 = vmatprep.subr.mxu0 %v651_v31  ;;  %845 = vmatprep.subr.mxu1 %v715_v32  ;;  %v710_v42 = vld [vmem:[%s1912_s3 + $0x280] sm:$0xff] }
 0x19e   :  { %vm570_vm10 = vcmp.lt.s32.totalorder %v567_v59, %v569_v60  ;;  %vm586_vm11 = vcmp.lt.s32.totalorder %v562_v61, %v564_v63  ;;  %vm588_vm12 = vcmp.lt.s32.totalorder %v563_v62, %v565_v0  ;;  %769 = vmatpush1.msra.mxu0 %v650_v33  ;;  %846 = vmatpush1.msra.mxu1 %v714_v34  ;;  %v706_v56 = vld [vmem:[%s1912_s3 + $0x260] sm:$0xff]  ;;  %v705_v58 = vld [vmem:[%s1912_s3 + $0x258] sm:$0xff]  ;;  %v755_v28 = vld [vmem:[%s1912_s3 + $0x3e8] sm:$0xff]  ;;  %vm959_vm8 = vcmask 0  }
 0x19f   :  { %v1473_v1 = vsel %vm570_vm10, %v567_v59, %v569_v60  ;;  %v587_v2 = vsel %vm586_vm11, %v562_v61, %v564_v63  ;;  %v589_v5 = vsel %vm588_vm12, %v563_v62, %v565_v0  ;;  %770 = vmatprep.subr.mxu0 %v649_v35  ;;  %847 = vmatprep.subr.mxu1 %v713_v36  ;;  %v640_v59 = vld [vmem:[%s1912_s3 + $0x50] sm:$0xff]  ;;  %v639_v61 = vld [vmem:[%s1912_s3 + $0x48] sm:$0xff]  ;;  %v638_v63 = vld [vmem:[%s1912_s3 + $0x40] sm:$0xff] }
 0x1a0   :  { %v573_v6 = vshra.s32 %v1473_v1, 16  ;;  %vm590_vm13 = vcmp.lt.s32.totalorder %v587_v2, %v589_v5  ;;  %771 = vmatpush1.msra.mxu0 %v648_v37  ;;  %848 = vmatpush1.msra.mxu1 %v712_v38  ;;  %v704_v60 = vld [vmem:[%s1912_s3 + $0x250] sm:$0xff]  ;;  %v703_v62 = vld [vmem:[%s1912_s3 + $0x248] sm:$0xff]  ;;  %v702_v0 = vld [vmem:[%s1912_s3 + $0x240] sm:$0xff] }
 0x1a1   :  { %v1476_v7 = vsel %vm590_vm13, %v587_v2, %v589_v5  ;;  %772 = vmatprep.subr.mxu0 %v647_v39  ;;  %849 = vmatprep.subr.mxu1 %v711_v40  ;;  %v637_v2 = vld [vmem:[%s1912_s3 + $0x38] sm:$0xff]  ;;  %v690_v29 = vld [vmem:[%s1912_s3 + $0x1e0] sm:$0xff]  ;;  %v688_v33 = vld [vmem:[%s1912_s3 + $0x1d0] sm:$0xff] }
 0x1a2   :  { %v1478_v8 = vcvt.s32.f32 %v573_v6  ;;  %v593_v9 = vshra.s32 %v1476_v7, 16  ;;  %773 = vmatpush1.msra.mxu0 %v646_v41  ;;  %850 = vmatpush1.msra.mxu1 %v710_v42  ;;  %v701_v5 = vld [vmem:[%s1912_s3 + $0x238] sm:$0xff]  ;;  %v636_v6 = vld [vmem:[%s1912_s3 + $0x30] sm:$0xff]  ;;  %v754_v30 = vld [vmem:[%s1912_s3 + $0x3e0] sm:$0xff] }
 0x1a3   :  { %774 = vmatprep.subr.mxu0 %v645_v43  ;;  %851 = vmatprep.subr.mxu1 %v709_v44  ;;  %v689_v31 = vld [vmem:[%s1912_s3 + $0x1d8] sm:$0xff]  ;;  %v752_v34 = vld [vmem:[%s1912_s3 + $0x3d0] sm:$0xff]  ;;  %v687_v35 = vld [vmem:[%s1912_s3 + $0x1c8] sm:$0xff] }
 0x1a4   :  { %576 = vmin.xlane.f32.xlu1 %v1478_v8  ;;  %v1482_v10 = vcvt.s32.f32 %v593_v9  ;;  %775 = vmatpush1.msra.mxu0 %v644_v45  ;;  %v700_v9 = vld [vmem:[%s1912_s3 + $0x230] sm:$0xff]  ;;  %v753_v32 = vld [vmem:[%s1912_s3 + $0x3d8] sm:$0xff]  ;;  %v751_v36 = vld [vmem:[%s1912_s3 + $0x3c8] sm:$0xff] }
 0x1a5   :  { %852 = vmatpush1.msra.mxu1 %v708_v48  ;;  %776 = vmatprep.subr.mxu0 %v643_v53  ;;  %v686_v37 = vld [vmem:[%s1912_s3 + $0x1c0] sm:$0xff]  ;;  %v685_v39 = vld [vmem:[%s1912_s3 + $0x1b8] sm:$0xff]  ;;  %v684_v41 = vld [vmem:[%s1912_s3 + $0x1b0] sm:$0xff] }
 0x1a6   :  { %853 = vmatprep.subr.mxu1 %v707_v54  ;;  %777 = vmatpush1.msra.mxu0 %v642_v55  ;;  %v750_v38 = vld [vmem:[%s1912_s3 + $0x3c0] sm:$0xff]  ;;  %v749_v40 = vld [vmem:[%s1912_s3 + $0x3b8] sm:$0xff]  ;;  %v748_v42 = vld [vmem:[%s1912_s3 + $0x3b0] sm:$0xff] }
 0x1a7   :  { %854 = vmatpush1.msra.mxu1 %v706_v56  ;;  %778 = vmatprep.subr.mxu0 %v641_v57  ;;  %v683_v43 = vld [vmem:[%s1912_s3 + $0x1a8] sm:$0xff]  ;;  %v682_v45 = vld [vmem:[%s1912_s3 + $0x1a0] sm:$0xff]  ;;  %v681_v53 = vld [vmem:[%s1912_s3 + $0x198] sm:$0xff] }
 0x1a8   :  { %596 = vmin.xlane.f32.xlu1 %v1482_v10  ;;  %855 = vmatprep.subr.mxu1 %v705_v58  ;;  %v747_v44 = vld [vmem:[%s1912_s3 + $0x3a8] sm:$0xff]  ;;  %v746_v48 = vld [vmem:[%s1912_s3 + $0x3a0] sm:$0xff]  ;;  %v745_v54 = vld [vmem:[%s1912_s3 + $0x398] sm:$0xff] }
 0x1a9   :  { %779 = vmatpush1.msra.mxu0 %v640_v59  ;;  %856 = vmatpush1.msra.mxu1 %v704_v60  ;;  %v680_v55 = vld [vmem:[%s1912_s3 + $0x190] sm:$0xff]  ;;  %v679_v57 = vld [vmem:[%s1912_s3 + $0x188] sm:$0xff]  ;;  %v678_v59 = vld [vmem:[%s1912_s3 + $0x180] sm:$0xff] }
 0x1aa   :  { %780 = vmatprep.subr.mxu0 %v639_v61  ;;  %857 = vmatprep.subr.mxu1 %v703_v62  ;;  %v744_v56 = vld [vmem:[%s1912_s3 + $0x390] sm:$0xff]  ;;  %v743_v58 = vld [vmem:[%s1912_s3 + $0x388] sm:$0xff]  ;;  %v742_v60 = vld [vmem:[%s1912_s3 + $0x380] sm:$0xff] }
 0x1ab   :  { %781 = vmatpush1.msra.mxu0 %v638_v63  ;;  %858 = vmatpush1.msra.mxu1 %v702_v0  ;;  %v677_v61 = vld [vmem:[%s1912_s3 + $0x178] sm:$0xff]  ;;  %v676_v63 = vld [vmem:[%s1912_s3 + $0x170] sm:$0xff] }
 0x1ac   :  { %782 = vmatprep.subr.mxu0 %v637_v2  ;;  %859 = vmatprep.subr.mxu1 %v701_v5  ;;  %v741_v62 = vld [vmem:[%s1912_s3 + $0x378] sm:$0xff]  ;;  %v740_v0 = vld [vmem:[%s1912_s3 + $0x370] sm:$0xff]  ;;  %v675_v2 = vld [vmem:[%s1912_s3 + $0x168] sm:$0xff] }
 0x1ad   :  { %783 = vmatpush1.msra.mxu0 %v636_v6  ;;  %860 = vmatpush1.msra.mxu1 %v700_v9  ;;  %v739_v5 = vld [vmem:[%s1912_s3 + $0x368] sm:$0xff]  ;;  %v674_v6 = vld [vmem:[%s1912_s3 + $0x160] sm:$0xff] }
 0x1ae   :  { %784 = vmatprep.subr.mxu0 %v635_v11  ;;  %861 = vmatprep.subr.mxu1 %v699_v12  ;;  %v738_v9 = vld [vmem:[%s1912_s3 + $0x360] sm:$0xff]  ;;  %v673_v11 = vld [vmem:[%s1912_s3 + $0x158] sm:$0xff] }
 0x1af   :  { %785 = vmatpush1.msra.mxu0 %v634_v13  ;;  %862 = vmatpush1.msra.mxu1 %v698_v14  ;;  %v737_v12 = vld [vmem:[%s1912_s3 + $0x358] sm:$0xff]  ;;  %v672_v13 = vld [vmem:[%s1912_s3 + $0x150] sm:$0xff] }
 0x1b0   :  { %786 = vmatprep.subr.mxu0 %v633_v15  ;;  %863 = vmatprep.subr.mxu1 %v697_v16  ;;  %v736_v14 = vld [vmem:[%s1912_s3 + $0x350] sm:$0xff]  ;;  %v671_v15 = vld [vmem:[%s1912_s3 + $0x148] sm:$0xff] }
 0x1b1   :  { %787 = vmatpush1.msra.mxu0 %v632_v17  ;;  %864 = vmatpush1.msra.mxu1 %v696_v18  ;;  %v735_v16 = vld [vmem:[%s1912_s3 + $0x348] sm:$0xff]  ;;  %v670_v17 = vld [vmem:[%s1912_s3 + $0x140] sm:$0xff] }
 0x1b2   :  { %788 = vmatprep.subr.mxu0 %v631_v19  ;;  %865 = vmatprep.subr.mxu1 %v695_v20  ;;  %v734_v18 = vld [vmem:[%s1912_s3 + $0x340] sm:$0xff]  ;;  %v669_v19 = vld [vmem:[%s1912_s3 + $0x138] sm:$0xff] }
 0x1b3   :  { %789 = vmatpush1.msra.mxu0 %v630_v21  ;;  %866 = vmatpush1.msra.mxu1 %v694_v22  ;;  %v733_v20 = vld [vmem:[%s1912_s3 + $0x338] sm:$0xff]  ;;  %v668_v21 = vld [vmem:[%s1912_s3 + $0x130] sm:$0xff] }
 0x1b4   :  { %790 = vmatprep.subr.mxu0 %v693_v23  ;;  %867 = vmatprep.subr.mxu1 %v757_v24  ;;  %v732_v22 = vld [vmem:[%s1912_s3 + $0x330] sm:$0xff]  ;;  %v572_v23 = vand.u32 65535, %v1473_v1  ;;  %v731_v1 = vld [vmem:[%s1912_s3 + $0x328] sm:$0xff] }
 0x1b5   :  { %791 = vmatpush2.msra.mxu0 %v692_v25  ;;  %868 = vmatpush2.msra.mxu1 %v756_v26  ;;  %v592_v26 = vand.u32 65535, %v1476_v7  ;;  %v666_v7 = vld [vmem:[%s1912_s3 + $0x120] sm:$0xff] }
 0x1b6   :  { %792 = vmatprep.subr.mxu0 %v691_v27  ;;  %869 = vmatprep.subr.mxu1 %v755_v28  ;;  %v574_v25 = vcvt.s32.f32 %v572_v23 }
 0x1b7   :  { %793 = vmatpush2.msra.mxu0 %v690_v29  ;;  %870 = vmatpush2.msra.mxu1 %v754_v30  ;;  %v594_v29 = vcvt.s32.f32 %v592_v26 }
 0x1b8   :  { %794 = vmatprep.subr.mxu0 %v689_v31  ;;  %871 = vmatprep.subr.mxu1 %v753_v32  ;;  %v667_v31 = vld [vmem:[%s1912_s3 + $0x128] sm:$0xff]  ;;  %v729_v32 = vld [vmem:[%s1912_s3 + $0x318] sm:$0xff] }
 0x1b9   :  { %795 = vmatpush2.msra.mxu0 %v688_v33  ;;  %872 = vmatpush2.msra.mxu1 %v752_v34  ;;  %v664_v33 = vld [vmem:[%s1912_s3 + $0x110] sm:$0xff] }
 0x1ba   :  { %796 = vmatprep.subr.mxu0 %v687_v35  ;;  %873 = vmatprep.subr.mxu1 %v751_v36  ;;  %v728_v34 = vld [vmem:[%s1912_s3 + $0x310] sm:$0xff]  ;;  %v663_v35 = vld [vmem:[%s1912_s3 + $0x108] sm:$0xff] }
 0x1bb   :  { %797 = vmatpush2.msra.mxu0 %v686_v37  ;;  %874 = vmatpush2.msra.mxu1 %v750_v38  ;;  %v727_v36 = vld [vmem:[%s1912_s3 + $0x308] sm:$0xff]  ;;  %v662_v37 = vld [vmem:[%s1912_s3 + $0x100] sm:$0xff] }
 0x1bc   :  { %798 = vmatprep.subr.mxu0 %v685_v39  ;;  %875 = vmatprep.subr.mxu1 %v749_v40  ;;  %v726_v38 = vld [vmem:[%s1912_s3 + $0x300] sm:$0xff] }
 0x1bd   :  { %799 = vmatpush2.msra.mxu0 %v684_v41  ;;  %876 = vmatpush2.msra.mxu1 %v748_v42 }
 0x1be   :  { %800 = vmatprep.subr.mxu0 %v683_v43  ;;  %877 = vmatprep.subr.mxu1 %v747_v44 }
 0x1bf   :  { %801 = vmatpush2.msra.mxu0 %v682_v45  ;;  %878 = vmatpush2.msra.mxu1 %v746_v48 }
 0x1c0   :  { %802 = vmatprep.subr.mxu0 %v681_v53  ;;  %879 = vmatprep.subr.mxu1 %v745_v54  ;;  %v1197_v54 = vmov 1.0  }
 0x1c1   :  { %803 = vmatpush2.msra.mxu0 %v680_v55  ;;  %880 = vmatpush2.msra.mxu1 %v744_v56 }
 0x1c2   :  { %804 = vmatprep.subr.mxu0 %v679_v57  ;;  %881 = vmatprep.subr.mxu1 %v743_v58 }
 0x1c3   :  { %805 = vmatpush2.msra.mxu0 %v678_v59  ;;  %882 = vmatpush2.msra.mxu1 %v742_v60 }
 0x1c4   :  { %806 = vmatprep.subr.mxu0 %v677_v61  ;;  %883 = vmatprep.subr.mxu1 %v741_v62 }
 0x1c5   :  { %807 = vmatpush2.msra.mxu0 %v676_v63  ;;  %884 = vmatpush2.msra.mxu1 %v740_v0 }
 0x1c6   :  { %808 = vmatprep.subr.mxu0 %v675_v2  ;;  %885 = vmatprep.subr.mxu1 %v739_v5 }
 0x1c7   :  { %809 = vmatpush2.msra.mxu0 %v674_v6  ;;  %886 = vmatpush2.msra.mxu1 %v738_v9 }
 0x1c8   :  { %810 = vmatprep.subr.mxu0 %v673_v11  ;;  %887 = vmatprep.subr.mxu1 %v737_v12 }
 0x1c9   :  { %811 = vmatpush2.msra.mxu0 %v672_v13  ;;  %888 = vmatpush2.msra.mxu1 %v736_v14 }
 0x1ca   :  { %812 = vmatprep.subr.mxu0 %v671_v15  ;;  %889 = vmatprep.subr.mxu1 %v735_v16 }
 0x1cb   :  { %813 = vmatpush2.msra.mxu0 %v670_v17  ;;  %890 = vmatpush2.msra.mxu1 %v734_v18  ;;  %v1198_v17 = vmov 0.0  }
 0x1cc   :  { %814 = vmatprep.subr.mxu0 %v669_v19  ;;  %891 = vmatprep.subr.mxu1 %v733_v20  ;;  %960 = vst.msk [vmem:[#allocation2] sm:$0x1] %vm959_vm8, %v1198_v17 }
 0x1cd   :  { %815 = vmatpush2.msra.mxu0 %v668_v21  ;;  %892 = vmatpush2.msra.mxu1 %v732_v22 }
 0x1ce   :  { %816 = vmatprep.subr.mxu0 %v667_v31  ;;  %893 = vmatprep.subr.mxu1 %v731_v1 }
 0x1cf   :  { %817 = vmatpush2.msra.mxu0 %v666_v7 }
 0x22d   :  { %v577_v24 = vpop.xlane.xlu1 %576 }
 0x22e   :  { %vm578_vm14 = vcmp.eq.f32.partialorder %v1478_v8, %v577_v24  ;;  %v730_v8 = vld [vmem:[%s1912_s3 + $0x320] sm:$0xff]  ;;  %v583_v39 = vcvt.f32.s32 %v577_v24 }
 0x22f   :  { %v579_v27 = vsel %vm578_vm14, %v574_v25, inf  ;;  %894 = vmatpush2.msra.mxu1 %v730_v8 }
 0x230   :  { %580 = vmin.xlane.f32.xlu0 %v579_v27  ;;  %895 = vmatprep.subr.mxu1 %v729_v32  ;;  %v584_v42 = vshll.u32 %v583_v39, 16 }
 0x231   :  { %v597_v28 = vpop.xlane.xlu1 %596  ;;  %896 = vmatpush2.msra.mxu1 %v728_v34 }
 0x232   :  { %vm598_vm15 = vcmp.eq.f32.partialorder %v1482_v10, %v597_v28  ;;  %v665_v10 = vld [vmem:[%s1912_s3 + $0x118] sm:$0xff]  ;;  %897 = vmatprep.subr.mxu1 %v727_v36  ;;  %v603_v40 = vcvt.f32.s32 %v597_v28 }
 0x233   :  { %v599_v30 = vsel %vm598_vm15, %v594_v29, inf  ;;  %818 = vmatprep.subr.mxu0 %v665_v10  ;;  %898 = vmatpush2.msra.mxu1 %v726_v38 }
 0x234   :  { %600 = vmin.xlane.f32.xlu1 %v599_v30  ;;  %819 = vmatpush2.msra.mxu0 %v664_v33  ;;  %v604_v45 = vshll.u32 %v603_v40, 16 }
 0x235   :  { %820 = vmatprep.subr.mxu0 %v663_v35 }
 0x236   :  { %821 = vmatpush2.msra.mxu0 %v662_v37 }
 0x2b9   :  { %v581_v41 = vpop.xlane.xlu0 %580 }
 0x2ba   :  { %v582_v43 = vcvt.f32.s32 %v581_v41 }
 0x2bc   :  { %v585_v44 = vadd.s32 %v584_v42, %v582_v43 }
 0x2bd   :  { %v601_v48 = vpop.xlane.xlu1 %600 }
 0x2be   :  { %916 = vst [vmem:[%s1914_s5] sm:$0xff] %v585_v44  ;;  %v602_v53 = vcvt.f32.s32 %v601_v48  ;;  %vm607_vm0 = vcmp.eq.s32.totalorder %v1457_v50, %v585_v44  ;;  %vm609_vm1 = vcmp.eq.s32.totalorder %v1463_v52, %v585_v44  ;;  %vm606_vm2 = vcmp.eq.s32.totalorder %v1454_v49, %v585_v44 }
 0x2bf   :  { %1066 = vmatprep.mubr.msk.f32.mxu0 %vm607_vm0, %v1197_v54  ;;  %1070 = vmatprep.mubr.msk.f32.mxu1 %vm609_vm1, %v1197_v54  ;;  %vm608_vm3 = vcmp.eq.s32.totalorder %v1460_v51, %v585_v44 }
 0x2c0   :  { %v605_v55 = vadd.s32 %v604_v45, %v602_v53  ;;  %1067 = vmatmul.mubr.msk.f32.vlgmr.msra.gmra.mxu0 %vm606_vm2, %v1197_v54  ;;  %1071 = vmatmul.mubr.msk.f32.vlgmr.msra.gmra.mxu1 %vm608_vm3, %v1197_v54 }
 0x2c2   :  { %917 = vst [vmem:[%s1914_s5 + $0x8] sm:$0xff] %v605_v55  ;;  %vm611_vm4 = vcmp.eq.s32.totalorder %v1457_v50, %v605_v55  ;;  %vm613_vm5 = vcmp.eq.s32.totalorder %v1463_v52, %v605_v55  ;;  %vm610_vm6 = vcmp.eq.s32.totalorder %v1454_v49, %v605_v55  ;;  %vm612_vm7 = vcmp.eq.s32.totalorder %v1460_v51, %v605_v55 }
 0x2c3   :  { %1068 = vmatprep.mubr.msk.f32.mxu0 %vm611_vm4, %v1197_v54  ;;  %1072 = vmatprep.mubr.msk.f32.mxu1 %vm613_vm5, %v1197_v54 }
 0x2c4   :  { %1069 = vmatmul.mubr.msk.f32.gmra.mxu0 %vm610_vm6, %v1197_v54  ;;  %1073 = vmatmul.mubr.msk.f32.gmra.mxu1 %vm612_vm7, %v1197_v54 }
 0x380   :  { %v824_v56 = vpop.f32.mrf.mxu0  ;;  %v901_v57 = vpop.f32.mrf.mxu1 }
 0x381   :  { %v902_v58 = vadd.f32 %v901_v57, %v824_v56 }
 0x382   :  { %v826_v59 = vpop.f32.mrf.mxu0  ;;  %v903_v60 = vpop.f32.mrf.mxu1 }
 0x383   :  { %912 = vst [vmem:[%s1913_s4] sm:$0xff] %v902_v58  ;;  %v904_v50 = vadd.f32 %v903_v60, %v826_v59  ;;  %v931_v49 = vsub.f32 %v902_v58, %v1442_v3 }
 0x384   :  { %v830_v61 = vpop.f32.mrf.mxu0  ;;  %v907_v52 = vpop.f32.mrf.mxu1 }
 0x385   :  { %913 = vst [vmem:[%s1913_s4 + $0x8] sm:$0xff] %v904_v50  ;;  %v932_v51 = vsub.f32 %v904_v50, %v1376_v46  ;;  %v908_v62 = vadd.f32 %v907_v52, %v830_v61  ;;  %v935_v9 = vmul.f32 %v931_v49, %v931_v49 }
 0x386   :  { %v832_v63 = vpop.f32.mrf.mxu0  ;;  %v909_v0 = vpop.f32.mrf.mxu1 }
 0x387   :  { %v936_v2 = vmul.f32 %v932_v51, %v932_v51  ;;  %914 = vst [vmem:[%s1913_s4 + $0x10] sm:$0xff] %v908_v62  ;;  %v933_v5 = vsub.f32 %v908_v62, %v1447_v4  ;;  %v910_v6 = vadd.f32 %v909_v0, %v832_v63 }
 0x389   :  { %v937_v11 = vmul.f32 %v933_v5, %v933_v5  ;;  %915 = vst [vmem:[%s1913_s4 + $0x18] sm:$0xff] %v910_v6  ;;  %v934_v3 = vsub.f32 %v910_v6, %v1381_v47  ;;  %v943_v46 = vadd.f32 %v936_v2, %v935_v9  ;;  %v961_v47 = vld [vmem:[#allocation2] sm:$0x1] }
 0x38b   :  { %v941_v12 = vmul.f32 0.0, %v937_v11  ;;  %v938_v13 = vmul.f32 %v934_v3, %v934_v3 }
 0x38d   :  { %v942_v14 = vmul.f32 0.0, %v938_v13  ;;  %v944_v15 = vadd.f32 %v943_v46, %v941_v12 }
 0x38f   :  { %v945_v16 = vadd.f32 %v944_v15, %v942_v14 }
 0x391   :  { %946 = vadd.xlane.f32.xlu0 %v945_v16 }
 0x41a   :  { %v947_v4 = vpop.xlane.xlu0 %946 }
 0x41b   :  { %v948_v18 = vrot.slane %v947_v4, 4 }
 0x41d   :  { %v949_v19 = vadd.f32 %v948_v18, %v947_v4 }
 0x41f   :  { %v950_v20 = vrot.slane %v949_v19, 2 }
 0x421   :  { %v951_v21 = vadd.f32 %v950_v20, %v949_v19 }
 0x423   :  { %v952_v22 = vrot.slane %v951_v21, 1 }
 0x425   :  { %v953_v23 = vadd.f32 %v952_v22, %v951_v21 }
 0x427   :  { %1074 = vpush %v953_v23 }
 0x458   :  { %s1075_s4 = spop %1074 }
 0x459   :  { %v962_v24 = vstv %s1075_s4 }
 0x45a   :  { %v963_v25 = vadd.f32 %v962_v24, %v961_v47 }
 0x45c   :  { %965 = vst.msk [vmem:[#allocation2] sm:$0x1] %vm959_vm8, %v963_v25 }
 0x463   :  { %v969_v26 = vld [vmem:[#allocation2] sm:$0x1] }
 0x464   :  { %v970_v27 = vmul.f32 0.00024414063, %v969_v26 }
 0x466   :  { %971 = vst.msk [vmem:[#allocation2] sm:$0x1] %vm959_vm8, %v970_v27 }
 0x467   :  { %1186 = shalt.err (!%p1183_p4)
}
 0x468   :  { %985 = dma.vmem_to_hbm [thread:$0]  %s983_s12, 16, %s1915_s6, [#allocation3]  }
 0x469   :  { %1195 = dma.done.wait [#allocation3], 16  }
 0x46a   :  { %1196 = vsyncadd [#allocation3], 4294967280 }
 0x46b   :  { %993 = vsyncpa [#allocation3], 1 }

// kernel: vqvae_forward.47
= control target key start
LH: loop header
LB: loop body
LE: loop exit
PB: predicated region body
PF: predicated region fallthrough
CT: control target
= control target key end

     0   :  { %s3795_s1 = inlined_call_operand.vmem [shape: bf16[1024,512], index: 1, kind: input, shape index: {}]   ;;  %s3796_s0 = inlined_call_operand.vmem [shape: bf16[32,1024], index: 0, kind: input, shape index: {}]   ;;  %s3797_s2 = inlined_call_operand.vmem [shape: f32[1,512], index: 2, kind: input, shape index: {}]   ;;  %s3798_s3 = inlined_call_operand.vmem [shape: bf16[32,512], index: 3, kind: output, shape index: {}]  }
   0x1   :  { %v2456_v0 = vld [vmem:[%s3795_s1 + $0xe4] ss:$16 sps:$4 sm:$0xff]   ;;  %v2460_v2 = vld [vmem:[%s3795_s1 + $0xe0] ss:$16 sps:$4 sm:$0xff]   ;;  %v15_v50 = vld [vmem:[%s3796_s0 + $0x8] sm:$0xff] }
   0x2   :  { %v2458_v1 = vld [vmem:[%s3795_s1 + $0x2e4] ss:$16 sps:$4 sm:$0xff]   ;;  %1668 = vmatprep.subr.bf16.mxu0 %v2456_v0  ;;  %v2461_v3 = vld [vmem:[%s3795_s1 + $0x2e0] ss:$16 sps:$4 sm:$0xff]   ;;  %v19_v51 = vld [vmem:[%s3796_s0 + $0x28] sm:$0xff] }
   0x3   :  { %1721 = vmatprep.subr.bf16.mxu1 %v2458_v1  ;;  %v2462_v4 = vld [vmem:[%s3795_s1 + $0xc4] ss:$16 sps:$4 sm:$0xff]   ;;  %1669 = vmatpush1.bf16.msra.mxu0 %v2460_v2  ;;  %v2466_v6 = vld [vmem:[%s3795_s1 + $0xc0] ss:$16 sps:$4 sm:$0xff]   ;;  %v3024_v55 = vcombine.high %v15_v50, %v19_v51 }
   0x4   :  { %1722 = vmatpush1.bf16.msra.mxu1 %v2461_v3  ;;  %v2464_v5 = vld [vmem:[%s3795_s1 + $0x2c4] ss:$16 sps:$4 sm:$0xff]   ;;  %1670 = vmatprep.subr.bf16.mxu0 %v2462_v4  ;;  %v2467_v7 = vld [vmem:[%s3795_s1 + $0x2c0] ss:$16 sps:$4 sm:$0xff]  }
   0x5   :  { %1723 = vmatprep.subr.bf16.mxu1 %v2464_v5  ;;  %v2468_v8 = vld [vmem:[%s3795_s1 + $0xa4] ss:$16 sps:$4 sm:$0xff]   ;;  %v2472_v10 = vld [vmem:[%s3795_s1 + $0xa0] ss:$16 sps:$4 sm:$0xff]   ;;  %1753 = vmatprep.mubr.bf16.mxu1 %v3024_v55 }
   0x6   :  { %v2470_v9 = vld [vmem:[%s3795_s1 + $0x2a4] ss:$16 sps:$4 sm:$0xff]   ;;  %v2473_v11 = vld [vmem:[%s3795_s1 + $0x2a0] ss:$16 sps:$4 sm:$0xff]  }
   0x7   :  { %1671 = vmatpush1.bf16.msra.mxu0 %v2466_v6  ;;  %v2474_v12 = vld [vmem:[%s3795_s1 + $0x84] ss:$16 sps:$4 sm:$0xff]   ;;  %v2478_v14 = vld [vmem:[%s3795_s1 + $0x80] ss:$16 sps:$4 sm:$0xff]  }
   0x8   :  { %1724 = vmatpush1.bf16.msra.mxu1 %v2467_v7  ;;  %1672 = vmatprep.subr.bf16.mxu0 %v2468_v8  ;;  %v2476_v13 = vld [vmem:[%s3795_s1 + $0x284] ss:$16 sps:$4 sm:$0xff]   ;;  %v2479_v15 = vld [vmem:[%s3795_s1 + $0x280] ss:$16 sps:$4 sm:$0xff]  }
   0x9   :  { %1725 = vmatprep.subr.bf16.mxu1 %v2470_v9  ;;  %v2480_v16 = vld [vmem:[%s3795_s1 + $0x64] ss:$16 sps:$4 sm:$0xff]   ;;  %v2484_v18 = vld [vmem:[%s3795_s1 + $0x60] ss:$16 sps:$4 sm:$0xff]   ;;  %v3078_v9 = vcombine.low %v15_v50, %v19_v51  ;;  %v3212_v50 = vld [vmem:[%s3796_s0 + $0x38] sm:$0xff] }
   0xa   :  { %v2482_v17 = vld [vmem:[%s3795_s1 + $0x264] ss:$16 sps:$4 sm:$0xff]   ;;  %v2485_v19 = vld [vmem:[%s3795_s1 + $0x260] ss:$16 sps:$4 sm:$0xff]  }
   0xb   :  { %1673 = vmatpush1.bf16.msra.mxu0 %v2472_v10  ;;  %v2486_v20 = vld [vmem:[%s3795_s1 + $0x44] ss:$16 sps:$4 sm:$0xff]   ;;  %v2490_v22 = vld [vmem:[%s3795_s1 + $0x40] ss:$16 sps:$4 sm:$0xff]  }
   0xc   :  { %1726 = vmatpush1.bf16.msra.mxu1 %v2473_v11  ;;  %1674 = vmatprep.subr.bf16.mxu0 %v2474_v12  ;;  %v2488_v21 = vld [vmem:[%s3795_s1 + $0x244] ss:$16 sps:$4 sm:$0xff]   ;;  %v2491_v23 = vld [vmem:[%s3795_s1 + $0x240] ss:$16 sps:$4 sm:$0xff]  }
   0xd   :  { %1727 = vmatprep.subr.bf16.mxu1 %v2476_v13  ;;  %v2492_v24 = vld [vmem:[%s3795_s1 + $0x24] ss:$16 sps:$4 sm:$0xff]   ;;  %v2496_v26 = vld [vmem:[%s3795_s1 + $0x20] ss:$16 sps:$4 sm:$0xff]  }
   0xe   :  { %v2494_v25 = vld [vmem:[%s3795_s1 + $0x224] ss:$16 sps:$4 sm:$0xff]   ;;  %v2497_v27 = vld [vmem:[%s3795_s1 + $0x220] ss:$16 sps:$4 sm:$0xff]  }
   0xf   :  { %1675 = vmatpush1.bf16.msra.mxu0 %v2478_v14  ;;  %v2498_v28 = vld [vmem:[%s3795_s1 + $0x4] ss:$16 sps:$4 sm:$0xff]   ;;  %v2502_v30 = vld [vmem:[%s3795_s1] ss:$16 sps:$4 sm:$0xff]  }
  0x10   :  { %1728 = vmatpush1.bf16.msra.mxu1 %v2479_v15  ;;  %1676 = vmatprep.subr.bf16.mxu0 %v2480_v16  ;;  %v2500_v29 = vld [vmem:[%s3795_s1 + $0x204] ss:$16 sps:$4 sm:$0xff]   ;;  %v2503_v31 = vld [vmem:[%s3795_s1 + $0x200] ss:$16 sps:$4 sm:$0xff]  }
  0x11   :  { %1729 = vmatprep.subr.bf16.mxu1 %v2482_v17  ;;  %v2504_v32 = vld [vmem:[%s3795_s1 + $0x1e4] ss:$16 sps:$4 sm:$0xff]   ;;  %v2508_v34 = vld [vmem:[%s3795_s1 + $0x1e0] ss:$16 sps:$4 sm:$0xff]  }
  0x12   :  { %v2506_v33 = vld [vmem:[%s3795_s1 + $0x3e4] ss:$16 sps:$4 sm:$0xff]   ;;  %v2509_v35 = vld [vmem:[%s3795_s1 + $0x3e0] ss:$16 sps:$4 sm:$0xff]  }
  0x13   :  { %1677 = vmatpush1.bf16.msra.mxu0 %v2484_v18  ;;  %v2510_v36 = vld [vmem:[%s3795_s1 + $0x1c4] ss:$16 sps:$4 sm:$0xff]   ;;  %v2514_v38 = vld [vmem:[%s3795_s1 + $0x1c0] ss:$16 sps:$4 sm:$0xff]  }
  0x14   :  { %1730 = vmatpush1.bf16.msra.mxu1 %v2485_v19  ;;  %1678 = vmatprep.subr.bf16.mxu0 %v2486_v20  ;;  %v2512_v37 = vld [vmem:[%s3795_s1 + $0x3c4] ss:$16 sps:$4 sm:$0xff]   ;;  %v2515_v39 = vld [vmem:[%s3795_s1 + $0x3c0] ss:$16 sps:$4 sm:$0xff]  }
  0x15   :  { %1731 = vmatprep.subr.bf16.mxu1 %v2488_v21  ;;  %v2516_v40 = vld [vmem:[%s3795_s1 + $0x1a4] ss:$16 sps:$4 sm:$0xff]   ;;  %v2520_v42 = vld [vmem:[%s3795_s1 + $0x1a0] ss:$16 sps:$4 sm:$0xff]  }
  0x16   :  { %v2518_v41 = vld [vmem:[%s3795_s1 + $0x3a4] ss:$16 sps:$4 sm:$0xff]   ;;  %v2521_v43 = vld [vmem:[%s3795_s1 + $0x3a0] ss:$16 sps:$4 sm:$0xff]  }
  0x17   :  { %1679 = vmatpush1.bf16.msra.mxu0 %v2490_v22  ;;  %v2522_v44 = vld [vmem:[%s3795_s1 + $0x184] ss:$16 sps:$4 sm:$0xff]   ;;  %v2526_v46 = vld [vmem:[%s3795_s1 + $0x180] ss:$16 sps:$4 sm:$0xff]  }
  0x18   :  { %1732 = vmatpush1.bf16.msra.mxu1 %v2491_v23  ;;  %1680 = vmatprep.subr.bf16.mxu0 %v2492_v24  ;;  %v2524_v45 = vld [vmem:[%s3795_s1 + $0x384] ss:$16 sps:$4 sm:$0xff]   ;;  %v2527_v47 = vld [vmem:[%s3795_s1 + $0x380] ss:$16 sps:$4 sm:$0xff]  }
  0x19   :  { %1733 = vmatprep.subr.bf16.mxu1 %v2494_v25  ;;  %v14_v48 = vld [vmem:[%s3796_s0] sm:$0xff] }
  0x1a   :  { %v18_v49 = vld [vmem:[%s3796_s0 + $0x20] sm:$0xff] }
  0x1b   :  { %1681 = vmatpush1.bf16.msra.mxu0 %v2496_v26  ;;  %v2528_v52 = vld [vmem:[%s3795_s1 + $0x164] ss:$16 sps:$4 sm:$0xff]   ;;  %v3019_v53 = vcombine.high %v14_v48, %v18_v49  ;;  %v2532_v56 = vld [vmem:[%s3795_s1 + $0x160] ss:$16 sps:$4 sm:$0xff]   ;;  %v3076_v8 = vcombine.low %v14_v48, %v18_v49  ;;  %v3203_v48 = vld [vmem:[%s3796_s0 + $0x18] sm:$0xff] }
  0x1c   :  { %1734 = vmatpush1.bf16.msra.mxu1 %v2497_v27  ;;  %1682 = vmatprep.subr.bf16.mxu0 %v2498_v28  ;;  %v2530_v54 = vld [vmem:[%s3795_s1 + $0x364] ss:$16 sps:$4 sm:$0xff]   ;;  %v2533_v57 = vld [vmem:[%s3795_s1 + $0x360] ss:$16 sps:$4 sm:$0xff]   ;;  %v3216_v51 = vcombine.high %v3203_v48, %v3212_v50 }
  0x1d   :  { %1735 = vmatprep.subr.bf16.mxu1 %v2500_v29  ;;  %1700 = vmatprep.mubr.bf16.mxu0 %v3019_v53  ;;  %v2534_v58 = vld [vmem:[%s3795_s1 + $0x144] ss:$16 sps:$4 sm:$0xff]   ;;  %v2538_v60 = vld [vmem:[%s3795_s1 + $0x140] ss:$16 sps:$4 sm:$0xff]  }
  0x1e   :  { %v2536_v59 = vld [vmem:[%s3795_s1 + $0x344] ss:$16 sps:$4 sm:$0xff]   ;;  %v2539_v61 = vld [vmem:[%s3795_s1 + $0x340] ss:$16 sps:$4 sm:$0xff]  }
  0x1f   :  { %1683 = vmatpush1.bf16.msra.mxu0 %v2502_v30  ;;  %v2540_v62 = vld [vmem:[%s3795_s1 + $0x124] ss:$16 sps:$4 sm:$0xff]   ;;  %v2544_v0 = vld [vmem:[%s3795_s1 + $0x120] ss:$16 sps:$4 sm:$0xff]   ;;  %v23_v30 = vld [vmem:[%s3796_s0 + $0x48] sm:$0xff] }
  0x20   :  { %1736 = vmatpush1.bf16.msra.mxu1 %v2503_v31  ;;  %1684 = vmatprep.subr.bf16.mxu0 %v2504_v32  ;;  %v2542_v63 = vld [vmem:[%s3795_s1 + $0x324] ss:$16 sps:$4 sm:$0xff]   ;;  %v2545_v1 = vld [vmem:[%s3795_s1 + $0x320] ss:$16 sps:$4 sm:$0xff]   ;;  %v27_v31 = vld [vmem:[%s3796_s0 + $0x68] sm:$0xff] }
  0x21   :  { %1737 = vmatprep.subr.bf16.mxu1 %v2506_v33  ;;  %v2546_v2 = vld [vmem:[%s3795_s1 + $0x104] ss:$16 sps:$4 sm:$0xff]   ;;  %v2550_v4 = vld [vmem:[%s3795_s1 + $0x100] ss:$16 sps:$4 sm:$0xff]  }
  0x22   :  { %v2548_v3 = vld [vmem:[%s3795_s1 + $0x304] ss:$16 sps:$4 sm:$0xff]   ;;  %v2551_v5 = vld [vmem:[%s3795_s1 + $0x300] ss:$16 sps:$4 sm:$0xff]  }
  0x23   :  { %1685 = vmatpush2.bf16.msra.mxu0 %v2508_v34  ;;  %v2554_v6 = vld [vmem:[%s3795_s1 + $0x4e4] ss:$16 sps:$4 sm:$0xff]   ;;  %v2552_v10 = vld [vmem:[%s3795_s1 + $0x4e0] ss:$16 sps:$4 sm:$0xff]  }
  0x24   :  { %1738 = vmatpush2.bf16.msra.mxu1 %v2509_v35  ;;  %1686 = vmatprep.subr.bf16.mxu0 %v2510_v36  ;;  %v2557_v7 = vld [vmem:[%s3795_s1 + $0x6e4] ss:$16 sps:$4 sm:$0xff]   ;;  %v2555_v11 = vld [vmem:[%s3795_s1 + $0x6e0] ss:$16 sps:$4 sm:$0xff]   ;;  %v3155_v35 = vcombine.high %v23_v30, %v27_v31 }
  0x25   :  { %1739 = vmatprep.subr.bf16.mxu1 %v2512_v37  ;;  %v2560_v12 = vld [vmem:[%s3795_s1 + $0x4c4] ss:$16 sps:$4 sm:$0xff]   ;;  %v2558_v14 = vld [vmem:[%s3795_s1 + $0x4c0] ss:$16 sps:$4 sm:$0xff]   ;;  %v3160_v37 = vcombine.low %v23_v30, %v27_v31 }
  0x26   :  { %v2563_v13 = vld [vmem:[%s3795_s1 + $0x6c4] ss:$16 sps:$4 sm:$0xff]   ;;  %v2561_v15 = vld [vmem:[%s3795_s1 + $0x6c0] ss:$16 sps:$4 sm:$0xff]  }
  0x27   :  { %1687 = vmatpush2.bf16.msra.mxu0 %v2514_v38  ;;  %v2566_v16 = vld [vmem:[%s3795_s1 + $0x4a4] ss:$16 sps:$4 sm:$0xff]   ;;  %v2564_v18 = vld [vmem:[%s3795_s1 + $0x4a0] ss:$16 sps:$4 sm:$0xff]  }
  0x28   :  { %1740 = vmatpush2.bf16.msra.mxu1 %v2515_v39  ;;  %1688 = vmatprep.subr.bf16.mxu0 %v2516_v40  ;;  %v2569_v17 = vld [vmem:[%s3795_s1 + $0x6a4] ss:$16 sps:$4 sm:$0xff]   ;;  %v2567_v19 = vld [vmem:[%s3795_s1 + $0x6a0] ss:$16 sps:$4 sm:$0xff]  }
  0x29   :  { %1741 = vmatprep.subr.bf16.mxu1 %v2518_v41  ;;  %v2572_v20 = vld [vmem:[%s3795_s1 + $0x484] ss:$16 sps:$4 sm:$0xff]   ;;  %v2570_v22 = vld [vmem:[%s3795_s1 + $0x480] ss:$16 sps:$4 sm:$0xff]  }
  0x2a   :  { %v2575_v21 = vld [vmem:[%s3795_s1 + $0x684] ss:$16 sps:$4 sm:$0xff]   ;;  %v2573_v23 = vld [vmem:[%s3795_s1 + $0x680] ss:$16 sps:$4 sm:$0xff]  }
  0x2b   :  { %1689 = vmatpush2.bf16.msra.mxu0 %v2520_v42  ;;  %v2578_v24 = vld [vmem:[%s3795_s1 + $0x464] ss:$16 sps:$4 sm:$0xff]   ;;  %v2576_v26 = vld [vmem:[%s3795_s1 + $0x460] ss:$16 sps:$4 sm:$0xff]  }
  0x2c   :  { %1742 = vmatpush2.bf16.msra.mxu1 %v2521_v43  ;;  %1690 = vmatprep.subr.bf16.mxu0 %v2522_v44  ;;  %v2581_v25 = vld [vmem:[%s3795_s1 + $0x664] ss:$16 sps:$4 sm:$0xff]   ;;  %v2579_v27 = vld [vmem:[%s3795_s1 + $0x660] ss:$16 sps:$4 sm:$0xff]  }
  0x2d   :  { %1743 = vmatprep.subr.bf16.mxu1 %v2524_v45  ;;  %v22_v28 = vld [vmem:[%s3796_s0 + $0x40] sm:$0xff]  ;;  %v24_v30 = vld [vmem:[%s3796_s0 + $0x50] sm:$0xff] }
  0x2e   :  { %v26_v29 = vld [vmem:[%s3796_s0 + $0x60] sm:$0xff]  ;;  %v28_v31 = vld [vmem:[%s3796_s0 + $0x70] sm:$0xff] }
  0x2f   :  { %1691 = vmatpush2.bf16.msra.mxu0 %v2526_v46  ;;  %v2584_v32 = vld [vmem:[%s3795_s1 + $0x444] ss:$16 sps:$4 sm:$0xff]   ;;  %v3151_v33 = vcombine.high %v22_v28, %v26_v29  ;;  %v3153_v34 = vcombine.low %v22_v28, %v26_v29  ;;  %v2582_v38 = vld [vmem:[%s3795_s1 + $0x440] ss:$16 sps:$4 sm:$0xff]   ;;  %v2648_v28 = vld [vmem:[%s3795_s1 + $0xe8] ss:$16 sps:$4 sm:$0xff]  }
  0x30   :  { %1744 = vmatpush2.bf16.msra.mxu1 %v2527_v47  ;;  %1692 = vmatprep.subr.bf16.mxu0 %v2528_v52  ;;  %v2587_v36 = vld [vmem:[%s3795_s1 + $0x644] ss:$16 sps:$4 sm:$0xff]   ;;  %v2585_v39 = vld [vmem:[%s3795_s1 + $0x640] ss:$16 sps:$4 sm:$0xff]   ;;  %v2651_v29 = vld [vmem:[%s3795_s1 + $0x2e8] ss:$16 sps:$4 sm:$0xff]  }
  0x31   :  { %1745 = vmatprep.subr.bf16.mxu1 %v2530_v54  ;;  %v2590_v40 = vld [vmem:[%s3795_s1 + $0x424] ss:$16 sps:$4 sm:$0xff]   ;;  %v2588_v42 = vld [vmem:[%s3795_s1 + $0x420] ss:$16 sps:$4 sm:$0xff]  }
  0x32   :  { %v2593_v41 = vld [vmem:[%s3795_s1 + $0x624] ss:$16 sps:$4 sm:$0xff]   ;;  %v2591_v43 = vld [vmem:[%s3795_s1 + $0x620] ss:$16 sps:$4 sm:$0xff]  }
  0x33   :  { %1693 = vmatpush2.bf16.msra.mxu0 %v2532_v56  ;;  %v2596_v44 = vld [vmem:[%s3795_s1 + $0x404] ss:$16 sps:$4 sm:$0xff]   ;;  %v2594_v52 = vld [vmem:[%s3795_s1 + $0x400] ss:$16 sps:$4 sm:$0xff]  }
  0x34   :  { %1746 = vmatpush2.bf16.msra.mxu1 %v2533_v57  ;;  %1694 = vmatprep.subr.bf16.mxu0 %v2534_v58  ;;  %v2599_v45 = vld [vmem:[%s3795_s1 + $0x604] ss:$16 sps:$4 sm:$0xff]   ;;  %v2597_v54 = vld [vmem:[%s3795_s1 + $0x600] ss:$16 sps:$4 sm:$0xff]  }
  0x35   :  { %1747 = vmatprep.subr.bf16.mxu1 %v2536_v59  ;;  %v3193_v46 = vld [vmem:[%s3796_s0 + $0x10] sm:$0xff] }
  0x36   :  { %v3198_v47 = vld [vmem:[%s3796_s0 + $0x30] sm:$0xff] }
  0x37   :  { %1695 = vmatpush2.bf16.msra.mxu0 %v2538_v60  ;;  %v3207_v49 = vcombine.high %v3193_v46, %v3198_v47  ;;  %v2602_v56 = vld [vmem:[%s3795_s1 + $0x5e4] ss:$16 sps:$4 sm:$0xff]   ;;  %v2600_v58 = vld [vmem:[%s3795_s1 + $0x5e0] ss:$16 sps:$4 sm:$0xff]  }
  0x38   :  { %1748 = vmatpush2.bf16.msra.mxu1 %v2539_v61  ;;  %1696 = vmatprep.subr.bf16.mxu0 %v2540_v62  ;;  %v2605_v57 = vld [vmem:[%s3795_s1 + $0x7e4] ss:$16 sps:$4 sm:$0xff]   ;;  %v2603_v59 = vld [vmem:[%s3795_s1 + $0x7e0] ss:$16 sps:$4 sm:$0xff]  }
  0x39   :  { %1749 = vmatprep.subr.bf16.mxu1 %v2542_v63  ;;  %v2608_v60 = vld [vmem:[%s3795_s1 + $0x5c4] ss:$16 sps:$4 sm:$0xff]   ;;  %v2606_v62 = vld [vmem:[%s3795_s1 + $0x5c0] ss:$16 sps:$4 sm:$0xff]  }
  0x3a   :  { %v2611_v61 = vld [vmem:[%s3795_s1 + $0x7c4] ss:$16 sps:$4 sm:$0xff]   ;;  %v2609_v63 = vld [vmem:[%s3795_s1 + $0x7c0] ss:$16 sps:$4 sm:$0xff]  }
  0x3b   :  { %1697 = vmatpush2.bf16.msra.mxu0 %v2544_v0  ;;  %v2614_v0 = vld [vmem:[%s3795_s1 + $0x5a4] ss:$16 sps:$4 sm:$0xff]  }
  0x3c   :  { %1750 = vmatpush2.bf16.msra.mxu1 %v2545_v1  ;;  %1698 = vmatprep.subr.bf16.mxu0 %v2546_v2  ;;  %v2617_v1 = vld [vmem:[%s3795_s1 + $0x7a4] ss:$16 sps:$4 sm:$0xff]   ;;  %v2612_v2 = vld [vmem:[%s3795_s1 + $0x5a0] ss:$16 sps:$4 sm:$0xff]  }
  0x3d   :  { %1751 = vmatprep.subr.bf16.mxu1 %v2548_v3  ;;  %v2615_v3 = vld [vmem:[%s3795_s1 + $0x7a0] ss:$16 sps:$4 sm:$0xff]  }
  0x3f   :  { %1699 = vmatpush2.bf16.msra.mxu0 %v2550_v4  ;;  %v2620_v4 = vld [vmem:[%s3795_s1 + $0x584] ss:$16 sps:$4 sm:$0xff]  }
  0x40   :  { %1752 = vmatpush2.bf16.msra.mxu1 %v2551_v5  ;;  %1774 = vmatprep.subr.bf16.mxu0 %v2554_v6  ;;  %v2623_v5 = vld [vmem:[%s3795_s1 + $0x784] ss:$16 sps:$4 sm:$0xff]   ;;  %v2618_v6 = vld [vmem:[%s3795_s1 + $0x580] ss:$16 sps:$4 sm:$0xff]  }
  0x41   :  { %1827 = vmatprep.subr.bf16.mxu1 %v2557_v7  ;;  %v2621_v7 = vld [vmem:[%s3795_s1 + $0x780] ss:$16 sps:$4 sm:$0xff]  }
  0x42   :  { %1701 = vmatmul.mubr.bf16.vlgmr.msra.gmra.mxu0 %v3076_v8 }
  0x43   :  { %1754 = vmatmul.mubr.bf16.vlgmr.msra.gmra.mxu1 %v3078_v9  ;;  %1775 = vmatpush1.bf16.msra.mxu0 %v2552_v10  ;;  %v2626_v10 = vld [vmem:[%s3795_s1 + $0x564] ss:$16 sps:$4 sm:$0xff]  }
  0x44   :  { %1828 = vmatpush1.bf16.msra.mxu1 %v2555_v11  ;;  %1776 = vmatprep.subr.bf16.mxu0 %v2560_v12  ;;  %v2629_v11 = vld [vmem:[%s3795_s1 + $0x764] ss:$16 sps:$4 sm:$0xff]   ;;  %v2624_v12 = vld [vmem:[%s3795_s1 + $0x560] ss:$16 sps:$4 sm:$0xff]  }
  0x45   :  { %1829 = vmatprep.subr.bf16.mxu1 %v2563_v13  ;;  %1710 = vmatprep.mubr.bf16.mxu0 %v3151_v33  ;;  %v2627_v13 = vld [vmem:[%s3795_s1 + $0x760] ss:$16 sps:$4 sm:$0xff]  }
  0x46   :  { %1763 = vmatprep.mubr.bf16.mxu1 %v3155_v35 }
  0x47   :  { %1777 = vmatpush1.bf16.msra.mxu0 %v2558_v14  ;;  %v2632_v14 = vld [vmem:[%s3795_s1 + $0x544] ss:$16 sps:$4 sm:$0xff]  }
  0x48   :  { %1830 = vmatpush1.bf16.msra.mxu1 %v2561_v15  ;;  %1778 = vmatprep.subr.bf16.mxu0 %v2566_v16  ;;  %v2635_v15 = vld [vmem:[%s3795_s1 + $0x744] ss:$16 sps:$4 sm:$0xff]   ;;  %v2630_v16 = vld [vmem:[%s3795_s1 + $0x540] ss:$16 sps:$4 sm:$0xff]  }
  0x49   :  { %1831 = vmatprep.subr.bf16.mxu1 %v2569_v17  ;;  %v2633_v17 = vld [vmem:[%s3795_s1 + $0x740] ss:$16 sps:$4 sm:$0xff]  }
  0x4a   :  { %1711 = vmatmul.mubr.bf16.gmra.mxu0 %v3153_v34 }
  0x4b   :  { %1779 = vmatpush1.bf16.msra.mxu0 %v2564_v18  ;;  %1764 = vmatmul.mubr.bf16.gmra.mxu1 %v3160_v37  ;;  %v2638_v18 = vld [vmem:[%s3795_s1 + $0x524] ss:$16 sps:$4 sm:$0xff]  }
  0x4c   :  { %1832 = vmatpush1.bf16.msra.mxu1 %v2567_v19  ;;  %1780 = vmatprep.subr.bf16.mxu0 %v2572_v20  ;;  %v2641_v19 = vld [vmem:[%s3795_s1 + $0x724] ss:$16 sps:$4 sm:$0xff]   ;;  %v2636_v20 = vld [vmem:[%s3795_s1 + $0x520] ss:$16 sps:$4 sm:$0xff]  }
  0x4d   :  { %1833 = vmatprep.subr.bf16.mxu1 %v2575_v21  ;;  %1806 = vmatprep.mubr.bf16.mxu0 %v3207_v49  ;;  %v2639_v21 = vld [vmem:[%s3795_s1 + $0x720] ss:$16 sps:$4 sm:$0xff]  }
  0x4e   :  { %1859 = vmatprep.mubr.bf16.mxu1 %v3216_v51 }
  0x4f   :  { %1781 = vmatpush1.bf16.msra.mxu0 %v2570_v22  ;;  %v2644_v22 = vld [vmem:[%s3795_s1 + $0x504] ss:$16 sps:$4 sm:$0xff]  }
  0x50   :  { %1834 = vmatpush1.bf16.msra.mxu1 %v2573_v23  ;;  %1782 = vmatprep.subr.bf16.mxu0 %v2578_v24  ;;  %v2647_v23 = vld [vmem:[%s3795_s1 + $0x704] ss:$16 sps:$4 sm:$0xff]   ;;  %v2642_v24 = vld [vmem:[%s3795_s1 + $0x500] ss:$16 sps:$4 sm:$0xff]  }
  0x51   :  { %1835 = vmatprep.subr.bf16.mxu1 %v2581_v25  ;;  %v2645_v25 = vld [vmem:[%s3795_s1 + $0x700] ss:$16 sps:$4 sm:$0xff]  }
  0x53   :  { %1783 = vmatpush1.bf16.msra.mxu0 %v2576_v26  ;;  %v2650_v26 = vld [vmem:[%s3795_s1 + $0xec] ss:$16 sps:$4 sm:$0xff]  }
  0x54   :  { %1836 = vmatpush1.bf16.msra.mxu1 %v2579_v27  ;;  %1784 = vmatprep.subr.bf16.mxu0 %v2584_v32  ;;  %v2653_v27 = vld [vmem:[%s3795_s1 + $0x2ec] ss:$16 sps:$4 sm:$0xff]   ;;  %v3342_v32 = vcombine.low %v3193_v46, %v3198_v47 }
  0x55   :  { %1837 = vmatprep.subr.bf16.mxu1 %v2587_v36  ;;  %v3346_v36 = vcombine.low %v3203_v48, %v3212_v50  ;;  %v2662_v46 = vld [vmem:[%s3795_s1 + $0xac] ss:$16 sps:$4 sm:$0xff]   ;;  %v3380_v48 = vcombine.low %v24_v30, %v28_v31  ;;  %v2660_v50 = vld [vmem:[%s3795_s1 + $0xa8] ss:$16 sps:$4 sm:$0xff]  }
  0x56   :  { %v2665_v47 = vld [vmem:[%s3795_s1 + $0x2ac] ss:$16 sps:$4 sm:$0xff]  }
  0x57   :  { %1785 = vmatpush1.bf16.msra.mxu0 %v2582_v38  ;;  %v25_v38 = vld [vmem:[%s3796_s0 + $0x58] sm:$0xff] }
  0x58   :  { %1838 = vmatpush1.bf16.msra.mxu1 %v2585_v39  ;;  %1786 = vmatprep.subr.bf16.mxu0 %v2590_v40  ;;  %v29_v39 = vld [vmem:[%s3796_s0 + $0x78] sm:$0xff] }
  0x59   :  { %1839 = vmatprep.subr.bf16.mxu1 %v2593_v41  ;;  %v2656_v40 = vld [vmem:[%s3795_s1 + $0xcc] ss:$16 sps:$4 sm:$0xff]  }
  0x5a   :  { %v2659_v41 = vld [vmem:[%s3795_s1 + $0x2cc] ss:$16 sps:$4 sm:$0xff]  }
  0x5b   :  { %1787 = vmatpush1.bf16.msra.mxu0 %v2588_v42  ;;  %v3360_v42 = vcombine.high %v24_v30, %v28_v31  ;;  %v2720_v30 = vld [vmem:[%s3795_s1 + $0x168] ss:$16 sps:$4 sm:$0xff]  }
  0x5c   :  { %1840 = vmatpush1.bf16.msra.mxu1 %v2591_v43  ;;  %1788 = vmatprep.subr.bf16.mxu0 %v2596_v44  ;;  %v3362_v43 = vcombine.high %v25_v38, %v29_v39  ;;  %v2654_v44 = vld [vmem:[%s3795_s1 + $0xc8] ss:$16 sps:$4 sm:$0xff]  }
  0x5d   :  { %1841 = vmatprep.subr.bf16.mxu1 %v2599_v45  ;;  %v2657_v45 = vld [vmem:[%s3795_s1 + $0x2c8] ss:$16 sps:$4 sm:$0xff]  }
  0x5e   :  { %v2723_v31 = vld [vmem:[%s3795_s1 + $0x368] ss:$16 sps:$4 sm:$0xff]  }
  0x5f   :  { %1789 = vmatpush1.bf16.msra.mxu0 %v2594_v52  ;;  %v2663_v52 = vld [vmem:[%s3795_s1 + $0x2a8] ss:$16 sps:$4 sm:$0xff]  }
  0x60   :  { %1842 = vmatpush1.bf16.msra.mxu1 %v2597_v54  ;;  %1790 = vmatprep.subr.bf16.mxu0 %v2602_v56  ;;  %v3388_v54 = vcombine.low %v25_v38, %v29_v39  ;;  %v2668_v56 = vld [vmem:[%s3795_s1 + $0x8c] ss:$16 sps:$4 sm:$0xff]  }
  0x61   :  { %1843 = vmatprep.subr.bf16.mxu1 %v2605_v57  ;;  %v2671_v57 = vld [vmem:[%s3795_s1 + $0x28c] ss:$16 sps:$4 sm:$0xff]  }
  0x62   :  { %v2728_v38 = vld [vmem:[%s3795_s1 + $0x14c] ss:$16 sps:$4 sm:$0xff]  }
  0x63   :  { %1791 = vmatpush2.bf16.msra.mxu0 %v2600_v58  ;;  %v2666_v58 = vld [vmem:[%s3795_s1 + $0x88] ss:$16 sps:$4 sm:$0xff]   ;;  %v2731_v39 = vld [vmem:[%s3795_s1 + $0x34c] ss:$16 sps:$4 sm:$0xff]  }
  0x64   :  { %1844 = vmatpush2.bf16.msra.mxu1 %v2603_v59  ;;  %1792 = vmatprep.subr.bf16.mxu0 %v2608_v60  ;;  %v2669_v59 = vld [vmem:[%s3795_s1 + $0x288] ss:$16 sps:$4 sm:$0xff]   ;;  %v2674_v60 = vld [vmem:[%s3795_s1 + $0x6c] ss:$16 sps:$4 sm:$0xff]  }
  0x65   :  { %1845 = vmatprep.subr.bf16.mxu1 %v2611_v61  ;;  %v2677_v61 = vld [vmem:[%s3795_s1 + $0x26c] ss:$16 sps:$4 sm:$0xff]  }
  0x67   :  { %1793 = vmatpush2.bf16.msra.mxu0 %v2606_v62  ;;  %v2672_v62 = vld [vmem:[%s3795_s1 + $0x68] ss:$16 sps:$4 sm:$0xff]  }
  0x68   :  { %1846 = vmatpush2.bf16.msra.mxu1 %v2609_v63  ;;  %1794 = vmatprep.subr.bf16.mxu0 %v2614_v0  ;;  %v2675_v63 = vld [vmem:[%s3795_s1 + $0x268] ss:$16 sps:$4 sm:$0xff]   ;;  %v2680_v0 = vld [vmem:[%s3795_s1 + $0x4c] ss:$16 sps:$4 sm:$0xff]  }
  0x69   :  { %1847 = vmatprep.subr.bf16.mxu1 %v2617_v1  ;;  %v2681_v1 = vld [vmem:[%s3795_s1 + $0x248] ss:$16 sps:$4 sm:$0xff]  }
  0x6b   :  { %1795 = vmatpush2.bf16.msra.mxu0 %v2612_v2  ;;  %v2686_v2 = vld [vmem:[%s3795_s1 + $0x2c] ss:$16 sps:$4 sm:$0xff]  }
  0x6c   :  { %1848 = vmatpush2.bf16.msra.mxu1 %v2615_v3  ;;  %1796 = vmatprep.subr.bf16.mxu0 %v2620_v4  ;;  %v2689_v3 = vld [vmem:[%s3795_s1 + $0x22c] ss:$16 sps:$4 sm:$0xff]   ;;  %v2684_v4 = vld [vmem:[%s3795_s1 + $0x28] ss:$16 sps:$4 sm:$0xff]  }
  0x6d   :  { %1849 = vmatprep.subr.bf16.mxu1 %v2623_v5  ;;  %v2687_v5 = vld [vmem:[%s3795_s1 + $0x228] ss:$16 sps:$4 sm:$0xff]  }
  0x6f   :  { %1797 = vmatpush2.bf16.msra.mxu0 %v2618_v6  ;;  %v2692_v6 = vld [vmem:[%s3795_s1 + $0xc] ss:$16 sps:$4 sm:$0xff]  }
  0x70   :  { %1850 = vmatpush2.bf16.msra.mxu1 %v2621_v7  ;;  %1798 = vmatprep.subr.bf16.mxu0 %v2626_v10  ;;  %v2695_v7 = vld [vmem:[%s3795_s1 + $0x20c] ss:$16 sps:$4 sm:$0xff]   ;;  %v2690_v10 = vld [vmem:[%s3795_s1 + $0x8] ss:$16 sps:$4 sm:$0xff]  }
  0x71   :  { %1851 = vmatprep.subr.bf16.mxu1 %v2629_v11  ;;  %v2693_v11 = vld [vmem:[%s3795_s1 + $0x208] ss:$16 sps:$4 sm:$0xff]  }
  0x73   :  { %1799 = vmatpush2.bf16.msra.mxu0 %v2624_v12  ;;  %v2698_v12 = vld [vmem:[%s3795_s1 + $0x1ec] ss:$16 sps:$4 sm:$0xff]  }
  0x74   :  { %1852 = vmatpush2.bf16.msra.mxu1 %v2627_v13  ;;  %1800 = vmatprep.subr.bf16.mxu0 %v2632_v14  ;;  %v2701_v13 = vld [vmem:[%s3795_s1 + $0x3ec] ss:$16 sps:$4 sm:$0xff]   ;;  %v2696_v14 = vld [vmem:[%s3795_s1 + $0x1e8] ss:$16 sps:$4 sm:$0xff]  }
  0x75   :  { %1853 = vmatprep.subr.bf16.mxu1 %v2635_v15  ;;  %v2699_v15 = vld [vmem:[%s3795_s1 + $0x3e8] ss:$16 sps:$4 sm:$0xff]  }
  0x77   :  { %1801 = vmatpush2.bf16.msra.mxu0 %v2630_v16  ;;  %v2704_v16 = vld [vmem:[%s3795_s1 + $0x1cc] ss:$16 sps:$4 sm:$0xff]  }
  0x78   :  { %1854 = vmatpush2.bf16.msra.mxu1 %v2633_v17  ;;  %1802 = vmatprep.subr.bf16.mxu0 %v2638_v18  ;;  %v2707_v17 = vld [vmem:[%s3795_s1 + $0x3cc] ss:$16 sps:$4 sm:$0xff]   ;;  %v2702_v18 = vld [vmem:[%s3795_s1 + $0x1c8] ss:$16 sps:$4 sm:$0xff]  }
  0x79   :  { %1855 = vmatprep.subr.bf16.mxu1 %v2641_v19  ;;  %v2705_v19 = vld [vmem:[%s3795_s1 + $0x3c8] ss:$16 sps:$4 sm:$0xff]  }
  0x7b   :  { %1803 = vmatpush2.bf16.msra.mxu0 %v2636_v20  ;;  %v2710_v20 = vld [vmem:[%s3795_s1 + $0x1ac] ss:$16 sps:$4 sm:$0xff]  }
  0x7c   :  { %1856 = vmatpush2.bf16.msra.mxu1 %v2639_v21  ;;  %1804 = vmatprep.subr.bf16.mxu0 %v2644_v22  ;;  %v2713_v21 = vld [vmem:[%s3795_s1 + $0x3ac] ss:$16 sps:$4 sm:$0xff]   ;;  %v2708_v22 = vld [vmem:[%s3795_s1 + $0x1a8] ss:$16 sps:$4 sm:$0xff]  }
  0x7d   :  { %1857 = vmatprep.subr.bf16.mxu1 %v2647_v23  ;;  %v2711_v23 = vld [vmem:[%s3795_s1 + $0x3a8] ss:$16 sps:$4 sm:$0xff]  }
  0x7f   :  { %1805 = vmatpush2.bf16.msra.mxu0 %v2642_v24  ;;  %v2716_v24 = vld [vmem:[%s3795_s1 + $0x18c] ss:$16 sps:$4 sm:$0xff]  }
  0x80   :  { %1858 = vmatpush2.bf16.msra.mxu1 %v2645_v25  ;;  %1880 = vmatprep.subr.bf16.mxu0 %v2650_v26  ;;  %v2719_v25 = vld [vmem:[%s3795_s1 + $0x38c] ss:$16 sps:$4 sm:$0xff]   ;;  %v2714_v26 = vld [vmem:[%s3795_s1 + $0x188] ss:$16 sps:$4 sm:$0xff]  }
  0x81   :  { %1933 = vmatprep.subr.bf16.mxu1 %v2653_v27  ;;  %v2717_v27 = vld [vmem:[%s3795_s1 + $0x388] ss:$16 sps:$4 sm:$0xff]  }
  0x82   :  { %1807 = vmatmul.mubr.bf16.vlgmr.msra.gmra.mxu0 %v3342_v32 }
  0x83   :  { %1860 = vmatmul.mubr.bf16.vlgmr.msra.gmra.mxu1 %v3346_v36  ;;  %1881 = vmatpush1.bf16.msra.mxu0 %v2648_v28  ;;  %v2722_v28 = vld [vmem:[%s3795_s1 + $0x16c] ss:$16 sps:$4 sm:$0xff]  }
  0x84   :  { %1934 = vmatpush1.bf16.msra.mxu1 %v2651_v29  ;;  %1882 = vmatprep.subr.bf16.mxu0 %v2656_v40  ;;  %v2725_v29 = vld [vmem:[%s3795_s1 + $0x36c] ss:$16 sps:$4 sm:$0xff]   ;;  %v2726_v40 = vld [vmem:[%s3795_s1 + $0x148] ss:$16 sps:$4 sm:$0xff]  }
  0x85   :  { %1935 = vmatprep.subr.bf16.mxu1 %v2659_v41  ;;  %1816 = vmatprep.mubr.bf16.mxu0 %v3360_v42  ;;  %v2729_v41 = vld [vmem:[%s3795_s1 + $0x348] ss:$16 sps:$4 sm:$0xff]  }
  0x86   :  { %1869 = vmatprep.mubr.bf16.mxu1 %v3362_v43 }
  0x87   :  { %1883 = vmatpush1.bf16.msra.mxu0 %v2654_v44  ;;  %v2734_v44 = vld [vmem:[%s3795_s1 + $0x12c] ss:$16 sps:$4 sm:$0xff]  }
  0x88   :  { %1936 = vmatpush1.bf16.msra.mxu1 %v2657_v45  ;;  %1884 = vmatprep.subr.bf16.mxu0 %v2662_v46  ;;  %v2737_v45 = vld [vmem:[%s3795_s1 + $0x32c] ss:$16 sps:$4 sm:$0xff]   ;;  %v2732_v46 = vld [vmem:[%s3795_s1 + $0x128] ss:$16 sps:$4 sm:$0xff]  }
  0x89   :  { %1937 = vmatprep.subr.bf16.mxu1 %v2665_v47  ;;  %v2735_v47 = vld [vmem:[%s3795_s1 + $0x328] ss:$16 sps:$4 sm:$0xff]  }
  0x8a   :  { %1817 = vmatmul.mubr.bf16.gmra.mxu0 %v3380_v48 }
  0x8b   :  { %1870 = vmatmul.mubr.bf16.gmra.mxu1 %v3388_v54  ;;  %1885 = vmatpush1.bf16.msra.mxu0 %v2660_v50  ;;  %v2740_v50 = vld [vmem:[%s3795_s1 + $0x10c] ss:$16 sps:$4 sm:$0xff]  }
  0x8c   :  { %1938 = vmatpush1.bf16.msra.mxu1 %v2663_v52  ;;  %1886 = vmatprep.subr.bf16.mxu0 %v2668_v56  ;;  %v2743_v52 = vld [vmem:[%s3795_s1 + $0x30c] ss:$16 sps:$4 sm:$0xff]   ;;  %v2738_v56 = vld [vmem:[%s3795_s1 + $0x108] ss:$16 sps:$4 sm:$0xff]  }
  0x8d   :  { %1939 = vmatprep.subr.bf16.mxu1 %v2671_v57  ;;  %1912 = vmatprep.mubr.bf16.mxu0 %v3019_v53  ;;  %v2683_v53 = vld [vmem:[%s3795_s1 + $0x24c] ss:$16 sps:$4 sm:$0xff]   ;;  %v2741_v57 = vld [vmem:[%s3795_s1 + $0x308] ss:$16 sps:$4 sm:$0xff]  }
  0x8e   :  { %1965 = vmatprep.mubr.bf16.mxu1 %v3024_v55  ;;  %v2678_v55 = vld [vmem:[%s3795_s1 + $0x48] ss:$16 sps:$4 sm:$0xff]  }
  0x8f   :  { %1887 = vmatpush1.bf16.msra.mxu0 %v2666_v58  ;;  %v2746_v58 = vld [vmem:[%s3795_s1 + $0x4ec] ss:$16 sps:$4 sm:$0xff]  }
  0x90   :  { %1940 = vmatpush1.bf16.msra.mxu1 %v2669_v59  ;;  %1888 = vmatprep.subr.bf16.mxu0 %v2674_v60  ;;  %v2749_v59 = vld [vmem:[%s3795_s1 + $0x6ec] ss:$16 sps:$4 sm:$0xff]   ;;  %v2744_v60 = vld [vmem:[%s3795_s1 + $0x4e8] ss:$16 sps:$4 sm:$0xff]  }
  0x91   :  { %1941 = vmatprep.subr.bf16.mxu1 %v2677_v61  ;;  %v2747_v61 = vld [vmem:[%s3795_s1 + $0x6e8] ss:$16 sps:$4 sm:$0xff]  }
  0x93   :  { %1889 = vmatpush1.bf16.msra.mxu0 %v2672_v62  ;;  %v2752_v62 = vld [vmem:[%s3795_s1 + $0x4cc] ss:$16 sps:$4 sm:$0xff]  }
  0x94   :  { %1942 = vmatpush1.bf16.msra.mxu1 %v2675_v63  ;;  %1890 = vmatprep.subr.bf16.mxu0 %v2680_v0  ;;  %v2755_v63 = vld [vmem:[%s3795_s1 + $0x6cc] ss:$16 sps:$4 sm:$0xff]   ;;  %v2750_v0 = vld [vmem:[%s3795_s1 + $0x4c8] ss:$16 sps:$4 sm:$0xff]  }
  0x95   :  { %1943 = vmatprep.subr.bf16.mxu1 %v2683_v53  ;;  %v2753_v53 = vld [vmem:[%s3795_s1 + $0x6c8] ss:$16 sps:$4 sm:$0xff]  }
  0x97   :  { %1891 = vmatpush1.bf16.msra.mxu0 %v2678_v55  ;;  %v2758_v55 = vld [vmem:[%s3795_s1 + $0x4ac] ss:$16 sps:$4 sm:$0xff]  }
  0x98   :  { %1944 = vmatpush1.bf16.msra.mxu1 %v2681_v1  ;;  %1892 = vmatprep.subr.bf16.mxu0 %v2686_v2  ;;  %v2759_v1 = vld [vmem:[%s3795_s1 + $0x6a8] ss:$16 sps:$4 sm:$0xff]   ;;  %v2764_v2 = vld [vmem:[%s3795_s1 + $0x48c] ss:$16 sps:$4 sm:$0xff]  }
  0x99   :  { %1945 = vmatprep.subr.bf16.mxu1 %v2689_v3  ;;  %v2765_v3 = vld [vmem:[%s3795_s1 + $0x688] ss:$16 sps:$4 sm:$0xff]  }
  0x9b   :  { %1893 = vmatpush1.bf16.msra.mxu0 %v2684_v4  ;;  %v2770_v4 = vld [vmem:[%s3795_s1 + $0x46c] ss:$16 sps:$4 sm:$0xff]  }
  0x9c   :  { %1946 = vmatpush1.bf16.msra.mxu1 %v2687_v5  ;;  %1894 = vmatprep.subr.bf16.mxu0 %v2692_v6  ;;  %v2771_v5 = vld [vmem:[%s3795_s1 + $0x668] ss:$16 sps:$4 sm:$0xff]   ;;  %v2776_v6 = vld [vmem:[%s3795_s1 + $0x44c] ss:$16 sps:$4 sm:$0xff]  }
  0x9d   :  { %1947 = vmatprep.subr.bf16.mxu1 %v2695_v7  ;;  %v2777_v7 = vld [vmem:[%s3795_s1 + $0x648] ss:$16 sps:$4 sm:$0xff]  }
  0x9f   :  { %1895 = vmatpush1.bf16.msra.mxu0 %v2690_v10  ;;  %v2782_v10 = vld [vmem:[%s3795_s1 + $0x42c] ss:$16 sps:$4 sm:$0xff]  }
  0xa0   :  { %1948 = vmatpush1.bf16.msra.mxu1 %v2693_v11  ;;  %1896 = vmatprep.subr.bf16.mxu0 %v2698_v12  ;;  %v2785_v11 = vld [vmem:[%s3795_s1 + $0x62c] ss:$16 sps:$4 sm:$0xff]   ;;  %v2780_v12 = vld [vmem:[%s3795_s1 + $0x428] ss:$16 sps:$4 sm:$0xff]  }
  0xa1   :  { %1949 = vmatprep.subr.bf16.mxu1 %v2701_v13  ;;  %v2783_v13 = vld [vmem:[%s3795_s1 + $0x628] ss:$16 sps:$4 sm:$0xff]  }
  0xa3   :  { %1897 = vmatpush2.bf16.msra.mxu0 %v2696_v14  ;;  %v2788_v14 = vld [vmem:[%s3795_s1 + $0x40c] ss:$16 sps:$4 sm:$0xff]  }
  0xa4   :  { %1950 = vmatpush2.bf16.msra.mxu1 %v2699_v15  ;;  %1898 = vmatprep.subr.bf16.mxu0 %v2704_v16  ;;  %v2791_v15 = vld [vmem:[%s3795_s1 + $0x60c] ss:$16 sps:$4 sm:$0xff]   ;;  %v2786_v16 = vld [vmem:[%s3795_s1 + $0x408] ss:$16 sps:$4 sm:$0xff]  }
  0xa5   :  { %1951 = vmatprep.subr.bf16.mxu1 %v2707_v17  ;;  %v2789_v17 = vld [vmem:[%s3795_s1 + $0x608] ss:$16 sps:$4 sm:$0xff]  }
  0xa7   :  { %1899 = vmatpush2.bf16.msra.mxu0 %v2702_v18  ;;  %v2794_v18 = vld [vmem:[%s3795_s1 + $0x5ec] ss:$16 sps:$4 sm:$0xff]  }
  0xa8   :  { %1952 = vmatpush2.bf16.msra.mxu1 %v2705_v19  ;;  %1900 = vmatprep.subr.bf16.mxu0 %v2710_v20  ;;  %v2797_v19 = vld [vmem:[%s3795_s1 + $0x7ec] ss:$16 sps:$4 sm:$0xff]   ;;  %v2792_v20 = vld [vmem:[%s3795_s1 + $0x5e8] ss:$16 sps:$4 sm:$0xff]  }
  0xa9   :  { %1953 = vmatprep.subr.bf16.mxu1 %v2713_v21  ;;  %v2795_v21 = vld [vmem:[%s3795_s1 + $0x7e8] ss:$16 sps:$4 sm:$0xff]  }
  0xab   :  { %1901 = vmatpush2.bf16.msra.mxu0 %v2708_v22  ;;  %v2800_v22 = vld [vmem:[%s3795_s1 + $0x5cc] ss:$16 sps:$4 sm:$0xff]  }
  0xac   :  { %1954 = vmatpush2.bf16.msra.mxu1 %v2711_v23  ;;  %1902 = vmatprep.subr.bf16.mxu0 %v2716_v24  ;;  %v2803_v23 = vld [vmem:[%s3795_s1 + $0x7cc] ss:$16 sps:$4 sm:$0xff]   ;;  %v2798_v24 = vld [vmem:[%s3795_s1 + $0x5c8] ss:$16 sps:$4 sm:$0xff]  }
  0xad   :  { %1955 = vmatprep.subr.bf16.mxu1 %v2719_v25  ;;  %v2801_v25 = vld [vmem:[%s3795_s1 + $0x7c8] ss:$16 sps:$4 sm:$0xff]  }
  0xaf   :  { %1903 = vmatpush2.bf16.msra.mxu0 %v2714_v26  ;;  %v2806_v26 = vld [vmem:[%s3795_s1 + $0x5ac] ss:$16 sps:$4 sm:$0xff]  }
  0xb0   :  { %1956 = vmatpush2.bf16.msra.mxu1 %v2717_v27  ;;  %1904 = vmatprep.subr.bf16.mxu0 %v2722_v28  ;;  %v2809_v27 = vld [vmem:[%s3795_s1 + $0x7ac] ss:$16 sps:$4 sm:$0xff]   ;;  %v2804_v28 = vld [vmem:[%s3795_s1 + $0x5a8] ss:$16 sps:$4 sm:$0xff]  }
  0xb1   :  { %1957 = vmatprep.subr.bf16.mxu1 %v2725_v29  ;;  %v2807_v29 = vld [vmem:[%s3795_s1 + $0x7a8] ss:$16 sps:$4 sm:$0xff]  }
  0xb3   :  { %1905 = vmatpush2.bf16.msra.mxu0 %v2720_v30  ;;  %v2812_v30 = vld [vmem:[%s3795_s1 + $0x58c] ss:$16 sps:$4 sm:$0xff]  }
  0xb4   :  { %1958 = vmatpush2.bf16.msra.mxu1 %v2723_v31  ;;  %1906 = vmatprep.subr.bf16.mxu0 %v2728_v38  ;;  %v2815_v31 = vld [vmem:[%s3795_s1 + $0x78c] ss:$16 sps:$4 sm:$0xff]   ;;  %v2810_v38 = vld [vmem:[%s3795_s1 + $0x588] ss:$16 sps:$4 sm:$0xff]  }
  0xb5   :  { %1959 = vmatprep.subr.bf16.mxu1 %v2731_v39  ;;  %v2813_v39 = vld [vmem:[%s3795_s1 + $0x788] ss:$16 sps:$4 sm:$0xff]  }
  0xb7   :  { %1907 = vmatpush2.bf16.msra.mxu0 %v2726_v40  ;;  %v2818_v40 = vld [vmem:[%s3795_s1 + $0x56c] ss:$16 sps:$4 sm:$0xff]  }
  0xb8   :  { %1960 = vmatpush2.bf16.msra.mxu1 %v2729_v41  ;;  %1908 = vmatprep.subr.bf16.mxu0 %v2734_v44  ;;  %v2821_v41 = vld [vmem:[%s3795_s1 + $0x76c] ss:$16 sps:$4 sm:$0xff]   ;;  %v2816_v44 = vld [vmem:[%s3795_s1 + $0x568] ss:$16 sps:$4 sm:$0xff]  }
  0xb9   :  { %1961 = vmatprep.subr.bf16.mxu1 %v2737_v45  ;;  %v2819_v45 = vld [vmem:[%s3795_s1 + $0x768] ss:$16 sps:$4 sm:$0xff]  }
  0xbb   :  { %1909 = vmatpush2.bf16.msra.mxu0 %v2732_v46  ;;  %v2824_v46 = vld [vmem:[%s3795_s1 + $0x54c] ss:$16 sps:$4 sm:$0xff]  }
  0xbc   :  { %1962 = vmatpush2.bf16.msra.mxu1 %v2735_v47  ;;  %1910 = vmatprep.subr.bf16.mxu0 %v2740_v50  ;;  %v2827_v47 = vld [vmem:[%s3795_s1 + $0x74c] ss:$16 sps:$4 sm:$0xff]   ;;  %v2822_v50 = vld [vmem:[%s3795_s1 + $0x548] ss:$16 sps:$4 sm:$0xff]  }
  0xbd   :  { %1963 = vmatprep.subr.bf16.mxu1 %v2743_v52  ;;  %v2825_v52 = vld [vmem:[%s3795_s1 + $0x748] ss:$16 sps:$4 sm:$0xff]  }
  0xbf   :  { %1911 = vmatpush2.bf16.msra.mxu0 %v2738_v56  ;;  %v2830_v56 = vld [vmem:[%s3795_s1 + $0x52c] ss:$16 sps:$4 sm:$0xff]  }
  0xc0   :  { %1964 = vmatpush2.bf16.msra.mxu1 %v2741_v57  ;;  %1986 = vmatprep.subr.bf16.mxu0 %v2746_v58  ;;  %v2833_v57 = vld [vmem:[%s3795_s1 + $0x72c] ss:$16 sps:$4 sm:$0xff]   ;;  %v2828_v58 = vld [vmem:[%s3795_s1 + $0x528] ss:$16 sps:$4 sm:$0xff]  }
  0xc1   :  { %2039 = vmatprep.subr.bf16.mxu1 %v2749_v59  ;;  %v2831_v59 = vld [vmem:[%s3795_s1 + $0x728] ss:$16 sps:$4 sm:$0xff]  }
  0xc2   :  { %1913 = vmatmul.mubr.bf16.vlgmr.msra.gmra.mxu0 %v3076_v8  ;;  %v2761_v8 = vld [vmem:[%s3795_s1 + $0x6ac] ss:$16 sps:$4 sm:$0xff]  }
  0xc3   :  { %1966 = vmatmul.mubr.bf16.vlgmr.msra.gmra.mxu1 %v3078_v9  ;;  %1987 = vmatpush1.bf16.msra.mxu0 %v2744_v60  ;;  %v2756_v9 = vld [vmem:[%s3795_s1 + $0x4a8] ss:$16 sps:$4 sm:$0xff]   ;;  %v2836_v60 = vld [vmem:[%s3795_s1 + $0x50c] ss:$16 sps:$4 sm:$0xff]  }
  0xc4   :  { %2040 = vmatpush1.bf16.msra.mxu1 %v2747_v61  ;;  %1988 = vmatprep.subr.bf16.mxu0 %v2752_v62  ;;  %v2839_v61 = vld [vmem:[%s3795_s1 + $0x70c] ss:$16 sps:$4 sm:$0xff]   ;;  %v2834_v62 = vld [vmem:[%s3795_s1 + $0x508] ss:$16 sps:$4 sm:$0xff]  }
  0xc5   :  { %2041 = vmatprep.subr.bf16.mxu1 %v2755_v63  ;;  %1922 = vmatprep.mubr.bf16.mxu0 %v3151_v33  ;;  %v2767_v33 = vld [vmem:[%s3795_s1 + $0x68c] ss:$16 sps:$4 sm:$0xff]   ;;  %v2837_v63 = vld [vmem:[%s3795_s1 + $0x708] ss:$16 sps:$4 sm:$0xff]  }
  0xc6   :  { %1975 = vmatprep.mubr.bf16.mxu1 %v3155_v35  ;;  %v2762_v35 = vld [vmem:[%s3795_s1 + $0x488] ss:$16 sps:$4 sm:$0xff]  }
  0xc7   :  { %1989 = vmatpush1.bf16.msra.mxu0 %v2750_v0 }
  0xc8   :  { %2042 = vmatpush1.bf16.msra.mxu1 %v2753_v53  ;;  %1990 = vmatprep.subr.bf16.mxu0 %v2758_v55 }
  0xc9   :  { %2043 = vmatprep.subr.bf16.mxu1 %v2761_v8 }
  0xca   :  { %1923 = vmatmul.mubr.bf16.gmra.mxu0 %v3153_v34  ;;  %v2773_v34 = vld [vmem:[%s3795_s1 + $0x66c] ss:$16 sps:$4 sm:$0xff]  }
  0xcb   :  { %1976 = vmatmul.mubr.bf16.gmra.mxu1 %v3160_v37  ;;  %1991 = vmatpush1.bf16.msra.mxu0 %v2756_v9  ;;  %v2768_v37 = vld [vmem:[%s3795_s1 + $0x468] ss:$16 sps:$4 sm:$0xff]   ;;  %v288_v9 = vlaneseq }
  0xcc   :  { %2044 = vmatpush1.bf16.msra.mxu1 %v2759_v1  ;;  %1992 = vmatprep.subr.bf16.mxu0 %v2764_v2 }
  0xcd   :  { %2045 = vmatprep.subr.bf16.mxu1 %v2767_v33  ;;  %2018 = vmatprep.mubr.bf16.mxu0 %v3207_v49  ;;  %v2779_v49 = vld [vmem:[%s3795_s1 + $0x64c] ss:$16 sps:$4 sm:$0xff]   ;;  %v3756_v33 = vshrl.u32 %v288_v9, 7 }
  0xce   :  { %2071 = vmatprep.mubr.bf16.mxu1 %v3216_v51  ;;  %v2774_v51 = vld [vmem:[%s3795_s1 + $0x448] ss:$16 sps:$4 sm:$0xff]  }
  0xcf   :  { %1993 = vmatpush1.bf16.msra.mxu0 %v2762_v35 }
  0xd0   :  { %2046 = vmatpush1.bf16.msra.mxu1 %v2765_v3  ;;  %1994 = vmatprep.subr.bf16.mxu0 %v2770_v4 }
  0xd1   :  { %2047 = vmatprep.subr.bf16.mxu1 %v2773_v34 }
  0xd3   :  { %1995 = vmatpush1.bf16.msra.mxu0 %v2768_v37 }
  0xd4   :  { %2048 = vmatpush1.bf16.msra.mxu1 %v2771_v5  ;;  %1996 = vmatprep.subr.bf16.mxu0 %v2776_v6 }
  0xd5   :  { %2049 = vmatprep.subr.bf16.mxu1 %v2779_v49 }
  0xd7   :  { %1997 = vmatpush1.bf16.msra.mxu0 %v2774_v51 }
  0xd8   :  { %2050 = vmatpush1.bf16.msra.mxu1 %v2777_v7  ;;  %1998 = vmatprep.subr.bf16.mxu0 %v2782_v10 }
  0xd9   :  { %2051 = vmatprep.subr.bf16.mxu1 %v2785_v11 }
  0xdb   :  { %1999 = vmatpush1.bf16.msra.mxu0 %v2780_v12 }
  0xdc   :  { %2052 = vmatpush1.bf16.msra.mxu1 %v2783_v13  ;;  %2000 = vmatprep.subr.bf16.mxu0 %v2788_v14 }
  0xdd   :  { %2053 = vmatprep.subr.bf16.mxu1 %v2791_v15 }
  0xdf   :  { %2001 = vmatpush1.bf16.msra.mxu0 %v2786_v16 }
  0xe0   :  { %2054 = vmatpush1.bf16.msra.mxu1 %v2789_v17  ;;  %2002 = vmatprep.subr.bf16.mxu0 %v2794_v18 }
  0xe1   :  { %2055 = vmatprep.subr.bf16.mxu1 %v2797_v19 }
  0xe3   :  { %2003 = vmatpush2.bf16.msra.mxu0 %v2792_v20 }
  0xe4   :  { %2056 = vmatpush2.bf16.msra.mxu1 %v2795_v21  ;;  %2004 = vmatprep.subr.bf16.mxu0 %v2800_v22 }
  0xe5   :  { %2057 = vmatprep.subr.bf16.mxu1 %v2803_v23 }
  0xe7   :  { %2005 = vmatpush2.bf16.msra.mxu0 %v2798_v24 }
  0xe8   :  { %2058 = vmatpush2.bf16.msra.mxu1 %v2801_v25  ;;  %2006 = vmatprep.subr.bf16.mxu0 %v2806_v26 }
  0xe9   :  { %2059 = vmatprep.subr.bf16.mxu1 %v2809_v27 }
  0xeb   :  { %2007 = vmatpush2.bf16.msra.mxu0 %v2804_v28 }
  0xec   :  { %2060 = vmatpush2.bf16.msra.mxu1 %v2807_v29  ;;  %2008 = vmatprep.subr.bf16.mxu0 %v2812_v30 }
  0xed   :  { %2061 = vmatprep.subr.bf16.mxu1 %v2815_v31 }
  0xef   :  { %2009 = vmatpush2.bf16.msra.mxu0 %v2810_v38 }
  0xf0   :  { %2062 = vmatpush2.bf16.msra.mxu1 %v2813_v39  ;;  %2010 = vmatprep.subr.bf16.mxu0 %v2818_v40 }
  0xf1   :  { %2063 = vmatprep.subr.bf16.mxu1 %v2821_v41 }
  0xf3   :  { %2011 = vmatpush2.bf16.msra.mxu0 %v2816_v44 }
  0xf4   :  { %2064 = vmatpush2.bf16.msra.mxu1 %v2819_v45  ;;  %2012 = vmatprep.subr.bf16.mxu0 %v2824_v46 }
  0xf5   :  { %2065 = vmatprep.subr.bf16.mxu1 %v2827_v47 }
  0xf7   :  { %2013 = vmatpush2.bf16.msra.mxu0 %v2822_v50 }
  0xf8   :  { %2066 = vmatpush2.bf16.msra.mxu1 %v2825_v52  ;;  %2014 = vmatprep.subr.bf16.mxu0 %v2830_v56 }
  0xf9   :  { %2067 = vmatprep.subr.bf16.mxu1 %v2833_v57 }
  0xfb   :  { %2015 = vmatpush2.bf16.msra.mxu0 %v2828_v58 }
  0xfc   :  { %2068 = vmatpush2.bf16.msra.mxu1 %v2831_v59  ;;  %2016 = vmatprep.subr.bf16.mxu0 %v2836_v60 }
  0xfd   :  { %2069 = vmatprep.subr.bf16.mxu1 %v2839_v61 }
  0xff   :  { %2017 = vmatpush2.bf16.msra.mxu0 %v2834_v62 }
 0x100   :  { %2070 = vmatpush2.bf16.msra.mxu1 %v2837_v63 }
 0x102   :  { %2019 = vmatmul.mubr.bf16.vlgmr.msra.gmra.mxu0 %v3342_v32  ;;  %v1702_v0 = vpop.f32.mrf.mxu0 }
 0x103   :  { %2072 = vmatmul.mubr.bf16.vlgmr.msra.gmra.mxu1 %v3346_v36  ;;  %2028 = vmatprep.mubr.bf16.mxu0 %v3360_v42  ;;  %v1755_v53 = vpop.f32.mrf.mxu1  ;;  %v290_v42 = vsub.s32 0, %v3756_v33 }
 0x104   :  { %2081 = vmatprep.mubr.bf16.mxu1 %v3362_v43  ;;  %v1704_v55 = vpop.f32.mrf.mxu0  ;;  %v3762_v43 = vld [vmem:[%s3797_s2] sm:$0xf] }
 0x105   :  { %v1757_v8 = vpop.f32.mrf.mxu1  ;;  %v291_v34 = vrot.slane %v3762_v43, %v290_v42 }
 0x106   :  { %v1706_v1 = vpop.f32.mrf.mxu0 }
 0x107   :  { %v1759_v2 = vpop.f32.mrf.mxu1  ;;  %v1703_v49 = vadd.f32 %v1702_v0, %v291_v34  ;;  %v1707_v12 = vadd.f32 %v1706_v1, %v291_v34 }
 0x108   :  { %v1708_v32 = vpop.f32.mrf.mxu0 }
 0x109   :  { %v1761_v35 = vpop.f32.mrf.mxu1  ;;  %v1756_v11 = vadd.f32 %v1755_v53, %v1703_v49  ;;  %v1760_v21 = vadd.f32 %v1759_v2, %v1707_v12 }
 0x10a   :  { %2029 = vmatmul.mubr.bf16.gmra.mxu0 %v3380_v48  ;;  %v1712_v36 = vpop.f32.mrf.mxu0  ;;  %v294_v48 = vsub.s32 1, %v3756_v33 }
 0x10b   :  { %2082 = vmatmul.mubr.bf16.gmra.mxu1 %v3388_v54  ;;  %v1765_v3 = vpop.f32.mrf.mxu1  ;;  %v1713_v18 = vadd.f32 %v1712_v36, %v291_v34 }
 0x10c   :  { %v1714_v54 = vpop.f32.mrf.mxu0  ;;  %v295_v37 = vrot.slane %v3762_v43, %v294_v48 }
 0x10d   :  { %v1767_v4 = vpop.f32.mrf.mxu1  ;;  %v1766_v30 = vadd.f32 %v1765_v3, %v1713_v18  ;;  %v302_v18 = vsub.s32 3, %v3756_v33 }
 0x10e   :  { %v1716_v5 = vpop.f32.mrf.mxu0  ;;  %v1705_v51 = vadd.f32 %v1704_v55, %v295_v37  ;;  %v1709_v16 = vadd.f32 %v1708_v32, %v295_v37  ;;  %v1715_v24 = vadd.f32 %v1714_v54, %v295_v37 }
 0x10f   :  { %v1769_v6 = vpop.f32.mrf.mxu1  ;;  %v1717_v31 = vadd.f32 %v1716_v5, %v291_v34 }
 0x110   :  { %v1718_v7 = vpop.f32.mrf.mxu0  ;;  %v1758_v15 = vadd.f32 %v1757_v8, %v1705_v51  ;;  %v1762_v27 = vadd.f32 %v1761_v35, %v1709_v16  ;;  %v1768_v46 = vadd.f32 %v1767_v4, %v1715_v24 }
 0x111   :  { %v1771_v10 = vpop.f32.mrf.mxu1  ;;  %v1719_v52 = vadd.f32 %v1718_v7, %v295_v37  ;;  %v1770_v59 = vadd.f32 %v1769_v6, %v1717_v31 }
 0x113   :  { %v1772_v9 = vadd.f32 %v1771_v10, %v1719_v52 }
 0x142   :  { %v1808_v13 = vpop.f32.mrf.mxu0 }
 0x143   :  { %v1861_v14 = vpop.f32.mrf.mxu1  ;;  %v1809_v17 = vadd.f32 %v1808_v13, %v1756_v11 }
 0x144   :  { %v1810_v19 = vpop.f32.mrf.mxu0 }
 0x145   :  { %v1863_v20 = vpop.f32.mrf.mxu1  ;;  %v1862_v22 = vadd.f32 %v1861_v14, %v1809_v17  ;;  %v1811_v23 = vadd.f32 %v1810_v19, %v1758_v15  ;;  %v298_v17 = vsub.s32 2, %v3756_v33 }
 0x146   :  { %v1812_v25 = vpop.f32.mrf.mxu0 }
 0x147   :  { %v1865_v26 = vpop.f32.mrf.mxu1  ;;  %v1864_v28 = vadd.f32 %v1863_v20, %v1811_v23  ;;  %v1813_v29 = vadd.f32 %v1812_v25, %v1760_v21  ;;  %v2092_v40 = vmax.f32 %v1862_v22, 0.0  ;;  %v299_v21 = vrot.slane %v3762_v43, %v298_v17 }
 0x148   :  { %v1814_v38 = vpop.f32.mrf.mxu0  ;;  %v303_v22 = vrot.slane %v3762_v43, %v302_v18 }
 0x149   :  { %v1867_v39 = vpop.f32.mrf.mxu1  ;;  %v2093_v41 = vmax.f32 %v1864_v28, 0.0  ;;  %v1866_v44 = vadd.f32 %v1865_v26, %v1813_v29  ;;  %v1815_v45 = vadd.f32 %v1814_v38, %v1762_v27 }
 0x14a   :  { %v1818_v47 = vpop.f32.mrf.mxu0 }
 0x14b   :  { %v1871_v50 = vpop.f32.mrf.mxu1  ;;  %v2448_v56 = vpack.c.bf16 %v2093_v41, %v2092_v40  ;;  %v1868_v57 = vadd.f32 %v1867_v39, %v1815_v45  ;;  %v1819_v58 = vadd.f32 %v1818_v47, %v1766_v30  ;;  %v2096_v62 = vmax.f32 %v1866_v44, 0.0 }
 0x14c   :  { %v1820_v60 = vpop.f32.mrf.mxu0 }
 0x14d   :  { %v1873_v61 = vpop.f32.mrf.mxu1  ;;  %2156 = vst [vmem:[%s3798_s3] sm:$0xff] %v2448_v56  ;;  %v2097_v63 = vmax.f32 %v1868_v57, 0.0  ;;  %v1821_v0 = vadd.f32 %v1820_v60, %v1768_v46  ;;  %v1872_v53 = vadd.f32 %v1871_v50, %v1819_v58 }
 0x14e   :  { %v1822_v55 = vpop.f32.mrf.mxu0 }
 0x14f   :  { %v1875_v8 = vpop.f32.mrf.mxu1  ;;  %v2450_v1 = vpack.c.bf16 %v2097_v63, %v2096_v62  ;;  %v1823_v2 = vadd.f32 %v1822_v55, %v1770_v59  ;;  %v1874_v32 = vadd.f32 %v1873_v61, %v1821_v0  ;;  %v2100_v3 = vmax.f32 %v1872_v53, 0.0 }
 0x150   :  { %v1824_v35 = vpop.f32.mrf.mxu0 }
 0x151   :  { %v1877_v36 = vpop.f32.mrf.mxu1  ;;  %2158 = vst [vmem:[%s3798_s3 + $0x10] sm:$0xff] %v2450_v1  ;;  %v2101_v42 = vmax.f32 %v1874_v32, 0.0  ;;  %v1825_v48 = vadd.f32 %v1824_v35, %v1772_v9  ;;  %v1876_v54 = vadd.f32 %v1875_v8, %v1823_v2 }
 0x153   :  { %v2452_v4 = vpack.c.bf16 %v2101_v42, %v2100_v3  ;;  %v1878_v34 = vadd.f32 %v1877_v36, %v1825_v48  ;;  %v2104_v37 = vmax.f32 %v1876_v54, 0.0 }
 0x155   :  { %2160 = vst [vmem:[%s3798_s3 + $0x20] sm:$0xff] %v2452_v4  ;;  %v2105_v5 = vmax.f32 %v1878_v34, 0.0 }
 0x157   :  { %v2454_v6 = vpack.c.bf16 %v2105_v5, %v2104_v37 }
 0x159   :  { %2162 = vst [vmem:[%s3798_s3 + $0x30] sm:$0xff] %v2454_v6 }
 0x182   :  { %v1914_v49 = vpop.f32.mrf.mxu0 }
 0x183   :  { %v1967_v51 = vpop.f32.mrf.mxu1  ;;  %v1915_v25 = vadd.f32 %v1914_v49, %v299_v21 }
 0x184   :  { %v1916_v7 = vpop.f32.mrf.mxu0 }
 0x185   :  { %v1969_v10 = vpop.f32.mrf.mxu1  ;;  %v1917_v26 = vadd.f32 %v1916_v7, %v303_v22  ;;  %v1968_v29 = vadd.f32 %v1967_v51, %v1915_v25 }
 0x186   :  { %v1918_v11 = vpop.f32.mrf.mxu0 }
 0x187   :  { %v1971_v12 = vpop.f32.mrf.mxu1  ;;  %v1919_v30 = vadd.f32 %v1918_v11, %v299_v21  ;;  %v1970_v39 = vadd.f32 %v1969_v10, %v1917_v26 }
 0x188   :  { %v1920_v13 = vpop.f32.mrf.mxu0 }
 0x189   :  { %v1973_v14 = vpop.f32.mrf.mxu1  ;;  %v1921_v40 = vadd.f32 %v1920_v13, %v303_v22  ;;  %v1972_v46 = vadd.f32 %v1971_v12, %v1919_v30 }
 0x18a   :  { %v1924_v15 = vpop.f32.mrf.mxu0 }
 0x18b   :  { %v1977_v16 = vpop.f32.mrf.mxu1  ;;  %v1925_v33 = vadd.f32 %v1924_v15, %v299_v21  ;;  %v1974_v57 = vadd.f32 %v1973_v14, %v1921_v40 }
 0x18c   :  { %v1926_v19 = vpop.f32.mrf.mxu0 }
 0x18d   :  { %v1979_v20 = vpop.f32.mrf.mxu1  ;;  %v1927_v43 = vadd.f32 %v1926_v19, %v303_v22  ;;  %v1978_v60 = vadd.f32 %v1977_v16, %v1925_v33 }
 0x18e   :  { %v1928_v23 = vpop.f32.mrf.mxu0 }
 0x18f   :  { %v1981_v24 = vpop.f32.mrf.mxu1  ;;  %v1929_v61 = vadd.f32 %v1928_v23, %v299_v21  ;;  %v1980_v9 = vadd.f32 %v1979_v20, %v1927_v43 }
 0x190   :  { %v1930_v27 = vpop.f32.mrf.mxu0 }
 0x191   :  { %v1983_v28 = vpop.f32.mrf.mxu1  ;;  %v1931_v32 = vadd.f32 %v1930_v27, %v303_v22  ;;  %v1982_v42 = vadd.f32 %v1981_v24, %v1929_v61 }
 0x193   :  { %v1984_v51 = vadd.f32 %v1983_v28, %v1931_v32 }
 0x1c2   :  { %v2020_v31 = vpop.f32.mrf.mxu0 }
 0x1c3   :  { %v2073_v38 = vpop.f32.mrf.mxu1  ;;  %v2021_v41 = vadd.f32 %v2020_v31, %v1968_v29 }
 0x1c4   :  { %v2022_v44 = vpop.f32.mrf.mxu0 }
 0x1c5   :  { %v2075_v45 = vpop.f32.mrf.mxu1  ;;  %v2074_v47 = vadd.f32 %v2073_v38, %v2021_v41  ;;  %v2023_v50 = vadd.f32 %v2022_v44, %v1970_v39 }
 0x1c6   :  { %v2024_v52 = vpop.f32.mrf.mxu0 }
 0x1c7   :  { %v2077_v56 = vpop.f32.mrf.mxu1  ;;  %v2076_v58 = vadd.f32 %v2075_v45, %v2023_v50  ;;  %v2025_v59 = vadd.f32 %v2024_v52, %v1972_v46  ;;  %v2094_v0 = vmax.f32 %v2074_v47, 0.0 }
 0x1c8   :  { %v2026_v62 = vpop.f32.mrf.mxu0 }
 0x1c9   :  { %v2079_v63 = vpop.f32.mrf.mxu1  ;;  %v2095_v53 = vmax.f32 %v2076_v58, 0.0  ;;  %v2078_v55 = vadd.f32 %v2077_v56, %v2025_v59  ;;  %v2027_v8 = vadd.f32 %v2026_v62, %v1974_v57 }
 0x1ca   :  { %v2030_v1 = vpop.f32.mrf.mxu0 }
 0x1cb   :  { %v2083_v2 = vpop.f32.mrf.mxu1  ;;  %v2449_v35 = vpack.c.bf16 %v2095_v53, %v2094_v0  ;;  %v2080_v36 = vadd.f32 %v2079_v63, %v2027_v8  ;;  %v2031_v3 = vadd.f32 %v2030_v1, %v1978_v60  ;;  %v2098_v4 = vmax.f32 %v2078_v55, 0.0 }
 0x1cc   :  { %v2032_v48 = vpop.f32.mrf.mxu0 }
 0x1cd   :  { %v2085_v54 = vpop.f32.mrf.mxu1  ;;  %2157 = vst [vmem:[%s3798_s3 + $0x8] sm:$0xff] %v2449_v35  ;;  %v2099_v34 = vmax.f32 %v2080_v36, 0.0  ;;  %v2084_v37 = vadd.f32 %v2083_v2, %v2031_v3  ;;  %v2033_v5 = vadd.f32 %v2032_v48, %v1980_v9 }
 0x1ce   :  { %v2034_v6 = vpop.f32.mrf.mxu0 }
 0x1cf   :  { %v2087_v49 = vpop.f32.mrf.mxu1  ;;  %v2451_v7 = vpack.c.bf16 %v2099_v34, %v2098_v4  ;;  %v2086_v10 = vadd.f32 %v2085_v54, %v2033_v5  ;;  %v2035_v11 = vadd.f32 %v2034_v6, %v1982_v42  ;;  %v2102_v13 = vmax.f32 %v2084_v37, 0.0 }
 0x1d0   :  { %v2036_v12 = vpop.f32.mrf.mxu0 }
 0x1d1   :  { %2159 = vst [vmem:[%s3798_s3 + $0x18] sm:$0xff] %v2451_v7  ;;  %v2103_v14 = vmax.f32 %v2086_v10, 0.0  ;;  %v2088_v15 = vadd.f32 %v2087_v49, %v2035_v11  ;;  %v2037_v16 = vadd.f32 %v2036_v12, %v1984_v51  ;;  %v2089_v17 = vpop.f32.mrf.mxu1 }
 0x1d3   :  { %v2453_v18 = vpack.c.bf16 %v2103_v14, %v2102_v13  ;;  %v2090_v19 = vadd.f32 %v2089_v17, %v2037_v16  ;;  %v2106_v20 = vmax.f32 %v2088_v15, 0.0 }
 0x1d5   :  { %2161 = vst [vmem:[%s3798_s3 + $0x28] sm:$0xff] %v2453_v18  ;;  %v2107_v21 = vmax.f32 %v2090_v19, 0.0 }
 0x1d7   :  { %v2455_v22 = vpack.c.bf16 %v2107_v21, %v2106_v20 }
 0x1d9   :  { %2163 = vst [vmem:[%s3798_s3 + $0x38] sm:$0xff] %v2455_v22 }

// kernel: vqvae_forward.48
= control target key start
LH: loop header
LB: loop body
LE: loop exit
PB: predicated region body
PF: predicated region fallthrough
CT: control target
= control target key end

     0   :  { %s1251_s1 = inlined_call_operand.vmem [shape: bf16[512,256], index: 1, kind: input, shape index: {}]   ;;  %s1252_s0 = inlined_call_operand.vmem [shape: bf16[64,512], index: 0, kind: input, shape index: {}]   ;;  %s1253_s2 = inlined_call_operand.vmem [shape: f32[1,256], index: 2, kind: input, shape index: {}]   ;;  %s1254_s3 = inlined_call_operand.vmem [shape: bf16[64,256], index: 3, kind: output, shape index: {}]  }
   0x1   :  { %v824_v0 = vld [vmem:[%s1251_s1 + $0x74] ss:$8 sps:$4 sm:$0xff]   ;;  %v828_v2 = vld [vmem:[%s1251_s1 + $0x70] ss:$8 sps:$4 sm:$0xff]   ;;  %v830_v4 = vld [vmem:[%s1251_s1 + $0x64] ss:$8 sps:$4 sm:$0xff]  }
   0x2   :  { %v826_v1 = vld [vmem:[%s1251_s1 + $0x174] ss:$8 sps:$4 sm:$0xff]   ;;  %506 = vmatprep.subr.bf16.mxu0 %v824_v0  ;;  %v829_v3 = vld [vmem:[%s1251_s1 + $0x170] ss:$8 sps:$4 sm:$0xff]   ;;  %v832_v5 = vld [vmem:[%s1251_s1 + $0x164] ss:$8 sps:$4 sm:$0xff]  }
   0x3   :  { %579 = vmatprep.subr.bf16.mxu1 %v826_v1  ;;  %507 = vmatpush1.bf16.msra.mxu0 %v828_v2  ;;  %v834_v6 = vld [vmem:[%s1251_s1 + $0x60] ss:$8 sps:$4 sm:$0xff]   ;;  %v836_v8 = vld [vmem:[%s1251_s1 + $0x54] ss:$8 sps:$4 sm:$0xff]   ;;  %v840_v10 = vld [vmem:[%s1251_s1 + $0x50] ss:$8 sps:$4 sm:$0xff]  }
   0x4   :  { %580 = vmatpush1.bf16.msra.mxu1 %v829_v3  ;;  %508 = vmatprep.subr.bf16.mxu0 %v830_v4  ;;  %v835_v7 = vld [vmem:[%s1251_s1 + $0x160] ss:$8 sps:$4 sm:$0xff]   ;;  %v838_v9 = vld [vmem:[%s1251_s1 + $0x154] ss:$8 sps:$4 sm:$0xff]   ;;  %v841_v11 = vld [vmem:[%s1251_s1 + $0x150] ss:$8 sps:$4 sm:$0xff]  }
   0x5   :  { %581 = vmatprep.subr.bf16.mxu1 %v832_v5  ;;  %v842_v12 = vld [vmem:[%s1251_s1 + $0x44] ss:$8 sps:$4 sm:$0xff]   ;;  %v846_v14 = vld [vmem:[%s1251_s1 + $0x40] ss:$8 sps:$4 sm:$0xff]   ;;  %v848_v16 = vld [vmem:[%s1251_s1 + $0x34] ss:$8 sps:$4 sm:$0xff]  }
   0x6   :  { %v844_v13 = vld [vmem:[%s1251_s1 + $0x144] ss:$8 sps:$4 sm:$0xff]   ;;  %v847_v15 = vld [vmem:[%s1251_s1 + $0x140] ss:$8 sps:$4 sm:$0xff]   ;;  %v850_v17 = vld [vmem:[%s1251_s1 + $0x134] ss:$8 sps:$4 sm:$0xff]  }
   0x7   :  { %509 = vmatpush1.bf16.msra.mxu0 %v834_v6  ;;  %v852_v18 = vld [vmem:[%s1251_s1 + $0x30] ss:$8 sps:$4 sm:$0xff]   ;;  %v854_v20 = vld [vmem:[%s1251_s1 + $0x24] ss:$8 sps:$4 sm:$0xff]   ;;  %v858_v22 = vld [vmem:[%s1251_s1 + $0x20] ss:$8 sps:$4 sm:$0xff]  }
   0x8   :  { %582 = vmatpush1.bf16.msra.mxu1 %v835_v7  ;;  %510 = vmatprep.subr.bf16.mxu0 %v836_v8  ;;  %v853_v19 = vld [vmem:[%s1251_s1 + $0x130] ss:$8 sps:$4 sm:$0xff]   ;;  %v856_v21 = vld [vmem:[%s1251_s1 + $0x124] ss:$8 sps:$4 sm:$0xff]   ;;  %v859_v23 = vld [vmem:[%s1251_s1 + $0x120] ss:$8 sps:$4 sm:$0xff]  }
   0x9   :  { %583 = vmatprep.subr.bf16.mxu1 %v838_v9  ;;  %v860_v24 = vld [vmem:[%s1251_s1 + $0x14] ss:$8 sps:$4 sm:$0xff]   ;;  %v864_v26 = vld [vmem:[%s1251_s1 + $0x10] ss:$8 sps:$4 sm:$0xff]   ;;  %v866_v28 = vld [vmem:[%s1251_s1 + $0x4] ss:$8 sps:$4 sm:$0xff]  }
   0xa   :  { %v862_v25 = vld [vmem:[%s1251_s1 + $0x114] ss:$8 sps:$4 sm:$0xff]   ;;  %v865_v27 = vld [vmem:[%s1251_s1 + $0x110] ss:$8 sps:$4 sm:$0xff]   ;;  %v868_v29 = vld [vmem:[%s1251_s1 + $0x104] ss:$8 sps:$4 sm:$0xff]  }
   0xb   :  { %511 = vmatpush1.bf16.msra.mxu0 %v840_v10  ;;  %v870_v30 = vld [vmem:[%s1251_s1] ss:$8 sps:$4 sm:$0xff]   ;;  %v872_v32 = vld [vmem:[%s1251_s1 + $0xf4] ss:$8 sps:$4 sm:$0xff]   ;;  %v876_v34 = vld [vmem:[%s1251_s1 + $0xf0] ss:$8 sps:$4 sm:$0xff]  }
   0xc   :  { %584 = vmatpush1.bf16.msra.mxu1 %v841_v11  ;;  %512 = vmatprep.subr.bf16.mxu0 %v842_v12  ;;  %v871_v31 = vld [vmem:[%s1251_s1 + $0x100] ss:$8 sps:$4 sm:$0xff]   ;;  %v874_v33 = vld [vmem:[%s1251_s1 + $0x1f4] ss:$8 sps:$4 sm:$0xff]   ;;  %v877_v35 = vld [vmem:[%s1251_s1 + $0x1f0] ss:$8 sps:$4 sm:$0xff]  }
   0xd   :  { %585 = vmatprep.subr.bf16.mxu1 %v844_v13  ;;  %v878_v36 = vld [vmem:[%s1251_s1 + $0xe4] ss:$8 sps:$4 sm:$0xff]   ;;  %v882_v38 = vld [vmem:[%s1251_s1 + $0xe0] ss:$8 sps:$4 sm:$0xff]   ;;  %v884_v40 = vld [vmem:[%s1251_s1 + $0xd4] ss:$8 sps:$4 sm:$0xff]  }
   0xe   :  { %v880_v37 = vld [vmem:[%s1251_s1 + $0x1e4] ss:$8 sps:$4 sm:$0xff]   ;;  %v883_v39 = vld [vmem:[%s1251_s1 + $0x1e0] ss:$8 sps:$4 sm:$0xff]   ;;  %v886_v41 = vld [vmem:[%s1251_s1 + $0x1d4] ss:$8 sps:$4 sm:$0xff]  }
   0xf   :  { %513 = vmatpush1.bf16.msra.mxu0 %v846_v14  ;;  %v888_v42 = vld [vmem:[%s1251_s1 + $0xd0] ss:$8 sps:$4 sm:$0xff]   ;;  %v890_v44 = vld [vmem:[%s1251_s1 + $0xc4] ss:$8 sps:$4 sm:$0xff]   ;;  %v894_v46 = vld [vmem:[%s1251_s1 + $0xc0] ss:$8 sps:$4 sm:$0xff]  }
  0x10   :  { %586 = vmatpush1.bf16.msra.mxu1 %v847_v15  ;;  %514 = vmatprep.subr.bf16.mxu0 %v848_v16  ;;  %v889_v43 = vld [vmem:[%s1251_s1 + $0x1d0] ss:$8 sps:$4 sm:$0xff]   ;;  %v892_v45 = vld [vmem:[%s1251_s1 + $0x1c4] ss:$8 sps:$4 sm:$0xff]   ;;  %v895_v47 = vld [vmem:[%s1251_s1 + $0x1c0] ss:$8 sps:$4 sm:$0xff]   ;;  %v96_v16 = vlaneseq }
  0x11   :  { %587 = vmatprep.subr.bf16.mxu1 %v850_v17  ;;  %v896_v48 = vld [vmem:[%s1251_s1 + $0xb4] ss:$8 sps:$4 sm:$0xff]   ;;  %v900_v52 = vld [vmem:[%s1251_s1 + $0xb0] ss:$8 sps:$4 sm:$0xff]   ;;  %v902_v54 = vld [vmem:[%s1251_s1 + $0xa4] ss:$8 sps:$4 sm:$0xff]  }
  0x12   :  { %v922_v49 = vld [vmem:[%s1252_s0 + $0x4] ss:$16 sps:$4 sm:$0xff]   ;;  %v925_v51 = vld [vmem:[%s1252_s0 + $0xc] ss:$16 sps:$4 sm:$0xff]   ;;  %v901_v53 = vld [vmem:[%s1251_s1 + $0x1b0] ss:$8 sps:$4 sm:$0xff]  }
  0x13   :  { %515 = vmatpush1.bf16.msra.mxu0 %v852_v18  ;;  %v898_v50 = vld [vmem:[%s1251_s1 + $0x1b4] ss:$8 sps:$4 sm:$0xff]   ;;  %538 = vmatprep.mubr.bf16.mxu0 %v922_v49  ;;  %v904_v55 = vld [vmem:[%s1251_s1 + $0x1a4] ss:$8 sps:$4 sm:$0xff]   ;;  %v906_v56 = vld [vmem:[%s1251_s1 + $0xa0] ss:$8 sps:$4 sm:$0xff]  }
  0x14   :  { %588 = vmatpush1.bf16.msra.mxu1 %v853_v19  ;;  %516 = vmatprep.subr.bf16.mxu0 %v854_v20  ;;  %v907_v57 = vld [vmem:[%s1251_s1 + $0x1a0] ss:$8 sps:$4 sm:$0xff]   ;;  %v908_v58 = vld [vmem:[%s1251_s1 + $0x94] ss:$8 sps:$4 sm:$0xff]   ;;  %v912_v60 = vld [vmem:[%s1251_s1 + $0x90] ss:$8 sps:$4 sm:$0xff]  }
  0x15   :  { %589 = vmatprep.subr.bf16.mxu1 %v856_v21  ;;  %611 = vmatprep.mubr.bf16.mxu1 %v925_v51  ;;  %v910_v59 = vld [vmem:[%s1251_s1 + $0x194] ss:$8 sps:$4 sm:$0xff]   ;;  %v913_v61 = vld [vmem:[%s1251_s1 + $0x190] ss:$8 sps:$4 sm:$0xff]   ;;  %v914_v62 = vld [vmem:[%s1251_s1 + $0x84] ss:$8 sps:$4 sm:$0xff]  }
  0x16   :  { %v916_v63 = vld [vmem:[%s1251_s1 + $0x184] ss:$8 sps:$4 sm:$0xff]   ;;  %v918_v0 = vld [vmem:[%s1251_s1 + $0x80] ss:$8 sps:$4 sm:$0xff]   ;;  %v97_v17 = vshrl.u32 %v96_v16, 7 }
  0x17   :  { %517 = vmatpush1.bf16.msra.mxu0 %v858_v22  ;;  %v919_v1 = vld [vmem:[%s1251_s1 + $0x180] ss:$8 sps:$4 sm:$0xff]   ;;  %v926_v4 = vld [vmem:[%s1252_s0 + $0x24] ss:$16 sps:$4 sm:$0xff]   ;;  %v928_v5 = vld [vmem:[%s1252_s0 + $0x2c] ss:$16 sps:$4 sm:$0xff]  }
  0x18   :  { %590 = vmatpush1.bf16.msra.mxu1 %v859_v23  ;;  %518 = vmatprep.subr.bf16.mxu0 %v860_v24  ;;  %v920_v2 = vld [vmem:[%s1252_s0] ss:$16 sps:$4 sm:$0xff]   ;;  %v923_v3 = vld [vmem:[%s1252_s0 + $0x8] ss:$16 sps:$4 sm:$0xff]   ;;  %v932_v8 = vld [vmem:[%s1252_s0 + $0x44] ss:$16 sps:$4 sm:$0xff]  }
  0x19   :  { %591 = vmatprep.subr.bf16.mxu1 %v862_v25  ;;  %v930_v6 = vld [vmem:[%s1252_s0 + $0x20] ss:$16 sps:$4 sm:$0xff]   ;;  %v931_v7 = vld [vmem:[%s1252_s0 + $0x28] ss:$16 sps:$4 sm:$0xff]   ;;  %v934_v9 = vld [vmem:[%s1252_s0 + $0x4c] ss:$16 sps:$4 sm:$0xff]  }
  0x1a   :  { %v936_v10 = vld [vmem:[%s1252_s0 + $0x40] ss:$16 sps:$4 sm:$0xff]   ;;  %v937_v11 = vld [vmem:[%s1252_s0 + $0x48] ss:$16 sps:$4 sm:$0xff]   ;;  %v938_v12 = vld [vmem:[%s1252_s0 + $0x64] ss:$16 sps:$4 sm:$0xff]  }
  0x1b   :  { %519 = vmatpush1.bf16.msra.mxu0 %v864_v26  ;;  %v940_v13 = vld [vmem:[%s1252_s0 + $0x6c] ss:$16 sps:$4 sm:$0xff]   ;;  %v942_v14 = vld [vmem:[%s1252_s0 + $0x60] ss:$16 sps:$4 sm:$0xff]   ;;  %v943_v15 = vld [vmem:[%s1252_s0 + $0x68] ss:$16 sps:$4 sm:$0xff]  }
  0x1c   :  { %592 = vmatpush1.bf16.msra.mxu1 %v865_v27  ;;  %520 = vmatprep.subr.bf16.mxu0 %v866_v28  ;;  %v98_v18 = vsub.s32 0, %v97_v17  ;;  %v94_v19 = vld [vmem:[%s1253_s2] sm:$0x3]  ;;  %v102_v20 = vsub.s32 1, %v97_v17 }
  0x1d   :  { %593 = vmatprep.subr.bf16.mxu1 %v868_v29 }
  0x1e   :  { %v1207_v21 = vrot.slane %v94_v19, %v98_v18  ;;  %v1209_v22 = vrot.slane %v94_v19, %v102_v20 }
  0x1f   :  { %521 = vmatpush1.bf16.msra.mxu0 %v870_v30 }
  0x20   :  { %594 = vmatpush1.bf16.msra.mxu1 %v871_v31  ;;  %522 = vmatprep.subr.bf16.mxu0 %v872_v32 }
  0x21   :  { %595 = vmatprep.subr.bf16.mxu1 %v874_v33 }
  0x23   :  { %523 = vmatpush2.bf16.msra.mxu0 %v876_v34 }
  0x24   :  { %596 = vmatpush2.bf16.msra.mxu1 %v877_v35  ;;  %524 = vmatprep.subr.bf16.mxu0 %v878_v36 }
  0x25   :  { %597 = vmatprep.subr.bf16.mxu1 %v880_v37 }
  0x27   :  { %525 = vmatpush2.bf16.msra.mxu0 %v882_v38 }
  0x28   :  { %598 = vmatpush2.bf16.msra.mxu1 %v883_v39  ;;  %526 = vmatprep.subr.bf16.mxu0 %v884_v40 }
  0x29   :  { %599 = vmatprep.subr.bf16.mxu1 %v886_v41 }
  0x2b   :  { %527 = vmatpush2.bf16.msra.mxu0 %v888_v42 }
  0x2c   :  { %600 = vmatpush2.bf16.msra.mxu1 %v889_v43  ;;  %528 = vmatprep.subr.bf16.mxu0 %v890_v44 }
  0x2d   :  { %601 = vmatprep.subr.bf16.mxu1 %v892_v45 }
  0x2f   :  { %529 = vmatpush2.bf16.msra.mxu0 %v894_v46 }
  0x30   :  { %602 = vmatpush2.bf16.msra.mxu1 %v895_v47  ;;  %530 = vmatprep.subr.bf16.mxu0 %v896_v48 }
  0x31   :  { %603 = vmatprep.subr.bf16.mxu1 %v898_v50 }
  0x33   :  { %531 = vmatpush2.bf16.msra.mxu0 %v900_v52 }
  0x34   :  { %604 = vmatpush2.bf16.msra.mxu1 %v901_v53  ;;  %532 = vmatprep.subr.bf16.mxu0 %v902_v54 }
  0x35   :  { %605 = vmatprep.subr.bf16.mxu1 %v904_v55 }
  0x37   :  { %533 = vmatpush2.bf16.msra.mxu0 %v906_v56 }
  0x38   :  { %606 = vmatpush2.bf16.msra.mxu1 %v907_v57  ;;  %534 = vmatprep.subr.bf16.mxu0 %v908_v58 }
  0x39   :  { %607 = vmatprep.subr.bf16.mxu1 %v910_v59 }
  0x3b   :  { %535 = vmatpush2.bf16.msra.mxu0 %v912_v60 }
  0x3c   :  { %608 = vmatpush2.bf16.msra.mxu1 %v913_v61  ;;  %536 = vmatprep.subr.bf16.mxu0 %v914_v62 }
  0x3d   :  { %609 = vmatprep.subr.bf16.mxu1 %v916_v63 }
  0x3f   :  { %537 = vmatpush2.bf16.msra.mxu0 %v918_v0 }
  0x40   :  { %610 = vmatpush2.bf16.msra.mxu1 %v919_v1 }
  0x42   :  { %539 = vmatmul.mubr.bf16.vlgmr.msra.gmra.mxu0 %v920_v2 }
  0x43   :  { %612 = vmatmul.mubr.bf16.vlgmr.msra.gmra.mxu1 %v923_v3  ;;  %548 = vmatprep.mubr.bf16.mxu0 %v926_v4 }
  0x44   :  { %621 = vmatprep.mubr.bf16.mxu1 %v928_v5 }
  0x4a   :  { %549 = vmatmul.mubr.bf16.gmra.mxu0 %v930_v6 }
  0x4b   :  { %622 = vmatmul.mubr.bf16.gmra.mxu1 %v931_v7  ;;  %558 = vmatprep.mubr.bf16.mxu0 %v932_v8 }
  0x4c   :  { %631 = vmatprep.mubr.bf16.mxu1 %v934_v9 }
  0x52   :  { %559 = vmatmul.mubr.bf16.gmra.mxu0 %v936_v10 }
  0x53   :  { %632 = vmatmul.mubr.bf16.gmra.mxu1 %v937_v11  ;;  %568 = vmatprep.mubr.bf16.mxu0 %v938_v12 }
  0x54   :  { %641 = vmatprep.mubr.bf16.mxu1 %v940_v13 }
  0x5a   :  { %569 = vmatmul.mubr.bf16.gmra.mxu0 %v942_v14 }
  0x5b   :  { %642 = vmatmul.mubr.bf16.gmra.mxu1 %v943_v15 }
 0x102   :  { %v540_v23 = vpop.f32.mrf.mxu0 }
 0x103   :  { %v613_v24 = vpop.f32.mrf.mxu1  ;;  %v541_v25 = vadd.f32 %v540_v23, %v1207_v21 }
 0x104   :  { %v542_v26 = vpop.f32.mrf.mxu0 }
 0x105   :  { %v615_v27 = vpop.f32.mrf.mxu1  ;;  %v614_v28 = vadd.f32 %v613_v24, %v541_v25  ;;  %v543_v29 = vadd.f32 %v542_v26, %v1209_v22 }
 0x106   :  { %v544_v30 = vpop.f32.mrf.mxu0 }
 0x107   :  { %v617_v31 = vpop.f32.mrf.mxu1  ;;  %v616_v32 = vadd.f32 %v615_v27, %v543_v29  ;;  %v545_v33 = vadd.f32 %v544_v30, %v1207_v21  ;;  %v652_v36 = vmax.f32 %v614_v28, 0.0 }
 0x108   :  { %v546_v34 = vpop.f32.mrf.mxu0 }
 0x109   :  { %v619_v35 = vpop.f32.mrf.mxu1  ;;  %v653_v37 = vmax.f32 %v616_v32, 0.0  ;;  %v618_v38 = vadd.f32 %v617_v31, %v545_v33  ;;  %v547_v39 = vadd.f32 %v546_v34, %v1209_v22 }
 0x10a   :  { %v550_v40 = vpop.f32.mrf.mxu0 }
 0x10b   :  { %v623_v41 = vpop.f32.mrf.mxu1  ;;  %v816_v42 = vpack.c.bf16 %v653_v37, %v652_v36  ;;  %v620_v43 = vadd.f32 %v619_v35, %v547_v39  ;;  %v551_v44 = vadd.f32 %v550_v40, %v1207_v21  ;;  %v654_v47 = vmax.f32 %v618_v38, 0.0 }
 0x10c   :  { %v552_v45 = vpop.f32.mrf.mxu0 }
 0x10d   :  { %v625_v46 = vpop.f32.mrf.mxu1  ;;  %716 = vst [vmem:[%s1254_s3] sm:$0xff] %v816_v42  ;;  %v655_v48 = vmax.f32 %v620_v43, 0.0  ;;  %v624_v49 = vadd.f32 %v623_v41, %v551_v44  ;;  %v553_v50 = vadd.f32 %v552_v45, %v1209_v22 }
 0x10e   :  { %v554_v51 = vpop.f32.mrf.mxu0 }
 0x10f   :  { %v627_v52 = vpop.f32.mrf.mxu1  ;;  %v817_v53 = vpack.c.bf16 %v655_v48, %v654_v47  ;;  %v626_v54 = vadd.f32 %v625_v46, %v553_v50  ;;  %v555_v55 = vadd.f32 %v554_v51, %v1207_v21  ;;  %v656_v58 = vmax.f32 %v624_v49, 0.0 }
 0x110   :  { %v556_v56 = vpop.f32.mrf.mxu0 }
 0x111   :  { %v629_v57 = vpop.f32.mrf.mxu1  ;;  %717 = vst [vmem:[%s1254_s3 + $0x8] sm:$0xff] %v817_v53  ;;  %v657_v59 = vmax.f32 %v626_v54, 0.0  ;;  %v628_v60 = vadd.f32 %v627_v52, %v555_v55  ;;  %v557_v61 = vadd.f32 %v556_v56, %v1209_v22 }
 0x112   :  { %v560_v62 = vpop.f32.mrf.mxu0 }
 0x113   :  { %v633_v63 = vpop.f32.mrf.mxu1  ;;  %v818_v0 = vpack.c.bf16 %v657_v59, %v656_v58  ;;  %v630_v1 = vadd.f32 %v629_v57, %v557_v61  ;;  %v561_v2 = vadd.f32 %v560_v62, %v1207_v21  ;;  %v658_v5 = vmax.f32 %v628_v60, 0.0 }
 0x114   :  { %v562_v3 = vpop.f32.mrf.mxu0 }
 0x115   :  { %v635_v4 = vpop.f32.mrf.mxu1  ;;  %718 = vst [vmem:[%s1254_s3 + $0x10] sm:$0xff] %v818_v0  ;;  %v659_v6 = vmax.f32 %v630_v1, 0.0  ;;  %v634_v7 = vadd.f32 %v633_v63, %v561_v2  ;;  %v563_v8 = vadd.f32 %v562_v3, %v1209_v22 }
 0x116   :  { %v564_v9 = vpop.f32.mrf.mxu0 }
 0x117   :  { %v637_v10 = vpop.f32.mrf.mxu1  ;;  %v819_v11 = vpack.c.bf16 %v659_v6, %v658_v5  ;;  %v636_v12 = vadd.f32 %v635_v4, %v563_v8  ;;  %v565_v13 = vadd.f32 %v564_v9, %v1207_v21  ;;  %v660_v16 = vmax.f32 %v634_v7, 0.0 }
 0x118   :  { %v566_v14 = vpop.f32.mrf.mxu0 }
 0x119   :  { %v639_v15 = vpop.f32.mrf.mxu1  ;;  %719 = vst [vmem:[%s1254_s3 + $0x18] sm:$0xff] %v819_v11  ;;  %v661_v17 = vmax.f32 %v636_v12, 0.0  ;;  %v638_v18 = vadd.f32 %v637_v10, %v565_v13  ;;  %v567_v19 = vadd.f32 %v566_v14, %v1209_v22 }
 0x11a   :  { %v570_v20 = vpop.f32.mrf.mxu0 }
 0x11b   :  { %v643_v23 = vpop.f32.mrf.mxu1  ;;  %v820_v24 = vpack.c.bf16 %v661_v17, %v660_v16  ;;  %v640_v25 = vadd.f32 %v639_v15, %v567_v19  ;;  %v571_v26 = vadd.f32 %v570_v20, %v1207_v21  ;;  %v662_v29 = vmax.f32 %v638_v18, 0.0 }
 0x11c   :  { %v572_v27 = vpop.f32.mrf.mxu0 }
 0x11d   :  { %v645_v28 = vpop.f32.mrf.mxu1  ;;  %720 = vst [vmem:[%s1254_s3 + $0x20] sm:$0xff] %v820_v24  ;;  %v663_v30 = vmax.f32 %v640_v25, 0.0  ;;  %v644_v31 = vadd.f32 %v643_v23, %v571_v26  ;;  %v573_v32 = vadd.f32 %v572_v27, %v1209_v22 }
 0x11e   :  { %v574_v33 = vpop.f32.mrf.mxu0 }
 0x11f   :  { %v647_v34 = vpop.f32.mrf.mxu1  ;;  %v821_v35 = vpack.c.bf16 %v663_v30, %v662_v29  ;;  %v646_v36 = vadd.f32 %v645_v28, %v573_v32  ;;  %v575_v37 = vadd.f32 %v574_v33, %v1207_v21  ;;  %v664_v39 = vmax.f32 %v644_v31, 0.0 }
 0x120   :  { %v576_v38 = vpop.f32.mrf.mxu0 }
 0x121   :  { %721 = vst [vmem:[%s1254_s3 + $0x28] sm:$0xff] %v821_v35  ;;  %v665_v40 = vmax.f32 %v646_v36, 0.0  ;;  %v648_v41 = vadd.f32 %v647_v34, %v575_v37  ;;  %v577_v42 = vadd.f32 %v576_v38, %v1209_v22  ;;  %v649_v43 = vpop.f32.mrf.mxu1 }
 0x123   :  { %v822_v44 = vpack.c.bf16 %v665_v40, %v664_v39  ;;  %v650_v45 = vadd.f32 %v649_v43, %v577_v42  ;;  %v666_v46 = vmax.f32 %v648_v41, 0.0 }
 0x125   :  { %722 = vst [vmem:[%s1254_s3 + $0x30] sm:$0xff] %v822_v44  ;;  %v667_v47 = vmax.f32 %v650_v45, 0.0 }
 0x127   :  { %v823_v21 = vpack.c.bf16 %v667_v47, %v666_v46 }
 0x129   :  { %723 = vst [vmem:[%s1254_s3 + $0x38] sm:$0xff] %v823_v21 }

// kernel: vqvae_forward.49
= control target key start
LH: loop header
LB: loop body
LE: loop exit
PB: predicated region body
PF: predicated region fallthrough
CT: control target
= control target key end

     0   :  { %s721_s12 = smov 0   ;;  %s723_s13 = smov 0   ;;  %s812_s0 = inlined_call_operand.vmem [shape: bf16[176,256], index: 0, kind: input, shape index: {}]   ;;  %s813_s1 = inlined_call_operand.vmem [shape: bf16[256,128], index: 1, kind: input, shape index: {}]   ;;  %s814_s2 = inlined_call_operand.vmem [shape: f32[1,128], index: 2, kind: input, shape index: {}]   ;;  %s815_s3 = inlined_call_operand.vmem [shape: f32[176,128], index: 3, kind: output, shape index: {}]  }
   0x1   :  { %s725_s14 = smov 0  }
   0x2 LB: > { %s32_s15 = sadd.s32 1, %s695_s13  ;;  %p580_p0 = scmp.ge.s32.totalorder %s699_s14, 1  ;;  %s699_s14 = sphi %s725_s14, %s13_s14   ;;  %s695_s13 = sphi %s723_s13, %s817_s13   ;;  %s691_s12 = sphi %s721_s12, %s816_s12  }
   0x3   : > { %p34_p1 = scmp.ge.s32.totalorder %s32_s15, 11  ;;  %p191_p2 = scmp.lt.s32.totalorder %s699_s14, 12 }
   0x5   : > { %s819_s15 = smov (%p34_p1, %s32_s15), 0  ;;  %p192_p3 = pnand %p580_p0, %p191_p2 }
   0x6   : > { %s581_s18 = sshll.u32 (!%p192_p3), %s691_s12, 1 }
   0x7   : > { %195 = sbr.rel (%p192_p3) target bundleno = 263 (0x107), region = 32  ;;  %p236_p4 = scmp.lt.s32.totalorder (!%p192_p3), %s581_s18, 21 }
   0xc   : > { %v654_v0 = vld [vmem:[%s813_s1 + $0x78] sm:$0xff]   ;;  %v656_v2 = vld [vmem:[%s813_s1 + $0x70] sm:$0xff]   ;;  %v658_v4 = vld [vmem:[%s813_s1 + $0x68] sm:$0xff]   ;;  %s821_s18 = smov (!%p236_p4, %s581_s18), 21 }
   0xd   : > { %v655_v1 = vld [vmem:[%s813_s1 + $0x38] sm:$0xff]   ;;  %608 = vmatprep.subr.bf16.mxu0 %v654_v0  ;;  %v657_v3 = vld [vmem:[%s813_s1 + $0x30] sm:$0xff]   ;;  %v659_v5 = vld [vmem:[%s813_s1 + $0x28] sm:$0xff]   ;;  %s607_s6 = sshll.u32 %s821_s18, 3 }
   0xe   : > { %609 = vmatpush3.bf16.msra.mxu0 %v655_v1  ;;  %v660_v6 = vld [vmem:[%s813_s1 + $0x60] sm:$0xff]   ;;  %v662_v8 = vld [vmem:[%s813_s1 + $0x58] sm:$0xff]   ;;  %s243_s11 = scalar_lea.vmem %s812_s0, %s607_s6  ;;  %v664_v10 = vld [vmem:[%s813_s1 + $0x50] sm:$0xff]   ;;  %s265_s8 = scalar_lea.vmem %s815_s3, %s607_s6 }
   0xf   : > { %610 = vmatprep.subr.bf16.mxu0 %v656_v2  ;;  %v661_v7 = vld [vmem:[%s813_s1 + $0x20] sm:$0xff]   ;;  %v663_v9 = vld [vmem:[%s813_s1 + $0x18] sm:$0xff]   ;;  %v665_v12 = vld [vmem:[%s813_s1 + $0x10] sm:$0xff]  }
  0x10   : > { %v672_v11 = vld [vmem:[%s243_s11 + $0x4] ss:$8 sps:$4 sm:$0xff]   ;;  %v670_v17 = vld [vmem:[%s243_s11] ss:$8 sps:$4 sm:$0xff]  }
  0x11   : > { %447 = vmatprep.mubr.bf16.mxu0 %v672_v11  ;;  %v666_v13 = vld [vmem:[%s813_s1 + $0x48] sm:$0xff]   ;;  %v668_v15 = vld [vmem:[%s813_s1 + $0x40] sm:$0xff]  }
  0x12   : > { %611 = vmatpush3.bf16.msra.mxu0 %v657_v3  ;;  %v667_v14 = vld [vmem:[%s813_s1 + $0x8] sm:$0xff]   ;;  %v669_v16 = vld [vmem:[%s813_s1] sm:$0xff]  }
  0x13   : > { %612 = vmatprep.subr.bf16.mxu0 %v658_v4  ;;  %v586_v19 = vld [vmem:[%s814_s2] ss:$0 sm:$0xff] }
  0x16   : > { %613 = vmatpush3.bf16.msra.mxu0 %v659_v5 }
  0x17   : > { %614 = vmatprep.subr.bf16.mxu0 %v660_v6 }
  0x1a   : > { %615 = vmatpush3.bf16.msra.mxu0 %v661_v7 }
  0x1b   : > { %616 = vmatprep.subr.bf16.mxu0 %v662_v8 }
  0x1e   : > { %617 = vmatpush3.bf16.msra.mxu0 %v663_v9 }
  0x1f   : > { %618 = vmatprep.subr.bf16.mxu0 %v664_v10 }
  0x22   : > { %619 = vmatpush3.bf16.msra.mxu0 %v665_v12 }
  0x23   : > { %620 = vmatprep.subr.bf16.mxu0 %v666_v13 }
  0x26   : > { %621 = vmatpush3.bf16.msra.mxu0 %v667_v14 }
  0x27   : > { %622 = vmatprep.subr.bf16.mxu0 %v668_v15 }
  0x2a   : > { %623 = vmatpush3.bf16.msra.mxu0 %v669_v16 }
  0x2d   : > { %448 = vmatmul.mubr.bf16.vlgmr.msra.gmra.mxu0 %v670_v17 }
  0xed   : > { %v624_v18 = vpop.f32.mrf.mxu0 }
  0xef   : > { %v625_v20 = vpop.f32.mrf.mxu0 }
  0xf0   : > { %v626_v21 = vadd.f32 %v625_v20, %v624_v18 }
  0xf1   : > { %v627_v22 = vpop.f32.mrf.mxu0 }
  0xf2   : > { %v450_v23 = vadd.f32 %v626_v21, %v586_v19 }
  0xf3   : > { %v628_v24 = vpop.f32.mrf.mxu0 }
  0xf4   : > { %673 = vtanh.f32 %v450_v23  ;;  %v629_v25 = vadd.f32 %v628_v24, %v627_v22 }
  0xf6   : > { %v453_v26 = vadd.f32 %v629_v25, %v586_v19 }
  0xf8   : > { %675 = vtanh.f32 %v453_v26 }
 0x101   : > { %v674_v27 = vpop.eup %673 }
 0x102   : > { %458 = vst [vmem:[%s265_s8] sm:$0xff] %v674_v27 }
 0x105   : > { %v676_v28 = vpop.eup %675 }
 0x106   : > { %459 = vst [vmem:[%s265_s8 + $0x8] sm:$0xff] %v676_v28 }
 0x107 PF: > { %s13_s14 = sadd.s32 1, %s699_s14   ;;  %s816_s12 = smov %s695_s13 }
 0x108   : > { %p10_p5 = scmp.ge.s32.totalorder %s13_s14, 13   ;;  %s817_s13 = smov %s819_s15 }
 0x10a   :  { %12 = sbr.rel (!%p10_p5) target bundleno = 2 (0x2), region = 68 }

</bundles_post_ra>
